<compile_context>
chip_gen: v7x
topology: tpu7x:2x2x1
jax: 0.10.0
libtpu: 0.0.40
codegen_flags: <defaults>
</compile_context>

<pallas_src>
import functools

import jax
import jax.numpy as jnp
from jax import lax
from jax.experimental import pallas as pl
from jax.experimental.pallas import tpu as pltpu

KSIZE = 7
PAD = 3
LANES = 128


def _kgfe_kernel(w_ref, x_ref, wp_ref, wn_ref,   # inputs (SMEM taps, VMEM data)
                 o_ref,                          # output (VMEM)
                 *, H, W, C, Bb):
    HW = H * W
    f32 = jnp.float32
    Hp = H + 2 * PAD

    def unflatten(v):
        # (1, H*W) flat map -> (H, W) 2-D map; O(H) tiny static slices.
        return jnp.concatenate([v[:, y * W:(y + 1) * W] for y in range(H)], axis=0)

    def pad_slab(p2d):
        # (H, W) -> (Hp, 128) with the data at rows [PAD, PAD+H), lanes [PAD, PAD+W)
        # and real zeros everywhere else (so the conv needs no wrap masks).
        mid = jnp.concatenate(
            [jnp.zeros((H, PAD), f32), p2d,
             jnp.zeros((H, LANES - W - PAD), f32)], axis=1)
        zrow = jnp.zeros((PAD, LANES), f32)
        return jnp.concatenate([zrow, mid, zrow], axis=0)

    def lane_shift(s, dx):
        # shifted[:, l] = s[:, l + dx], zero filled (exact because the slab's
        # lane borders are zero and |dx| <= PAD).  One hoisted shift per kx.
        if dx == 0:
            return s
        if dx > 0:
            return jnp.concatenate([s[:, dx:], jnp.zeros((Hp, dx), f32)], axis=1)
        return jnp.concatenate([jnp.zeros((Hp, -dx), f32), s[:, :LANES + dx]], axis=1)

    for bb in range(Bb):   # static sub-batch loop over the block's batch rows
        # ---- channel statistics of x: one pass over the lane-dense slab ----
        xf = x_ref[bb].astype(f32)                               # (C, HW)
        mx = jnp.max(xf, axis=0, keepdims=True)                  # (1, HW)
        mn = jnp.min(xf, axis=0, keepdims=True)                  # (1, HW)
        av = jnp.sum(xf, axis=0, keepdims=True) * (1.0 / C)      # (1, HW)
        # (xf is intentionally not kept live across the unrolled conv below;
        #  x is re-loaded from VMEM for the final multiply.)

        # ---- tiny stat maps -> 2-D (H, W) conv domain ----
        mx2, mn2, av2 = unflatten(mx), unflatten(mn), unflatten(av)
        wp2 = wp_ref[bb].astype(f32)                             # (H, W)
        wn2 = wn_ref[bb].astype(f32)

        # Exact sign-aware factorization (finite w):
        #   max_c(x*w) = w*max_c(x) if w >= 0 else w*min_c(x);  mean_c(x*w) = w*mean_c(x)
        p_max2 = jnp.where(wp2 >= 0.0, wp2 * mx2, wp2 * mn2)
        p_avg2 = wp2 * av2
        n_max2 = jnp.where(wn2 >= 0.0, wn2 * mx2, wn2 * mn2)
        n_avg2 = wn2 * av2

        slabs = [pad_slab(p_max2), pad_slab(p_avg2),
                 pad_slab(n_max2), pad_slab(n_avg2)]             # 4 x (Hp, 128)

        # ---- fused 7x7 "same" conv of both branches ----
        # 7 hoisted lane shifts (kx); the 7 ky taps are sublane-axis slices.
        acc_p = jnp.zeros((H, LANES), f32)
        acc_n = jnp.zeros((H, LANES), f32)
        for kx in range(KSIZE):
            dx = kx - PAD
            sh = [lane_shift(s, dx) for s in slabs]
            for ky in range(KSIZE):
                k = ky * KSIZE + kx
                acc_p = (acc_p + w_ref[0, k] * sh[0][ky:ky + H, :]
                               + w_ref[1, k] * sh[1][ky:ky + H, :])
                acc_n = (acc_n + w_ref[2, k] * sh[2][ky:ky + H, :]
                               + w_ref[3, k] * sh[3][ky:ky + H, :])

        # ---- gates and fused output factor ----
        zp = acc_p[:, PAD:PAD + W]                               # (H, W)
        zn = acc_n[:, PAD:PAD + W]
        gate_p = 1.0 / (1.0 + jnp.exp(-zp))
        gate_n = 1.0 / (1.0 + jnp.exp(-zn))
        factor2 = 1.0 + gate_p * wp2 + gate_n * wn2              # (H, W)

        # Back to the lane-dense flat domain for the (only) full-size store.
        factor = jnp.concatenate(
            [factor2[y:y + 1, :] for y in range(H)], axis=1)     # (1, HW)

        # o = x + gate_p*(x*w_p) + gate_n*(x*w_n) = x * factor
        o_ref[bb] = (x_ref[bb].astype(f32) * factor).astype(o_ref.dtype)


def kgfe_forward(x, w_p, w_n, conv_p_w, conv_n_w, *, batch_block=1):
    """Pallas forward of Knowledge_Guided_Feature_Enhancement_Module.

    x:       (B, C, H, W)   features (f32 or bf16)
    w_p/w_n: (B, 1, H, W)   knowledge / prior maps (broadcast over channels)
    conv_*:  (1, 2, 7, 7)   Conv2d(2, 1, 7, padding=3, bias=False) weights (OIHW)
    batch_block: batch elements per grid step (keep 1 on v7x so both TCs get
                 work when B == 2; raise on v5e/v6e when B is large).
    """
    B, C, H, W = x.shape
    HW = H * W
    assert B % batch_block == 0
    if W + 2 * PAD > LANES:
        raise NotImplementedError("kgfe_forward assumes W + 6 <= 128 for now")

    # Lane-dense view of x / o (lane dim = H*W); 2-D (H, W) view of the priors.
    x_flat = x.reshape(B, C, HW)
    wp2 = w_p.reshape(B, H, W)
    wn2 = w_n.reshape(B, H, W)

    # Conv tap table in SMEM, rows = [p_max, p_avg, n_max, n_avg], cols k = ky*7+kx.
    wts = jnp.stack([conv_p_w[0, 0].reshape(-1), conv_p_w[0, 1].reshape(-1),
                     conv_n_w[0, 0].reshape(-1), conv_n_w[0, 1].reshape(-1)],
                    axis=0).astype(jnp.float32)                  # (4, 49)

    Bb = batch_block
    kernel = functools.partial(_kgfe_kernel, H=H, W=W, C=C, Bb=Bb)

    x_item = jnp.dtype(x.dtype).itemsize
    w_item = jnp.dtype(w_p.dtype).itemsize
    flops = int(B * HW * (3 * C + 8 * KSIZE * KSIZE + 24))
    transcendentals = int(2 * B * HW)                            # two sigmoids / pixel
    bytes_accessed = int(B * HW * (2 * C * x_item + 2 * w_item))

    out_flat = pl.pallas_call(
        kernel,
        out_shape=jax.ShapeDtypeStruct((B, C, HW), x.dtype),
        grid=(B // Bb,),
        in_specs=[
            pl.BlockSpec(memory_space=pltpu.MemorySpace.SMEM),    # conv taps (4, 49)
            pl.BlockSpec((Bb, C, HW), lambda b: (b, 0, 0)),       # x (lane-dense)
            pl.BlockSpec((Bb, H, W), lambda b: (b, 0, 0)),        # w_p (2-D)
            pl.BlockSpec((Bb, H, W), lambda b: (b, 0, 0)),        # w_n (2-D)
        ],
        out_specs=pl.BlockSpec((Bb, C, HW), lambda b: (b, 0, 0)),
        compiler_params=pltpu.CompilerParams(dimension_semantics=("parallel",)),
        cost_estimate=pl.CostEstimate(flops=flops,
                                      transcendentals=transcendentals,
                                      bytes_accessed=bytes_accessed),
    )(wts, x_flat, wp2, wn2)

    return out_flat.reshape(B, C, H, W)


def kgfe_reference(x, w_p, w_n, conv_p_w, conv_n_w):
    """Pure-JAX reference (mirrors the PyTorch forward exactly)."""
    def branch(xm, w):
        mx = jnp.max(xm, axis=1, keepdims=True)
        av = jnp.mean(xm, axis=1, keepdims=True)
        cat = jnp.concatenate([mx, av], axis=1)
        conv = lax.conv_general_dilated(
            cat, w, window_strides=(1, 1), padding=((PAD, PAD), (PAD, PAD)),
            dimension_numbers=("NCHW", "OIHW", "NCHW"))
        return jax.nn.sigmoid(conv) * xm

    x_p = x * w_p
    x_n = x * w_n
    return x + branch(x_p, conv_p_w) + branch(x_n, conv_n_w)


if __name__ == "__main__":
    key = jax.random.PRNGKey(0)
    k1, k2, k3, k4, k5 = jax.random.split(key, 5)

    B, C, H, W = 2, 4, 16, 16
    x = jax.random.normal(k1, (B, C, H, W), dtype=jnp.float32)
    # knowledge maps (positive / negative priors), broadcast over channels
    w_p = jax.nn.sigmoid(jax.random.normal(k2, (B, 1, H, W), dtype=jnp.float32))
    w_n = jax.nn.sigmoid(jax.random.normal(k3, (B, 1, H, W), dtype=jnp.float32))

    # deterministic Conv2d(2,1,7,bias=False) init (PyTorch default: U(-1/sqrt(fan_in), +))
    fan_in = 2 * KSIZE * KSIZE
    bound = 1.0 / (fan_in ** 0.5)
    conv_p_w = jax.random.uniform(k4, (1, 2, KSIZE, KSIZE), jnp.float32, -bound, bound)
    conv_n_w = jax.random.uniform(k5, (1, 2, KSIZE, KSIZE), jnp.float32, -bound, bound)

    out = kgfe_forward(x, w_p, w_n, conv_p_w, conv_n_w)
    out = jax.block_until_ready(out)

    ref = kgfe_reference(x, w_p, w_n, conv_p_w, conv_n_w)
    assert out.shape == (B, C, H, W)
    max_err = float(jnp.max(jnp.abs(out - ref)))
    assert max_err < 1e-4, max_err
    print("KERNEL_OK")
</pallas_src>

<mosaic_0001>
module attributes {stable_mosaic.version = 11 : i64} {
  func.func @_kgfe_kernel(%arg0: i32, %arg1: memref<4x49xf32, #tpu.memory_space<smem>>, %arg2: memref<1x4x256xf32, #tpu.memory_space<vmem>>, %arg3: memref<1x16x16xf32, #tpu.memory_space<vmem>>, %arg4: memref<1x16x16xf32, #tpu.memory_space<vmem>>, %arg5: memref<1x4x256xf32, #tpu.memory_space<vmem>>) attributes {dimension_semantics = [#tpu.dimension_semantics<parallel>], iteration_bounds = array<i64: 2>, scalar_prefetch = 0 : i64, scratch_operands = 0 : i64, tpu.core_type = #tpu.core_type<tc>, window_params = [{transform_indices = @transform_0, window_bounds = array<i64: 4, 49>}, {transform_indices = @transform_1, window_bounds = array<i64: 1, 4, 256>}, {transform_indices = @transform_2, window_bounds = array<i64: 1, 16, 16>}, {transform_indices = @transform_3, window_bounds = array<i64: 1, 16, 16>}, {transform_indices = @transform_4, window_bounds = array<i64: 1, 4, 256>}]} {
    %c0 = arith.constant 0 : index
    %c0_0 = arith.constant 0 : index
    %c0_1 = arith.constant 0 : index
    %0 = vector.load %arg2[%c0, %c0_0, %c0_1] : memref<1x4x256xf32, #tpu.memory_space<vmem>>, vector<1x4x256xf32>
    %1 = vector.shape_cast %0 : vector<1x4x256xf32> to vector<4x256xf32>
    %cst = arith.constant dense<0xFF800000> : vector<256xf32>
    %2 = vector.multi_reduction <maximumf>, %1, %cst [0] : vector<4x256xf32> to vector<256xf32>
    %3 = vector.shape_cast %2 : vector<256xf32> to vector<1x256xf32>
    %cst_2 = arith.constant dense<0x7F800000> : vector<256xf32>
    %4 = vector.multi_reduction <minimumf>, %1, %cst_2 [0] : vector<4x256xf32> to vector<256xf32>
    %5 = vector.shape_cast %4 : vector<256xf32> to vector<1x256xf32>
    %cst_3 = arith.constant dense<0.000000e+00> : vector<256xf32>
    %6 = vector.multi_reduction <add>, %1, %cst_3 [0] : vector<4x256xf32> to vector<256xf32>
    %7 = vector.shape_cast %6 : vector<256xf32> to vector<1x256xf32>
    %cst_4 = arith.constant 2.500000e-01 : f32
    %8 = vector.broadcast %cst_4 : f32 to vector<1x256xf32>
    %9 = arith.mulf %7, %8 : vector<1x256xf32>
    %10 = vector.extract_strided_slice %3 {offsets = [0, 0], sizes = [1, 16], strides = [1, 1]} : vector<1x256xf32> to vector<1x16xf32>
    %11 = vector.extract_strided_slice %3 {offsets = [0, 16], sizes = [1, 16], strides = [1, 1]} : vector<1x256xf32> to vector<1x16xf32>
    %12 = vector.extract_strided_slice %3 {offsets = [0, 32], sizes = [1, 16], strides = [1, 1]} : vector<1x256xf32> to vector<1x16xf32>
    %13 = vector.extract_strided_slice %3 {offsets = [0, 48], sizes = [1, 16], strides = [1, 1]} : vector<1x256xf32> to vector<1x16xf32>
    %14 = vector.extract_strided_slice %3 {offsets = [0, 64], sizes = [1, 16], strides = [1, 1]} : vector<1x256xf32> to vector<1x16xf32>
    %15 = vector.extract_strided_slice %3 {offsets = [0, 80], sizes = [1, 16], strides = [1, 1]} : vector<1x256xf32> to vector<1x16xf32>
    %16 = vector.extract_strided_slice %3 {offsets = [0, 96], sizes = [1, 16], strides = [1, 1]} : vector<1x256xf32> to vector<1x16xf32>
    %17 = vector.extract_strided_slice %3 {offsets = [0, 112], sizes = [1, 16], strides = [1, 1]} : vector<1x256xf32> to vector<1x16xf32>
    %18 = vector.extract_strided_slice %3 {offsets = [0, 128], sizes = [1, 16], strides = [1, 1]} : vector<1x256xf32> to vector<1x16xf32>
    %19 = vector.extract_strided_slice %3 {offsets = [0, 144], sizes = [1, 16], strides = [1, 1]} : vector<1x256xf32> to vector<1x16xf32>
    %20 = vector.extract_strided_slice %3 {offsets = [0, 160], sizes = [1, 16], strides = [1, 1]} : vector<1x256xf32> to vector<1x16xf32>
    %21 = vector.extract_strided_slice %3 {offsets = [0, 176], sizes = [1, 16], strides = [1, 1]} : vector<1x256xf32> to vector<1x16xf32>
    %22 = vector.extract_strided_slice %3 {offsets = [0, 192], sizes = [1, 16], strides = [1, 1]} : vector<1x256xf32> to vector<1x16xf32>
    %23 = vector.extract_strided_slice %3 {offsets = [0, 208], sizes = [1, 16], strides = [1, 1]} : vector<1x256xf32> to vector<1x16xf32>
    %24 = vector.extract_strided_slice %3 {offsets = [0, 224], sizes = [1, 16], strides = [1, 1]} : vector<1x256xf32> to vector<1x16xf32>
    %25 = vector.extract_strided_slice %3 {offsets = [0, 240], sizes = [1, 16], strides = [1, 1]} : vector<1x256xf32> to vector<1x16xf32>
    %26 = tpu.concatenate %10, %11, %12, %13, %14, %15, %16, %17, %18, %19, %20, %21, %22, %23, %24, %25 in 0 : vector<1x16xf32>, vector<1x16xf32>, vector<1x16xf32>, vector<1x16xf32>, vector<1x16xf32>, vector<1x16xf32>, vector<1x16xf32>, vector<1x16xf32>, vector<1x16xf32>, vector<1x16xf32>, vector<1x16xf32>, vector<1x16xf32>, vector<1x16xf32>, vector<1x16xf32>, vector<1x16xf32>, vector<1x16xf32> -> vector<16x16xf32>
    %27 = vector.extract_strided_slice %5 {offsets = [0, 0], sizes = [1, 16], strides = [1, 1]} : vector<1x256xf32> to vector<1x16xf32>
    %28 = vector.extract_strided_slice %5 {offsets = [0, 16], sizes = [1, 16], strides = [1, 1]} : vector<1x256xf32> to vector<1x16xf32>
    %29 = vector.extract_strided_slice %5 {offsets = [0, 32], sizes = [1, 16], strides = [1, 1]} : vector<1x256xf32> to vector<1x16xf32>
    %30 = vector.extract_strided_slice %5 {offsets = [0, 48], sizes = [1, 16], strides = [1, 1]} : vector<1x256xf32> to vector<1x16xf32>
    %31 = vector.extract_strided_slice %5 {offsets = [0, 64], sizes = [1, 16], strides = [1, 1]} : vector<1x256xf32> to vector<1x16xf32>
    %32 = vector.extract_strided_slice %5 {offsets = [0, 80], sizes = [1, 16], strides = [1, 1]} : vector<1x256xf32> to vector<1x16xf32>
    %33 = vector.extract_strided_slice %5 {offsets = [0, 96], sizes = [1, 16], strides = [1, 1]} : vector<1x256xf32> to vector<1x16xf32>
    %34 = vector.extract_strided_slice %5 {offsets = [0, 112], sizes = [1, 16], strides = [1, 1]} : vector<1x256xf32> to vector<1x16xf32>
    %35 = vector.extract_strided_slice %5 {offsets = [0, 128], sizes = [1, 16], strides = [1, 1]} : vector<1x256xf32> to vector<1x16xf32>
    %36 = vector.extract_strided_slice %5 {offsets = [0, 144], sizes = [1, 16], strides = [1, 1]} : vector<1x256xf32> to vector<1x16xf32>
    %37 = vector.extract_strided_slice %5 {offsets = [0, 160], sizes = [1, 16], strides = [1, 1]} : vector<1x256xf32> to vector<1x16xf32>
    %38 = vector.extract_strided_slice %5 {offsets = [0, 176], sizes = [1, 16], strides = [1, 1]} : vector<1x256xf32> to vector<1x16xf32>
    %39 = vector.extract_strided_slice %5 {offsets = [0, 192], sizes = [1, 16], strides = [1, 1]} : vector<1x256xf32> to vector<1x16xf32>
    %40 = vector.extract_strided_slice %5 {offsets = [0, 208], sizes = [1, 16], strides = [1, 1]} : vector<1x256xf32> to vector<1x16xf32>
    %41 = vector.extract_strided_slice %5 {offsets = [0, 224], sizes = [1, 16], strides = [1, 1]} : vector<1x256xf32> to vector<1x16xf32>
    %42 = vector.extract_strided_slice %5 {offsets = [0, 240], sizes = [1, 16], strides = [1, 1]} : vector<1x256xf32> to vector<1x16xf32>
    %43 = tpu.concatenate %27, %28, %29, %30, %31, %32, %33, %34, %35, %36, %37, %38, %39, %40, %41, %42 in 0 : vector<1x16xf32>, vector<1x16xf32>, vector<1x16xf32>, vector<1x16xf32>, vector<1x16xf32>, vector<1x16xf32>, vector<1x16xf32>, vector<1x16xf32>, vector<1x16xf32>, vector<1x16xf32>, vector<1x16xf32>, vector<1x16xf32>, vector<1x16xf32>, vector<1x16xf32>, vector<1x16xf32>, vector<1x16xf32> -> vector<16x16xf32>
    %44 = vector.extract_strided_slice %9 {offsets = [0, 0], sizes = [1, 16], strides = [1, 1]} : vector<1x256xf32> to vector<1x16xf32>
    %45 = vector.extract_strided_slice %9 {offsets = [0, 16], sizes = [1, 16], strides = [1, 1]} : vector<1x256xf32> to vector<1x16xf32>
    %46 = vector.extract_strided_slice %9 {offsets = [0, 32], sizes = [1, 16], strides = [1, 1]} : vector<1x256xf32> to vector<1x16xf32>
    %47 = vector.extract_strided_slice %9 {offsets = [0, 48], sizes = [1, 16], strides = [1, 1]} : vector<1x256xf32> to vector<1x16xf32>
    %48 = vector.extract_strided_slice %9 {offsets = [0, 64], sizes = [1, 16], strides = [1, 1]} : vector<1x256xf32> to vector<1x16xf32>
    %49 = vector.extract_strided_slice %9 {offsets = [0, 80], sizes = [1, 16], strides = [1, 1]} : vector<1x256xf32> to vector<1x16xf32>
    %50 = vector.extract_strided_slice %9 {offsets = [0, 96], sizes = [1, 16], strides = [1, 1]} : vector<1x256xf32> to vector<1x16xf32>
    %51 = vector.extract_strided_slice %9 {offsets = [0, 112], sizes = [1, 16], strides = [1, 1]} : vector<1x256xf32> to vector<1x16xf32>
    %52 = vector.extract_strided_slice %9 {offsets = [0, 128], sizes = [1, 16], strides = [1, 1]} : vector<1x256xf32> to vector<1x16xf32>
    %53 = vector.extract_strided_slice %9 {offsets = [0, 144], sizes = [1, 16], strides = [1, 1]} : vector<1x256xf32> to vector<1x16xf32>
    %54 = vector.extract_strided_slice %9 {offsets = [0, 160], sizes = [1, 16], strides = [1, 1]} : vector<1x256xf32> to vector<1x16xf32>
    %55 = vector.extract_strided_slice %9 {offsets = [0, 176], sizes = [1, 16], strides = [1, 1]} : vector<1x256xf32> to vector<1x16xf32>
    %56 = vector.extract_strided_slice %9 {offsets = [0, 192], sizes = [1, 16], strides = [1, 1]} : vector<1x256xf32> to vector<1x16xf32>
    %57 = vector.extract_strided_slice %9 {offsets = [0, 208], sizes = [1, 16], strides = [1, 1]} : vector<1x256xf32> to vector<1x16xf32>
    %58 = vector.extract_strided_slice %9 {offsets = [0, 224], sizes = [1, 16], strides = [1, 1]} : vector<1x256xf32> to vector<1x16xf32>
    %59 = vector.extract_strided_slice %9 {offsets = [0, 240], sizes = [1, 16], strides = [1, 1]} : vector<1x256xf32> to vector<1x16xf32>
    %60 = tpu.concatenate %44, %45, %46, %47, %48, %49, %50, %51, %52, %53, %54, %55, %56, %57, %58, %59 in 0 : vector<1x16xf32>, vector<1x16xf32>, vector<1x16xf32>, vector<1x16xf32>, vector<1x16xf32>, vector<1x16xf32>, vector<1x16xf32>, vector<1x16xf32>, vector<1x16xf32>, vector<1x16xf32>, vector<1x16xf32>, vector<1x16xf32>, vector<1x16xf32>, vector<1x16xf32>, vector<1x16xf32>, vector<1x16xf32> -> vector<16x16xf32>
    %c0_5 = arith.constant 0 : index
    %c0_6 = arith.constant 0 : index
    %c0_7 = arith.constant 0 : index
    %61 = vector.load %arg3[%c0_5, %c0_6, %c0_7] : memref<1x16x16xf32, #tpu.memory_space<vmem>>, vector<1x16x16xf32>
    %62 = vector.shape_cast %61 : vector<1x16x16xf32> to vector<16x16xf32>
    %c0_8 = arith.constant 0 : index
    %c0_9 = arith.constant 0 : index
    %c0_10 = arith.constant 0 : index
    %63 = vector.load %arg4[%c0_8, %c0_9, %c0_10] : memref<1x16x16xf32, #tpu.memory_space<vmem>>, vector<1x16x16xf32>
    %64 = vector.shape_cast %63 : vector<1x16x16xf32> to vector<16x16xf32>
    %cst_11 = arith.constant 0.000000e+00 : f32
    %65 = vector.broadcast %cst_11 : f32 to vector<16x16xf32>
    %66 = arith.cmpf oge, %62, %65 : vector<16x16xf32>
    %67 = arith.mulf %62, %26 : vector<16x16xf32>
    %68 = arith.mulf %62, %43 : vector<16x16xf32>
    %69 = arith.select %66, %67, %68 : vector<16x16xi1>, vector<16x16xf32>
    %70 = arith.mulf %62, %60 : vector<16x16xf32>
    %cst_12 = arith.constant 0.000000e+00 : f32
    %71 = vector.broadcast %cst_12 : f32 to vector<16x16xf32>
    %72 = arith.cmpf oge, %64, %71 : vector<16x16xf32>
    %73 = arith.mulf %64, %26 : vector<16x16xf32>
    %74 = arith.mulf %64, %43 : vector<16x16xf32>
    %75 = arith.select %72, %73, %74 : vector<16x16xi1>, vector<16x16xf32>
    %76 = arith.mulf %64, %60 : vector<16x16xf32>
    %cst_13 = arith.constant 0.000000e+00 : f32
    %77 = vector.broadcast %cst_13 : f32 to vector<16x3xf32>
    %cst_14 = arith.constant 0.000000e+00 : f32
    %78 = vector.broadcast %cst_14 : f32 to vector<16x109xf32>
    %79 = tpu.concatenate %77, %69, %78 in 1 : vector<16x3xf32>, vector<16x16xf32>, vector<16x109xf32> -> vector<16x128xf32>
    %cst_15 = arith.constant 0.000000e+00 : f32
    %80 = vector.broadcast %cst_15 : f32 to vector<3x128xf32>
    %81 = tpu.concatenate %80, %79, %80 in 0 : vector<3x128xf32>, vector<16x128xf32>, vector<3x128xf32> -> vector<22x128xf32>
    %cst_16 = arith.constant 0.000000e+00 : f32
    %82 = vector.broadcast %cst_16 : f32 to vector<16x3xf32>
    %cst_17 = arith.constant 0.000000e+00 : f32
    %83 = vector.broadcast %cst_17 : f32 to vector<16x109xf32>
    %84 = tpu.concatenate %82, %70, %83 in 1 : vector<16x3xf32>, vector<16x16xf32>, vector<16x109xf32> -> vector<16x128xf32>
    %cst_18 = arith.constant 0.000000e+00 : f32
    %85 = vector.broadcast %cst_18 : f32 to vector<3x128xf32>
    %86 = tpu.concatenate %85, %84, %85 in 0 : vector<3x128xf32>, vector<16x128xf32>, vector<3x128xf32> -> vector<22x128xf32>
    %cst_19 = arith.constant 0.000000e+00 : f32
    %87 = vector.broadcast %cst_19 : f32 to vector<16x3xf32>
    %cst_20 = arith.constant 0.000000e+00 : f32
    %88 = vector.broadcast %cst_20 : f32 to vector<16x109xf32>
    %89 = tpu.concatenate %87, %75, %88 in 1 : vector<16x3xf32>, vector<16x16xf32>, vector<16x109xf32> -> vector<16x128xf32>
    %cst_21 = arith.constant 0.000000e+00 : f32
    %90 = vector.broadcast %cst_21 : f32 to vector<3x128xf32>
    %91 = tpu.concatenate %90, %89, %90 in 0 : vector<3x128xf32>, vector<16x128xf32>, vector<3x128xf32> -> vector<22x128xf32>
    %cst_22 = arith.constant 0.000000e+00 : f32
    %92 = vector.broadcast %cst_22 : f32 to vector<16x3xf32>
    %cst_23 = arith.constant 0.000000e+00 : f32
    %93 = vector.broadcast %cst_23 : f32 to vector<16x109xf32>
    %94 = tpu.concatenate %92, %76, %93 in 1 : vector<16x3xf32>, vector<16x16xf32>, vector<16x109xf32> -> vector<16x128xf32>
    %cst_24 = arith.constant 0.000000e+00 : f32
    %95 = vector.broadcast %cst_24 : f32 to vector<3x128xf32>
    %96 = tpu.concatenate %95, %94, %95 in 0 : vector<3x128xf32>, vector<16x128xf32>, vector<3x128xf32> -> vector<22x128xf32>
    %cst_25 = arith.constant 0.000000e+00 : f32
    %97 = vector.broadcast %cst_25 : f32 to vector<16x128xf32>
    %cst_26 = arith.constant 0.000000e+00 : f32
    %98 = vector.broadcast %cst_26 : f32 to vector<16x128xf32>
    %cst_27 = arith.constant 0.000000e+00 : f32
    %99 = vector.broadcast %cst_27 : f32 to vector<22x3xf32>
    %100 = vector.extract_strided_slice %81 {offsets = [0, 0], sizes = [22, 125], strides = [1, 1]} : vector<22x128xf32> to vector<22x125xf32>
    %101 = tpu.concatenate %99, %100 in 1 : vector<22x3xf32>, vector<22x125xf32> -> vector<22x128xf32>
    %cst_28 = arith.constant 0.000000e+00 : f32
    %102 = vector.broadcast %cst_28 : f32 to vector<22x3xf32>
    %103 = vector.extract_strided_slice %86 {offsets = [0, 0], sizes = [22, 125], strides = [1, 1]} : vector<22x128xf32> to vector<22x125xf32>
    %104 = tpu.concatenate %102, %103 in 1 : vector<22x3xf32>, vector<22x125xf32> -> vector<22x128xf32>
    %cst_29 = arith.constant 0.000000e+00 : f32
    %105 = vector.broadcast %cst_29 : f32 to vector<22x3xf32>
    %106 = vector.extract_strided_slice %91 {offsets = [0, 0], sizes = [22, 125], strides = [1, 1]} : vector<22x128xf32> to vector<22x125xf32>
    %107 = tpu.concatenate %105, %106 in 1 : vector<22x3xf32>, vector<22x125xf32> -> vector<22x128xf32>
    %cst_30 = arith.constant 0.000000e+00 : f32
    %108 = vector.broadcast %cst_30 : f32 to vector<22x3xf32>
    %109 = vector.extract_strided_slice %96 {offsets = [0, 0], sizes = [22, 125], strides = [1, 1]} : vector<22x128xf32> to vector<22x125xf32>
    %110 = tpu.concatenate %108, %109 in 1 : vector<22x3xf32>, vector<22x125xf32> -> vector<22x128xf32>
    %c0_31 = arith.constant 0 : index
    %c0_32 = arith.constant 0 : index
    %111 = memref.load %arg1[%c0_31, %c0_32] : memref<4x49xf32, #tpu.memory_space<smem>>
    %112 = vector.extract_strided_slice %101 {offsets = [0, 0], sizes = [16, 128], strides = [1, 1]} : vector<22x128xf32> to vector<16x128xf32>
    %113 = vector.broadcast %111 : f32 to vector<16x128xf32>
    %114 = arith.mulf %113, %112 : vector<16x128xf32>
    %115 = arith.addf %97, %114 : vector<16x128xf32>
    %c1 = arith.constant 1 : index
    %c0_33 = arith.constant 0 : index
    %116 = memref.load %arg1[%c1, %c0_33] : memref<4x49xf32, #tpu.memory_space<smem>>
    %117 = vector.extract_strided_slice %104 {offsets = [0, 0], sizes = [16, 128], strides = [1, 1]} : vector<22x128xf32> to vector<16x128xf32>
    %118 = vector.broadcast %116 : f32 to vector<16x128xf32>
    %119 = arith.mulf %118, %117 : vector<16x128xf32>
    %120 = arith.addf %115, %119 : vector<16x128xf32>
    %c2 = arith.constant 2 : index
    %c0_34 = arith.constant 0 : index
    %121 = memref.load %arg1[%c2, %c0_34] : memref<4x49xf32, #tpu.memory_space<smem>>
    %122 = vector.extract_strided_slice %107 {offsets = [0, 0], sizes = [16, 128], strides = [1, 1]} : vector<22x128xf32> to vector<16x128xf32>
    %123 = vector.broadcast %121 : f32 to vector<16x128xf32>
    %124 = arith.mulf %123, %122 : vector<16x128xf32>
    %125 = arith.addf %98, %124 : vector<16x128xf32>
    %c3 = arith.constant 3 : index
    %c0_35 = arith.constant 0 : index
    %126 = memref.load %arg1[%c3, %c0_35] : memref<4x49xf32, #tpu.memory_space<smem>>
    %127 = vector.extract_strided_slice %110 {offsets = [0, 0], sizes = [16, 128], strides = [1, 1]} : vector<22x128xf32> to vector<16x128xf32>
    %128 = vector.broadcast %126 : f32 to vector<16x128xf32>
    %129 = arith.mulf %128, %127 : vector<16x128xf32>
    %130 = arith.addf %125, %129 : vector<16x128xf32>
    %c0_36 = arith.constant 0 : index
    %c7 = arith.constant 7 : index
    %131 = memref.load %arg1[%c0_36, %c7] : memref<4x49xf32, #tpu.memory_space<smem>>
    %132 = vector.extract_strided_slice %101 {offsets = [1, 0], sizes = [16, 128], strides = [1, 1]} : vector<22x128xf32> to vector<16x128xf32>
    %133 = vector.broadcast %131 : f32 to vector<16x128xf32>
    %134 = arith.mulf %133, %132 : vector<16x128xf32>
    %135 = arith.addf %120, %134 : vector<16x128xf32>
    %c1_37 = arith.constant 1 : index
    %c7_38 = arith.constant 7 : index
    %136 = memref.load %arg1[%c1_37, %c7_38] : memref<4x49xf32, #tpu.memory_space<smem>>
    %137 = vector.extract_strided_slice %104 {offsets = [1, 0], sizes = [16, 128], strides = [1, 1]} : vector<22x128xf32> to vector<16x128xf32>
    %138 = vector.broadcast %136 : f32 to vector<16x128xf32>
    %139 = arith.mulf %138, %137 : vector<16x128xf32>
    %140 = arith.addf %135, %139 : vector<16x128xf32>
    %c2_39 = arith.constant 2 : index
    %c7_40 = arith.constant 7 : index
    %141 = memref.load %arg1[%c2_39, %c7_40] : memref<4x49xf32, #tpu.memory_space<smem>>
    %142 = vector.extract_strided_slice %107 {offsets = [1, 0], sizes = [16, 128], strides = [1, 1]} : vector<22x128xf32> to vector<16x128xf32>
    %143 = vector.broadcast %141 : f32 to vector<16x128xf32>
    %144 = arith.mulf %143, %142 : vector<16x128xf32>
    %145 = arith.addf %130, %144 : vector<16x128xf32>
    %c3_41 = arith.constant 3 : index
    %c7_42 = arith.constant 7 : index
    %146 = memref.load %arg1[%c3_41, %c7_42] : memref<4x49xf32, #tpu.memory_space<smem>>
    %147 = vector.extract_strided_slice %110 {offsets = [1, 0], sizes = [16, 128], strides = [1, 1]} : vector<22x128xf32> to vector<16x128xf32>
    %148 = vector.broadcast %146 : f32 to vector<16x128xf32>
    %149 = arith.mulf %148, %147 : vector<16x128xf32>
    %150 = arith.addf %145, %149 : vector<16x128xf32>
    %c0_43 = arith.constant 0 : index
    %c14 = arith.constant 14 : index
    %151 = memref.load %arg1[%c0_43, %c14] : memref<4x49xf32, #tpu.memory_space<smem>>
    %152 = vector.extract_strided_slice %101 {offsets = [2, 0], sizes = [16, 128], strides = [1, 1]} : vector<22x128xf32> to vector<16x128xf32>
    %153 = vector.broadcast %151 : f32 to vector<16x128xf32>
    %154 = arith.mulf %153, %152 : vector<16x128xf32>
    %155 = arith.addf %140, %154 : vector<16x128xf32>
    %c1_44 = arith.constant 1 : index
    %c14_45 = arith.constant 14 : index
    %156 = memref.load %arg1[%c1_44, %c14_45] : memref<4x49xf32, #tpu.memory_space<smem>>
    %157 = vector.extract_strided_slice %104 {offsets = [2, 0], sizes = [16, 128], strides = [1, 1]} : vector<22x128xf32> to vector<16x128xf32>
    %158 = vector.broadcast %156 : f32 to vector<16x128xf32>
    %159 = arith.mulf %158, %157 : vector<16x128xf32>
    %160 = arith.addf %155, %159 : vector<16x128xf32>
    %c2_46 = arith.constant 2 : index
    %c14_47 = arith.constant 14 : index
    %161 = memref.load %arg1[%c2_46, %c14_47] : memref<4x49xf32, #tpu.memory_space<smem>>
    %162 = vector.extract_strided_slice %107 {offsets = [2, 0], sizes = [16, 128], strides = [1, 1]} : vector<22x128xf32> to vector<16x128xf32>
    %163 = vector.broadcast %161 : f32 to vector<16x128xf32>
    %164 = arith.mulf %163, %162 : vector<16x128xf32>
    %165 = arith.addf %150, %164 : vector<16x128xf32>
    %c3_48 = arith.constant 3 : index
    %c14_49 = arith.constant 14 : index
    %166 = memref.load %arg1[%c3_48, %c14_49] : memref<4x49xf32, #tpu.memory_space<smem>>
    %167 = vector.extract_strided_slice %110 {offsets = [2, 0], sizes = [16, 128], strides = [1, 1]} : vector<22x128xf32> to vector<16x128xf32>
    %168 = vector.broadcast %166 : f32 to vector<16x128xf32>
    %169 = arith.mulf %168, %167 : vector<16x128xf32>
    %170 = arith.addf %165, %169 : vector<16x128xf32>
    %c0_50 = arith.constant 0 : index
    %c21 = arith.constant 21 : index
    %171 = memref.load %arg1[%c0_50, %c21] : memref<4x49xf32, #tpu.memory_space<smem>>
    %172 = vector.extract_strided_slice %101 {offsets = [3, 0], sizes = [16, 128], strides = [1, 1]} : vector<22x128xf32> to vector<16x128xf32>
    %173 = vector.broadcast %171 : f32 to vector<16x128xf32>
    %174 = arith.mulf %173, %172 : vector<16x128xf32>
    %175 = arith.addf %160, %174 : vector<16x128xf32>
    %c1_51 = arith.constant 1 : index
    %c21_52 = arith.constant 21 : index
    %176 = memref.load %arg1[%c1_51, %c21_52] : memref<4x49xf32, #tpu.memory_space<smem>>
    %177 = vector.extract_strided_slice %104 {offsets = [3, 0], sizes = [16, 128], strides = [1, 1]} : vector<22x128xf32> to vector<16x128xf32>
    %178 = vector.broadcast %176 : f32 to vector<16x128xf32>
    %179 = arith.mulf %178, %177 : vector<16x128xf32>
    %180 = arith.addf %175, %179 : vector<16x128xf32>
    %c2_53 = arith.constant 2 : index
    %c21_54 = arith.constant 21 : index
    %181 = memref.load %arg1[%c2_53, %c21_54] : memref<4x49xf32, #tpu.memory_space<smem>>
    %182 = vector.extract_strided_slice %107 {offsets = [3, 0], sizes = [16, 128], strides = [1, 1]} : vector<22x128xf32> to vector<16x128xf32>
    %183 = vector.broadcast %181 : f32 to vector<16x128xf32>
    %184 = arith.mulf %183, %182 : vector<16x128xf32>
    %185 = arith.addf %170, %184 : vector<16x128xf32>
    %c3_55 = arith.constant 3 : index
    %c21_56 = arith.constant 21 : index
    %186 = memref.load %arg1[%c3_55, %c21_56] : memref<4x49xf32, #tpu.memory_space<smem>>
    %187 = vector.extract_strided_slice %110 {offsets = [3, 0], sizes = [16, 128], strides = [1, 1]} : vector<22x128xf32> to vector<16x128xf32>
    %188 = vector.broadcast %186 : f32 to vector<16x128xf32>
    %189 = arith.mulf %188, %187 : vector<16x128xf32>
    %190 = arith.addf %185, %189 : vector<16x128xf32>
    %c0_57 = arith.constant 0 : index
    %c28 = arith.constant 28 : index
    %191 = memref.load %arg1[%c0_57, %c28] : memref<4x49xf32, #tpu.memory_space<smem>>
    %192 = vector.extract_strided_slice %101 {offsets = [4, 0], sizes = [16, 128], strides = [1, 1]} : vector<22x128xf32> to vector<16x128xf32>
    %193 = vector.broadcast %191 : f32 to vector<16x128xf32>
    %194 = arith.mulf %193, %192 : vector<16x128xf32>
    %195 = arith.addf %180, %194 : vector<16x128xf32>
    %c1_58 = arith.constant 1 : index
    %c28_59 = arith.constant 28 : index
    %196 = memref.load %arg1[%c1_58, %c28_59] : memref<4x49xf32, #tpu.memory_space<smem>>
    %197 = vector.extract_strided_slice %104 {offsets = [4, 0], sizes = [16, 128], strides = [1, 1]} : vector<22x128xf32> to vector<16x128xf32>
    %198 = vector.broadcast %196 : f32 to vector<16x128xf32>
    %199 = arith.mulf %198, %197 : vector<16x128xf32>
    %200 = arith.addf %195, %199 : vector<16x128xf32>
    %c2_60 = arith.constant 2 : index
    %c28_61 = arith.constant 28 : index
    %201 = memref.load %arg1[%c2_60, %c28_61] : memref<4x49xf32, #tpu.memory_space<smem>>
    %202 = vector.extract_strided_slice %107 {offsets = [4, 0], sizes = [16, 128], strides = [1, 1]} : vector<22x128xf32> to vector<16x128xf32>
    %203 = vector.broadcast %201 : f32 to vector<16x128xf32>
    %204 = arith.mulf %203, %202 : vector<16x128xf32>
    %205 = arith.addf %190, %204 : vector<16x128xf32>
    %c3_62 = arith.constant 3 : index
    %c28_63 = arith.constant 28 : index
    %206 = memref.load %arg1[%c3_62, %c28_63] : memref<4x49xf32, #tpu.memory_space<smem>>
    %207 = vector.extract_strided_slice %110 {offsets = [4, 0], sizes = [16, 128], strides = [1, 1]} : vector<22x128xf32> to vector<16x128xf32>
    %208 = vector.broadcast %206 : f32 to vector<16x128xf32>
    %209 = arith.mulf %208, %207 : vector<16x128xf32>
    %210 = arith.addf %205, %209 : vector<16x128xf32>
    %c0_64 = arith.constant 0 : index
    %c35 = arith.constant 35 : index
    %211 = memref.load %arg1[%c0_64, %c35] : memref<4x49xf32, #tpu.memory_space<smem>>
    %212 = vector.extract_strided_slice %101 {offsets = [5, 0], sizes = [16, 128], strides = [1, 1]} : vector<22x128xf32> to vector<16x128xf32>
    %213 = vector.broadcast %211 : f32 to vector<16x128xf32>
    %214 = arith.mulf %213, %212 : vector<16x128xf32>
    %215 = arith.addf %200, %214 : vector<16x128xf32>
    %c1_65 = arith.constant 1 : index
    %c35_66 = arith.constant 35 : index
    %216 = memref.load %arg1[%c1_65, %c35_66] : memref<4x49xf32, #tpu.memory_space<smem>>
    %217 = vector.extract_strided_slice %104 {offsets = [5, 0], sizes = [16, 128], strides = [1, 1]} : vector<22x128xf32> to vector<16x128xf32>
    %218 = vector.broadcast %216 : f32 to vector<16x128xf32>
    %219 = arith.mulf %218, %217 : vector<16x128xf32>
    %220 = arith.addf %215, %219 : vector<16x128xf32>
    %c2_67 = arith.constant 2 : index
    %c35_68 = arith.constant 35 : index
    %221 = memref.load %arg1[%c2_67, %c35_68] : memref<4x49xf32, #tpu.memory_space<smem>>
    %222 = vector.extract_strided_slice %107 {offsets = [5, 0], sizes = [16, 128], strides = [1, 1]} : vector<22x128xf32> to vector<16x128xf32>
    %223 = vector.broadcast %221 : f32 to vector<16x128xf32>
    %224 = arith.mulf %223, %222 : vector<16x128xf32>
    %225 = arith.addf %210, %224 : vector<16x128xf32>
    %c3_69 = arith.constant 3 : index
    %c35_70 = arith.constant 35 : index
    %226 = memref.load %arg1[%c3_69, %c35_70] : memref<4x49xf32, #tpu.memory_space<smem>>
    %227 = vector.extract_strided_slice %110 {offsets = [5, 0], sizes = [16, 128], strides = [1, 1]} : vector<22x128xf32> to vector<16x128xf32>
    %228 = vector.broadcast %226 : f32 to vector<16x128xf32>
    %229 = arith.mulf %228, %227 : vector<16x128xf32>
    %230 = arith.addf %225, %229 : vector<16x128xf32>
    %c0_71 = arith.constant 0 : index
    %c42 = arith.constant 42 : index
    %231 = memref.load %arg1[%c0_71, %c42] : memref<4x49xf32, #tpu.memory_space<smem>>
    %232 = vector.extract_strided_slice %101 {offsets = [6, 0], sizes = [16, 128], strides = [1, 1]} : vector<22x128xf32> to vector<16x128xf32>
    %233 = vector.broadcast %231 : f32 to vector<16x128xf32>
    %234 = arith.mulf %233, %232 : vector<16x128xf32>
    %235 = arith.addf %220, %234 : vector<16x128xf32>
    %c1_72 = arith.constant 1 : index
    %c42_73 = arith.constant 42 : index
    %236 = memref.load %arg1[%c1_72, %c42_73] : memref<4x49xf32, #tpu.memory_space<smem>>
    %237 = vector.extract_strided_slice %104 {offsets = [6, 0], sizes = [16, 128], strides = [1, 1]} : vector<22x128xf32> to vector<16x128xf32>
    %238 = vector.broadcast %236 : f32 to vector<16x128xf32>
    %239 = arith.mulf %238, %237 : vector<16x128xf32>
    %240 = arith.addf %235, %239 : vector<16x128xf32>
    %c2_74 = arith.constant 2 : index
    %c42_75 = arith.constant 42 : index
    %241 = memref.load %arg1[%c2_74, %c42_75] : memref<4x49xf32, #tpu.memory_space<smem>>
    %242 = vector.extract_strided_slice %107 {offsets = [6, 0], sizes = [16, 128], strides = [1, 1]} : vector<22x128xf32> to vector<16x128xf32>
    %243 = vector.broadcast %241 : f32 to vector<16x128xf32>
    %244 = arith.mulf %243, %242 : vector<16x128xf32>
    %245 = arith.addf %230, %244 : vector<16x128xf32>
    %c3_76 = arith.constant 3 : index
    %c42_77 = arith.constant 42 : index
    %246 = memref.load %arg1[%c3_76, %c42_77] : memref<4x49xf32, #tpu.memory_space<smem>>
    %247 = vector.extract_strided_slice %110 {offsets = [6, 0], sizes = [16, 128], strides = [1, 1]} : vector<22x128xf32> to vector<16x128xf32>
    %248 = vector.broadcast %246 : f32 to vector<16x128xf32>
    %249 = arith.mulf %248, %247 : vector<16x128xf32>
    %250 = arith.addf %245, %249 : vector<16x128xf32>
    %cst_78 = arith.constant 0.000000e+00 : f32
    %251 = vector.broadcast %cst_78 : f32 to vector<22x2xf32>
    %252 = vector.extract_strided_slice %81 {offsets = [0, 0], sizes = [22, 126], strides = [1, 1]} : vector<22x128xf32> to vector<22x126xf32>
    %253 = tpu.concatenate %251, %252 in 1 : vector<22x2xf32>, vector<22x126xf32> -> vector<22x128xf32>
    %cst_79 = arith.constant 0.000000e+00 : f32
    %254 = vector.broadcast %cst_79 : f32 to vector<22x2xf32>
    %255 = vector.extract_strided_slice %86 {offsets = [0, 0], sizes = [22, 126], strides = [1, 1]} : vector<22x128xf32> to vector<22x126xf32>
    %256 = tpu.concatenate %254, %255 in 1 : vector<22x2xf32>, vector<22x126xf32> -> vector<22x128xf32>
    %cst_80 = arith.constant 0.000000e+00 : f32
    %257 = vector.broadcast %cst_80 : f32 to vector<22x2xf32>
    %258 = vector.extract_strided_slice %91 {offsets = [0, 0], sizes = [22, 126], strides = [1, 1]} : vector<22x128xf32> to vector<22x126xf32>
    %259 = tpu.concatenate %257, %258 in 1 : vector<22x2xf32>, vector<22x126xf32> -> vector<22x128xf32>
    %cst_81 = arith.constant 0.000000e+00 : f32
    %260 = vector.broadcast %cst_81 : f32 to vector<22x2xf32>
    %261 = vector.extract_strided_slice %96 {offsets = [0, 0], sizes = [22, 126], strides = [1, 1]} : vector<22x128xf32> to vector<22x126xf32>
    %262 = tpu.concatenate %260, %261 in 1 : vector<22x2xf32>, vector<22x126xf32> -> vector<22x128xf32>
    %c0_82 = arith.constant 0 : index
    %c1_83 = arith.constant 1 : index
    %263 = memref.load %arg1[%c0_82, %c1_83] : memref<4x49xf32, #tpu.memory_space<smem>>
    %264 = vector.extract_strided_slice %253 {offsets = [0, 0], sizes = [16, 128], strides = [1, 1]} : vector<22x128xf32> to vector<16x128xf32>
    %265 = vector.broadcast %263 : f32 to vector<16x128xf32>
    %266 = arith.mulf %265, %264 : vector<16x128xf32>
    %267 = arith.addf %240, %266 : vector<16x128xf32>
    %c1_84 = arith.constant 1 : index
    %c1_85 = arith.constant 1 : index
    %268 = memref.load %arg1[%c1_84, %c1_85] : memref<4x49xf32, #tpu.memory_space<smem>>
    %269 = vector.extract_strided_slice %256 {offsets = [0, 0], sizes = [16, 128], strides = [1, 1]} : vector<22x128xf32> to vector<16x128xf32>
    %270 = vector.broadcast %268 : f32 to vector<16x128xf32>
    %271 = arith.mulf %270, %269 : vector<16x128xf32>
    %272 = arith.addf %267, %271 : vector<16x128xf32>
    %c2_86 = arith.constant 2 : index
    %c1_87 = arith.constant 1 : index
    %273 = memref.load %arg1[%c2_86, %c1_87] : memref<4x49xf32, #tpu.memory_space<smem>>
    %274 = vector.extract_strided_slice %259 {offsets = [0, 0], sizes = [16, 128], strides = [1, 1]} : vector<22x128xf32> to vector<16x128xf32>
    %275 = vector.broadcast %273 : f32 to vector<16x128xf32>
    %276 = arith.mulf %275, %274 : vector<16x128xf32>
    %277 = arith.addf %250, %276 : vector<16x128xf32>
    %c3_88 = arith.constant 3 : index
    %c1_89 = arith.constant 1 : index
    %278 = memref.load %arg1[%c3_88, %c1_89] : memref<4x49xf32, #tpu.memory_space<smem>>
    %279 = vector.extract_strided_slice %262 {offsets = [0, 0], sizes = [16, 128], strides = [1, 1]} : vector<22x128xf32> to vector<16x128xf32>
    %280 = vector.broadcast %278 : f32 to vector<16x128xf32>
    %281 = arith.mulf %280, %279 : vector<16x128xf32>
    %282 = arith.addf %277, %281 : vector<16x128xf32>
    %c0_90 = arith.constant 0 : index
    %c8 = arith.constant 8 : index
    %283 = memref.load %arg1[%c0_90, %c8] : memref<4x49xf32, #tpu.memory_space<smem>>
    %284 = vector.extract_strided_slice %253 {offsets = [1, 0], sizes = [16, 128], strides = [1, 1]} : vector<22x128xf32> to vector<16x128xf32>
    %285 = vector.broadcast %283 : f32 to vector<16x128xf32>
    %286 = arith.mulf %285, %284 : vector<16x128xf32>
    %287 = arith.addf %272, %286 : vector<16x128xf32>
    %c1_91 = arith.constant 1 : index
    %c8_92 = arith.constant 8 : index
    %288 = memref.load %arg1[%c1_91, %c8_92] : memref<4x49xf32, #tpu.memory_space<smem>>
    %289 = vector.extract_strided_slice %256 {offsets = [1, 0], sizes = [16, 128], strides = [1, 1]} : vector<22x128xf32> to vector<16x128xf32>
    %290 = vector.broadcast %288 : f32 to vector<16x128xf32>
    %291 = arith.mulf %290, %289 : vector<16x128xf32>
    %292 = arith.addf %287, %291 : vector<16x128xf32>
    %c2_93 = arith.constant 2 : index
    %c8_94 = arith.constant 8 : index
    %293 = memref.load %arg1[%c2_93, %c8_94] : memref<4x49xf32, #tpu.memory_space<smem>>
    %294 = vector.extract_strided_slice %259 {offsets = [1, 0], sizes = [16, 128], strides = [1, 1]} : vector<22x128xf32> to vector<16x128xf32>
    %295 = vector.broadcast %293 : f32 to vector<16x128xf32>
    %296 = arith.mulf %295, %294 : vector<16x128xf32>
    %297 = arith.addf %282, %296 : vector<16x128xf32>
    %c3_95 = arith.constant 3 : index
    %c8_96 = arith.constant 8 : index
    %298 = memref.load %arg1[%c3_95, %c8_96] : memref<4x49xf32, #tpu.memory_space<smem>>
    %299 = vector.extract_strided_slice %262 {offsets = [1, 0], sizes = [16, 128], strides = [1, 1]} : vector<22x128xf32> to vector<16x128xf32>
    %300 = vector.broadcast %298 : f32 to vector<16x128xf32>
    %301 = arith.mulf %300, %299 : vector<16x128xf32>
    %302 = arith.addf %297, %301 : vector<16x128xf32>
    %c0_97 = arith.constant 0 : index
    %c15 = arith.constant 15 : index
    %303 = memref.load %arg1[%c0_97, %c15] : memref<4x49xf32, #tpu.memory_space<smem>>
    %304 = vector.extract_strided_slice %253 {offsets = [2, 0], sizes = [16, 128], strides = [1, 1]} : vector<22x128xf32> to vector<16x128xf32>
    %305 = vector.broadcast %303 : f32 to vector<16x128xf32>
    %306 = arith.mulf %305, %304 : vector<16x128xf32>
    %307 = arith.addf %292, %306 : vector<16x128xf32>
    %c1_98 = arith.constant 1 : index
    %c15_99 = arith.constant 15 : index
    %308 = memref.load %arg1[%c1_98, %c15_99] : memref<4x49xf32, #tpu.memory_space<smem>>
    %309 = vector.extract_strided_slice %256 {offsets = [2, 0], sizes = [16, 128], strides = [1, 1]} : vector<22x128xf32> to vector<16x128xf32>
    %310 = vector.broadcast %308 : f32 to vector<16x128xf32>
    %311 = arith.mulf %310, %309 : vector<16x128xf32>
    %312 = arith.addf %307, %311 : vector<16x128xf32>
    %c2_100 = arith.constant 2 : index
    %c15_101 = arith.constant 15 : index
    %313 = memref.load %arg1[%c2_100, %c15_101] : memref<4x49xf32, #tpu.memory_space<smem>>
    %314 = vector.extract_strided_slice %259 {offsets = [2, 0], sizes = [16, 128], strides = [1, 1]} : vector<22x128xf32> to vector<16x128xf32>
    %315 = vector.broadcast %313 : f32 to vector<16x128xf32>
    %316 = arith.mulf %315, %314 : vector<16x128xf32>
    %317 = arith.addf %302, %316 : vector<16x128xf32>
    %c3_102 = arith.constant 3 : index
    %c15_103 = arith.constant 15 : index
    %318 = memref.load %arg1[%c3_102, %c15_103] : memref<4x49xf32, #tpu.memory_space<smem>>
    %319 = vector.extract_strided_slice %262 {offsets = [2, 0], sizes = [16, 128], strides = [1, 1]} : vector<22x128xf32> to vector<16x128xf32>
    %320 = vector.broadcast %318 : f32 to vector<16x128xf32>
    %321 = arith.mulf %320, %319 : vector<16x128xf32>
    %322 = arith.addf %317, %321 : vector<16x128xf32>
    %c0_104 = arith.constant 0 : index
    %c22 = arith.constant 22 : index
    %323 = memref.load %arg1[%c0_104, %c22] : memref<4x49xf32, #tpu.memory_space<smem>>
    %324 = vector.extract_strided_slice %253 {offsets = [3, 0], sizes = [16, 128], strides = [1, 1]} : vector<22x128xf32> to vector<16x128xf32>
    %325 = vector.broadcast %323 : f32 to vector<16x128xf32>
    %326 = arith.mulf %325, %324 : vector<16x128xf32>
    %327 = arith.addf %312, %326 : vector<16x128xf32>
    %c1_105 = arith.constant 1 : index
    %c22_106 = arith.constant 22 : index
    %328 = memref.load %arg1[%c1_105, %c22_106] : memref<4x49xf32, #tpu.memory_space<smem>>
    %329 = vector.extract_strided_slice %256 {offsets = [3, 0], sizes = [16, 128], strides = [1, 1]} : vector<22x128xf32> to vector<16x128xf32>
    %330 = vector.broadcast %328 : f32 to vector<16x128xf32>
    %331 = arith.mulf %330, %329 : vector<16x128xf32>
    %332 = arith.addf %327, %331 : vector<16x128xf32>
    %c2_107 = arith.constant 2 : index
    %c22_108 = arith.constant 22 : index
    %333 = memref.load %arg1[%c2_107, %c22_108] : memref<4x49xf32, #tpu.memory_space<smem>>
    %334 = vector.extract_strided_slice %259 {offsets = [3, 0], sizes = [16, 128], strides = [1, 1]} : vector<22x128xf32> to vector<16x128xf32>
    %335 = vector.broadcast %333 : f32 to vector<16x128xf32>
    %336 = arith.mulf %335, %334 : vector<16x128xf32>
    %337 = arith.addf %322, %336 : vector<16x128xf32>
    %c3_109 = arith.constant 3 : index
    %c22_110 = arith.constant 22 : index
    %338 = memref.load %arg1[%c3_109, %c22_110] : memref<4x49xf32, #tpu.memory_space<smem>>
    %339 = vector.extract_strided_slice %262 {offsets = [3, 0], sizes = [16, 128], strides = [1, 1]} : vector<22x128xf32> to vector<16x128xf32>
    %340 = vector.broadcast %338 : f32 to vector<16x128xf32>
    %341 = arith.mulf %340, %339 : vector<16x128xf32>
    %342 = arith.addf %337, %341 : vector<16x128xf32>
    %c0_111 = arith.constant 0 : index
    %c29 = arith.constant 29 : index
    %343 = memref.load %arg1[%c0_111, %c29] : memref<4x49xf32, #tpu.memory_space<smem>>
    %344 = vector.extract_strided_slice %253 {offsets = [4, 0], sizes = [16, 128], strides = [1, 1]} : vector<22x128xf32> to vector<16x128xf32>
    %345 = vector.broadcast %343 : f32 to vector<16x128xf32>
    %346 = arith.mulf %345, %344 : vector<16x128xf32>
    %347 = arith.addf %332, %346 : vector<16x128xf32>
    %c1_112 = arith.constant 1 : index
    %c29_113 = arith.constant 29 : index
    %348 = memref.load %arg1[%c1_112, %c29_113] : memref<4x49xf32, #tpu.memory_space<smem>>
    %349 = vector.extract_strided_slice %256 {offsets = [4, 0], sizes = [16, 128], strides = [1, 1]} : vector<22x128xf32> to vector<16x128xf32>
    %350 = vector.broadcast %348 : f32 to vector<16x128xf32>
    %351 = arith.mulf %350, %349 : vector<16x128xf32>
    %352 = arith.addf %347, %351 : vector<16x128xf32>
    %c2_114 = arith.constant 2 : index
    %c29_115 = arith.constant 29 : index
    %353 = memref.load %arg1[%c2_114, %c29_115] : memref<4x49xf32, #tpu.memory_space<smem>>
    %354 = vector.extract_strided_slice %259 {offsets = [4, 0], sizes = [16, 128], strides = [1, 1]} : vector<22x128xf32> to vector<16x128xf32>
    %355 = vector.broadcast %353 : f32 to vector<16x128xf32>
    %356 = arith.mulf %355, %354 : vector<16x128xf32>
    %357 = arith.addf %342, %356 : vector<16x128xf32>
    %c3_116 = arith.constant 3 : index
    %c29_117 = arith.constant 29 : index
    %358 = memref.load %arg1[%c3_116, %c29_117] : memref<4x49xf32, #tpu.memory_space<smem>>
    %359 = vector.extract_strided_slice %262 {offsets = [4, 0], sizes = [16, 128], strides = [1, 1]} : vector<22x128xf32> to vector<16x128xf32>
    %360 = vector.broadcast %358 : f32 to vector<16x128xf32>
    %361 = arith.mulf %360, %359 : vector<16x128xf32>
    %362 = arith.addf %357, %361 : vector<16x128xf32>
    %c0_118 = arith.constant 0 : index
    %c36 = arith.constant 36 : index
    %363 = memref.load %arg1[%c0_118, %c36] : memref<4x49xf32, #tpu.memory_space<smem>>
    %364 = vector.extract_strided_slice %253 {offsets = [5, 0], sizes = [16, 128], strides = [1, 1]} : vector<22x128xf32> to vector<16x128xf32>
    %365 = vector.broadcast %363 : f32 to vector<16x128xf32>
    %366 = arith.mulf %365, %364 : vector<16x128xf32>
    %367 = arith.addf %352, %366 : vector<16x128xf32>
    %c1_119 = arith.constant 1 : index
    %c36_120 = arith.constant 36 : index
    %368 = memref.load %arg1[%c1_119, %c36_120] : memref<4x49xf32, #tpu.memory_space<smem>>
    %369 = vector.extract_strided_slice %256 {offsets = [5, 0], sizes = [16, 128], strides = [1, 1]} : vector<22x128xf32> to vector<16x128xf32>
    %370 = vector.broadcast %368 : f32 to vector<16x128xf32>
    %371 = arith.mulf %370, %369 : vector<16x128xf32>
    %372 = arith.addf %367, %371 : vector<16x128xf32>
    %c2_121 = arith.constant 2 : index
    %c36_122 = arith.constant 36 : index
    %373 = memref.load %arg1[%c2_121, %c36_122] : memref<4x49xf32, #tpu.memory_space<smem>>
    %374 = vector.extract_strided_slice %259 {offsets = [5, 0], sizes = [16, 128], strides = [1, 1]} : vector<22x128xf32> to vector<16x128xf32>
    %375 = vector.broadcast %373 : f32 to vector<16x128xf32>
    %376 = arith.mulf %375, %374 : vector<16x128xf32>
    %377 = arith.addf %362, %376 : vector<16x128xf32>
    %c3_123 = arith.constant 3 : index
    %c36_124 = arith.constant 36 : index
    %378 = memref.load %arg1[%c3_123, %c36_124] : memref<4x49xf32, #tpu.memory_space<smem>>
    %379 = vector.extract_strided_slice %262 {offsets = [5, 0], sizes = [16, 128], strides = [1, 1]} : vector<22x128xf32> to vector<16x128xf32>
    %380 = vector.broadcast %378 : f32 to vector<16x128xf32>
    %381 = arith.mulf %380, %379 : vector<16x128xf32>
    %382 = arith.addf %377, %381 : vector<16x128xf32>
    %c0_125 = arith.constant 0 : index
    %c43 = arith.constant 43 : index
    %383 = memref.load %arg1[%c0_125, %c43] : memref<4x49xf32, #tpu.memory_space<smem>>
    %384 = vector.extract_strided_slice %253 {offsets = [6, 0], sizes = [16, 128], strides = [1, 1]} : vector<22x128xf32> to vector<16x128xf32>
    %385 = vector.broadcast %383 : f32 to vector<16x128xf32>
    %386 = arith.mulf %385, %384 : vector<16x128xf32>
    %387 = arith.addf %372, %386 : vector<16x128xf32>
    %c1_126 = arith.constant 1 : index
    %c43_127 = arith.constant 43 : index
    %388 = memref.load %arg1[%c1_126, %c43_127] : memref<4x49xf32, #tpu.memory_space<smem>>
    %389 = vector.extract_strided_slice %256 {offsets = [6, 0], sizes = [16, 128], strides = [1, 1]} : vector<22x128xf32> to vector<16x128xf32>
    %390 = vector.broadcast %388 : f32 to vector<16x128xf32>
    %391 = arith.mulf %390, %389 : vector<16x128xf32>
    %392 = arith.addf %387, %391 : vector<16x128xf32>
    %c2_128 = arith.constant 2 : index
    %c43_129 = arith.constant 43 : index
    %393 = memref.load %arg1[%c2_128, %c43_129] : memref<4x49xf32, #tpu.memory_space<smem>>
    %394 = vector.extract_strided_slice %259 {offsets = [6, 0], sizes = [16, 128], strides = [1, 1]} : vector<22x128xf32> to vector<16x128xf32>
    %395 = vector.broadcast %393 : f32 to vector<16x128xf32>
    %396 = arith.mulf %395, %394 : vector<16x128xf32>
    %397 = arith.addf %382, %396 : vector<16x128xf32>
    %c3_130 = arith.constant 3 : index
    %c43_131 = arith.constant 43 : index
    %398 = memref.load %arg1[%c3_130, %c43_131] : memref<4x49xf32, #tpu.memory_space<smem>>
    %399 = vector.extract_strided_slice %262 {offsets = [6, 0], sizes = [16, 128], strides = [1, 1]} : vector<22x128xf32> to vector<16x128xf32>
    %400 = vector.broadcast %398 : f32 to vector<16x128xf32>
    %401 = arith.mulf %400, %399 : vector<16x128xf32>
    %402 = arith.addf %397, %401 : vector<16x128xf32>
    %cst_132 = arith.constant 0.000000e+00 : f32
    %403 = vector.broadcast %cst_132 : f32 to vector<22x1xf32>
    %404 = vector.extract_strided_slice %81 {offsets = [0, 0], sizes = [22, 127], strides = [1, 1]} : vector<22x128xf32> to vector<22x127xf32>
    %405 = tpu.concatenate %403, %404 in 1 : vector<22x1xf32>, vector<22x127xf32> -> vector<22x128xf32>
    %cst_133 = arith.constant 0.000000e+00 : f32
    %406 = vector.broadcast %cst_133 : f32 to vector<22x1xf32>
    %407 = vector.extract_strided_slice %86 {offsets = [0, 0], sizes = [22, 127], strides = [1, 1]} : vector<22x128xf32> to vector<22x127xf32>
    %408 = tpu.concatenate %406, %407 in 1 : vector<22x1xf32>, vector<22x127xf32> -> vector<22x128xf32>
    %cst_134 = arith.constant 0.000000e+00 : f32
    %409 = vector.broadcast %cst_134 : f32 to vector<22x1xf32>
    %410 = vector.extract_strided_slice %91 {offsets = [0, 0], sizes = [22, 127], strides = [1, 1]} : vector<22x128xf32> to vector<22x127xf32>
    %411 = tpu.concatenate %409, %410 in 1 : vector<22x1xf32>, vector<22x127xf32> -> vector<22x128xf32>
    %cst_135 = arith.constant 0.000000e+00 : f32
    %412 = vector.broadcast %cst_135 : f32 to vector<22x1xf32>
    %413 = vector.extract_strided_slice %96 {offsets = [0, 0], sizes = [22, 127], strides = [1, 1]} : vector<22x128xf32> to vector<22x127xf32>
    %414 = tpu.concatenate %412, %413 in 1 : vector<22x1xf32>, vector<22x127xf32> -> vector<22x128xf32>
    %c0_136 = arith.constant 0 : index
    %c2_137 = arith.constant 2 : index
    %415 = memref.load %arg1[%c0_136, %c2_137] : memref<4x49xf32, #tpu.memory_space<smem>>
    %416 = vector.extract_strided_slice %405 {offsets = [0, 0], sizes = [16, 128], strides = [1, 1]} : vector<22x128xf32> to vector<16x128xf32>
    %417 = vector.broadcast %415 : f32 to vector<16x128xf32>
    %418 = arith.mulf %417, %416 : vector<16x128xf32>
    %419 = arith.addf %392, %418 : vector<16x128xf32>
    %c1_138 = arith.constant 1 : index
    %c2_139 = arith.constant 2 : index
    %420 = memref.load %arg1[%c1_138, %c2_139] : memref<4x49xf32, #tpu.memory_space<smem>>
    %421 = vector.extract_strided_slice %408 {offsets = [0, 0], sizes = [16, 128], strides = [1, 1]} : vector<22x128xf32> to vector<16x128xf32>
    %422 = vector.broadcast %420 : f32 to vector<16x128xf32>
    %423 = arith.mulf %422, %421 : vector<16x128xf32>
    %424 = arith.addf %419, %423 : vector<16x128xf32>
    %c2_140 = arith.constant 2 : index
    %c2_141 = arith.constant 2 : index
    %425 = memref.load %arg1[%c2_140, %c2_141] : memref<4x49xf32, #tpu.memory_space<smem>>
    %426 = vector.extract_strided_slice %411 {offsets = [0, 0], sizes = [16, 128], strides = [1, 1]} : vector<22x128xf32> to vector<16x128xf32>
    %427 = vector.broadcast %425 : f32 to vector<16x128xf32>
    %428 = arith.mulf %427, %426 : vector<16x128xf32>
    %429 = arith.addf %402, %428 : vector<16x128xf32>
    %c3_142 = arith.constant 3 : index
    %c2_143 = arith.constant 2 : index
    %430 = memref.load %arg1[%c3_142, %c2_143] : memref<4x49xf32, #tpu.memory_space<smem>>
    %431 = vector.extract_strided_slice %414 {offsets = [0, 0], sizes = [16, 128], strides = [1, 1]} : vector<22x128xf32> to vector<16x128xf32>
    %432 = vector.broadcast %430 : f32 to vector<16x128xf32>
    %433 = arith.mulf %432, %431 : vector<16x128xf32>
    %434 = arith.addf %429, %433 : vector<16x128xf32>
    %c0_144 = arith.constant 0 : index
    %c9 = arith.constant 9 : index
    %435 = memref.load %arg1[%c0_144, %c9] : memref<4x49xf32, #tpu.memory_space<smem>>
    %436 = vector.extract_strided_slice %405 {offsets = [1, 0], sizes = [16, 128], strides = [1, 1]} : vector<22x128xf32> to vector<16x128xf32>
    %437 = vector.broadcast %435 : f32 to vector<16x128xf32>
    %438 = arith.mulf %437, %436 : vector<16x128xf32>
    %439 = arith.addf %424, %438 : vector<16x128xf32>
    %c1_145 = arith.constant 1 : index
    %c9_146 = arith.constant 9 : index
    %440 = memref.load %arg1[%c1_145, %c9_146] : memref<4x49xf32, #tpu.memory_space<smem>>
    %441 = vector.extract_strided_slice %408 {offsets = [1, 0], sizes = [16, 128], strides = [1, 1]} : vector<22x128xf32> to vector<16x128xf32>
    %442 = vector.broadcast %440 : f32 to vector<16x128xf32>
    %443 = arith.mulf %442, %441 : vector<16x128xf32>
    %444 = arith.addf %439, %443 : vector<16x128xf32>
    %c2_147 = arith.constant 2 : index
    %c9_148 = arith.constant 9 : index
    %445 = memref.load %arg1[%c2_147, %c9_148] : memref<4x49xf32, #tpu.memory_space<smem>>
    %446 = vector.extract_strided_slice %411 {offsets = [1, 0], sizes = [16, 128], strides = [1, 1]} : vector<22x128xf32> to vector<16x128xf32>
    %447 = vector.broadcast %445 : f32 to vector<16x128xf32>
    %448 = arith.mulf %447, %446 : vector<16x128xf32>
    %449 = arith.addf %434, %448 : vector<16x128xf32>
    %c3_149 = arith.constant 3 : index
    %c9_150 = arith.constant 9 : index
    %450 = memref.load %arg1[%c3_149, %c9_150] : memref<4x49xf32, #tpu.memory_space<smem>>
    %451 = vector.extract_strided_slice %414 {offsets = [1, 0], sizes = [16, 128], strides = [1, 1]} : vector<22x128xf32> to vector<16x128xf32>
    %452 = vector.broadcast %450 : f32 to vector<16x128xf32>
    %453 = arith.mulf %452, %451 : vector<16x128xf32>
    %454 = arith.addf %449, %453 : vector<16x128xf32>
    %c0_151 = arith.constant 0 : index
    %c16 = arith.constant 16 : index
    %455 = memref.load %arg1[%c0_151, %c16] : memref<4x49xf32, #tpu.memory_space<smem>>
    %456 = vector.extract_strided_slice %405 {offsets = [2, 0], sizes = [16, 128], strides = [1, 1]} : vector<22x128xf32> to vector<16x128xf32>
    %457 = vector.broadcast %455 : f32 to vector<16x128xf32>
    %458 = arith.mulf %457, %456 : vector<16x128xf32>
    %459 = arith.addf %444, %458 : vector<16x128xf32>
    %c1_152 = arith.constant 1 : index
    %c16_153 = arith.constant 16 : index
    %460 = memref.load %arg1[%c1_152, %c16_153] : memref<4x49xf32, #tpu.memory_space<smem>>
    %461 = vector.extract_strided_slice %408 {offsets = [2, 0], sizes = [16, 128], strides = [1, 1]} : vector<22x128xf32> to vector<16x128xf32>
    %462 = vector.broadcast %460 : f32 to vector<16x128xf32>
    %463 = arith.mulf %462, %461 : vector<16x128xf32>
    %464 = arith.addf %459, %463 : vector<16x128xf32>
    %c2_154 = arith.constant 2 : index
    %c16_155 = arith.constant 16 : index
    %465 = memref.load %arg1[%c2_154, %c16_155] : memref<4x49xf32, #tpu.memory_space<smem>>
    %466 = vector.extract_strided_slice %411 {offsets = [2, 0], sizes = [16, 128], strides = [1, 1]} : vector<22x128xf32> to vector<16x128xf32>
    %467 = vector.broadcast %465 : f32 to vector<16x128xf32>
    %468 = arith.mulf %467, %466 : vector<16x128xf32>
    %469 = arith.addf %454, %468 : vector<16x128xf32>
    %c3_156 = arith.constant 3 : index
    %c16_157 = arith.constant 16 : index
    %470 = memref.load %arg1[%c3_156, %c16_157] : memref<4x49xf32, #tpu.memory_space<smem>>
    %471 = vector.extract_strided_slice %414 {offsets = [2, 0], sizes = [16, 128], strides = [1, 1]} : vector<22x128xf32> to vector<16x128xf32>
    %472 = vector.broadcast %470 : f32 to vector<16x128xf32>
    %473 = arith.mulf %472, %471 : vector<16x128xf32>
    %474 = arith.addf %469, %473 : vector<16x128xf32>
    %c0_158 = arith.constant 0 : index
    %c23 = arith.constant 23 : index
    %475 = memref.load %arg1[%c0_158, %c23] : memref<4x49xf32, #tpu.memory_space<smem>>
    %476 = vector.extract_strided_slice %405 {offsets = [3, 0], sizes = [16, 128], strides = [1, 1]} : vector<22x128xf32> to vector<16x128xf32>
    %477 = vector.broadcast %475 : f32 to vector<16x128xf32>
    %478 = arith.mulf %477, %476 : vector<16x128xf32>
    %479 = arith.addf %464, %478 : vector<16x128xf32>
    %c1_159 = arith.constant 1 : index
    %c23_160 = arith.constant 23 : index
    %480 = memref.load %arg1[%c1_159, %c23_160] : memref<4x49xf32, #tpu.memory_space<smem>>
    %481 = vector.extract_strided_slice %408 {offsets = [3, 0], sizes = [16, 128], strides = [1, 1]} : vector<22x128xf32> to vector<16x128xf32>
    %482 = vector.broadcast %480 : f32 to vector<16x128xf32>
    %483 = arith.mulf %482, %481 : vector<16x128xf32>
    %484 = arith.addf %479, %483 : vector<16x128xf32>
    %c2_161 = arith.constant 2 : index
    %c23_162 = arith.constant 23 : index
    %485 = memref.load %arg1[%c2_161, %c23_162] : memref<4x49xf32, #tpu.memory_space<smem>>
    %486 = vector.extract_strided_slice %411 {offsets = [3, 0], sizes = [16, 128], strides = [1, 1]} : vector<22x128xf32> to vector<16x128xf32>
    %487 = vector.broadcast %485 : f32 to vector<16x128xf32>
    %488 = arith.mulf %487, %486 : vector<16x128xf32>
    %489 = arith.addf %474, %488 : vector<16x128xf32>
    %c3_163 = arith.constant 3 : index
    %c23_164 = arith.constant 23 : index
    %490 = memref.load %arg1[%c3_163, %c23_164] : memref<4x49xf32, #tpu.memory_space<smem>>
    %491 = vector.extract_strided_slice %414 {offsets = [3, 0], sizes = [16, 128], strides = [1, 1]} : vector<22x128xf32> to vector<16x128xf32>
    %492 = vector.broadcast %490 : f32 to vector<16x128xf32>
    %493 = arith.mulf %492, %491 : vector<16x128xf32>
    %494 = arith.addf %489, %493 : vector<16x128xf32>
    %c0_165 = arith.constant 0 : index
    %c30 = arith.constant 30 : index
    %495 = memref.load %arg1[%c0_165, %c30] : memref<4x49xf32, #tpu.memory_space<smem>>
    %496 = vector.extract_strided_slice %405 {offsets = [4, 0], sizes = [16, 128], strides = [1, 1]} : vector<22x128xf32> to vector<16x128xf32>
    %497 = vector.broadcast %495 : f32 to vector<16x128xf32>
    %498 = arith.mulf %497, %496 : vector<16x128xf32>
    %499 = arith.addf %484, %498 : vector<16x128xf32>
    %c1_166 = arith.constant 1 : index
    %c30_167 = arith.constant 30 : index
    %500 = memref.load %arg1[%c1_166, %c30_167] : memref<4x49xf32, #tpu.memory_space<smem>>
    %501 = vector.extract_strided_slice %408 {offsets = [4, 0], sizes = [16, 128], strides = [1, 1]} : vector<22x128xf32> to vector<16x128xf32>
    %502 = vector.broadcast %500 : f32 to vector<16x128xf32>
    %503 = arith.mulf %502, %501 : vector<16x128xf32>
    %504 = arith.addf %499, %503 : vector<16x128xf32>
    %c2_168 = arith.constant 2 : index
    %c30_169 = arith.constant 30 : index
    %505 = memref.load %arg1[%c2_168, %c30_169] : memref<4x49xf32, #tpu.memory_space<smem>>
    %506 = vector.extract_strided_slice %411 {offsets = [4, 0], sizes = [16, 128], strides = [1, 1]} : vector<22x128xf32> to vector<16x128xf32>
    %507 = vector.broadcast %505 : f32 to vector<16x128xf32>
    %508 = arith.mulf %507, %506 : vector<16x128xf32>
    %509 = arith.addf %494, %508 : vector<16x128xf32>
    %c3_170 = arith.constant 3 : index
    %c30_171 = arith.constant 30 : index
    %510 = memref.load %arg1[%c3_170, %c30_171] : memref<4x49xf32, #tpu.memory_space<smem>>
    %511 = vector.extract_strided_slice %414 {offsets = [4, 0], sizes = [16, 128], strides = [1, 1]} : vector<22x128xf32> to vector<16x128xf32>
    %512 = vector.broadcast %510 : f32 to vector<16x128xf32>
    %513 = arith.mulf %512, %511 : vector<16x128xf32>
    %514 = arith.addf %509, %513 : vector<16x128xf32>
    %c0_172 = arith.constant 0 : index
    %c37 = arith.constant 37 : index
    %515 = memref.load %arg1[%c0_172, %c37] : memref<4x49xf32, #tpu.memory_space<smem>>
    %516 = vector.extract_strided_slice %405 {offsets = [5, 0], sizes = [16, 128], strides = [1, 1]} : vector<22x128xf32> to vector<16x128xf32>
    %517 = vector.broadcast %515 : f32 to vector<16x128xf32>
    %518 = arith.mulf %517, %516 : vector<16x128xf32>
    %519 = arith.addf %504, %518 : vector<16x128xf32>
    %c1_173 = arith.constant 1 : index
    %c37_174 = arith.constant 37 : index
    %520 = memref.load %arg1[%c1_173, %c37_174] : memref<4x49xf32, #tpu.memory_space<smem>>
    %521 = vector.extract_strided_slice %408 {offsets = [5, 0], sizes = [16, 128], strides = [1, 1]} : vector<22x128xf32> to vector<16x128xf32>
    %522 = vector.broadcast %520 : f32 to vector<16x128xf32>
    %523 = arith.mulf %522, %521 : vector<16x128xf32>
    %524 = arith.addf %519, %523 : vector<16x128xf32>
    %c2_175 = arith.constant 2 : index
    %c37_176 = arith.constant 37 : index
    %525 = memref.load %arg1[%c2_175, %c37_176] : memref<4x49xf32, #tpu.memory_space<smem>>
    %526 = vector.extract_strided_slice %411 {offsets = [5, 0], sizes = [16, 128], strides = [1, 1]} : vector<22x128xf32> to vector<16x128xf32>
    %527 = vector.broadcast %525 : f32 to vector<16x128xf32>
    %528 = arith.mulf %527, %526 : vector<16x128xf32>
    %529 = arith.addf %514, %528 : vector<16x128xf32>
    %c3_177 = arith.constant 3 : index
    %c37_178 = arith.constant 37 : index
    %530 = memref.load %arg1[%c3_177, %c37_178] : memref<4x49xf32, #tpu.memory_space<smem>>
    %531 = vector.extract_strided_slice %414 {offsets = [5, 0], sizes = [16, 128], strides = [1, 1]} : vector<22x128xf32> to vector<16x128xf32>
    %532 = vector.broadcast %530 : f32 to vector<16x128xf32>
    %533 = arith.mulf %532, %531 : vector<16x128xf32>
    %534 = arith.addf %529, %533 : vector<16x128xf32>
    %c0_179 = arith.constant 0 : index
    %c44 = arith.constant 44 : index
    %535 = memref.load %arg1[%c0_179, %c44] : memref<4x49xf32, #tpu.memory_space<smem>>
    %536 = vector.extract_strided_slice %405 {offsets = [6, 0], sizes = [16, 128], strides = [1, 1]} : vector<22x128xf32> to vector<16x128xf32>
    %537 = vector.broadcast %535 : f32 to vector<16x128xf32>
    %538 = arith.mulf %537, %536 : vector<16x128xf32>
    %539 = arith.addf %524, %538 : vector<16x128xf32>
    %c1_180 = arith.constant 1 : index
    %c44_181 = arith.constant 44 : index
    %540 = memref.load %arg1[%c1_180, %c44_181] : memref<4x49xf32, #tpu.memory_space<smem>>
    %541 = vector.extract_strided_slice %408 {offsets = [6, 0], sizes = [16, 128], strides = [1, 1]} : vector<22x128xf32> to vector<16x128xf32>
    %542 = vector.broadcast %540 : f32 to vector<16x128xf32>
    %543 = arith.mulf %542, %541 : vector<16x128xf32>
    %544 = arith.addf %539, %543 : vector<16x128xf32>
    %c2_182 = arith.constant 2 : index
    %c44_183 = arith.constant 44 : index
    %545 = memref.load %arg1[%c2_182, %c44_183] : memref<4x49xf32, #tpu.memory_space<smem>>
    %546 = vector.extract_strided_slice %411 {offsets = [6, 0], sizes = [16, 128], strides = [1, 1]} : vector<22x128xf32> to vector<16x128xf32>
    %547 = vector.broadcast %545 : f32 to vector<16x128xf32>
    %548 = arith.mulf %547, %546 : vector<16x128xf32>
    %549 = arith.addf %534, %548 : vector<16x128xf32>
    %c3_184 = arith.constant 3 : index
    %c44_185 = arith.constant 44 : index
    %550 = memref.load %arg1[%c3_184, %c44_185] : memref<4x49xf32, #tpu.memory_space<smem>>
    %551 = vector.extract_strided_slice %414 {offsets = [6, 0], sizes = [16, 128], strides = [1, 1]} : vector<22x128xf32> to vector<16x128xf32>
    %552 = vector.broadcast %550 : f32 to vector<16x128xf32>
    %553 = arith.mulf %552, %551 : vector<16x128xf32>
    %554 = arith.addf %549, %553 : vector<16x128xf32>
    %c0_186 = arith.constant 0 : index
    %c3_187 = arith.constant 3 : index
    %555 = memref.load %arg1[%c0_186, %c3_187] : memref<4x49xf32, #tpu.memory_space<smem>>
    %556 = vector.extract_strided_slice %81 {offsets = [0, 0], sizes = [16, 128], strides = [1, 1]} : vector<22x128xf32> to vector<16x128xf32>
    %557 = vector.broadcast %555 : f32 to vector<16x128xf32>
    %558 = arith.mulf %557, %556 : vector<16x128xf32>
    %559 = arith.addf %544, %558 : vector<16x128xf32>
    %c1_188 = arith.constant 1 : index
    %c3_189 = arith.constant 3 : index
    %560 = memref.load %arg1[%c1_188, %c3_189] : memref<4x49xf32, #tpu.memory_space<smem>>
    %561 = vector.extract_strided_slice %86 {offsets = [0, 0], sizes = [16, 128], strides = [1, 1]} : vector<22x128xf32> to vector<16x128xf32>
    %562 = vector.broadcast %560 : f32 to vector<16x128xf32>
    %563 = arith.mulf %562, %561 : vector<16x128xf32>
    %564 = arith.addf %559, %563 : vector<16x128xf32>
    %c2_190 = arith.constant 2 : index
    %c3_191 = arith.constant 3 : index
    %565 = memref.load %arg1[%c2_190, %c3_191] : memref<4x49xf32, #tpu.memory_space<smem>>
    %566 = vector.extract_strided_slice %91 {offsets = [0, 0], sizes = [16, 128], strides = [1, 1]} : vector<22x128xf32> to vector<16x128xf32>
    %567 = vector.broadcast %565 : f32 to vector<16x128xf32>
    %568 = arith.mulf %567, %566 : vector<16x128xf32>
    %569 = arith.addf %554, %568 : vector<16x128xf32>
    %c3_192 = arith.constant 3 : index
    %c3_193 = arith.constant 3 : index
    %570 = memref.load %arg1[%c3_192, %c3_193] : memref<4x49xf32, #tpu.memory_space<smem>>
    %571 = vector.extract_strided_slice %96 {offsets = [0, 0], sizes = [16, 128], strides = [1, 1]} : vector<22x128xf32> to vector<16x128xf32>
    %572 = vector.broadcast %570 : f32 to vector<16x128xf32>
    %573 = arith.mulf %572, %571 : vector<16x128xf32>
    %574 = arith.addf %569, %573 : vector<16x128xf32>
    %c0_194 = arith.constant 0 : index
    %c10 = arith.constant 10 : index
    %575 = memref.load %arg1[%c0_194, %c10] : memref<4x49xf32, #tpu.memory_space<smem>>
    %576 = vector.extract_strided_slice %81 {offsets = [1, 0], sizes = [16, 128], strides = [1, 1]} : vector<22x128xf32> to vector<16x128xf32>
    %577 = vector.broadcast %575 : f32 to vector<16x128xf32>
    %578 = arith.mulf %577, %576 : vector<16x128xf32>
    %579 = arith.addf %564, %578 : vector<16x128xf32>
    %c1_195 = arith.constant 1 : index
    %c10_196 = arith.constant 10 : index
    %580 = memref.load %arg1[%c1_195, %c10_196] : memref<4x49xf32, #tpu.memory_space<smem>>
    %581 = vector.extract_strided_slice %86 {offsets = [1, 0], sizes = [16, 128], strides = [1, 1]} : vector<22x128xf32> to vector<16x128xf32>
    %582 = vector.broadcast %580 : f32 to vector<16x128xf32>
    %583 = arith.mulf %582, %581 : vector<16x128xf32>
    %584 = arith.addf %579, %583 : vector<16x128xf32>
    %c2_197 = arith.constant 2 : index
    %c10_198 = arith.constant 10 : index
    %585 = memref.load %arg1[%c2_197, %c10_198] : memref<4x49xf32, #tpu.memory_space<smem>>
    %586 = vector.extract_strided_slice %91 {offsets = [1, 0], sizes = [16, 128], strides = [1, 1]} : vector<22x128xf32> to vector<16x128xf32>
    %587 = vector.broadcast %585 : f32 to vector<16x128xf32>
    %588 = arith.mulf %587, %586 : vector<16x128xf32>
    %589 = arith.addf %574, %588 : vector<16x128xf32>
    %c3_199 = arith.constant 3 : index
    %c10_200 = arith.constant 10 : index
    %590 = memref.load %arg1[%c3_199, %c10_200] : memref<4x49xf32, #tpu.memory_space<smem>>
    %591 = vector.extract_strided_slice %96 {offsets = [1, 0], sizes = [16, 128], strides = [1, 1]} : vector<22x128xf32> to vector<16x128xf32>
    %592 = vector.broadcast %590 : f32 to vector<16x128xf32>
    %593 = arith.mulf %592, %591 : vector<16x128xf32>
    %594 = arith.addf %589, %593 : vector<16x128xf32>
    %c0_201 = arith.constant 0 : index
    %c17 = arith.constant 17 : index
    %595 = memref.load %arg1[%c0_201, %c17] : memref<4x49xf32, #tpu.memory_space<smem>>
    %596 = vector.extract_strided_slice %81 {offsets = [2, 0], sizes = [16, 128], strides = [1, 1]} : vector<22x128xf32> to vector<16x128xf32>
    %597 = vector.broadcast %595 : f32 to vector<16x128xf32>
    %598 = arith.mulf %597, %596 : vector<16x128xf32>
    %599 = arith.addf %584, %598 : vector<16x128xf32>
    %c1_202 = arith.constant 1 : index
    %c17_203 = arith.constant 17 : index
    %600 = memref.load %arg1[%c1_202, %c17_203] : memref<4x49xf32, #tpu.memory_space<smem>>
    %601 = vector.extract_strided_slice %86 {offsets = [2, 0], sizes = [16, 128], strides = [1, 1]} : vector<22x128xf32> to vector<16x128xf32>
    %602 = vector.broadcast %600 : f32 to vector<16x128xf32>
    %603 = arith.mulf %602, %601 : vector<16x128xf32>
    %604 = arith.addf %599, %603 : vector<16x128xf32>
    %c2_204 = arith.constant 2 : index
    %c17_205 = arith.constant 17 : index
    %605 = memref.load %arg1[%c2_204, %c17_205] : memref<4x49xf32, #tpu.memory_space<smem>>
    %606 = vector.extract_strided_slice %91 {offsets = [2, 0], sizes = [16, 128], strides = [1, 1]} : vector<22x128xf32> to vector<16x128xf32>
    %607 = vector.broadcast %605 : f32 to vector<16x128xf32>
    %608 = arith.mulf %607, %606 : vector<16x128xf32>
    %609 = arith.addf %594, %608 : vector<16x128xf32>
    %c3_206 = arith.constant 3 : index
    %c17_207 = arith.constant 17 : index
    %610 = memref.load %arg1[%c3_206, %c17_207] : memref<4x49xf32, #tpu.memory_space<smem>>
    %611 = vector.extract_strided_slice %96 {offsets = [2, 0], sizes = [16, 128], strides = [1, 1]} : vector<22x128xf32> to vector<16x128xf32>
    %612 = vector.broadcast %610 : f32 to vector<16x128xf32>
    %613 = arith.mulf %612, %611 : vector<16x128xf32>
    %614 = arith.addf %609, %613 : vector<16x128xf32>
    %c0_208 = arith.constant 0 : index
    %c24 = arith.constant 24 : index
    %615 = memref.load %arg1[%c0_208, %c24] : memref<4x49xf32, #tpu.memory_space<smem>>
    %616 = vector.extract_strided_slice %81 {offsets = [3, 0], sizes = [16, 128], strides = [1, 1]} : vector<22x128xf32> to vector<16x128xf32>
    %617 = vector.broadcast %615 : f32 to vector<16x128xf32>
    %618 = arith.mulf %617, %616 : vector<16x128xf32>
    %619 = arith.addf %604, %618 : vector<16x128xf32>
    %c1_209 = arith.constant 1 : index
    %c24_210 = arith.constant 24 : index
    %620 = memref.load %arg1[%c1_209, %c24_210] : memref<4x49xf32, #tpu.memory_space<smem>>
    %621 = vector.extract_strided_slice %86 {offsets = [3, 0], sizes = [16, 128], strides = [1, 1]} : vector<22x128xf32> to vector<16x128xf32>
    %622 = vector.broadcast %620 : f32 to vector<16x128xf32>
    %623 = arith.mulf %622, %621 : vector<16x128xf32>
    %624 = arith.addf %619, %623 : vector<16x128xf32>
    %c2_211 = arith.constant 2 : index
    %c24_212 = arith.constant 24 : index
    %625 = memref.load %arg1[%c2_211, %c24_212] : memref<4x49xf32, #tpu.memory_space<smem>>
    %626 = vector.extract_strided_slice %91 {offsets = [3, 0], sizes = [16, 128], strides = [1, 1]} : vector<22x128xf32> to vector<16x128xf32>
    %627 = vector.broadcast %625 : f32 to vector<16x128xf32>
    %628 = arith.mulf %627, %626 : vector<16x128xf32>
    %629 = arith.addf %614, %628 : vector<16x128xf32>
    %c3_213 = arith.constant 3 : index
    %c24_214 = arith.constant 24 : index
    %630 = memref.load %arg1[%c3_213, %c24_214] : memref<4x49xf32, #tpu.memory_space<smem>>
    %631 = vector.extract_strided_slice %96 {offsets = [3, 0], sizes = [16, 128], strides = [1, 1]} : vector<22x128xf32> to vector<16x128xf32>
    %632 = vector.broadcast %630 : f32 to vector<16x128xf32>
    %633 = arith.mulf %632, %631 : vector<16x128xf32>
    %634 = arith.addf %629, %633 : vector<16x128xf32>
    %c0_215 = arith.constant 0 : index
    %c31 = arith.constant 31 : index
    %635 = memref.load %arg1[%c0_215, %c31] : memref<4x49xf32, #tpu.memory_space<smem>>
    %636 = vector.extract_strided_slice %81 {offsets = [4, 0], sizes = [16, 128], strides = [1, 1]} : vector<22x128xf32> to vector<16x128xf32>
    %637 = vector.broadcast %635 : f32 to vector<16x128xf32>
    %638 = arith.mulf %637, %636 : vector<16x128xf32>
    %639 = arith.addf %624, %638 : vector<16x128xf32>
    %c1_216 = arith.constant 1 : index
    %c31_217 = arith.constant 31 : index
    %640 = memref.load %arg1[%c1_216, %c31_217] : memref<4x49xf32, #tpu.memory_space<smem>>
    %641 = vector.extract_strided_slice %86 {offsets = [4, 0], sizes = [16, 128], strides = [1, 1]} : vector<22x128xf32> to vector<16x128xf32>
    %642 = vector.broadcast %640 : f32 to vector<16x128xf32>
    %643 = arith.mulf %642, %641 : vector<16x128xf32>
    %644 = arith.addf %639, %643 : vector<16x128xf32>
    %c2_218 = arith.constant 2 : index
    %c31_219 = arith.constant 31 : index
    %645 = memref.load %arg1[%c2_218, %c31_219] : memref<4x49xf32, #tpu.memory_space<smem>>
    %646 = vector.extract_strided_slice %91 {offsets = [4, 0], sizes = [16, 128], strides = [1, 1]} : vector<22x128xf32> to vector<16x128xf32>
    %647 = vector.broadcast %645 : f32 to vector<16x128xf32>
    %648 = arith.mulf %647, %646 : vector<16x128xf32>
    %649 = arith.addf %634, %648 : vector<16x128xf32>
    %c3_220 = arith.constant 3 : index
    %c31_221 = arith.constant 31 : index
    %650 = memref.load %arg1[%c3_220, %c31_221] : memref<4x49xf32, #tpu.memory_space<smem>>
    %651 = vector.extract_strided_slice %96 {offsets = [4, 0], sizes = [16, 128], strides = [1, 1]} : vector<22x128xf32> to vector<16x128xf32>
    %652 = vector.broadcast %650 : f32 to vector<16x128xf32>
    %653 = arith.mulf %652, %651 : vector<16x128xf32>
    %654 = arith.addf %649, %653 : vector<16x128xf32>
    %c0_222 = arith.constant 0 : index
    %c38 = arith.constant 38 : index
    %655 = memref.load %arg1[%c0_222, %c38] : memref<4x49xf32, #tpu.memory_space<smem>>
    %656 = vector.extract_strided_slice %81 {offsets = [5, 0], sizes = [16, 128], strides = [1, 1]} : vector<22x128xf32> to vector<16x128xf32>
    %657 = vector.broadcast %655 : f32 to vector<16x128xf32>
    %658 = arith.mulf %657, %656 : vector<16x128xf32>
    %659 = arith.addf %644, %658 : vector<16x128xf32>
    %c1_223 = arith.constant 1 : index
    %c38_224 = arith.constant 38 : index
    %660 = memref.load %arg1[%c1_223, %c38_224] : memref<4x49xf32, #tpu.memory_space<smem>>
    %661 = vector.extract_strided_slice %86 {offsets = [5, 0], sizes = [16, 128], strides = [1, 1]} : vector<22x128xf32> to vector<16x128xf32>
    %662 = vector.broadcast %660 : f32 to vector<16x128xf32>
    %663 = arith.mulf %662, %661 : vector<16x128xf32>
    %664 = arith.addf %659, %663 : vector<16x128xf32>
    %c2_225 = arith.constant 2 : index
    %c38_226 = arith.constant 38 : index
    %665 = memref.load %arg1[%c2_225, %c38_226] : memref<4x49xf32, #tpu.memory_space<smem>>
    %666 = vector.extract_strided_slice %91 {offsets = [5, 0], sizes = [16, 128], strides = [1, 1]} : vector<22x128xf32> to vector<16x128xf32>
    %667 = vector.broadcast %665 : f32 to vector<16x128xf32>
    %668 = arith.mulf %667, %666 : vector<16x128xf32>
    %669 = arith.addf %654, %668 : vector<16x128xf32>
    %c3_227 = arith.constant 3 : index
    %c38_228 = arith.constant 38 : index
    %670 = memref.load %arg1[%c3_227, %c38_228] : memref<4x49xf32, #tpu.memory_space<smem>>
    %671 = vector.extract_strided_slice %96 {offsets = [5, 0], sizes = [16, 128], strides = [1, 1]} : vector<22x128xf32> to vector<16x128xf32>
    %672 = vector.broadcast %670 : f32 to vector<16x128xf32>
    %673 = arith.mulf %672, %671 : vector<16x128xf32>
    %674 = arith.addf %669, %673 : vector<16x128xf32>
    %c0_229 = arith.constant 0 : index
    %c45 = arith.constant 45 : index
    %675 = memref.load %arg1[%c0_229, %c45] : memref<4x49xf32, #tpu.memory_space<smem>>
    %676 = vector.extract_strided_slice %81 {offsets = [6, 0], sizes = [16, 128], strides = [1, 1]} : vector<22x128xf32> to vector<16x128xf32>
    %677 = vector.broadcast %675 : f32 to vector<16x128xf32>
    %678 = arith.mulf %677, %676 : vector<16x128xf32>
    %679 = arith.addf %664, %678 : vector<16x128xf32>
    %c1_230 = arith.constant 1 : index
    %c45_231 = arith.constant 45 : index
    %680 = memref.load %arg1[%c1_230, %c45_231] : memref<4x49xf32, #tpu.memory_space<smem>>
    %681 = vector.extract_strided_slice %86 {offsets = [6, 0], sizes = [16, 128], strides = [1, 1]} : vector<22x128xf32> to vector<16x128xf32>
    %682 = vector.broadcast %680 : f32 to vector<16x128xf32>
    %683 = arith.mulf %682, %681 : vector<16x128xf32>
    %684 = arith.addf %679, %683 : vector<16x128xf32>
    %c2_232 = arith.constant 2 : index
    %c45_233 = arith.constant 45 : index
    %685 = memref.load %arg1[%c2_232, %c45_233] : memref<4x49xf32, #tpu.memory_space<smem>>
    %686 = vector.extract_strided_slice %91 {offsets = [6, 0], sizes = [16, 128], strides = [1, 1]} : vector<22x128xf32> to vector<16x128xf32>
    %687 = vector.broadcast %685 : f32 to vector<16x128xf32>
    %688 = arith.mulf %687, %686 : vector<16x128xf32>
    %689 = arith.addf %674, %688 : vector<16x128xf32>
    %c3_234 = arith.constant 3 : index
    %c45_235 = arith.constant 45 : index
    %690 = memref.load %arg1[%c3_234, %c45_235] : memref<4x49xf32, #tpu.memory_space<smem>>
    %691 = vector.extract_strided_slice %96 {offsets = [6, 0], sizes = [16, 128], strides = [1, 1]} : vector<22x128xf32> to vector<16x128xf32>
    %692 = vector.broadcast %690 : f32 to vector<16x128xf32>
    %693 = arith.mulf %692, %691 : vector<16x128xf32>
    %694 = arith.addf %689, %693 : vector<16x128xf32>
    %695 = vector.extract_strided_slice %81 {offsets = [0, 1], sizes = [22, 127], strides = [1, 1]} : vector<22x128xf32> to vector<22x127xf32>
    %cst_236 = arith.constant 0.000000e+00 : f32
    %696 = vector.broadcast %cst_236 : f32 to vector<22x1xf32>
    %697 = tpu.concatenate %695, %696 in 1 : vector<22x127xf32>, vector<22x1xf32> -> vector<22x128xf32>
    %698 = vector.extract_strided_slice %86 {offsets = [0, 1], sizes = [22, 127], strides = [1, 1]} : vector<22x128xf32> to vector<22x127xf32>
    %cst_237 = arith.constant 0.000000e+00 : f32
    %699 = vector.broadcast %cst_237 : f32 to vector<22x1xf32>
    %700 = tpu.concatenate %698, %699 in 1 : vector<22x127xf32>, vector<22x1xf32> -> vector<22x128xf32>
    %701 = vector.extract_strided_slice %91 {offsets = [0, 1], sizes = [22, 127], strides = [1, 1]} : vector<22x128xf32> to vector<22x127xf32>
    %cst_238 = arith.constant 0.000000e+00 : f32
    %702 = vector.broadcast %cst_238 : f32 to vector<22x1xf32>
    %703 = tpu.concatenate %701, %702 in 1 : vector<22x127xf32>, vector<22x1xf32> -> vector<22x128xf32>
    %704 = vector.extract_strided_slice %96 {offsets = [0, 1], sizes = [22, 127], strides = [1, 1]} : vector<22x128xf32> to vector<22x127xf32>
    %cst_239 = arith.constant 0.000000e+00 : f32
    %705 = vector.broadcast %cst_239 : f32 to vector<22x1xf32>
    %706 = tpu.concatenate %704, %705 in 1 : vector<22x127xf32>, vector<22x1xf32> -> vector<22x128xf32>
    %c0_240 = arith.constant 0 : index
    %c4 = arith.constant 4 : index
    %707 = memref.load %arg1[%c0_240, %c4] : memref<4x49xf32, #tpu.memory_space<smem>>
    %708 = vector.extract_strided_slice %697 {offsets = [0, 0], sizes = [16, 128], strides = [1, 1]} : vector<22x128xf32> to vector<16x128xf32>
    %709 = vector.broadcast %707 : f32 to vector<16x128xf32>
    %710 = arith.mulf %709, %708 : vector<16x128xf32>
    %711 = arith.addf %684, %710 : vector<16x128xf32>
    %c1_241 = arith.constant 1 : index
    %c4_242 = arith.constant 4 : index
    %712 = memref.load %arg1[%c1_241, %c4_242] : memref<4x49xf32, #tpu.memory_space<smem>>
    %713 = vector.extract_strided_slice %700 {offsets = [0, 0], sizes = [16, 128], strides = [1, 1]} : vector<22x128xf32> to vector<16x128xf32>
    %714 = vector.broadcast %712 : f32 to vector<16x128xf32>
    %715 = arith.mulf %714, %713 : vector<16x128xf32>
    %716 = arith.addf %711, %715 : vector<16x128xf32>
    %c2_243 = arith.constant 2 : index
    %c4_244 = arith.constant 4 : index
    %717 = memref.load %arg1[%c2_243, %c4_244] : memref<4x49xf32, #tpu.memory_space<smem>>
    %718 = vector.extract_strided_slice %703 {offsets = [0, 0], sizes = [16, 128], strides = [1, 1]} : vector<22x128xf32> to vector<16x128xf32>
    %719 = vector.broadcast %717 : f32 to vector<16x128xf32>
    %720 = arith.mulf %719, %718 : vector<16x128xf32>
    %721 = arith.addf %694, %720 : vector<16x128xf32>
    %c3_245 = arith.constant 3 : index
    %c4_246 = arith.constant 4 : index
    %722 = memref.load %arg1[%c3_245, %c4_246] : memref<4x49xf32, #tpu.memory_space<smem>>
    %723 = vector.extract_strided_slice %706 {offsets = [0, 0], sizes = [16, 128], strides = [1, 1]} : vector<22x128xf32> to vector<16x128xf32>
    %724 = vector.broadcast %722 : f32 to vector<16x128xf32>
    %725 = arith.mulf %724, %723 : vector<16x128xf32>
    %726 = arith.addf %721, %725 : vector<16x128xf32>
    %c0_247 = arith.constant 0 : index
    %c11 = arith.constant 11 : index
    %727 = memref.load %arg1[%c0_247, %c11] : memref<4x49xf32, #tpu.memory_space<smem>>
    %728 = vector.extract_strided_slice %697 {offsets = [1, 0], sizes = [16, 128], strides = [1, 1]} : vector<22x128xf32> to vector<16x128xf32>
    %729 = vector.broadcast %727 : f32 to vector<16x128xf32>
    %730 = arith.mulf %729, %728 : vector<16x128xf32>
    %731 = arith.addf %716, %730 : vector<16x128xf32>
    %c1_248 = arith.constant 1 : index
    %c11_249 = arith.constant 11 : index
    %732 = memref.load %arg1[%c1_248, %c11_249] : memref<4x49xf32, #tpu.memory_space<smem>>
    %733 = vector.extract_strided_slice %700 {offsets = [1, 0], sizes = [16, 128], strides = [1, 1]} : vector<22x128xf32> to vector<16x128xf32>
    %734 = vector.broadcast %732 : f32 to vector<16x128xf32>
    %735 = arith.mulf %734, %733 : vector<16x128xf32>
    %736 = arith.addf %731, %735 : vector<16x128xf32>
    %c2_250 = arith.constant 2 : index
    %c11_251 = arith.constant 11 : index
    %737 = memref.load %arg1[%c2_250, %c11_251] : memref<4x49xf32, #tpu.memory_space<smem>>
    %738 = vector.extract_strided_slice %703 {offsets = [1, 0], sizes = [16, 128], strides = [1, 1]} : vector<22x128xf32> to vector<16x128xf32>
    %739 = vector.broadcast %737 : f32 to vector<16x128xf32>
    %740 = arith.mulf %739, %738 : vector<16x128xf32>
    %741 = arith.addf %726, %740 : vector<16x128xf32>
    %c3_252 = arith.constant 3 : index
    %c11_253 = arith.constant 11 : index
    %742 = memref.load %arg1[%c3_252, %c11_253] : memref<4x49xf32, #tpu.memory_space<smem>>
    %743 = vector.extract_strided_slice %706 {offsets = [1, 0], sizes = [16, 128], strides = [1, 1]} : vector<22x128xf32> to vector<16x128xf32>
    %744 = vector.broadcast %742 : f32 to vector<16x128xf32>
    %745 = arith.mulf %744, %743 : vector<16x128xf32>
    %746 = arith.addf %741, %745 : vector<16x128xf32>
    %c0_254 = arith.constant 0 : index
    %c18 = arith.constant 18 : index
    %747 = memref.load %arg1[%c0_254, %c18] : memref<4x49xf32, #tpu.memory_space<smem>>
    %748 = vector.extract_strided_slice %697 {offsets = [2, 0], sizes = [16, 128], strides = [1, 1]} : vector<22x128xf32> to vector<16x128xf32>
    %749 = vector.broadcast %747 : f32 to vector<16x128xf32>
    %750 = arith.mulf %749, %748 : vector<16x128xf32>
    %751 = arith.addf %736, %750 : vector<16x128xf32>
    %c1_255 = arith.constant 1 : index
    %c18_256 = arith.constant 18 : index
    %752 = memref.load %arg1[%c1_255, %c18_256] : memref<4x49xf32, #tpu.memory_space<smem>>
    %753 = vector.extract_strided_slice %700 {offsets = [2, 0], sizes = [16, 128], strides = [1, 1]} : vector<22x128xf32> to vector<16x128xf32>
    %754 = vector.broadcast %752 : f32 to vector<16x128xf32>
    %755 = arith.mulf %754, %753 : vector<16x128xf32>
    %756 = arith.addf %751, %755 : vector<16x128xf32>
    %c2_257 = arith.constant 2 : index
    %c18_258 = arith.constant 18 : index
    %757 = memref.load %arg1[%c2_257, %c18_258] : memref<4x49xf32, #tpu.memory_space<smem>>
    %758 = vector.extract_strided_slice %703 {offsets = [2, 0], sizes = [16, 128], strides = [1, 1]} : vector<22x128xf32> to vector<16x128xf32>
    %759 = vector.broadcast %757 : f32 to vector<16x128xf32>
    %760 = arith.mulf %759, %758 : vector<16x128xf32>
    %761 = arith.addf %746, %760 : vector<16x128xf32>
    %c3_259 = arith.constant 3 : index
    %c18_260 = arith.constant 18 : index
    %762 = memref.load %arg1[%c3_259, %c18_260] : memref<4x49xf32, #tpu.memory_space<smem>>
    %763 = vector.extract_strided_slice %706 {offsets = [2, 0], sizes = [16, 128], strides = [1, 1]} : vector<22x128xf32> to vector<16x128xf32>
    %764 = vector.broadcast %762 : f32 to vector<16x128xf32>
    %765 = arith.mulf %764, %763 : vector<16x128xf32>
    %766 = arith.addf %761, %765 : vector<16x128xf32>
    %c0_261 = arith.constant 0 : index
    %c25 = arith.constant 25 : index
    %767 = memref.load %arg1[%c0_261, %c25] : memref<4x49xf32, #tpu.memory_space<smem>>
    %768 = vector.extract_strided_slice %697 {offsets = [3, 0], sizes = [16, 128], strides = [1, 1]} : vector<22x128xf32> to vector<16x128xf32>
    %769 = vector.broadcast %767 : f32 to vector<16x128xf32>
    %770 = arith.mulf %769, %768 : vector<16x128xf32>
    %771 = arith.addf %756, %770 : vector<16x128xf32>
    %c1_262 = arith.constant 1 : index
    %c25_263 = arith.constant 25 : index
    %772 = memref.load %arg1[%c1_262, %c25_263] : memref<4x49xf32, #tpu.memory_space<smem>>
    %773 = vector.extract_strided_slice %700 {offsets = [3, 0], sizes = [16, 128], strides = [1, 1]} : vector<22x128xf32> to vector<16x128xf32>
    %774 = vector.broadcast %772 : f32 to vector<16x128xf32>
    %775 = arith.mulf %774, %773 : vector<16x128xf32>
    %776 = arith.addf %771, %775 : vector<16x128xf32>
    %c2_264 = arith.constant 2 : index
    %c25_265 = arith.constant 25 : index
    %777 = memref.load %arg1[%c2_264, %c25_265] : memref<4x49xf32, #tpu.memory_space<smem>>
    %778 = vector.extract_strided_slice %703 {offsets = [3, 0], sizes = [16, 128], strides = [1, 1]} : vector<22x128xf32> to vector<16x128xf32>
    %779 = vector.broadcast %777 : f32 to vector<16x128xf32>
    %780 = arith.mulf %779, %778 : vector<16x128xf32>
    %781 = arith.addf %766, %780 : vector<16x128xf32>
    %c3_266 = arith.constant 3 : index
    %c25_267 = arith.constant 25 : index
    %782 = memref.load %arg1[%c3_266, %c25_267] : memref<4x49xf32, #tpu.memory_space<smem>>
    %783 = vector.extract_strided_slice %706 {offsets = [3, 0], sizes = [16, 128], strides = [1, 1]} : vector<22x128xf32> to vector<16x128xf32>
    %784 = vector.broadcast %782 : f32 to vector<16x128xf32>
    %785 = arith.mulf %784, %783 : vector<16x128xf32>
    %786 = arith.addf %781, %785 : vector<16x128xf32>
    %c0_268 = arith.constant 0 : index
    %c32 = arith.constant 32 : index
    %787 = memref.load %arg1[%c0_268, %c32] : memref<4x49xf32, #tpu.memory_space<smem>>
    %788 = vector.extract_strided_slice %697 {offsets = [4, 0], sizes = [16, 128], strides = [1, 1]} : vector<22x128xf32> to vector<16x128xf32>
    %789 = vector.broadcast %787 : f32 to vector<16x128xf32>
    %790 = arith.mulf %789, %788 : vector<16x128xf32>
    %791 = arith.addf %776, %790 : vector<16x128xf32>
    %c1_269 = arith.constant 1 : index
    %c32_270 = arith.constant 32 : index
    %792 = memref.load %arg1[%c1_269, %c32_270] : memref<4x49xf32, #tpu.memory_space<smem>>
    %793 = vector.extract_strided_slice %700 {offsets = [4, 0], sizes = [16, 128], strides = [1, 1]} : vector<22x128xf32> to vector<16x128xf32>
    %794 = vector.broadcast %792 : f32 to vector<16x128xf32>
    %795 = arith.mulf %794, %793 : vector<16x128xf32>
    %796 = arith.addf %791, %795 : vector<16x128xf32>
    %c2_271 = arith.constant 2 : index
    %c32_272 = arith.constant 32 : index
    %797 = memref.load %arg1[%c2_271, %c32_272] : memref<4x49xf32, #tpu.memory_space<smem>>
    %798 = vector.extract_strided_slice %703 {offsets = [4, 0], sizes = [16, 128], strides = [1, 1]} : vector<22x128xf32> to vector<16x128xf32>
    %799 = vector.broadcast %797 : f32 to vector<16x128xf32>
    %800 = arith.mulf %799, %798 : vector<16x128xf32>
    %801 = arith.addf %786, %800 : vector<16x128xf32>
    %c3_273 = arith.constant 3 : index
    %c32_274 = arith.constant 32 : index
    %802 = memref.load %arg1[%c3_273, %c32_274] : memref<4x49xf32, #tpu.memory_space<smem>>
    %803 = vector.extract_strided_slice %706 {offsets = [4, 0], sizes = [16, 128], strides = [1, 1]} : vector<22x128xf32> to vector<16x128xf32>
    %804 = vector.broadcast %802 : f32 to vector<16x128xf32>
    %805 = arith.mulf %804, %803 : vector<16x128xf32>
    %806 = arith.addf %801, %805 : vector<16x128xf32>
    %c0_275 = arith.constant 0 : index
    %c39 = arith.constant 39 : index
    %807 = memref.load %arg1[%c0_275, %c39] : memref<4x49xf32, #tpu.memory_space<smem>>
    %808 = vector.extract_strided_slice %697 {offsets = [5, 0], sizes = [16, 128], strides = [1, 1]} : vector<22x128xf32> to vector<16x128xf32>
    %809 = vector.broadcast %807 : f32 to vector<16x128xf32>
    %810 = arith.mulf %809, %808 : vector<16x128xf32>
    %811 = arith.addf %796, %810 : vector<16x128xf32>
    %c1_276 = arith.constant 1 : index
    %c39_277 = arith.constant 39 : index
    %812 = memref.load %arg1[%c1_276, %c39_277] : memref<4x49xf32, #tpu.memory_space<smem>>
    %813 = vector.extract_strided_slice %700 {offsets = [5, 0], sizes = [16, 128], strides = [1, 1]} : vector<22x128xf32> to vector<16x128xf32>
    %814 = vector.broadcast %812 : f32 to vector<16x128xf32>
    %815 = arith.mulf %814, %813 : vector<16x128xf32>
    %816 = arith.addf %811, %815 : vector<16x128xf32>
    %c2_278 = arith.constant 2 : index
    %c39_279 = arith.constant 39 : index
    %817 = memref.load %arg1[%c2_278, %c39_279] : memref<4x49xf32, #tpu.memory_space<smem>>
    %818 = vector.extract_strided_slice %703 {offsets = [5, 0], sizes = [16, 128], strides = [1, 1]} : vector<22x128xf32> to vector<16x128xf32>
    %819 = vector.broadcast %817 : f32 to vector<16x128xf32>
    %820 = arith.mulf %819, %818 : vector<16x128xf32>
    %821 = arith.addf %806, %820 : vector<16x128xf32>
    %c3_280 = arith.constant 3 : index
    %c39_281 = arith.constant 39 : index
    %822 = memref.load %arg1[%c3_280, %c39_281] : memref<4x49xf32, #tpu.memory_space<smem>>
    %823 = vector.extract_strided_slice %706 {offsets = [5, 0], sizes = [16, 128], strides = [1, 1]} : vector<22x128xf32> to vector<16x128xf32>
    %824 = vector.broadcast %822 : f32 to vector<16x128xf32>
    %825 = arith.mulf %824, %823 : vector<16x128xf32>
    %826 = arith.addf %821, %825 : vector<16x128xf32>
    %c0_282 = arith.constant 0 : index
    %c46 = arith.constant 46 : index
    %827 = memref.load %arg1[%c0_282, %c46] : memref<4x49xf32, #tpu.memory_space<smem>>
    %828 = vector.extract_strided_slice %697 {offsets = [6, 0], sizes = [16, 128], strides = [1, 1]} : vector<22x128xf32> to vector<16x128xf32>
    %829 = vector.broadcast %827 : f32 to vector<16x128xf32>
    %830 = arith.mulf %829, %828 : vector<16x128xf32>
    %831 = arith.addf %816, %830 : vector<16x128xf32>
    %c1_283 = arith.constant 1 : index
    %c46_284 = arith.constant 46 : index
    %832 = memref.load %arg1[%c1_283, %c46_284] : memref<4x49xf32, #tpu.memory_space<smem>>
    %833 = vector.extract_strided_slice %700 {offsets = [6, 0], sizes = [16, 128], strides = [1, 1]} : vector<22x128xf32> to vector<16x128xf32>
    %834 = vector.broadcast %832 : f32 to vector<16x128xf32>
    %835 = arith.mulf %834, %833 : vector<16x128xf32>
    %836 = arith.addf %831, %835 : vector<16x128xf32>
    %c2_285 = arith.constant 2 : index
    %c46_286 = arith.constant 46 : index
    %837 = memref.load %arg1[%c2_285, %c46_286] : memref<4x49xf32, #tpu.memory_space<smem>>
    %838 = vector.extract_strided_slice %703 {offsets = [6, 0], sizes = [16, 128], strides = [1, 1]} : vector<22x128xf32> to vector<16x128xf32>
    %839 = vector.broadcast %837 : f32 to vector<16x128xf32>
    %840 = arith.mulf %839, %838 : vector<16x128xf32>
    %841 = arith.addf %826, %840 : vector<16x128xf32>
    %c3_287 = arith.constant 3 : index
    %c46_288 = arith.constant 46 : index
    %842 = memref.load %arg1[%c3_287, %c46_288] : memref<4x49xf32, #tpu.memory_space<smem>>
    %843 = vector.extract_strided_slice %706 {offsets = [6, 0], sizes = [16, 128], strides = [1, 1]} : vector<22x128xf32> to vector<16x128xf32>
    %844 = vector.broadcast %842 : f32 to vector<16x128xf32>
    %845 = arith.mulf %844, %843 : vector<16x128xf32>
    %846 = arith.addf %841, %845 : vector<16x128xf32>
    %847 = vector.extract_strided_slice %81 {offsets = [0, 2], sizes = [22, 126], strides = [1, 1]} : vector<22x128xf32> to vector<22x126xf32>
    %cst_289 = arith.constant 0.000000e+00 : f32
    %848 = vector.broadcast %cst_289 : f32 to vector<22x2xf32>
    %849 = tpu.concatenate %847, %848 in 1 : vector<22x126xf32>, vector<22x2xf32> -> vector<22x128xf32>
    %850 = vector.extract_strided_slice %86 {offsets = [0, 2], sizes = [22, 126], strides = [1, 1]} : vector<22x128xf32> to vector<22x126xf32>
    %cst_290 = arith.constant 0.000000e+00 : f32
    %851 = vector.broadcast %cst_290 : f32 to vector<22x2xf32>
    %852 = tpu.concatenate %850, %851 in 1 : vector<22x126xf32>, vector<22x2xf32> -> vector<22x128xf32>
    %853 = vector.extract_strided_slice %91 {offsets = [0, 2], sizes = [22, 126], strides = [1, 1]} : vector<22x128xf32> to vector<22x126xf32>
    %cst_291 = arith.constant 0.000000e+00 : f32
    %854 = vector.broadcast %cst_291 : f32 to vector<22x2xf32>
    %855 = tpu.concatenate %853, %854 in 1 : vector<22x126xf32>, vector<22x2xf32> -> vector<22x128xf32>
    %856 = vector.extract_strided_slice %96 {offsets = [0, 2], sizes = [22, 126], strides = [1, 1]} : vector<22x128xf32> to vector<22x126xf32>
    %cst_292 = arith.constant 0.000000e+00 : f32
    %857 = vector.broadcast %cst_292 : f32 to vector<22x2xf32>
    %858 = tpu.concatenate %856, %857 in 1 : vector<22x126xf32>, vector<22x2xf32> -> vector<22x128xf32>
    %c0_293 = arith.constant 0 : index
    %c5 = arith.constant 5 : index
    %859 = memref.load %arg1[%c0_293, %c5] : memref<4x49xf32, #tpu.memory_space<smem>>
    %860 = vector.extract_strided_slice %849 {offsets = [0, 0], sizes = [16, 128], strides = [1, 1]} : vector<22x128xf32> to vector<16x128xf32>
    %861 = vector.broadcast %859 : f32 to vector<16x128xf32>
    %862 = arith.mulf %861, %860 : vector<16x128xf32>
    %863 = arith.addf %836, %862 : vector<16x128xf32>
    %c1_294 = arith.constant 1 : index
    %c5_295 = arith.constant 5 : index
    %864 = memref.load %arg1[%c1_294, %c5_295] : memref<4x49xf32, #tpu.memory_space<smem>>
    %865 = vector.extract_strided_slice %852 {offsets = [0, 0], sizes = [16, 128], strides = [1, 1]} : vector<22x128xf32> to vector<16x128xf32>
    %866 = vector.broadcast %864 : f32 to vector<16x128xf32>
    %867 = arith.mulf %866, %865 : vector<16x128xf32>
    %868 = arith.addf %863, %867 : vector<16x128xf32>
    %c2_296 = arith.constant 2 : index
    %c5_297 = arith.constant 5 : index
    %869 = memref.load %arg1[%c2_296, %c5_297] : memref<4x49xf32, #tpu.memory_space<smem>>
    %870 = vector.extract_strided_slice %855 {offsets = [0, 0], sizes = [16, 128], strides = [1, 1]} : vector<22x128xf32> to vector<16x128xf32>
    %871 = vector.broadcast %869 : f32 to vector<16x128xf32>
    %872 = arith.mulf %871, %870 : vector<16x128xf32>
    %873 = arith.addf %846, %872 : vector<16x128xf32>
    %c3_298 = arith.constant 3 : index
    %c5_299 = arith.constant 5 : index
    %874 = memref.load %arg1[%c3_298, %c5_299] : memref<4x49xf32, #tpu.memory_space<smem>>
    %875 = vector.extract_strided_slice %858 {offsets = [0, 0], sizes = [16, 128], strides = [1, 1]} : vector<22x128xf32> to vector<16x128xf32>
    %876 = vector.broadcast %874 : f32 to vector<16x128xf32>
    %877 = arith.mulf %876, %875 : vector<16x128xf32>
    %878 = arith.addf %873, %877 : vector<16x128xf32>
    %c0_300 = arith.constant 0 : index
    %c12 = arith.constant 12 : index
    %879 = memref.load %arg1[%c0_300, %c12] : memref<4x49xf32, #tpu.memory_space<smem>>
    %880 = vector.extract_strided_slice %849 {offsets = [1, 0], sizes = [16, 128], strides = [1, 1]} : vector<22x128xf32> to vector<16x128xf32>
    %881 = vector.broadcast %879 : f32 to vector<16x128xf32>
    %882 = arith.mulf %881, %880 : vector<16x128xf32>
    %883 = arith.addf %868, %882 : vector<16x128xf32>
    %c1_301 = arith.constant 1 : index
    %c12_302 = arith.constant 12 : index
    %884 = memref.load %arg1[%c1_301, %c12_302] : memref<4x49xf32, #tpu.memory_space<smem>>
    %885 = vector.extract_strided_slice %852 {offsets = [1, 0], sizes = [16, 128], strides = [1, 1]} : vector<22x128xf32> to vector<16x128xf32>
    %886 = vector.broadcast %884 : f32 to vector<16x128xf32>
    %887 = arith.mulf %886, %885 : vector<16x128xf32>
    %888 = arith.addf %883, %887 : vector<16x128xf32>
    %c2_303 = arith.constant 2 : index
    %c12_304 = arith.constant 12 : index
    %889 = memref.load %arg1[%c2_303, %c12_304] : memref<4x49xf32, #tpu.memory_space<smem>>
    %890 = vector.extract_strided_slice %855 {offsets = [1, 0], sizes = [16, 128], strides = [1, 1]} : vector<22x128xf32> to vector<16x128xf32>
    %891 = vector.broadcast %889 : f32 to vector<16x128xf32>
    %892 = arith.mulf %891, %890 : vector<16x128xf32>
    %893 = arith.addf %878, %892 : vector<16x128xf32>
    %c3_305 = arith.constant 3 : index
    %c12_306 = arith.constant 12 : index
    %894 = memref.load %arg1[%c3_305, %c12_306] : memref<4x49xf32, #tpu.memory_space<smem>>
    %895 = vector.extract_strided_slice %858 {offsets = [1, 0], sizes = [16, 128], strides = [1, 1]} : vector<22x128xf32> to vector<16x128xf32>
    %896 = vector.broadcast %894 : f32 to vector<16x128xf32>
    %897 = arith.mulf %896, %895 : vector<16x128xf32>
    %898 = arith.addf %893, %897 : vector<16x128xf32>
    %c0_307 = arith.constant 0 : index
    %c19 = arith.constant 19 : index
    %899 = memref.load %arg1[%c0_307, %c19] : memref<4x49xf32, #tpu.memory_space<smem>>
    %900 = vector.extract_strided_slice %849 {offsets = [2, 0], sizes = [16, 128], strides = [1, 1]} : vector<22x128xf32> to vector<16x128xf32>
    %901 = vector.broadcast %899 : f32 to vector<16x128xf32>
    %902 = arith.mulf %901, %900 : vector<16x128xf32>
    %903 = arith.addf %888, %902 : vector<16x128xf32>
    %c1_308 = arith.constant 1 : index
    %c19_309 = arith.constant 19 : index
    %904 = memref.load %arg1[%c1_308, %c19_309] : memref<4x49xf32, #tpu.memory_space<smem>>
    %905 = vector.extract_strided_slice %852 {offsets = [2, 0], sizes = [16, 128], strides = [1, 1]} : vector<22x128xf32> to vector<16x128xf32>
    %906 = vector.broadcast %904 : f32 to vector<16x128xf32>
    %907 = arith.mulf %906, %905 : vector<16x128xf32>
    %908 = arith.addf %903, %907 : vector<16x128xf32>
    %c2_310 = arith.constant 2 : index
    %c19_311 = arith.constant 19 : index
    %909 = memref.load %arg1[%c2_310, %c19_311] : memref<4x49xf32, #tpu.memory_space<smem>>
    %910 = vector.extract_strided_slice %855 {offsets = [2, 0], sizes = [16, 128], strides = [1, 1]} : vector<22x128xf32> to vector<16x128xf32>
    %911 = vector.broadcast %909 : f32 to vector<16x128xf32>
    %912 = arith.mulf %911, %910 : vector<16x128xf32>
    %913 = arith.addf %898, %912 : vector<16x128xf32>
    %c3_312 = arith.constant 3 : index
    %c19_313 = arith.constant 19 : index
    %914 = memref.load %arg1[%c3_312, %c19_313] : memref<4x49xf32, #tpu.memory_space<smem>>
    %915 = vector.extract_strided_slice %858 {offsets = [2, 0], sizes = [16, 128], strides = [1, 1]} : vector<22x128xf32> to vector<16x128xf32>
    %916 = vector.broadcast %914 : f32 to vector<16x128xf32>
    %917 = arith.mulf %916, %915 : vector<16x128xf32>
    %918 = arith.addf %913, %917 : vector<16x128xf32>
    %c0_314 = arith.constant 0 : index
    %c26 = arith.constant 26 : index
    %919 = memref.load %arg1[%c0_314, %c26] : memref<4x49xf32, #tpu.memory_space<smem>>
    %920 = vector.extract_strided_slice %849 {offsets = [3, 0], sizes = [16, 128], strides = [1, 1]} : vector<22x128xf32> to vector<16x128xf32>
    %921 = vector.broadcast %919 : f32 to vector<16x128xf32>
    %922 = arith.mulf %921, %920 : vector<16x128xf32>
    %923 = arith.addf %908, %922 : vector<16x128xf32>
    %c1_315 = arith.constant 1 : index
    %c26_316 = arith.constant 26 : index
    %924 = memref.load %arg1[%c1_315, %c26_316] : memref<4x49xf32, #tpu.memory_space<smem>>
    %925 = vector.extract_strided_slice %852 {offsets = [3, 0], sizes = [16, 128], strides = [1, 1]} : vector<22x128xf32> to vector<16x128xf32>
    %926 = vector.broadcast %924 : f32 to vector<16x128xf32>
    %927 = arith.mulf %926, %925 : vector<16x128xf32>
    %928 = arith.addf %923, %927 : vector<16x128xf32>
    %c2_317 = arith.constant 2 : index
    %c26_318 = arith.constant 26 : index
    %929 = memref.load %arg1[%c2_317, %c26_318] : memref<4x49xf32, #tpu.memory_space<smem>>
    %930 = vector.extract_strided_slice %855 {offsets = [3, 0], sizes = [16, 128], strides = [1, 1]} : vector<22x128xf32> to vector<16x128xf32>
    %931 = vector.broadcast %929 : f32 to vector<16x128xf32>
    %932 = arith.mulf %931, %930 : vector<16x128xf32>
    %933 = arith.addf %918, %932 : vector<16x128xf32>
    %c3_319 = arith.constant 3 : index
    %c26_320 = arith.constant 26 : index
    %934 = memref.load %arg1[%c3_319, %c26_320] : memref<4x49xf32, #tpu.memory_space<smem>>
    %935 = vector.extract_strided_slice %858 {offsets = [3, 0], sizes = [16, 128], strides = [1, 1]} : vector<22x128xf32> to vector<16x128xf32>
    %936 = vector.broadcast %934 : f32 to vector<16x128xf32>
    %937 = arith.mulf %936, %935 : vector<16x128xf32>
    %938 = arith.addf %933, %937 : vector<16x128xf32>
    %c0_321 = arith.constant 0 : index
    %c33 = arith.constant 33 : index
    %939 = memref.load %arg1[%c0_321, %c33] : memref<4x49xf32, #tpu.memory_space<smem>>
    %940 = vector.extract_strided_slice %849 {offsets = [4, 0], sizes = [16, 128], strides = [1, 1]} : vector<22x128xf32> to vector<16x128xf32>
    %941 = vector.broadcast %939 : f32 to vector<16x128xf32>
    %942 = arith.mulf %941, %940 : vector<16x128xf32>
    %943 = arith.addf %928, %942 : vector<16x128xf32>
    %c1_322 = arith.constant 1 : index
    %c33_323 = arith.constant 33 : index
    %944 = memref.load %arg1[%c1_322, %c33_323] : memref<4x49xf32, #tpu.memory_space<smem>>
    %945 = vector.extract_strided_slice %852 {offsets = [4, 0], sizes = [16, 128], strides = [1, 1]} : vector<22x128xf32> to vector<16x128xf32>
    %946 = vector.broadcast %944 : f32 to vector<16x128xf32>
    %947 = arith.mulf %946, %945 : vector<16x128xf32>
    %948 = arith.addf %943, %947 : vector<16x128xf32>
    %c2_324 = arith.constant 2 : index
    %c33_325 = arith.constant 33 : index
    %949 = memref.load %arg1[%c2_324, %c33_325] : memref<4x49xf32, #tpu.memory_space<smem>>
    %950 = vector.extract_strided_slice %855 {offsets = [4, 0], sizes = [16, 128], strides = [1, 1]} : vector<22x128xf32> to vector<16x128xf32>
    %951 = vector.broadcast %949 : f32 to vector<16x128xf32>
    %952 = arith.mulf %951, %950 : vector<16x128xf32>
    %953 = arith.addf %938, %952 : vector<16x128xf32>
    %c3_326 = arith.constant 3 : index
    %c33_327 = arith.constant 33 : index
    %954 = memref.load %arg1[%c3_326, %c33_327] : memref<4x49xf32, #tpu.memory_space<smem>>
    %955 = vector.extract_strided_slice %858 {offsets = [4, 0], sizes = [16, 128], strides = [1, 1]} : vector<22x128xf32> to vector<16x128xf32>
    %956 = vector.broadcast %954 : f32 to vector<16x128xf32>
    %957 = arith.mulf %956, %955 : vector<16x128xf32>
    %958 = arith.addf %953, %957 : vector<16x128xf32>
    %c0_328 = arith.constant 0 : index
    %c40 = arith.constant 40 : index
    %959 = memref.load %arg1[%c0_328, %c40] : memref<4x49xf32, #tpu.memory_space<smem>>
    %960 = vector.extract_strided_slice %849 {offsets = [5, 0], sizes = [16, 128], strides = [1, 1]} : vector<22x128xf32> to vector<16x128xf32>
    %961 = vector.broadcast %959 : f32 to vector<16x128xf32>
    %962 = arith.mulf %961, %960 : vector<16x128xf32>
    %963 = arith.addf %948, %962 : vector<16x128xf32>
    %c1_329 = arith.constant 1 : index
    %c40_330 = arith.constant 40 : index
    %964 = memref.load %arg1[%c1_329, %c40_330] : memref<4x49xf32, #tpu.memory_space<smem>>
    %965 = vector.extract_strided_slice %852 {offsets = [5, 0], sizes = [16, 128], strides = [1, 1]} : vector<22x128xf32> to vector<16x128xf32>
    %966 = vector.broadcast %964 : f32 to vector<16x128xf32>
    %967 = arith.mulf %966, %965 : vector<16x128xf32>
    %968 = arith.addf %963, %967 : vector<16x128xf32>
    %c2_331 = arith.constant 2 : index
    %c40_332 = arith.constant 40 : index
    %969 = memref.load %arg1[%c2_331, %c40_332] : memref<4x49xf32, #tpu.memory_space<smem>>
    %970 = vector.extract_strided_slice %855 {offsets = [5, 0], sizes = [16, 128], strides = [1, 1]} : vector<22x128xf32> to vector<16x128xf32>
    %971 = vector.broadcast %969 : f32 to vector<16x128xf32>
    %972 = arith.mulf %971, %970 : vector<16x128xf32>
    %973 = arith.addf %958, %972 : vector<16x128xf32>
    %c3_333 = arith.constant 3 : index
    %c40_334 = arith.constant 40 : index
    %974 = memref.load %arg1[%c3_333, %c40_334] : memref<4x49xf32, #tpu.memory_space<smem>>
    %975 = vector.extract_strided_slice %858 {offsets = [5, 0], sizes = [16, 128], strides = [1, 1]} : vector<22x128xf32> to vector<16x128xf32>
    %976 = vector.broadcast %974 : f32 to vector<16x128xf32>
    %977 = arith.mulf %976, %975 : vector<16x128xf32>
    %978 = arith.addf %973, %977 : vector<16x128xf32>
    %c0_335 = arith.constant 0 : index
    %c47 = arith.constant 47 : index
    %979 = memref.load %arg1[%c0_335, %c47] : memref<4x49xf32, #tpu.memory_space<smem>>
    %980 = vector.extract_strided_slice %849 {offsets = [6, 0], sizes = [16, 128], strides = [1, 1]} : vector<22x128xf32> to vector<16x128xf32>
    %981 = vector.broadcast %979 : f32 to vector<16x128xf32>
    %982 = arith.mulf %981, %980 : vector<16x128xf32>
    %983 = arith.addf %968, %982 : vector<16x128xf32>
    %c1_336 = arith.constant 1 : index
    %c47_337 = arith.constant 47 : index
    %984 = memref.load %arg1[%c1_336, %c47_337] : memref<4x49xf32, #tpu.memory_space<smem>>
    %985 = vector.extract_strided_slice %852 {offsets = [6, 0], sizes = [16, 128], strides = [1, 1]} : vector<22x128xf32> to vector<16x128xf32>
    %986 = vector.broadcast %984 : f32 to vector<16x128xf32>
    %987 = arith.mulf %986, %985 : vector<16x128xf32>
    %988 = arith.addf %983, %987 : vector<16x128xf32>
    %c2_338 = arith.constant 2 : index
    %c47_339 = arith.constant 47 : index
    %989 = memref.load %arg1[%c2_338, %c47_339] : memref<4x49xf32, #tpu.memory_space<smem>>
    %990 = vector.extract_strided_slice %855 {offsets = [6, 0], sizes = [16, 128], strides = [1, 1]} : vector<22x128xf32> to vector<16x128xf32>
    %991 = vector.broadcast %989 : f32 to vector<16x128xf32>
    %992 = arith.mulf %991, %990 : vector<16x128xf32>
    %993 = arith.addf %978, %992 : vector<16x128xf32>
    %c3_340 = arith.constant 3 : index
    %c47_341 = arith.constant 47 : index
    %994 = memref.load %arg1[%c3_340, %c47_341] : memref<4x49xf32, #tpu.memory_space<smem>>
    %995 = vector.extract_strided_slice %858 {offsets = [6, 0], sizes = [16, 128], strides = [1, 1]} : vector<22x128xf32> to vector<16x128xf32>
    %996 = vector.broadcast %994 : f32 to vector<16x128xf32>
    %997 = arith.mulf %996, %995 : vector<16x128xf32>
    %998 = arith.addf %993, %997 : vector<16x128xf32>
    %999 = vector.extract_strided_slice %81 {offsets = [0, 3], sizes = [22, 125], strides = [1, 1]} : vector<22x128xf32> to vector<22x125xf32>
    %cst_342 = arith.constant 0.000000e+00 : f32
    %1000 = vector.broadcast %cst_342 : f32 to vector<22x3xf32>
    %1001 = tpu.concatenate %999, %1000 in 1 : vector<22x125xf32>, vector<22x3xf32> -> vector<22x128xf32>
    %1002 = vector.extract_strided_slice %86 {offsets = [0, 3], sizes = [22, 125], strides = [1, 1]} : vector<22x128xf32> to vector<22x125xf32>
    %cst_343 = arith.constant 0.000000e+00 : f32
    %1003 = vector.broadcast %cst_343 : f32 to vector<22x3xf32>
    %1004 = tpu.concatenate %1002, %1003 in 1 : vector<22x125xf32>, vector<22x3xf32> -> vector<22x128xf32>
    %1005 = vector.extract_strided_slice %91 {offsets = [0, 3], sizes = [22, 125], strides = [1, 1]} : vector<22x128xf32> to vector<22x125xf32>
    %cst_344 = arith.constant 0.000000e+00 : f32
    %1006 = vector.broadcast %cst_344 : f32 to vector<22x3xf32>
    %1007 = tpu.concatenate %1005, %1006 in 1 : vector<22x125xf32>, vector<22x3xf32> -> vector<22x128xf32>
    %1008 = vector.extract_strided_slice %96 {offsets = [0, 3], sizes = [22, 125], strides = [1, 1]} : vector<22x128xf32> to vector<22x125xf32>
    %cst_345 = arith.constant 0.000000e+00 : f32
    %1009 = vector.broadcast %cst_345 : f32 to vector<22x3xf32>
    %1010 = tpu.concatenate %1008, %1009 in 1 : vector<22x125xf32>, vector<22x3xf32> -> vector<22x128xf32>
    %c0_346 = arith.constant 0 : index
    %c6 = arith.constant 6 : index
    %1011 = memref.load %arg1[%c0_346, %c6] : memref<4x49xf32, #tpu.memory_space<smem>>
    %1012 = vector.extract_strided_slice %1001 {offsets = [0, 0], sizes = [16, 128], strides = [1, 1]} : vector<22x128xf32> to vector<16x128xf32>
    %1013 = vector.broadcast %1011 : f32 to vector<16x128xf32>
    %1014 = arith.mulf %1013, %1012 : vector<16x128xf32>
    %1015 = arith.addf %988, %1014 : vector<16x128xf32>
    %c1_347 = arith.constant 1 : index
    %c6_348 = arith.constant 6 : index
    %1016 = memref.load %arg1[%c1_347, %c6_348] : memref<4x49xf32, #tpu.memory_space<smem>>
    %1017 = vector.extract_strided_slice %1004 {offsets = [0, 0], sizes = [16, 128], strides = [1, 1]} : vector<22x128xf32> to vector<16x128xf32>
    %1018 = vector.broadcast %1016 : f32 to vector<16x128xf32>
    %1019 = arith.mulf %1018, %1017 : vector<16x128xf32>
    %1020 = arith.addf %1015, %1019 : vector<16x128xf32>
    %c2_349 = arith.constant 2 : index
    %c6_350 = arith.constant 6 : index
    %1021 = memref.load %arg1[%c2_349, %c6_350] : memref<4x49xf32, #tpu.memory_space<smem>>
    %1022 = vector.extract_strided_slice %1007 {offsets = [0, 0], sizes = [16, 128], strides = [1, 1]} : vector<22x128xf32> to vector<16x128xf32>
    %1023 = vector.broadcast %1021 : f32 to vector<16x128xf32>
    %1024 = arith.mulf %1023, %1022 : vector<16x128xf32>
    %1025 = arith.addf %998, %1024 : vector<16x128xf32>
    %c3_351 = arith.constant 3 : index
    %c6_352 = arith.constant 6 : index
    %1026 = memref.load %arg1[%c3_351, %c6_352] : memref<4x49xf32, #tpu.memory_space<smem>>
    %1027 = vector.extract_strided_slice %1010 {offsets = [0, 0], sizes = [16, 128], strides = [1, 1]} : vector<22x128xf32> to vector<16x128xf32>
    %1028 = vector.broadcast %1026 : f32 to vector<16x128xf32>
    %1029 = arith.mulf %1028, %1027 : vector<16x128xf32>
    %1030 = arith.addf %1025, %1029 : vector<16x128xf32>
    %c0_353 = arith.constant 0 : index
    %c13 = arith.constant 13 : index
    %1031 = memref.load %arg1[%c0_353, %c13] : memref<4x49xf32, #tpu.memory_space<smem>>
    %1032 = vector.extract_strided_slice %1001 {offsets = [1, 0], sizes = [16, 128], strides = [1, 1]} : vector<22x128xf32> to vector<16x128xf32>
    %1033 = vector.broadcast %1031 : f32 to vector<16x128xf32>
    %1034 = arith.mulf %1033, %1032 : vector<16x128xf32>
    %1035 = arith.addf %1020, %1034 : vector<16x128xf32>
    %c1_354 = arith.constant 1 : index
    %c13_355 = arith.constant 13 : index
    %1036 = memref.load %arg1[%c1_354, %c13_355] : memref<4x49xf32, #tpu.memory_space<smem>>
    %1037 = vector.extract_strided_slice %1004 {offsets = [1, 0], sizes = [16, 128], strides = [1, 1]} : vector<22x128xf32> to vector<16x128xf32>
    %1038 = vector.broadcast %1036 : f32 to vector<16x128xf32>
    %1039 = arith.mulf %1038, %1037 : vector<16x128xf32>
    %1040 = arith.addf %1035, %1039 : vector<16x128xf32>
    %c2_356 = arith.constant 2 : index
    %c13_357 = arith.constant 13 : index
    %1041 = memref.load %arg1[%c2_356, %c13_357] : memref<4x49xf32, #tpu.memory_space<smem>>
    %1042 = vector.extract_strided_slice %1007 {offsets = [1, 0], sizes = [16, 128], strides = [1, 1]} : vector<22x128xf32> to vector<16x128xf32>
    %1043 = vector.broadcast %1041 : f32 to vector<16x128xf32>
    %1044 = arith.mulf %1043, %1042 : vector<16x128xf32>
    %1045 = arith.addf %1030, %1044 : vector<16x128xf32>
    %c3_358 = arith.constant 3 : index
    %c13_359 = arith.constant 13 : index
    %1046 = memref.load %arg1[%c3_358, %c13_359] : memref<4x49xf32, #tpu.memory_space<smem>>
    %1047 = vector.extract_strided_slice %1010 {offsets = [1, 0], sizes = [16, 128], strides = [1, 1]} : vector<22x128xf32> to vector<16x128xf32>
    %1048 = vector.broadcast %1046 : f32 to vector<16x128xf32>
    %1049 = arith.mulf %1048, %1047 : vector<16x128xf32>
    %1050 = arith.addf %1045, %1049 : vector<16x128xf32>
    %c0_360 = arith.constant 0 : index
    %c20 = arith.constant 20 : index
    %1051 = memref.load %arg1[%c0_360, %c20] : memref<4x49xf32, #tpu.memory_space<smem>>
    %1052 = vector.extract_strided_slice %1001 {offsets = [2, 0], sizes = [16, 128], strides = [1, 1]} : vector<22x128xf32> to vector<16x128xf32>
    %1053 = vector.broadcast %1051 : f32 to vector<16x128xf32>
    %1054 = arith.mulf %1053, %1052 : vector<16x128xf32>
    %1055 = arith.addf %1040, %1054 : vector<16x128xf32>
    %c1_361 = arith.constant 1 : index
    %c20_362 = arith.constant 20 : index
    %1056 = memref.load %arg1[%c1_361, %c20_362] : memref<4x49xf32, #tpu.memory_space<smem>>
    %1057 = vector.extract_strided_slice %1004 {offsets = [2, 0], sizes = [16, 128], strides = [1, 1]} : vector<22x128xf32> to vector<16x128xf32>
    %1058 = vector.broadcast %1056 : f32 to vector<16x128xf32>
    %1059 = arith.mulf %1058, %1057 : vector<16x128xf32>
    %1060 = arith.addf %1055, %1059 : vector<16x128xf32>
    %c2_363 = arith.constant 2 : index
    %c20_364 = arith.constant 20 : index
    %1061 = memref.load %arg1[%c2_363, %c20_364] : memref<4x49xf32, #tpu.memory_space<smem>>
    %1062 = vector.extract_strided_slice %1007 {offsets = [2, 0], sizes = [16, 128], strides = [1, 1]} : vector<22x128xf32> to vector<16x128xf32>
    %1063 = vector.broadcast %1061 : f32 to vector<16x128xf32>
    %1064 = arith.mulf %1063, %1062 : vector<16x128xf32>
    %1065 = arith.addf %1050, %1064 : vector<16x128xf32>
    %c3_365 = arith.constant 3 : index
    %c20_366 = arith.constant 20 : index
    %1066 = memref.load %arg1[%c3_365, %c20_366] : memref<4x49xf32, #tpu.memory_space<smem>>
    %1067 = vector.extract_strided_slice %1010 {offsets = [2, 0], sizes = [16, 128], strides = [1, 1]} : vector<22x128xf32> to vector<16x128xf32>
    %1068 = vector.broadcast %1066 : f32 to vector<16x128xf32>
    %1069 = arith.mulf %1068, %1067 : vector<16x128xf32>
    %1070 = arith.addf %1065, %1069 : vector<16x128xf32>
    %c0_367 = arith.constant 0 : index
    %c27 = arith.constant 27 : index
    %1071 = memref.load %arg1[%c0_367, %c27] : memref<4x49xf32, #tpu.memory_space<smem>>
    %1072 = vector.extract_strided_slice %1001 {offsets = [3, 0], sizes = [16, 128], strides = [1, 1]} : vector<22x128xf32> to vector<16x128xf32>
    %1073 = vector.broadcast %1071 : f32 to vector<16x128xf32>
    %1074 = arith.mulf %1073, %1072 : vector<16x128xf32>
    %1075 = arith.addf %1060, %1074 : vector<16x128xf32>
    %c1_368 = arith.constant 1 : index
    %c27_369 = arith.constant 27 : index
    %1076 = memref.load %arg1[%c1_368, %c27_369] : memref<4x49xf32, #tpu.memory_space<smem>>
    %1077 = vector.extract_strided_slice %1004 {offsets = [3, 0], sizes = [16, 128], strides = [1, 1]} : vector<22x128xf32> to vector<16x128xf32>
    %1078 = vector.broadcast %1076 : f32 to vector<16x128xf32>
    %1079 = arith.mulf %1078, %1077 : vector<16x128xf32>
    %1080 = arith.addf %1075, %1079 : vector<16x128xf32>
    %c2_370 = arith.constant 2 : index
    %c27_371 = arith.constant 27 : index
    %1081 = memref.load %arg1[%c2_370, %c27_371] : memref<4x49xf32, #tpu.memory_space<smem>>
    %1082 = vector.extract_strided_slice %1007 {offsets = [3, 0], sizes = [16, 128], strides = [1, 1]} : vector<22x128xf32> to vector<16x128xf32>
    %1083 = vector.broadcast %1081 : f32 to vector<16x128xf32>
    %1084 = arith.mulf %1083, %1082 : vector<16x128xf32>
    %1085 = arith.addf %1070, %1084 : vector<16x128xf32>
    %c3_372 = arith.constant 3 : index
    %c27_373 = arith.constant 27 : index
    %1086 = memref.load %arg1[%c3_372, %c27_373] : memref<4x49xf32, #tpu.memory_space<smem>>
    %1087 = vector.extract_strided_slice %1010 {offsets = [3, 0], sizes = [16, 128], strides = [1, 1]} : vector<22x128xf32> to vector<16x128xf32>
    %1088 = vector.broadcast %1086 : f32 to vector<16x128xf32>
    %1089 = arith.mulf %1088, %1087 : vector<16x128xf32>
    %1090 = arith.addf %1085, %1089 : vector<16x128xf32>
    %c0_374 = arith.constant 0 : index
    %c34 = arith.constant 34 : index
    %1091 = memref.load %arg1[%c0_374, %c34] : memref<4x49xf32, #tpu.memory_space<smem>>
    %1092 = vector.extract_strided_slice %1001 {offsets = [4, 0], sizes = [16, 128], strides = [1, 1]} : vector<22x128xf32> to vector<16x128xf32>
    %1093 = vector.broadcast %1091 : f32 to vector<16x128xf32>
    %1094 = arith.mulf %1093, %1092 : vector<16x128xf32>
    %1095 = arith.addf %1080, %1094 : vector<16x128xf32>
    %c1_375 = arith.constant 1 : index
    %c34_376 = arith.constant 34 : index
    %1096 = memref.load %arg1[%c1_375, %c34_376] : memref<4x49xf32, #tpu.memory_space<smem>>
    %1097 = vector.extract_strided_slice %1004 {offsets = [4, 0], sizes = [16, 128], strides = [1, 1]} : vector<22x128xf32> to vector<16x128xf32>
    %1098 = vector.broadcast %1096 : f32 to vector<16x128xf32>
    %1099 = arith.mulf %1098, %1097 : vector<16x128xf32>
    %1100 = arith.addf %1095, %1099 : vector<16x128xf32>
    %c2_377 = arith.constant 2 : index
    %c34_378 = arith.constant 34 : index
    %1101 = memref.load %arg1[%c2_377, %c34_378] : memref<4x49xf32, #tpu.memory_space<smem>>
    %1102 = vector.extract_strided_slice %1007 {offsets = [4, 0], sizes = [16, 128], strides = [1, 1]} : vector<22x128xf32> to vector<16x128xf32>
    %1103 = vector.broadcast %1101 : f32 to vector<16x128xf32>
    %1104 = arith.mulf %1103, %1102 : vector<16x128xf32>
    %1105 = arith.addf %1090, %1104 : vector<16x128xf32>
    %c3_379 = arith.constant 3 : index
    %c34_380 = arith.constant 34 : index
    %1106 = memref.load %arg1[%c3_379, %c34_380] : memref<4x49xf32, #tpu.memory_space<smem>>
    %1107 = vector.extract_strided_slice %1010 {offsets = [4, 0], sizes = [16, 128], strides = [1, 1]} : vector<22x128xf32> to vector<16x128xf32>
    %1108 = vector.broadcast %1106 : f32 to vector<16x128xf32>
    %1109 = arith.mulf %1108, %1107 : vector<16x128xf32>
    %1110 = arith.addf %1105, %1109 : vector<16x128xf32>
    %c0_381 = arith.constant 0 : index
    %c41 = arith.constant 41 : index
    %1111 = memref.load %arg1[%c0_381, %c41] : memref<4x49xf32, #tpu.memory_space<smem>>
    %1112 = vector.extract_strided_slice %1001 {offsets = [5, 0], sizes = [16, 128], strides = [1, 1]} : vector<22x128xf32> to vector<16x128xf32>
    %1113 = vector.broadcast %1111 : f32 to vector<16x128xf32>
    %1114 = arith.mulf %1113, %1112 : vector<16x128xf32>
    %1115 = arith.addf %1100, %1114 : vector<16x128xf32>
    %c1_382 = arith.constant 1 : index
    %c41_383 = arith.constant 41 : index
    %1116 = memref.load %arg1[%c1_382, %c41_383] : memref<4x49xf32, #tpu.memory_space<smem>>
    %1117 = vector.extract_strided_slice %1004 {offsets = [5, 0], sizes = [16, 128], strides = [1, 1]} : vector<22x128xf32> to vector<16x128xf32>
    %1118 = vector.broadcast %1116 : f32 to vector<16x128xf32>
    %1119 = arith.mulf %1118, %1117 : vector<16x128xf32>
    %1120 = arith.addf %1115, %1119 : vector<16x128xf32>
    %c2_384 = arith.constant 2 : index
    %c41_385 = arith.constant 41 : index
    %1121 = memref.load %arg1[%c2_384, %c41_385] : memref<4x49xf32, #tpu.memory_space<smem>>
    %1122 = vector.extract_strided_slice %1007 {offsets = [5, 0], sizes = [16, 128], strides = [1, 1]} : vector<22x128xf32> to vector<16x128xf32>
    %1123 = vector.broadcast %1121 : f32 to vector<16x128xf32>
    %1124 = arith.mulf %1123, %1122 : vector<16x128xf32>
    %1125 = arith.addf %1110, %1124 : vector<16x128xf32>
    %c3_386 = arith.constant 3 : index
    %c41_387 = arith.constant 41 : index
    %1126 = memref.load %arg1[%c3_386, %c41_387] : memref<4x49xf32, #tpu.memory_space<smem>>
    %1127 = vector.extract_strided_slice %1010 {offsets = [5, 0], sizes = [16, 128], strides = [1, 1]} : vector<22x128xf32> to vector<16x128xf32>
    %1128 = vector.broadcast %1126 : f32 to vector<16x128xf32>
    %1129 = arith.mulf %1128, %1127 : vector<16x128xf32>
    %1130 = arith.addf %1125, %1129 : vector<16x128xf32>
    %c0_388 = arith.constant 0 : index
    %c48 = arith.constant 48 : index
    %1131 = memref.load %arg1[%c0_388, %c48] : memref<4x49xf32, #tpu.memory_space<smem>>
    %1132 = vector.extract_strided_slice %1001 {offsets = [6, 0], sizes = [16, 128], strides = [1, 1]} : vector<22x128xf32> to vector<16x128xf32>
    %1133 = vector.broadcast %1131 : f32 to vector<16x128xf32>
    %1134 = arith.mulf %1133, %1132 : vector<16x128xf32>
    %1135 = arith.addf %1120, %1134 : vector<16x128xf32>
    %c1_389 = arith.constant 1 : index
    %c48_390 = arith.constant 48 : index
    %1136 = memref.load %arg1[%c1_389, %c48_390] : memref<4x49xf32, #tpu.memory_space<smem>>
    %1137 = vector.extract_strided_slice %1004 {offsets = [6, 0], sizes = [16, 128], strides = [1, 1]} : vector<22x128xf32> to vector<16x128xf32>
    %1138 = vector.broadcast %1136 : f32 to vector<16x128xf32>
    %1139 = arith.mulf %1138, %1137 : vector<16x128xf32>
    %1140 = arith.addf %1135, %1139 : vector<16x128xf32>
    %c2_391 = arith.constant 2 : index
    %c48_392 = arith.constant 48 : index
    %1141 = memref.load %arg1[%c2_391, %c48_392] : memref<4x49xf32, #tpu.memory_space<smem>>
    %1142 = vector.extract_strided_slice %1007 {offsets = [6, 0], sizes = [16, 128], strides = [1, 1]} : vector<22x128xf32> to vector<16x128xf32>
    %1143 = vector.broadcast %1141 : f32 to vector<16x128xf32>
    %1144 = arith.mulf %1143, %1142 : vector<16x128xf32>
    %1145 = arith.addf %1130, %1144 : vector<16x128xf32>
    %c3_393 = arith.constant 3 : index
    %c48_394 = arith.constant 48 : index
    %1146 = memref.load %arg1[%c3_393, %c48_394] : memref<4x49xf32, #tpu.memory_space<smem>>
    %1147 = vector.extract_strided_slice %1010 {offsets = [6, 0], sizes = [16, 128], strides = [1, 1]} : vector<22x128xf32> to vector<16x128xf32>
    %1148 = vector.broadcast %1146 : f32 to vector<16x128xf32>
    %1149 = arith.mulf %1148, %1147 : vector<16x128xf32>
    %1150 = arith.addf %1145, %1149 : vector<16x128xf32>
    %1151 = vector.extract_strided_slice %1140 {offsets = [0, 3], sizes = [16, 16], strides = [1, 1]} : vector<16x128xf32> to vector<16x16xf32>
    %1152 = vector.extract_strided_slice %1150 {offsets = [0, 3], sizes = [16, 16], strides = [1, 1]} : vector<16x128xf32> to vector<16x16xf32>
    %cst_395 = arith.constant 0.000000e+00 : f32
    %1153 = vector.broadcast %cst_395 : f32 to vector<16x16xf32>
    %1154 = arith.subf %1153, %1151 : vector<16x16xf32>
    %1155 = math.exp %1154 : vector<16x16xf32>
    %cst_396 = arith.constant 1.000000e+00 : f32
    %1156 = vector.broadcast %cst_396 : f32 to vector<16x16xf32>
    %1157 = arith.addf %1156, %1155 : vector<16x16xf32>
    %cst_397 = arith.constant 1.000000e+00 : f32
    %1158 = vector.broadcast %cst_397 : f32 to vector<16x16xf32>
    %1159 = arith.divf %1158, %1157 : vector<16x16xf32>
    %cst_398 = arith.constant 0.000000e+00 : f32
    %1160 = vector.broadcast %cst_398 : f32 to vector<16x16xf32>
    %1161 = arith.subf %1160, %1152 : vector<16x16xf32>
    %1162 = math.exp %1161 : vector<16x16xf32>
    %cst_399 = arith.constant 1.000000e+00 : f32
    %1163 = vector.broadcast %cst_399 : f32 to vector<16x16xf32>
    %1164 = arith.addf %1163, %1162 : vector<16x16xf32>
    %cst_400 = arith.constant 1.000000e+00 : f32
    %1165 = vector.broadcast %cst_400 : f32 to vector<16x16xf32>
    %1166 = arith.divf %1165, %1164 : vector<16x16xf32>
    %1167 = arith.mulf %1159, %62 : vector<16x16xf32>
    %cst_401 = arith.constant 1.000000e+00 : f32
    %1168 = vector.broadcast %cst_401 : f32 to vector<16x16xf32>
    %1169 = arith.addf %1168, %1167 : vector<16x16xf32>
    %1170 = arith.mulf %1166, %64 : vector<16x16xf32>
    %1171 = arith.addf %1169, %1170 : vector<16x16xf32>
    %1172 = vector.extract_strided_slice %1171 {offsets = [0, 0], sizes = [1, 16], strides = [1, 1]} : vector<16x16xf32> to vector<1x16xf32>
    %1173 = vector.extract_strided_slice %1171 {offsets = [1, 0], sizes = [1, 16], strides = [1, 1]} : vector<16x16xf32> to vector<1x16xf32>
    %1174 = vector.extract_strided_slice %1171 {offsets = [2, 0], sizes = [1, 16], strides = [1, 1]} : vector<16x16xf32> to vector<1x16xf32>
    %1175 = vector.extract_strided_slice %1171 {offsets = [3, 0], sizes = [1, 16], strides = [1, 1]} : vector<16x16xf32> to vector<1x16xf32>
    %1176 = vector.extract_strided_slice %1171 {offsets = [4, 0], sizes = [1, 16], strides = [1, 1]} : vector<16x16xf32> to vector<1x16xf32>
    %1177 = vector.extract_strided_slice %1171 {offsets = [5, 0], sizes = [1, 16], strides = [1, 1]} : vector<16x16xf32> to vector<1x16xf32>
    %1178 = vector.extract_strided_slice %1171 {offsets = [6, 0], sizes = [1, 16], strides = [1, 1]} : vector<16x16xf32> to vector<1x16xf32>
    %1179 = vector.extract_strided_slice %1171 {offsets = [7, 0], sizes = [1, 16], strides = [1, 1]} : vector<16x16xf32> to vector<1x16xf32>
    %1180 = vector.extract_strided_slice %1171 {offsets = [8, 0], sizes = [1, 16], strides = [1, 1]} : vector<16x16xf32> to vector<1x16xf32>
    %1181 = vector.extract_strided_slice %1171 {offsets = [9, 0], sizes = [1, 16], strides = [1, 1]} : vector<16x16xf32> to vector<1x16xf32>
    %1182 = vector.extract_strided_slice %1171 {offsets = [10, 0], sizes = [1, 16], strides = [1, 1]} : vector<16x16xf32> to vector<1x16xf32>
    %1183 = vector.extract_strided_slice %1171 {offsets = [11, 0], sizes = [1, 16], strides = [1, 1]} : vector<16x16xf32> to vector<1x16xf32>
    %1184 = vector.extract_strided_slice %1171 {offsets = [12, 0], sizes = [1, 16], strides = [1, 1]} : vector<16x16xf32> to vector<1x16xf32>
    %1185 = vector.extract_strided_slice %1171 {offsets = [13, 0], sizes = [1, 16], strides = [1, 1]} : vector<16x16xf32> to vector<1x16xf32>
    %1186 = vector.extract_strided_slice %1171 {offsets = [14, 0], sizes = [1, 16], strides = [1, 1]} : vector<16x16xf32> to vector<1x16xf32>
    %1187 = vector.extract_strided_slice %1171 {offsets = [15, 0], sizes = [1, 16], strides = [1, 1]} : vector<16x16xf32> to vector<1x16xf32>
    %1188 = tpu.concatenate %1172, %1173, %1174, %1175, %1176, %1177, %1178, %1179, %1180, %1181, %1182, %1183, %1184, %1185, %1186, %1187 in 1 : vector<1x16xf32>, vector<1x16xf32>, vector<1x16xf32>, vector<1x16xf32>, vector<1x16xf32>, vector<1x16xf32>, vector<1x16xf32>, vector<1x16xf32>, vector<1x16xf32>, vector<1x16xf32>, vector<1x16xf32>, vector<1x16xf32>, vector<1x16xf32>, vector<1x16xf32>, vector<1x16xf32>, vector<1x16xf32> -> vector<1x256xf32>
    %c0_402 = arith.constant 0 : index
    %c0_403 = arith.constant 0 : index
    %c0_404 = arith.constant 0 : index
    %1189 = vector.load %arg2[%c0_402, %c0_403, %c0_404] : memref<1x4x256xf32, #tpu.memory_space<vmem>>, vector<1x4x256xf32>
    %1190 = vector.shape_cast %1189 : vector<1x4x256xf32> to vector<4x256xf32>
    %1191 = vector.broadcast %1188 : vector<1x256xf32> to vector<4x256xf32>
    %1192 = arith.mulf %1190, %1191 : vector<4x256xf32>
    %c0_405 = arith.constant 0 : index
    %c0_406 = arith.constant 0 : index
    %c0_407 = arith.constant 0 : index
    %1193 = vector.load %arg5[%c0_405, %c0_406, %c0_407] : memref<1x4x256xf32, #tpu.memory_space<vmem>>, vector<1x4x256xf32>
    %1194 = vector.shape_cast %1193 : vector<1x4x256xf32> to vector<4x256xf32>
    %1195 = vector.shape_cast %1192 : vector<4x256xf32> to vector<1x4x256xf32>
    tpu.vector_store %arg5[%c0_405, %c0_406, %c0_407], %1195 {strides = array<i32>} : memref<1x4x256xf32, #tpu.memory_space<vmem>>, vector<1x4x256xf32>,
    return
  }
  func.func @transform_0(%arg0: i32) -> (i32, i32) {
    %c0_i32 = arith.constant 0 : i32
    %c0_i32_0 = arith.constant 0 : i32
    %c0_i32_1 = arith.constant 0 : i32
    return %c0_i32, %c0_i32_0 : i32, i32
  }
  func.func @transform_1(%arg0: i32) -> (i32, i32, i32) {
    %c0_i32 = arith.constant 0 : i32
    %c0_i32_0 = arith.constant 0 : i32
    %c0_i32_1 = arith.constant 0 : i32
    return %arg0, %c0_i32, %c0_i32_0 : i32, i32, i32
  }
  func.func @transform_2(%arg0: i32) -> (i32, i32, i32) {
    %c0_i32 = arith.constant 0 : i32
    %c0_i32_0 = arith.constant 0 : i32
    %c0_i32_1 = arith.constant 0 : i32
    return %arg0, %c0_i32, %c0_i32_0 : i32, i32, i32
  }
  func.func @transform_3(%arg0: i32) -> (i32, i32, i32) {
    %c0_i32 = arith.constant 0 : i32
    %c0_i32_0 = arith.constant 0 : i32
    %c0_i32_1 = arith.constant 0 : i32
    return %arg0, %c0_i32, %c0_i32_0 : i32, i32, i32
  }
  func.func @transform_4(%arg0: i32) -> (i32, i32, i32) {
    %c0_i32 = arith.constant 0 : i32
    %c0_i32_0 = arith.constant 0 : i32
    %c0_i32_1 = arith.constant 0 : i32
    return %arg0, %c0_i32, %c0_i32_0 : i32, i32, i32
  }
}

</mosaic_0001>

<bundles_post_ra>
// kernel: tpu_custom_call.1
= control target key start
LH: loop header
LB: loop body
LE: loop exit
PB: predicated region body
PF: predicated region fallthrough
CT: control target
= control target key end

     0   :  { %s8843_s0 = inlined_call_operand.hbm [shape: f32[4,49], index: 0, kind: input, shape index: {}]   ;;  %s8844_s1 = inlined_call_operand.hbm [shape: f32[2,4,256], index: 1, kind: input, shape index: {}]   ;;  %s8845_s2 = inlined_call_operand.hbm [shape: f32[2,16,16], index: 2, kind: input, shape index: {}]   ;;  %s8846_s3 = inlined_call_operand.hbm [shape: f32[2,16,16], index: 3, kind: input, shape index: {}]   ;;  %s8847_s4 = inlined_call_operand.hbm [shape: f32[2,4,256], index: 4, kind: output, shape index: {}]  }
   0x1   :  { %8936 = sst [smem:[#allocation133_spill]] %s8843_s0 }
   0x2   :  { %8937 = sst [smem:[#allocation134_spill]] %s8844_s1 }
   0x3   :  { %8938 = sst [smem:[#allocation135_spill]] %s8845_s2 }
   0x4   :  { %8939 = sst [smem:[#allocation136_spill]] %s8846_s3 }
   0x5   :  { %8940 = sst [smem:[#allocation137_spill]] %s8847_s4 }
   0x6   :  { %9 = vsyncpa [#allocation5], 0 }
   0x7   :  { %10 = vsyncpa [#allocation3], 0 }
   0x8   :  { %12 = vsyncpa [#allocation3 + $0x1], 0 }
   0x9   :  { %13 = vsyncpa [#allocation8], 0 }
   0xa   :  { %15 = vsyncpa [#allocation8 + $0x1], 0 }
   0xb   :  { %16 = vsyncpa [#allocation4], 0 }
   0xc   :  { %18 = vsyncpa [#allocation4 + $0x1], 0  ;;  %s4823_s15 = smov 0   ;;  %s4825_s16 = smov 0  }
   0xd   :  { %s4827_s17 = smov 0   ;;  %s4829_s18 = smov 0  }
   0xe LB: > { %8941 = sst [smem:[#allocation15_spill]] %s4757_s15  ;;  %s4844_s19 = sadd.s32 1, %s4769_s18   ;;  %s4769_s18 = sphi %s4829_s18, %s9330_s18   ;;  %s4765_s17 = sphi %s4827_s17, %s9333_s17   ;;  %s4761_s16 = sphi %s4825_s16, %s9332_s16   ;;  %s4757_s15 = sphi %s4823_s15, %s9331_s15  }
   0xf   : > { %8942 = sst [smem:[#allocation16_spill]] %s4761_s16  ;;  %s52_s20 = sadd.s32 1, %s4765_s17 }
  0x10   : > { %8943 = sst [smem:[#allocation17_spill]] %s4765_s17  ;;  %s49_s21 = ssub.s32 %s4769_s18, %s4844_s19 }
  0x11   : > { %8944 = sst [smem:[#allocation18_spill]] %s4769_s18  ;;  %p8848_p0 = scmp.ne.s32.totalorder %s4765_s17, %s4761_s16 }
  0x12   : > { %8945 = sst [smem:[#allocation19_spill]] %s4844_s19  ;;  %p50_p1 = scmp.eq.s32.totalorder %s49_s21, 0 }
  0x13   : > { %p60_p2 = scmp.eq.s32.totalorder %s4769_s18, 0  ;;  %p4512_p4 = scmp.lt.s32.totalorder %s4769_s18, 2 }
  0x14   : > { %s4855_s22 = scalar_select %p50_p1, %s4765_s17, %s52_s20  }
  0x15   : > { %p61_p5 = por %p60_p2, %p8848_p0  ;;  %s4861_s23 = sand.u32 1, %s4765_s17  }
  0x16   : > { %8946 = sst [smem:[#allocation20_spill]] %s4855_s22  ;;  %s195_s24 = sand.u32 1, %s4769_s18  }
  0x17   : > { %s4265_s25 = sshll.u32 %s4861_s23, 4  ;;  %p4865_p6 = pnand %p4512_p4, %p61_p5 }
  0x18   : > { %s4478_s27 = sshll.u32 %s4769_s18, 8  ;;  %s8948_s2 = sld [smem:[#allocation135_spill]] }
  0x19   : > { %s8947_s26 = scalar_select %p4865_p6, 1, 0 }
  0x1a   : > { %s199_s5 = scalar_lea.vmem [#allocation7], %s4265_s25  ;;  %s4881_s7 = scalar_lea.sflag [#allocation8], %s195_s24 }
  0x1b   : > { %s206_s6 = sshll.u32 %s199_s5, 4  ;;  %p4887_p8 = pneg %p4865_p6  ;;  %s4879_s6 = int_to_ptr.vmem [resolvable:$true] %s206_s6 }
  0x1e   : > { %s4875_s30 = scalar_lea.hbm %s8948_s2, %s4478_s27  ;;  %s4597_s12 = scalar_lea.hbm %s8948_s2, 512 }
  0x1f   : > { %s4592_s8 = scalar_lea.hbm %s4875_s30, 256  ;;  %p4598_p11 = scmp.lt.u32.totalorder %s4875_s30, %s8948_s2 }
  0x20   : > { %p4593_p7 = scmp.ne.s32.totalorder %s4875_s30, %s4592_s8  ;;  %p4599_p12 = scmp.lt.u32.totalorder %s4597_s12, %s4592_s8 }
  0x21   : > { %p4601_p1 = scmp.lt.u32.totalorder %s4592_s8, %s4875_s30 }
  0x22   : > { %p4595_p9 = pnand %p4887_p8, %p4593_p7  ;;  %p4600_p13 = por %p4599_p12, %p4598_p11 }
  0x24   : > { %p4596_p10 = pneg %p4595_p9  ;;  %p4602_p2 = por %p4601_p1, %p4600_p13 }
  0x26   : > { %p4603_p4 = pnand %p4602_p2, %p4596_p10 }
  0x28   : > { %4606 = shalt.err (!%p4603_p4)
}
  0x29   : > { %s4607_s20 = scalar_lea.vmem %s4879_s6, 256  ;;  %s4771_s21 = smov [#allocation7]  }
  0x2a   : > { %p4608_p5 = scmp.ne.s32.totalorder %s4879_s6, %s4607_s20  ;;  %s4612_s24 = sshll.u32 %s4771_s21, 4  ;;  %s4613_s24 = int_to_ptr.vmem [resolvable:$false] %s4612_s24 }
  0x2b   : > { %s4614_s28 = scalar_lea.vmem %s4613_s24, 512  ;;  %p4615_p3 = scmp.lt.s32.totalorder %s4879_s6, %s4613_s24 }
  0x2c   : > { %p4610_p7 = pnand %p4608_p5, %p4887_p8  ;;  %p4616_p0 = scmp.lt.s32.totalorder %s4614_s28, %s4607_s20 }
  0x2e   : > { %p4611_p9 = pneg %p4610_p7  ;;  %p4617_p11 = por %p4616_p0, %p4615_p3 }
  0x30   : > { %p4618_p12 = pnand %p4617_p11, %p4611_p9 }
  0x32   : > { %4621 = shalt.err (!%p4618_p12)
}
  0x33   : > { %s8849_s29 = smov 128   ;;  %s8850_s5 = smov 8  }
  0x34   : > { %4503 = dma.hbm_to_vmem [thread:$0]  (!%p4865_p6), %s4875_s30, 256, %s4879_s6, %s4881_s7, %s8849_s29, %s8849_s29, %s8850_s5  }
  0x35   : > { %s8950_s3 = sld [smem:[#allocation136_spill]]  ;;  %s220_s12 = scalar_lea.vmem [#allocation9], %s4265_s25 }
  0x36   : > { %s227_s13 = sshll.u32 %s220_s12, 4  ;;  %s4924_s14 = sadd.s32 4294967295, %s4769_s18   ;;  %s4950_s13 = int_to_ptr.vmem [resolvable:$true] %s227_s13 }
  0x37   : > { %8951 = sst [smem:[#allocation21_spill]] %s4924_s14  ;;  %s4258_s20 = sadd.s32 4294967294, %s4769_s18  }
  0x38   : > { %p65_p0 = scmp.ne.s32.totalorder %s4761_s16, %s4757_s15  ;;  %p8852_p3 = scmp.eq.s32.totalorder %s4924_s14, 0 }
  0x39   : > { %p141_p10 = scmp.eq.s32.totalorder %s4924_s14, 1  ;;  %p147_p13 = scmp.eq.s32.totalorder %s4258_s20, 1 }
  0x3a   : > { %p4933_p1 = por %p8852_p3, %p65_p0  ;;  %p4259_p2 = scmp.ge.s32.totalorder %s4769_s18, 1 }
  0x3b   : > { %s4919_s11 = scalar_lea.hbm %s8950_s3, %s4478_s27  ;;  %p8953_p4 = scmp.ne.s32.totalorder %s4765_s17, %s4761_s16 }
  0x3c   : > { %s8952_s27 = scalar_select %p4933_p1, 1, 0 }
  0x3d   : > { %p4941_p5 = por %p141_p10, %p8953_p4  ;;  %p4945_p7 = por %p147_p13, %p65_p0 }
  0x3e   : > { %p154_p9 = scmp.lt.s32.totalorder %s4769_s18, 3  ;;  %s4262_s21 = sshll.u32 %s4861_s23, 3 }
  0x3f   : > { %s8954_s25 = scalar_select %p4941_p5, 1, 0 }
  0x40   : > { %s8956_s30 = scalar_select %p4945_p7, 1, 0 }
  0x41   : > { %8955 = sst [smem:[#allocation22_spill]] %s8954_s25  ;;  %p4952_p11 = pnand %p4259_p2, %p154_p9 }
  0x42   : > { %8957 = sst [smem:[#allocation23_spill]] %s8956_s30  ;;  %s4477_s24 = sshll.u32 %s4769_s18, 7 }
  0x43   : > { %s8958_s6 = scalar_select %p4952_p11, 1, 0 }
  0x44   : > { %p4493_p12 = pneg %p4952_p11  ;;  %s8959_s1 = sld [smem:[#allocation134_spill]] }
  0x45   : > { %s180_s12 = scalar_lea.vmem [#allocation6], %s4262_s21  ;;  %s177_s5 = scalar_lea.sflag [#allocation3], %s4861_s23 }
  0x46   : > { %s188_s20 = sshll.u32 %s180_s12, 4  ;;  %p4967_p0 = pnand %p4493_p12, %p8852_p3  ;;  %s189_s20 = int_to_ptr.vmem [resolvable:$true] %s188_s20 }
  0x48   : > { %s8960_s29 = scalar_select %p4967_p0, 1, 0 }
  0x4a   : > { %s4963_s10 = scalar_lea.hbm %s8959_s1, %s4477_s24  ;;  %s4627_s8 = scalar_lea.hbm %s8959_s1, 256 }
  0x4b   : > { %s4622_s2 = scalar_lea.hbm %s4963_s10, 128  ;;  %p4628_p4 = scmp.lt.u32.totalorder %s4963_s10, %s8959_s1 }
  0x4c   : > { %p4623_p10 = scmp.ne.s32.totalorder %s4963_s10, %s4622_s2  ;;  %p4629_p9 = scmp.lt.u32.totalorder %s4627_s8, %s4622_s2 }
  0x4d   : > { %p4631_p3 = scmp.lt.u32.totalorder %s4622_s2, %s4963_s10 }
  0x4e   : > { %p4625_p13 = pnand %p4623_p10, %p4887_p8  ;;  %p4630_p12 = por %p4629_p9, %p4628_p4 }
  0x50   : > { %p4626_p2 = pneg %p4625_p13  ;;  %p4632_p7 = por %p4631_p3, %p4630_p12 }
  0x52   : > { %p4633_p5 = pnand %p4632_p7, %p4626_p2 }
  0x54   : > { %4636 = shalt.err (!%p4633_p5)
}
  0x55   : > { %s4637_s23 = scalar_lea.vmem %s189_s20, 128  ;;  %s4774_s21 = smov [#allocation6]  }
  0x56   : > { %p4638_p1 = scmp.ne.s32.totalorder %s189_s20, %s4637_s23  ;;  %s4642_s12 = sshll.u32 %s4774_s21, 4  ;;  %s4643_s12 = int_to_ptr.vmem [resolvable:$false] %s4642_s12 }
  0x57   : > { %s4644_s24 = scalar_lea.vmem %s4643_s12, 256  ;;  %p4645_p11 = scmp.lt.s32.totalorder %s189_s20, %s4643_s12 }
  0x58   : > { %p4640_p10 = pnand %p4638_p1, %p4887_p8  ;;  %p4646_p0 = scmp.lt.s32.totalorder %s4644_s24, %s4637_s23 }
  0x5a   : > { %p4641_p13 = pneg %p4640_p10  ;;  %p4647_p6 = por %p4646_p0, %p4645_p11 }
  0x5c   : > { %p4648_p4 = pnand %p4647_p6, %p4641_p13 }
  0x5e   : > { %4651 = shalt.err (!%p4648_p4)
}
  0x5f   : > { %p8961_p9 = scmp.ne.s32.totalorder %s8947_s26, 0  ;;  %s8962_s0 = sld [smem:[#allocation133_spill]] }
  0x60   : > { %p8963_p1 = scmp.ne.s32.totalorder %s8960_s29, 0 }
  0x61   : > { %4500 = dma.hbm_to_vmem [thread:$0]  (!%p8961_p9), %s4963_s10, 128, %s189_s20, %s177_s5  }
  0x62   : > { %p4654_p5 = pneg %p8963_p1 }
  0x65   : > { %s4652_s22 = scalar_lea.hbm %s8962_s0, 64 }
  0x66   : > { %p4653_p3 = scmp.ne.s32.totalorder %s8962_s0, %s4652_s22  ;;  %p4659_p6 = scmp.lt.u32.totalorder %s4652_s22, %s8962_s0 }
  0x68   : > { %p4655_p7 = pnand %p4654_p5, %p4653_p3 }
  0x6a   : > { %p4656_p2 = pneg %p4655_p7 }
  0x6c   : > { %p4661_p11 = pnand %p4659_p6, %p4656_p2 }
  0x6e   : > { %4664 = shalt.err (!%p4661_p11)
}
  0x6f   : > { %s4775_s12 = smov [#allocation2]   ;;  %s4665_s20 = scalar_lea.hbm %s4919_s11, 256 }
  0x70   : > { %4496 = dma.hbm_to_smem (!%p8963_p1), %s8962_s0, 64, %s4775_s12, [#allocation5]  }
  0x71   : > { %p4666_p0 = scmp.ne.s32.totalorder %s4919_s11, %s4665_s20  ;;  %s4670_s17 = scalar_lea.hbm %s8950_s3, 512 }
  0x72   : > { %p4671_p13 = scmp.lt.u32.totalorder %s4919_s11, %s8950_s3  ;;  %p4672_p4 = scmp.lt.u32.totalorder %s4670_s17, %s4665_s20 }
  0x73   : > { %p4668_p12 = pnand %p4666_p0, %p4887_p8  ;;  %p4674_p5 = scmp.lt.u32.totalorder %s4665_s20, %s4919_s11 }
  0x74   : > { %p4673_p3 = por %p4672_p4, %p4671_p13 }
  0x75   : > { %p4669_p10 = pneg %p4668_p12 }
  0x76   : > { %p4675_p7 = por %p4674_p5, %p4673_p3 }
  0x78   : > { %p4676_p2 = pnand %p4675_p7, %p4669_p10 }
  0x7a   : > { %4679 = shalt.err (!%p4676_p2)
}
  0x7b   : > { %s4680_s28 = scalar_lea.vmem %s4950_s13, 256  ;;  %s4776_s8 = smov [#allocation9]  }
  0x7c   : > { %p4681_p1 = scmp.ne.s32.totalorder %s4950_s13, %s4680_s28  ;;  %s4685_s23 = sshll.u32 %s4776_s8, 4  ;;  %s4686_s23 = int_to_ptr.vmem [resolvable:$false] %s4685_s23 }
  0x7d   : > { %s4687_s21 = scalar_lea.vmem %s4686_s23, 512  ;;  %p4688_p0 = scmp.lt.s32.totalorder %s4950_s13, %s4686_s23 }
  0x7e   : > { %p4683_p6 = pnand %p4681_p1, %p4887_p8  ;;  %p4689_p12 = scmp.lt.s32.totalorder %s4687_s21, %s4680_s28 }
  0x80   : > { %p4684_p11 = pneg %p4683_p6  ;;  %p4690_p13 = por %p4689_p12, %p4688_p0 }
  0x82   : > { %p4691_p4 = pnand %p4690_p13, %p4684_p11 }
  0x84   : > { %4694 = shalt.err (!%p4691_p4)
}
  0x85   : > { %s8964_s12 = smov 8   ;;  %s8965_s5 = smov 128  }
  0x86   : > { %4506 = dma.hbm_to_vmem [thread:$0]  (!%p8961_p9), %s4919_s11, 256, %s4950_s13, %s4881_s7, %s8965_s5, %s8965_s5, %s8964_s12  }
  0x87   : > { %p8966_p8 = scmp.ne.s32.totalorder %s8958_s6, 0 }
  0x89   : > { %239 = sbr.rel (%p8966_p8) target bundleno = 1251 (0x4e3), region = 36 }
  0x90   : > { %p8967_p10 = scmp.eq.s32.totalorder %s4924_s14, 0 }
  0x92   : > { %4740 = dma.done.wait (%p8967_p10), [#allocation5], 64   ;;  %p8968_p3 = pmov %p8967_p10 }
  0x93   : > { %s5037_s9 = sand.u32 1, %s4761_s16   ;;  %p8971_p9 = scmp.ne.s32.totalorder %s8952_s27, 0 }
  0x94   : > { %4742 = vsyncadd (%p8968_p3), [#allocation5], 4294967232  ;;  %8969 = sst [smem:[#allocation24_spill]] %s5037_s9  ;;  %s8859_s26 = sshll.u32 %s5037_s9, 3 }
  0x95   : > { %s246_s10 = scalar_lea.sflag [#allocation3], %s5037_s9  ;;  %s5043_s7 = scalar_lea.vmem [#allocation6], %s8859_s26 }
  0x96   : > { %8970 = sst [smem:[#allocation25_spill]] %s5043_s7 }
  0x97   : > { %4744 = dma.done.wait (%p8971_p9), %s246_s10, 128  }
  0x98   : > { %4746 = vsyncadd (%p8971_p9), %s246_s10, 4294967168  ;;  %s254_s11 = sand.u32 1, %s4924_s14   ;;  %s4274_s13 = sshll.u32 %s5037_s9, 4 }
  0x99   : > { %s255_s6 = scalar_lea.sflag [#allocation8], %s254_s11  ;;  %s5051_s20 = scalar_lea.vmem [#allocation7], %s4274_s13 }
  0x9a   : > { %4748 = dma.done.wait (%p8971_p9), %s255_s6, 512  }
  0x9b   : > { %4750 = vsyncadd (%p8971_p9), %s255_s6, 4294966784  ;;  %s5057_s24 = scalar_lea.vmem [#allocation9], %s4274_s13 }
  0x9c   : > { %272 = sfence }
  0x9d   : > { %v303_v0 = vld [vmem:[%s5043_s7] sm:$0xff]  ;;  %vm307_vm0 = vcmask 1043456   ;;  %s4777_s27 = smov 112   ;;  %s4778_s2 = smov 96   ;;  %vm396_vm1 = vcmask 1040384   ;;  %vm398_vm2 = vcmask 1041408  }
  0x9e   : > { %v322_v1 = vsel %vm307_vm0, %v303_v0, inf  ;;  %v308_v2 = vsel %vm307_vm0, %v303_v0, -inf  ;;  %v305_v3 = vcombine.high %v303_v0, %v303_v0  ;;  %v336_v13 = vsel %vm307_vm0, %v303_v0, 0.0  ;;  %s4779_s17 = smov 80   ;;  %s4780_s22 = smov 64  }
  0x9f   : > { %v323_v4 = vrot.slane %v322_v1, 4  ;;  %v309_v5 = vrot.slane %v308_v2, 4  ;;  %v337_v23 = vrot.slane %v336_v13, 4  ;;  %s4781_s29 = smov 48   ;;  %s4782_s28 = smov 32   ;;  %vm400_vm3 = vcmask 1042432  }
  0xa0   : > { %v329_v6 = vsel %vm307_vm0, %v305_v3, inf  ;;  %v315_v7 = vsel %vm307_vm0, %v305_v3, -inf  ;;  %v343_v12 = vsel %vm307_vm0, %v305_v3, 0.0  ;;  %s4783_s8 = smov 16   ;;  %vm403_vm4 = vcmask 1044480   ;;  %s8860_s23 = smov 3  }
  0xa1   : > { %v324_v8 = vmin.f32 %v322_v1, %v323_v4  ;;  %v310_v9 = vmax.f32 %v308_v2, %v309_v5  ;;  %v330_v10 = vrot.slane %v329_v6, 4  ;;  %v316_v11 = vrot.slane %v315_v7, 4  ;;  %s4785_s21 = smov 2   ;;  %s5302_s12 = sld [smem:[#allocation2 + $0x3]] }
  0xa2   : > { %v344_v22 = vrot.slane %v343_v12, 4  ;;  %v338_v34 = vadd.f32 %v337_v23, %v336_v13  ;;  %vm405_vm5 = vcmask 1045504   ;;  %vm407_vm6 = vcmask 1046528   ;;  %s4364_s5 = sld [smem:[#allocation2 + $0xa]]  ;;  %s4368_s10 = sld [smem:[#allocation2 + $0x11]] }
  0xa3   : > { %v325_v14 = vrot.slane %v324_v8, 2  ;;  %v311_v15 = vrot.slane %v310_v9, 2  ;;  %v331_v16 = vmin.f32 %v329_v6, %v330_v10  ;;  %v317_v17 = vmax.f32 %v315_v7, %v316_v11  ;;  %s4372_s11 = sld [smem:[#allocation2 + $0x18]]  ;;  %s4280_s6 = sld [smem:[#allocation2 + $0x7]] }
  0xa4   : > { %v345_v33 = vadd.f32 %v344_v22, %v343_v12  ;;  %v339_v37 = vrot.slane %v338_v34, 2  ;;  %vm564_vm11 = vcmask 23552   ;;  %vm567_vm12 = vcmask 154624   ;;  %s5308_s13 = sld [smem:[#allocation2]]  ;;  %s5324_s26 = sld [smem:[#allocation2 + $0x83]] }
  0xa5   : > { %v326_v18 = vmin.f32 %v324_v8, %v325_v14  ;;  %v312_v19 = vmax.f32 %v310_v9, %v311_v15  ;;  %v332_v20 = vrot.slane %v331_v16, 2  ;;  %v318_v21 = vrot.slane %v317_v17, 2  ;;  %s5328_s0 = sld [smem:[#allocation2 + $0x115]]  ;;  %s5330_s1 = sld [smem:[#allocation2 + $0x11c]] }
  0xa6   : > { %v346_v36 = vrot.slane %v345_v33, 2  ;;  %v340_v39 = vadd.f32 %v339_v37, %v338_v34  ;;  %s5332_s3 = sld [smem:[#allocation2 + $0x123]]  ;;  %s5336_s16 = sld [smem:[#allocation2 + $0x12a]]  ;;  %vm1143_vm13 = vcmask 15360   ;;  %vm1624_vm14 = vcmask 7168  }
  0xa7   : > { %v327_v24 = vrot.slane %v326_v18, 1  ;;  %v313_v25 = vrot.slane %v312_v19, 1  ;;  %v333_v26 = vmin.f32 %v331_v16, %v332_v20  ;;  %v319_v27 = vmax.f32 %v317_v17, %v318_v21  ;;  %s5338_s19 = sld [smem:[#allocation2 + $0x8a]]  ;;  %s8868_s18 = smov 1  }
  0xa8   : > { %v347_v38 = vadd.f32 %v346_v36, %v345_v33  ;;  %v341_v41 = vrot.slane %v340_v39, 1  ;;  %s5342_s30 = sld [smem:[#allocation2 + $0x91]]  ;;  %s5344_s15 = sld [smem:[#allocation2 + $0x80]]  ;;  %vm2537_vm15 = vcmask 1039360  }
  0xa9   : > { %v5066_v28 = vmin.f32 %v326_v18, %v327_v24  ;;  %v5068_v29 = vmax.f32 %v312_v19, %v313_v25  ;;  %v334_v30 = vrot.slane %v333_v26, 1  ;;  %v320_v32 = vrot.slane %v319_v27, 1  ;;  %s5993_s4 = sld [smem:[#allocation2 + $0x10]]  ;;  %s5995_s25 = sld [smem:[#allocation2 + $0x17]] }
  0xaa   : > { %v348_v40 = vrot.slane %v347_v38, 1  ;;  %v342_v43 = vadd.f32 %v341_v41, %v340_v39  ;;  %s6014_s7 = sld [smem:[#allocation2 + $0x1e]]  ;;  %s6016_s9 = sld [smem:[#allocation2 + $0x25]] }
  0xab   : > { %417 = vrot.lane.b32.xlu1 %v5066_v28, %s4777_s27  ;;  %353 = vrot.lane.b32.xlu0 %v5068_v29, %s4777_s27  ;;  %v5074_v31 = vmin.f32 %v333_v26, %v334_v30  ;;  %v5080_v35 = vmax.f32 %v319_v27, %v320_v32  ;;  %s6037_s14 = sld [smem:[#allocation2 + $0x18f]] }
  0xac   : > { %v349_v42 = vadd.f32 %v348_v40, %v347_v38  ;;  %v5096_v45 = vmul.f32 0.25, %v342_v43  ;;  %v533_v38 = vld [vmem:[%s5051_s20 + $0x8] sm:$0xff]  ;;  %v532_v40 = vld [vmem:[%s5051_s20] sm:$0xff] }
  0xad   : > { %vm537_vm7 = vcmp.ge.f32.partialorder %v533_v38, 0.0  ;;  %vm536_vm8 = vcmp.ge.f32.partialorder %v532_v40, 0.0 }
  0xae   : > { %v5094_v44 = vmul.f32 0.25, %v349_v42 }
  0xaf   : > { %356 = vrot.lane.b32.xlu0 %v5068_v29, %s4778_s2  ;;  %439 = vrot.lane.b32.xlu1 %v5074_v31, %s4777_s27 }
  0xb3   : > { %420 = vrot.lane.b32.xlu0 %v5066_v28, %s4778_s2  ;;  %378 = vrot.lane.b32.xlu1 %v5080_v35, %s4778_s2 }
  0xb7   : > { %359 = vrot.lane.b32.xlu0 %v5068_v29, %s4779_s17  ;;  %442 = vrot.lane.b32.xlu1 %v5074_v31, %s4778_s2 }
  0xbb   : > { %381 = vrot.lane.b32.xlu1 %v5080_v35, %s4779_s17  ;;  %375 = vrot.lane.b32.xlu0 %v5080_v35, %s4777_s27 }
  0xbf   : > { %445 = vrot.lane.b32.xlu1 %v5074_v31, %s4779_s17  ;;  %423 = vrot.lane.b32.xlu0 %v5066_v28, %s4779_s17 }
  0xc3   : > { %497 = vrot.lane.b32.xlu1 %v5094_v44, %s4777_s27  ;;  %475 = vrot.lane.b32.xlu0 %v5096_v45, %s4777_s27  ;;  %s4284_s27 = sld [smem:[#allocation2 + $0xe]] }
  0xc7   : > { %384 = vrot.lane.b32.xlu1 %v5080_v35, %s4780_s22  ;;  %362 = vrot.lane.b32.xlu0 %v5068_v29, %s4780_s22 }
  0xcb   : > { %448 = vrot.lane.b32.xlu1 %v5074_v31, %s4780_s22  ;;  %426 = vrot.lane.b32.xlu0 %v5066_v28, %s4780_s22 }
  0xcf   : > { %500 = vrot.lane.b32.xlu1 %v5094_v44, %s4778_s2  ;;  %478 = vrot.lane.b32.xlu0 %v5096_v45, %s4778_s2  ;;  %s4288_s2 = sld [smem:[#allocation2 + $0x15]] }
  0xd3   : > { %387 = vrot.lane.b32.xlu1 %v5080_v35, %s4781_s29  ;;  %365 = vrot.lane.b32.xlu0 %v5068_v29, %s4781_s29 }
  0xd7   : > { %451 = vrot.lane.b32.xlu1 %v5074_v31, %s4781_s29  ;;  %429 = vrot.lane.b32.xlu0 %v5066_v28, %s4781_s29 }
  0xdb   : > { %503 = vrot.lane.b32.xlu1 %v5094_v44, %s4779_s17  ;;  %481 = vrot.lane.b32.xlu0 %v5096_v45, %s4779_s17  ;;  %s5310_s17 = sld [smem:[#allocation2 + $0x1c]] }
  0xdf   : > { %390 = vrot.lane.b32.xlu1 %v5080_v35, %s4782_s28  ;;  %368 = vrot.lane.b32.xlu0 %v5068_v29, %s4782_s28 }
  0xe3   : > { %454 = vrot.lane.b32.xlu1 %v5074_v31, %s4782_s28  ;;  %432 = vrot.lane.b32.xlu0 %v5066_v28, %s4782_s28 }
  0xe7   : > { %506 = vrot.lane.b32.xlu1 %v5094_v44, %s4780_s22  ;;  %484 = vrot.lane.b32.xlu0 %v5096_v45, %s4780_s22  ;;  %s5312_s22 = sld [smem:[#allocation2 + $0x23]] }
  0xeb   : > { %393 = vrot.lane.b32.xlu1 %v5080_v35, %s4783_s8  ;;  %371 = vrot.lane.b32.xlu0 %v5068_v29, %s4783_s8 }
  0xef   : > { %457 = vrot.lane.b32.xlu1 %v5074_v31, %s4783_s8  ;;  %435 = vrot.lane.b32.xlu0 %v5066_v28, %s4783_s8 }
  0xf3   : > { %509 = vrot.lane.b32.xlu1 %v5094_v44, %s4781_s29  ;;  %487 = vrot.lane.b32.xlu0 %v5096_v45, %s4781_s29  ;;  %s5316_s29 = sld [smem:[#allocation2 + $0x100]] }
  0xf7   : > { %512 = vrot.lane.b32.xlu1 %v5094_v44, %s4782_s28  ;;  %490 = vrot.lane.b32.xlu0 %v5096_v45, %s4782_s28  ;;  %s5318_s28 = sld [smem:[#allocation2 + $0x2a]] }
  0xfb   : > { %515 = vrot.lane.b32.xlu1 %v5094_v44, %s4783_s8  ;;  %493 = vrot.lane.b32.xlu0 %v5096_v45, %s4783_s8  ;;  %s5322_s8 = sld [smem:[#allocation2 + $0x107]] }
 0x11d   : > { %v418_v46 = vpop.permute.xlu1 %417  ;;  %v354_v47 = vpop.permute.xlu0 %353 }
 0x11e   : > { %v460_v16 = vsel %vm396_vm1, %v5066_v28, %v418_v46  ;;  %v397_v17 = vsel %vm396_vm1, %v5068_v29, %v354_v47 }
 0x121   : > { %v357_v48 = vpop.permute.xlu0 %356  ;;  %v440_v49 = vpop.permute.xlu1 %439 }
 0x122   : > { %v467_v18 = vsel %vm396_vm1, %v5074_v31, %v440_v49  ;;  %v399_v19 = vsel %vm398_vm2, %v397_v17, %v357_v48 }
 0x125   : > { %v421_v50 = vpop.permute.xlu0 %420  ;;  %v379_v51 = vpop.permute.xlu1 %378 }
 0x126   : > { %v461_v22 = vsel %vm398_vm2, %v460_v16, %v421_v50 }
 0x129   : > { %v360_v52 = vpop.permute.xlu0 %359  ;;  %v443_v53 = vpop.permute.xlu1 %442 }
 0x12a   : > { %v401_v20 = vsel %vm400_vm3, %v399_v19, %v360_v52  ;;  %v468_v23 = vsel %vm398_vm2, %v467_v18, %v443_v53 }
 0x12d   : > { %v382_v54 = vpop.permute.xlu1 %381  ;;  %v376_v55 = vpop.permute.xlu0 %375 }
 0x12e   : > { %v409_v12 = vsel %vm396_vm1, %v5080_v35, %v376_v55  ;;  %v534_v55 = vld [vmem:[%s5057_s24] sm:$0xff] }
 0x12f   : > { %v410_v13 = vsel %vm398_vm2, %v409_v12, %v379_v51  ;;  %vm546_vm10 = vcmp.ge.f32.partialorder %v534_v55, 0.0 }
 0x130   : > { %v411_v21 = vsel %vm400_vm3, %v410_v13, %v382_v54  ;;  %v535_v54 = vld [vmem:[%s5057_s24 + $0x8] sm:$0xff] }
 0x131   : > { %v446_v56 = vpop.permute.xlu1 %445  ;;  %v424_v57 = vpop.permute.xlu0 %423  ;;  %vm547_vm9 = vcmp.ge.f32.partialorder %v535_v54, 0.0 }
 0x132   : > { %v469_v28 = vsel %vm400_vm3, %v468_v23, %v446_v56  ;;  %v462_v29 = vsel %vm400_vm3, %v461_v22, %v424_v57 }
 0x135   : > { %v5132_v58 = vpop.permute.xlu1 %497  ;;  %v5134_v59 = vpop.permute.xlu0 %475 }
 0x139   : > { %v385_v60 = vpop.permute.xlu1 %384  ;;  %v363_v61 = vpop.permute.xlu0 %362 }
 0x13a   : > { %v412_v24 = vsel %vm307_vm0, %v411_v21, %v385_v60  ;;  %v402_v25 = vsel %vm307_vm0, %v401_v20, %v363_v61 }
 0x13d   : > { %v449_v62 = vpop.permute.xlu1 %448  ;;  %v427_v63 = vpop.permute.xlu0 %426 }
 0x13e   : > { %v470_v32 = vsel %vm307_vm0, %v469_v28, %v449_v62  ;;  %v463_v33 = vsel %vm307_vm0, %v462_v29, %v427_v63 }
 0x141   : > { %v5136_v0 = vpop.permute.xlu1 %500  ;;  %v5138_v1 = vpop.permute.xlu0 %478 }
 0x145   : > { %v388_v2 = vpop.permute.xlu1 %387  ;;  %v366_v3 = vpop.permute.xlu0 %365 }
 0x146   : > { %v413_v30 = vsel %vm403_vm4, %v412_v24, %v388_v2  ;;  %v404_v31 = vsel %vm403_vm4, %v402_v25, %v366_v3  ;;  %v525_v2 = vsel %vm396_vm1, %v5094_v44, %v5132_v58 }
 0x149   : > { %v452_v4 = vpop.permute.xlu1 %451  ;;  %v430_v5 = vpop.permute.xlu0 %429 }
 0x14a   : > { %v471_v36 = vsel %vm403_vm4, %v470_v32, %v452_v4  ;;  %v464_v37 = vsel %vm403_vm4, %v463_v33, %v430_v5  ;;  %v518_v5 = vsel %vm396_vm1, %v5096_v45, %v5134_v59  ;;  %vm3018_vm1 = vcmask 1031168  }
 0x14d   : > { %v5140_v6 = vpop.permute.xlu1 %503  ;;  %v5142_v7 = vpop.permute.xlu0 %481 }
 0x151   : > { %v391_v8 = vpop.permute.xlu1 %390  ;;  %v369_v9 = vpop.permute.xlu0 %368 }
 0x152   : > { %v414_v34 = vsel %vm405_vm5, %v413_v30, %v391_v8  ;;  %v406_v35 = vsel %vm405_vm5, %v404_v31, %v369_v9  ;;  %v526_v8 = vsel %vm398_vm2, %v525_v2, %v5136_v0  ;;  %v519_v9 = vsel %vm398_vm2, %v518_v5, %v5138_v1 }
 0x153   : > { %v527_v12 = vsel %vm400_vm3, %v526_v8, %v5140_v6  ;;  %v520_v13 = vsel %vm400_vm3, %v519_v9, %v5142_v7 }
 0x155   : > { %v455_v10 = vpop.permute.xlu1 %454  ;;  %v433_v11 = vpop.permute.xlu0 %432 }
 0x156   : > { %v472_v42 = vsel %vm405_vm5, %v471_v36, %v455_v10  ;;  %v465_v43 = vsel %vm405_vm5, %v464_v37, %v433_v11 }
 0x159   : > { %v5147_v14 = vpop.permute.xlu1 %506  ;;  %v5149_v15 = vpop.permute.xlu0 %484 }
 0x15a   : > { %v528_v45 = vsel %vm307_vm0, %v527_v12, %v5147_v14  ;;  %v521_v59 = vsel %vm307_vm0, %v520_v13, %v5149_v15  ;;  %v5350_v13 = vstv %s4280_s6  ;;  %s5388_s6 = sld [smem:[#allocation2 + $0x10a]] }
 0x15d   : > { %v394_v26 = vpop.permute.xlu1 %393  ;;  %v372_v27 = vpop.permute.xlu0 %371 }
 0x15e   : > { %v415_v39 = vsel %vm407_vm6, %v414_v34, %v394_v26  ;;  %v408_v41 = vsel %vm407_vm6, %v406_v35, %v372_v27 }
 0x15f   : > { %v539_v50 = vmul.f32 %v533_v38, %v415_v39  ;;  %v538_v51 = vmul.f32 %v532_v40, %v408_v41  ;;  %v549_v3 = vmul.f32 %v535_v54, %v415_v39  ;;  %v548_v4 = vmul.f32 %v534_v55, %v408_v41 }
 0x161   : > { %v458_v46 = vpop.permute.xlu1 %457  ;;  %v436_v47 = vpop.permute.xlu0 %435 }
 0x162   : > { %v473_v48 = vsel %vm407_vm6, %v472_v42, %v458_v46  ;;  %v466_v49 = vsel %vm407_vm6, %v465_v43, %v436_v47 }
 0x163   : > { %v541_v52 = vmul.f32 %v533_v38, %v473_v48  ;;  %v540_v53 = vmul.f32 %v532_v40, %v466_v49  ;;  %v551_v56 = vmul.f32 %v535_v54, %v473_v48  ;;  %v550_v57 = vmul.f32 %v534_v55, %v466_v49 }
 0x165   : > { %v510_v60 = vpop.permute.xlu1 %509  ;;  %v488_v61 = vpop.permute.xlu0 %487  ;;  %v543_v62 = vsel %vm537_vm7, %v539_v50, %v541_v52  ;;  %v542_v63 = vsel %vm536_vm8, %v538_v51, %v540_v53  ;;  %v553_v10 = vsel %vm547_vm9, %v549_v3, %v551_v56  ;;  %v552_v11 = vsel %vm546_vm10, %v548_v4, %v550_v57 }
 0x166   : > { %560 = vrot.lane.b32.xlu1 %v543_v62, %s8860_s23  ;;  %558 = vrot.lane.b32.xlu0 %v542_v63, %s8860_s23  ;;  %v529_v0 = vsel %vm403_vm4, %v528_v45, %v510_v60  ;;  %v522_v1 = vsel %vm403_vm4, %v521_v59, %v488_v61  ;;  %v5352_v45 = vstv %s4284_s27  ;;  %v5354_v59 = vstv %s4288_s2  ;;  %s5402_s27 = sld [smem:[#allocation2 + $0x103]]  ;;  %s5491_s2 = sld [smem:[#allocation2 + $0x11f]] }
 0x167   : > { %vm3499_vm7 = vcmask 1022976   ;;  %vm4095_vm8 = vcmask 916480  }
 0x169   : > { %v513_v44 = vpop.permute.xlu1 %512  ;;  %v491_v58 = vpop.permute.xlu0 %490 }
 0x16a   : > { %606 = vrot.lane.b32.xlu1 %v553_v10, %s8860_s23  ;;  %604 = vrot.lane.b32.xlu0 %v552_v11, %s8860_s23  ;;  %v530_v16 = vsel %vm405_vm5, %v529_v0, %v513_v44  ;;  %v523_v6 = vsel %vm405_vm5, %v522_v1, %v491_v58  ;;  %v2121_v44 = vstv %s4364_s5  ;;  %v2097_v58 = vstv %s5302_s12  ;;  %s5358_s5 = sld [smem:[#allocation2 + $0x87]]  ;;  %s5368_s12 = sld [smem:[#allocation2 + $0x8e]] }
 0x16b   : > { %v2189_v10 = vstv %s4368_s10  ;;  %v5347_v11 = vstv %s4372_s11  ;;  %v5363_v0 = vstv %s5310_s17  ;;  %v5366_v1 = vstv %s5312_s22  ;;  %s5370_s10 = sld [smem:[#allocation2 + $0x95]]  ;;  %s8973_s11 = smov 1  }
 0x16c   : > { %s5506_s17 = sld [smem:[#allocation2 + $0x198]]  ;;  %s5508_s22 = sld [smem:[#allocation2 + $0x126]] }
 0x16d   : > { %v516_v17 = vpop.permute.xlu1 %515  ;;  %v494_v7 = vpop.permute.xlu0 %493 }
 0x16e   : > { %v531_v18 = vsel %vm407_vm6, %v530_v16, %v516_v17  ;;  %v524_v19 = vsel %vm407_vm6, %v523_v6, %v494_v7  ;;  %v5377_v17 = vstv %s5318_s28  ;;  %s5517_s28 = sld [smem:[#allocation2 + $0x19f]] }
 0x16f   : > { %v545_v20 = vmul.f32 %v533_v38, %v531_v18  ;;  %v544_v21 = vmul.f32 %v532_v40, %v524_v19  ;;  %v555_v14 = vmul.f32 %v535_v54, %v531_v18  ;;  %v554_v15 = vmul.f32 %v534_v55, %v524_v19 }
 0x171   : > { %584 = vrot.lane.b32.xlu1 %v545_v20, %s8860_s23  ;;  %582 = vrot.lane.b32.xlu0 %v544_v21, %s8860_s23  ;;  %v5384_v21 = vstv %s5322_s8  ;;  %s5546_s8 = sld [smem:[#allocation2 + $0x187]] }
 0x172   : > { %8974 = vst [vmem:[#allocation27_spill] sm:$0xff] %v5384_v21 }
 0x175   : > { %628 = vrot.lane.b32.xlu1 %v555_v14, %s8860_s23  ;;  %626 = vrot.lane.b32.xlu0 %v554_v15, %s8860_s23  ;;  %v2103_v14 = vstv %s5324_s26  ;;  %s5410_s26 = sld [smem:[#allocation2 + $0x111]] }
 0x1d8   : > { %v561_v22 = vpop.permute.xlu1 %560  ;;  %v559_v23 = vpop.permute.xlu0 %558 }
 0x1d9   : > { %v565_v24 = vsel %vm564_vm11, 0.0, %v559_v23  ;;  %v566_v27 = vsel %vm564_vm11, 0.0, %v561_v22  ;;  %v5394_v23 = vstv %s5328_s0  ;;  %s5416_s0 = sld [smem:[#allocation2 + $0x9c]] }
 0x1da   : > { %v568_v25 = vsel %vm567_vm12, %v565_v24, 0.0  ;;  %v569_v32 = vsel %vm567_vm12, %v566_v27, 0.0  ;;  %8976 = vst [vmem:[#allocation29_spill] sm:$0xff] %v5394_v23  ;;  %v5397_v24 = vstv %s5330_s1  ;;  %s5430_s1 = sld [smem:[#allocation2 + $0x18a]] }
 0x1db   : > { %v572_v26 = vrot.slane %v568_v25, 5  ;;  %v573_v36 = vrot.slane %v569_v32, 5  ;;  %8977 = vst [vmem:[#allocation30_spill] sm:$0xff] %v5397_v24  ;;  %v5400_v25 = vstv %s5332_s3  ;;  %s5444_s3 = sld [smem:[#allocation2 + $0x191]] }
 0x1dc   : > { %v605_v28 = vpop.permute.xlu0 %604  ;;  %v607_v30 = vpop.permute.xlu1 %606  ;;  %8978 = vst [vmem:[#allocation31_spill] sm:$0xff] %v5400_v25 }
 0x1dd   : > { %v5220_v29 = vsel %vm400_vm3, 0.0, %v572_v26  ;;  %v610_v31 = vsel %vm564_vm11, 0.0, %v605_v28  ;;  %v611_v34 = vsel %vm564_vm11, 0.0, %v607_v30  ;;  %v5238_v46 = vsel %vm400_vm3, %v573_v36, 0.0 }
 0x1de   : > { %648 = vrot.lane.b32.xlu0 %v5220_v29, %s8860_s23  ;;  %v612_v33 = vsel %vm567_vm12, %v610_v31, 0.0  ;;  %v613_v38 = vsel %vm567_vm12, %v611_v34, 0.0  ;;  %8972 = vst [vmem:[#allocation26_spill] sm:$0xff] %v5238_v46  ;;  %v5268_v3 = vsel %vm400_vm3, %v572_v26, %v573_v36  ;;  %v2122_v16 = vmul.f32 %v2121_v44, %v5220_v29 }
 0x1df   : > { %v616_v35 = vrot.slane %v612_v33, 5  ;;  %v617_v47 = vrot.slane %v613_v38, 5  ;;  %v2123_v6 = vmul.f32 %v2121_v44, %v5268_v3  ;;  %v2124_v7 = vmul.f32 %v2121_v44, %v5238_v46 }
 0x1e0   : > { %v2190_v18 = vmul.f32 %v2189_v10, %v5220_v29  ;;  %v2191_v19 = vmul.f32 %v2189_v10, %v5268_v3  ;;  %v2192_v15 = vmul.f32 %v2189_v10, %v5238_v46  ;;  %v5407_v26 = vstv %s5336_s16  ;;  %s5468_s16 = sld [smem:[#allocation2 + $0x183]] }
 0x1e1   : > { %v5229_v37 = vsel %vm400_vm3, 0.0, %v616_v35  ;;  %v5251_v55 = vsel %vm400_vm3, %v617_v47, 0.0  ;;  %v5278_v5 = vsel %vm400_vm3, %v616_v35, %v617_v47  ;;  %8979 = vst [vmem:[#allocation32_spill] sm:$0xff] %v5407_v26  ;;  %v2128_v27 = vrot.slane %v2122_v16, 1 }
 0x1e2   : > { %676 = vrot.lane.b32.xlu0 %v5229_v37, %s8860_s23  ;;  %v2129_v28 = vrot.slane %v2123_v6, 1  ;;  %v2138_v30 = vstv %s5338_s19  ;;  %v2131_v31 = vrot.slane %v2124_v7, 1  ;;  %v2196_v32 = vrot.slane %v2190_v18, 2  ;;  %s5470_s19 = sld [smem:[#allocation2 + $0x118]] }
 0x1e3   : > { %v585_v39 = vpop.permute.xlu1 %584  ;;  %v583_v40 = vpop.permute.xlu0 %582  ;;  %v2197_v33 = vrot.slane %v2191_v19, 2  ;;  %v2206_v34 = vstv %s5342_s30  ;;  %v5419_v36 = vmul.f32 %v2097_v58, %v5220_v29  ;;  %v5422_v38 = vmul.f32 %v2097_v58, %v5268_v3  ;;  %s5474_s30 = sld [smem:[#allocation2 + $0x1]] }
 0x1e4   : > { %v589_v41 = vsel %vm564_vm11, 0.0, %v585_v39  ;;  %v588_v42 = vsel %vm564_vm11, 0.0, %v583_v40  ;;  %v2199_v39 = vrot.slane %v2192_v15, 2  ;;  %v5435_v47 = vstv %s5368_s12  ;;  %s5565_s12 = sld [smem:[#allocation2 + $0x1a6]] }
 0x1e5   : > { %v590_v43 = vsel %vm567_vm12, %v588_v42, 0.0  ;;  %v591_v49 = vsel %vm567_vm12, %v589_v41, 0.0  ;;  %8980 = vst [vmem:[#allocation33_spill] sm:$0xff] %v5419_v36  ;;  %8981 = vst [vmem:[#allocation34_spill] sm:$0xff] %v5422_v38  ;;  %v5426_v41 = vstv %s5358_s5  ;;  %v2260_v10 = vmul.f32 %v5347_v11, %v5238_v46  ;;  %s4787_s5 = smov 127  }
 0x1e6   : > { %v594_v48 = vrot.slane %v590_v43, 5  ;;  %652 = vrot.lane.b32.xlu0 %v5238_v46, %s8860_s23  ;;  %v595_v56 = vrot.slane %v591_v49, 5  ;;  %8982 = vst [vmem:[#allocation35_spill] sm:$0xff] %v5426_v41  ;;  %8983 = vst [vmem:[#allocation36_spill] sm:$0xff] %v5435_v47  ;;  %v5441_v49 = vsel %vm407_vm6, %v2128_v27, %v2129_v28  ;;  %v2109_v16 = vstv %s5402_s27  ;;  %s5611_s27 = sld [smem:[#allocation2 + $0x98]] }
 0x1e7   : > { %v629_v50 = vpop.permute.xlu1 %628  ;;  %v627_v51 = vpop.permute.xlu0 %626  ;;  %8985 = vst [vmem:[#allocation38_spill] sm:$0xff] %v5441_v49  ;;  %v2223_v19 = vstv %s5410_s26  ;;  %s5613_s26 = sld [smem:[#allocation2 + $0x9f]] }
 0x1e8   : > { %v5244_v52 = vsel %vm400_vm3, 0.0, %v594_v48  ;;  %v633_v53 = vsel %vm564_vm11, 0.0, %v629_v50  ;;  %v632_v54 = vsel %vm564_vm11, 0.0, %v627_v51  ;;  %v5261_v63 = vsel %vm400_vm3, %v594_v48, %v595_v56 }
 0x1e9   : > { %662 = vrot.lane.b32.xlu1 %v5244_v52, %s8860_s23  ;;  %v634_v57 = vsel %vm567_vm12, %v632_v54, 0.0  ;;  %v635_v60 = vsel %vm567_vm12, %v633_v53, 0.0  ;;  %v5285_v8 = vsel %vm400_vm3, %v595_v56, 0.0  ;;  %v2139_v42 = vmul.f32 %v2138_v30, %v5244_v52  ;;  %8989 = sst [smem:[#allocation42_spill]] %s5474_s30 }
 0x1ea   : > { %v638_v61 = vrot.slane %v634_v57, 5  ;;  %680 = vrot.lane.b32.xlu0 %v5251_v55, %s8860_s23  ;;  %v639_v2 = vrot.slane %v635_v60, 5  ;;  %v2140_v43 = vmul.f32 %v2138_v30, %v5261_v63  ;;  %v5438_v48 = vstv %s5370_s10  ;;  %s5577_s10 = sld [smem:[#allocation2 + $0x12d]]  ;;  %s6082_s30 = sld [smem:[#allocation2 + $0x1ab]] }
 0x1eb   : > { %8984 = vst [vmem:[#allocation37_spill] sm:$0xff] %v5438_v48  ;;  %v2141_v50 = vmul.f32 %v2138_v30, %v5285_v8  ;;  %v5449_v51 = vsel %vm407_vm6, %v2129_v28, %v2131_v31  ;;  %v5452_v53 = vsel %vm405_vm5, %v2196_v32, %v2197_v33  ;;  %v2207_v54 = vmul.f32 %v2206_v34, %v5244_v52 }
 0x1ec   : > { %v5258_v62 = vsel %vm400_vm3, 0.0, %v638_v61  ;;  %v5271_v4 = vsel %vm400_vm3, %v638_v61, %v639_v2  ;;  %v5292_v9 = vsel %vm400_vm3, %v639_v2, 0.0  ;;  %8986 = vst [vmem:[#allocation39_spill] sm:$0xff] %v5449_v51  ;;  %8987 = vst [vmem:[#allocation40_spill] sm:$0xff] %v5452_v53  ;;  %v2208_v56 = vmul.f32 %v2206_v34, %v5261_v63 }
 0x1ed   : > { %690 = vrot.lane.b32.xlu1 %v5258_v62, %s8860_s23  ;;  %v5457_v57 = vsel %vm405_vm5, %v2197_v33, %v2199_v39  ;;  %v2209_v60 = vmul.f32 %v2206_v34, %v5285_v8  ;;  %v5462_v61 = vmul.f32 %v5347_v11, %v5268_v3  ;;  %v2155_v2 = vstv %s5388_s6  ;;  %s5601_s6 = sld [smem:[#allocation2 + $0x1f]] }
 0x1ee   : > { %664 = vrot.lane.b32.xlu0 %v5261_v63, %s8860_s23  ;;  %8988 = vst [vmem:[#allocation41_spill] sm:$0xff] %v5457_v57  ;;  %v2145_v44 = vrot.slane %v2139_v42, 1  ;;  %v2146_v58 = vrot.slane %v2140_v43, 1  ;;  %v5479_v6 = vmul.f32 %v2103_v14, %v5244_v52  ;;  %v5482_v7 = vmul.f32 %v2103_v14, %v5261_v63 }
 0x1ef   : > { %v2148_v18 = vrot.slane %v2141_v50, 1  ;;  %v2213_v15 = vrot.slane %v2207_v54, 2  ;;  %v2214_v27 = vrot.slane %v2208_v56, 2  ;;  %v2156_v28 = vmul.f32 %v2155_v2, %v5229_v37 }
 0x1f0   : > { %8990 = vst [vmem:[#allocation43_spill] sm:$0xff] %v5479_v6  ;;  %8991 = vst [vmem:[#allocation44_spill] sm:$0xff] %v5482_v7  ;;  %v2157_v30 = vmul.f32 %v2155_v2, %v5278_v5  ;;  %v5494_v31 = vstv %s5416_s0  ;;  %v2216_v14 = vrot.slane %v2209_v60, 2  ;;  %v5497_v32 = vmul.f32 %v2109_v16, %v5229_v37  ;;  %s5615_s0 = sld [smem:[#allocation2 + $0x8]] }
 0x1f1   : > { %650 = vrot.lane.b32.xlu1 %v5268_v3, %s8860_s23  ;;  %8992 = vst [vmem:[#allocation45_spill] sm:$0xff] %v5494_v31  ;;  %v2158_v33 = vmul.f32 %v2155_v2, %v5251_v55  ;;  %v5501_v34 = vsel %vm407_vm6, %v2145_v44, %v2146_v58  ;;  %v2172_v39 = vstv %s5430_s1  ;;  %v2224_v42 = vmul.f32 %v2223_v19, %v5229_v37  ;;  %s5617_s1 = sld [smem:[#allocation2 + $0xf]] }
 0x1f2   : > { %692 = vrot.lane.b32.xlu0 %v5271_v4, %s8860_s23  ;;  %8993 = vst [vmem:[#allocation46_spill] sm:$0xff] %v5497_v32  ;;  %8994 = vst [vmem:[#allocation47_spill] sm:$0xff] %v5501_v34  ;;  %v2225_v43 = vmul.f32 %v2223_v19, %v5278_v5  ;;  %v5513_v50 = vsel %vm407_vm6, %v2146_v58, %v2148_v18  ;;  %v8870_v54 = vrot.slane %v5462_v61, 3  ;;  %v2267_v56 = vrot.slane %v2260_v10, 3 }
 0x1f3   : > { %8995 = vst [vmem:[#allocation48_spill] sm:$0xff] %v5513_v50  ;;  %v2240_v60 = vstv %s5444_s3  ;;  %v5522_v2 = vsel %vm405_vm5, %v2213_v15, %v2214_v27  ;;  %v2162_v44 = vrot.slane %v2156_v28, 1  ;;  %v2163_v40 = vrot.slane %v2157_v30, 1  ;;  %s5626_s3 = sld [smem:[#allocation2 + $0x16]] }
 0x1f4   : > { %8996 = vst [vmem:[#allocation49_spill] sm:$0xff] %v5522_v2  ;;  %v2226_v58 = vmul.f32 %v2223_v19, %v5251_v55  ;;  %v5526_v18 = vsel %vm405_vm5, %v2214_v27, %v2216_v14  ;;  %v5529_v10 = vmul.f32 %v2109_v16, %v5278_v5  ;;  %v2165_v35 = vrot.slane %v2158_v33, 1 }
 0x1f5   : > { %678 = vrot.lane.b32.xlu1 %v5278_v5, %s8860_s23  ;;  %8997 = vst [vmem:[#allocation50_spill] sm:$0xff] %v5526_v18  ;;  %v5532_v20 = vmul.f32 %v2172_v39, %v5292_v9  ;;  %v2230_v12 = vrot.slane %v2224_v42, 2  ;;  %v2231_v15 = vrot.slane %v2225_v43, 2  ;;  %v5535_v28 = vmul.f32 %v2240_v60, %v5292_v9 }
 0x1f6   : > { %1134 = vrot.lane.b32.xlu0 %v5220_v29, %s4785_s21  ;;  %8998 = vst [vmem:[#allocation51_spill] sm:$0xff] %v5529_v10  ;;  %v5538_v30 = vstv %s5470_s19  ;;  %v5551_v16 = vsel %vm403_vm4, %v8870_v54, %v2267_v56  ;;  %v5560_v42 = vsel %vm407_vm6, %v2162_v44, %v2163_v40  ;;  %v2233_v43 = vrot.slane %v2226_v58, 2  ;;  %s5628_s19 = sld [smem:[#allocation2 + $0x1d]] }
 0x1f7   : > { %9000 = vst [vmem:[#allocation53_spill] sm:$0xff] %v5551_v16  ;;  %9002 = vst [vmem:[#allocation55_spill] sm:$0xff] %v5560_v42  ;;  %v5563_v19 = vstv %s5491_s2  ;;  %v5568_v56 = vsel %vm407_vm6, %v2163_v40, %v2165_v35  ;;  %v5573_v14 = vmul.f32 %v5538_v30, %v5278_v5  ;;  %v2294_v10 = vmul.f32 %v5538_v30, %v5251_v55  ;;  %s5659_s2 = sld [smem:[#allocation2 + $0x18e]] }
 0x1f8   : > { %9003 = vst [vmem:[#allocation56_spill] sm:$0xff] %v5568_v56  ;;  %v5580_v44 = vsel %vm405_vm5, %v2230_v12, %v2231_v15  ;;  %v5584_v42 = vstv %s5506_s17  ;;  %v5587_v35 = vstv %s5508_s22  ;;  %v2173_v40 = vmul.f32 %v2172_v39, %v5258_v62  ;;  %s5677_s17 = sld [smem:[#allocation2 + $0x26]]  ;;  %s5681_s22 = sld [smem:[#allocation2 + $0x195]] }
 0x1f9   : > { %666 = vrot.lane.b32.xlu1 %v5285_v8, %s8860_s23  ;;  %9004 = vst [vmem:[#allocation57_spill] sm:$0xff] %v5580_v44  ;;  %v5594_v54 = vmul.f32 %v5563_v19, %v5278_v5  ;;  %v2362_v56 = vmul.f32 %v5563_v19, %v5251_v55  ;;  %v5599_v12 = vstv %s5517_s28  ;;  %v5606_v58 = vsel %vm405_vm5, %v2231_v15, %v2233_v43  ;;  %s5731_s28 = sld [smem:[#allocation2 + $0xa6]] }
 0x1fa   : > { %1138 = vrot.lane.b32.xlu0 %v5238_v46, %s4785_s21  ;;  %9005 = vst [vmem:[#allocation58_spill] sm:$0xff] %v5606_v58  ;;  %v2174_v44 = vmul.f32 %v2172_v39, %v5271_v4  ;;  %v2241_v32 = vmul.f32 %v2240_v60, %v5258_v62  ;;  %v2242_v2 = vmul.f32 %v2240_v60, %v5271_v4  ;;  %v2301_v34 = vrot.slane %v2294_v10, 3 }
 0x1fb   : > { %v5622_v15 = vmul.f32 %v5584_v42, %v5271_v4  ;;  %v2311_v39 = vmul.f32 %v5584_v42, %v5292_v9  ;;  %v5632_v60 = vmul.f32 %v5599_v12, %v5271_v4  ;;  %v2379_v43 = vmul.f32 %v5599_v12, %v5292_v9 }
 0x1fc   : > { %v5638_v10 = vmul.f32 %v5587_v35, %v5278_v5  ;;  %v2430_v53 = vmul.f32 %v5587_v35, %v5251_v55  ;;  %v5645_v58 = vstv %s5546_s8  ;;  %v2179_v16 = vrot.slane %v2173_v40, 1  ;;  %s5742_s8 = sld [smem:[#allocation2 + $0x1a3]] }
 0x1fd   : > { %694 = vrot.lane.b32.xlu1 %v5292_v9, %s8860_s23  ;;  %s5326_s23 = sld [smem:[#allocation2 + $0x10e]]  ;;  %9006 = vst [vmem:[#allocation59_spill] sm:$0xff] %v5645_v58  ;;  %v2369_v18 = vrot.slane %v2362_v56, 4  ;;  %v2180_v57 = vrot.slane %v2174_v44, 1  ;;  %v2247_v6 = vrot.slane %v2241_v32, 2  ;;  %v2248_v50 = vrot.slane %v2242_v2, 2 }
 0x1fe   : > { %1161 = vrot.lane.b32.xlu0 %v5278_v5, %s4785_s21  ;;  %v5655_v51 = vstv %s5565_s12  ;;  %v9007_v40 = vrot.slane %v5573_v14, 3  ;;  %v2318_v36 = vrot.slane %v2311_v39, 3  ;;  %v5668_v7 = vstv %s5577_s10  ;;  %s5763_s12 = sld [smem:[#allocation2 + $0x2d]] }
 0x1ff   : > { %v9009_v32 = vstv %s5468_s16  ;;  %v2386_v38 = vrot.slane %v2379_v43, 4  ;;  %v2437_v43 = vrot.slane %v2430_v53, 5  ;;  %v5695_v58 = vmul.f32 %v5655_v51, %v5271_v4  ;;  %s5715_s16 = sld [smem:[#allocation2 + $0x19c]]  ;;  %s5773_s10 = sld [smem:[#allocation2 + $0xad]] }
 0x200   : > { %v5664_v56 = vsel %vm403_vm4, %v9007_v40, %v2301_v34  ;;  %v5673_v44 = vmul.f32 %v9009_v32, %v5258_v62  ;;  %v9011_v34 = vmov %v9009_v32  ;;  %v9013_v40 = vrot.slane %v5594_v54, 4 }
 0x201   : > { %1136 = vrot.lane.b32.xlu1 %v5268_v3, %s4785_s21  ;;  %9008 = vst [vmem:[#allocation60_spill] sm:$0xff] %v5664_v56  ;;  %v5686_v39 = vmul.f32 %v9011_v34, %v5271_v4  ;;  %v5700_v2 = vsel %vm407_vm6, %v2179_v16, %v2180_v57  ;;  %v9016_v34 = vrot.slane %v5532_v20, 1  ;;  %v2447_v53 = vmul.f32 %v5655_v51, %v5292_v9 }
 0x202   : > { %1163 = vrot.lane.b32.xlu0 %v5251_v55, %s4785_s21  ;;  %9010 = vst [vmem:[#allocation61_spill] sm:$0xff] %v5673_v44  ;;  %v5691_v32 = vsel %vm307_vm0, %v9013_v40, %v2369_v18  ;;  %9015 = vst [vmem:[#allocation64_spill] sm:$0xff] %v5700_v2  ;;  %v5708_v18 = vsel %vm405_vm5, %v2247_v6, %v2248_v50  ;;  %v5713_v40 = vstv %s5615_s0  ;;  %v9020_v16 = vrot.slane %v5535_v28, 2  ;;  %s5898_s0 = sld [smem:[#allocation2 + $0x108]] }
 0x203   : > { %v5391_v22 = vstv %s5326_s23  ;;  %s5476_s23 = sld [smem:[#allocation2 + $0xa3]]  ;;  %9012 = vst [vmem:[#allocation62_spill] sm:$0xff] %v5686_v39  ;;  %9014 = vst [vmem:[#allocation63_spill] sm:$0xff] %v5691_v32  ;;  %v5705_v49 = vsel %vm407_vm6, %v2180_v57, %v9016_v34  ;;  %v9022_v20 = vrot.slane %v5622_v15, 3  ;;  %v5729_v6 = vmul.f32 %v5668_v7, %v5278_v5 }
 0x204   : > { %8975 = vst [vmem:[#allocation28_spill] sm:$0xff] %v5391_v22  ;;  %9017 = vst [vmem:[#allocation65_spill] sm:$0xff] %v5705_v49  ;;  %v5720_v32 = vsel %vm405_vm5, %v2248_v50, %v9020_v16  ;;  %v5734_v34 = vstv %s5617_s1  ;;  %v5737_v56 = vstv %s5626_s3  ;;  %v5740_v50 = vstv %s5628_s19  ;;  %s5905_s1 = sld [smem:[#allocation2 + $0x10f]]  ;;  %s5907_s3 = sld [smem:[#allocation2 + $0x116]] }
 0x205   : > { %1147 = vrot.lane.b32.xlu1 %v5244_v52, %s4785_s21  ;;  %9018 = vst [vmem:[#allocation66_spill] sm:$0xff] %v5708_v18  ;;  %9019 = vst [vmem:[#allocation67_spill] sm:$0xff] %v5713_v40  ;;  %v5725_v57 = vsel %vm403_vm4, %v9022_v20, %v2318_v36  ;;  %v9027_v36 = vrot.slane %v5632_v60, 4  ;;  %v9029_v16 = vrot.slane %v5638_v10, 5  ;;  %v5761_v18 = vstv %s5611_s27  ;;  %s5781_s27 = sld [smem:[#allocation2 + $0x1aa]]  ;;  %s5914_s19 = sld [smem:[#allocation2 + $0x11d]] }
 0x206   : > { %1149 = vrot.lane.b32.xlu0 %v5261_v63, %s4785_s21  ;;  %9021 = vst [vmem:[#allocation68_spill] sm:$0xff] %v5720_v32  ;;  %9023 = vst [vmem:[#allocation69_spill] sm:$0xff] %v5725_v57  ;;  %v2342_v49 = vstv %s5613_s26  ;;  %v5793_v39 = vmul.f32 %v5761_v18, %v5261_v63  ;;  %v2393_v44 = vstv %s5677_s17  ;;  %v2410_v48 = vstv %s5731_s28  ;;  %s5896_s26 = sld [smem:[#allocation2 + $0x101]]  ;;  %s5956_s28 = sld [smem:[#allocation2 + $0xa4]] }
 0x207   : > { %9024 = vst [vmem:[#allocation70_spill] sm:$0xff] %v5734_v34  ;;  %9025 = vst [vmem:[#allocation71_spill] sm:$0xff] %v5737_v56  ;;  %v5747_v28 = vsel %vm307_vm0, %v9027_v36, %v2386_v38  ;;  %v5754_v20 = vsel %vm400_vm3, %v9029_v16, %v2437_v43  ;;  %v2454_v36 = vrot.slane %v2447_v53, 5  ;;  %v2498_v43 = vmul.f32 %v5668_v7, %v5251_v55  ;;  %s5940_s17 = sld [smem:[#allocation2 + $0x181]] }
 0x208   : > { %9026 = vst [vmem:[#allocation72_spill] sm:$0xff] %v5740_v50  ;;  %9028 = vst [vmem:[#allocation73_spill] sm:$0xff] %v5747_v28  ;;  %v2325_v16 = vstv %s5601_s6  ;;  %v5799_v28 = vstv %s5681_s22  ;;  %v9035_v50 = vrot.slane %v5695_v58, 5  ;;  %v2345_v40 = vmul.f32 %v2342_v49, %v5285_v8  ;;  %s8902_s6 = smov 126   ;;  %s5942_s22 = sld [smem:[#allocation2 + $0x96]] }
 0x209   : > { %1159 = vrot.lane.b32.xlu1 %v5229_v37, %s4785_s21  ;;  %v5544_v27 = vstv %s5476_s23  ;;  %s5648_s23 = sld [smem:[#allocation2 + $0x1ad]]  ;;  %9030 = vst [vmem:[#allocation74_spill] sm:$0xff] %v5754_v20  ;;  %v5779_v20 = vstv %s5659_s2  ;;  %9034 = vst [vmem:[#allocation78_spill] sm:$0xff] %v5799_v28  ;;  %v2505_v34 = vrot.slane %v2498_v43, 6  ;;  %v5815_v28 = vmul.f32 %v2342_v49, %v5261_v63  ;;  %s5932_s2 = sld [smem:[#allocation2 + $0x8f]] }
 0x20a   : > { %1173 = vrot.lane.b32.xlu0 %v5271_v4, %s4785_s21  ;;  %8999 = vst [vmem:[#allocation52_spill] sm:$0xff] %v5544_v27  ;;  %9033 = vst [vmem:[#allocation77_spill] sm:$0xff] %v5779_v20  ;;  %v2277_v20 = vmul.f32 %v5761_v18, %v5285_v8  ;;  %v5812_v56 = vsel %vm400_vm3, %v9035_v50, %v2454_v36  ;;  %v5822_v27 = vmul.f32 %v2393_v44, %v5268_v3 }
 0x20b   : > { %9036 = vst [vmem:[#allocation79_spill] sm:$0xff] %v5812_v56  ;;  %v2396_v31 = vmul.f32 %v2393_v44, %v5238_v46  ;;  %v5827_v47 = vstv %s5742_s8  ;;  %v2461_v26 = vstv %s5763_s12  ;;  %v5839_v50 = vmul.f32 %v2410_v48, %v5261_v63  ;;  %s5963_s8 = sld [smem:[#allocation2 + $0x2]]  ;;  %s5965_s12 = sld [smem:[#allocation2 + $0xab]] }
 0x20c   : > { %9038 = vst [vmem:[#allocation81_spill] sm:$0xff] %v5827_v47  ;;  %v2284_v56 = vrot.slane %v2277_v20, 3  ;;  %v2352_v47 = vrot.slane %v2345_v40, 4  ;;  %v5843_v43 = vstv %s5781_s27  ;;  %v5858_v25 = vmul.f32 %v2461_v26, %v5268_v3  ;;  %9052 = sst [smem:[#allocation89_spill]] %s5896_s26  ;;  %s5979_s27 = sld [smem:[#allocation2 + $0x188]] }
 0x20d   : > { %1171 = vrot.lane.b32.xlu1 %v5258_v62, %s4785_s21  ;;  %9039 = vst [vmem:[#allocation82_spill] sm:$0xff] %v5843_v43  ;;  %v2403_v20 = vrot.slane %v2396_v31, 5  ;;  %v2464_v43 = vmul.f32 %v2461_v26, %v5238_v46  ;;  %v9044_v31 = vrot.slane %v5793_v39, 3  ;;  %v2326_v21 = vmul.f32 %v2325_v16, %v5220_v29  ;;  %s6057_s26 = sld [smem:[#allocation2 + $0x19d]] }
 0x20e   : > { %1615 = vrot.lane.b32.xlu0 %v5220_v29, %s8868_s18  ;;  %s5356_s18 = sld [smem:[#allocation2 + $0x180]] }
 0x20f   : > { %v5758_v32 = vstv %s5648_s23  ;;  %v5866_v24 = vsel %vm403_vm4, %v9044_v31, %v2284_v56  ;;  %v2418_v56 = vrot.slane %v5839_v50, 5  ;;  %v2258_v31 = vmul.f32 %v5347_v11, %v5220_v29  ;;  %s5916_s23 = sld [smem:[#allocation2 + $0x124]] }
 0x210   : > { %v5787_v2 = vmul.f32 %v5758_v32, %v5271_v4  ;;  %v2515_v53 = vmul.f32 %v5758_v32, %v5292_v9  ;;  %9045 = vst [vmem:[#allocation85_spill] sm:$0xff] %v5866_v24  ;;  %v2471_v11 = vrot.slane %v2464_v43, 6  ;;  %v2360_v43 = vmul.f32 %v5563_v19, %v5229_v37 }
 0x211   : > { %1151 = vrot.lane.b32.xlu1 %v5285_v8, %s4785_s21  ;;  %v2309_v19 = vmul.f32 %v5584_v42, %v5258_v62  ;;  %v9069_v50 = vrot.slane %v5573_v14, 3  ;;  %v9074_v14 = vrot.slane %v5638_v10, 5  ;;  %v9080_v10 = vrot.slane %v5622_v15, 3 }
 0x212   : > { %1619 = vrot.lane.b32.xlu0 %v5238_v46, %s8973_s11  ;;  %v2522_v36 = vrot.slane %v2515_v53, 6  ;;  %v2478_v53 = vstv %s5773_s10  ;;  %v9042_v22 = vrot.slane %v5787_v2, 6  ;;  %s5977_s10 = sld [smem:[#allocation2 + $0x9]] }
 0x214   : > { %v5855_v40 = vsel %vm398_vm2, %v9042_v22, %v2522_v36  ;;  %v5874_v22 = vmul.f32 %v2478_v53, %v5261_v63  ;;  %v2481_v36 = vmul.f32 %v2478_v53, %v5285_v8 }
 0x215   : > { %1175 = vrot.lane.b32.xlu1 %v5292_v9, %s4785_s21  ;;  %s5487_s21 = sld [smem:[#allocation2 + $0xaa]]  ;;  %9043 = vst [vmem:[#allocation84_spill] sm:$0xff] %v5855_v40  ;;  %v9048_v40 = vrot.slane %v5815_v28, 4 }
 0x216   : > { %1642 = vrot.lane.b32.xlu0 %v5278_v5, %s8973_s11 }
 0x219   : > { %1617 = vrot.lane.b32.xlu1 %v5268_v3, %s8973_s11 }
 0x21a   : > { %1644 = vrot.lane.b32.xlu0 %v5251_v55, %s8973_s11 }
 0x21b   : > { %v5557_v33 = vstv %s5487_s21  ;;  %s5652_s21 = sld [smem:[#allocation2 + $0x24]] }
 0x21c   : > { %9001 = vst [vmem:[#allocation54_spill] sm:$0xff] %v5557_v33  ;;  %v5819_v33 = vstv %s5715_s16  ;;  %s5954_s16 = sld [smem:[#allocation2 + $0x9d]] }
 0x21d   : > { %1628 = vrot.lane.b32.xlu1 %v5244_v52, %s8973_s11  ;;  %9037 = vst [vmem:[#allocation80_spill] sm:$0xff] %v5819_v33  ;;  %v2413_v33 = vmul.f32 %v2410_v48, %v5285_v8 }
 0x21e   : > { %1630 = vrot.lane.b32.xlu0 %v5261_v63, %s8973_s11 }
 0x21f   : > { %v2420_v24 = vrot.slane %v2413_v33, 5  ;;  %v2488_v33 = vrot.slane %v2481_v36, 6  ;;  %v2496_v36 = vmul.f32 %v5668_v7, %v5229_v37 }
 0x221   : > { %1640 = vrot.lane.b32.xlu1 %v5229_v37, %s8973_s11  ;;  %v5768_v38 = vstv %s5652_s21  ;;  %s5924_s21 = sld [smem:[#allocation2 + $0x81]] }
 0x222   : > { %1654 = vrot.lane.b32.xlu0 %v5271_v4, %s8973_s11  ;;  %9031 = vst [vmem:[#allocation75_spill] sm:$0xff] %v5768_v38  ;;  %v2328_v38 = vmul.f32 %v2325_v16, %v5238_v46 }
 0x224   : > { %v2335_v41 = vrot.slane %v2328_v38, 4  ;;  %v9040_v38 = vrot.slane %v5729_v6, 6 }
 0x225   : > { %1652 = vrot.lane.b32.xlu1 %v5258_v62, %s8973_s11 }
 0x226   : > { %2528 = vrot.lane.b32.xlu0 %v5220_v29, %s4787_s5  ;;  %v5850_v23 = vsel %vm398_vm2, %v9040_v38, %v2505_v34 }
 0x227   : > { %9041 = vst [vmem:[#allocation83_spill] sm:$0xff] %v5850_v23  ;;  %v5882_v23 = vsel %vm307_vm0, %v9048_v40, %v2352_v47  ;;  %v2469_v47 = vrot.slane %v5858_v25, 6  ;;  %v2394_v40 = vmul.f32 %v2393_v44, %v5220_v29  ;;  %v2264_v25 = vrot.slane %v2258_v31, 3 }
 0x228   : > { %9049 = vst [vmem:[#allocation87_spill] sm:$0xff] %v5882_v23  ;;  %v2292_v44 = vmul.f32 %v5538_v30, %v5229_v37  ;;  %v9117_v23 = vld [vmem:[#allocation32_spill] sm:$0xff] }
 0x229   : > { %1632 = vrot.lane.b32.xlu1 %v5285_v8, %s8973_s11  ;;  %v2400_v30 = vrot.slane %v2394_v40, 5 }
 0x22a   : > { %2532 = vrot.lane.b32.xlu0 %v5238_v46, %s4787_s5 }
 0x22d   : > { %1656 = vrot.lane.b32.xlu1 %v5292_v9, %s8973_s11  ;;  %s5657_s11 = sld [smem:[#allocation2 + $0x2b]] }
 0x22e   : > { %2555 = vrot.lane.b32.xlu0 %v5278_v5, %s4787_s5 }
 0x231   : > { %2530 = vrot.lane.b32.xlu1 %v5268_v3, %s4787_s5 }
 0x232   : > { %2557 = vrot.lane.b32.xlu0 %v5251_v55, %s4787_s5 }
 0x233   : > { %v5776_v57 = vstv %s5657_s11  ;;  %s5930_s11 = sld [smem:[#allocation2 + $0x88]] }
 0x234   : > { %9032 = vst [vmem:[#allocation76_spill] sm:$0xff] %v5776_v57  ;;  %v5804_v57 = vmul.f32 %v2325_v16, %v5268_v3  ;;  %v2462_v16 = vmul.f32 %v2461_v26, %v5220_v29  ;;  %v2332_v26 = vrot.slane %v2326_v21, 4  ;;  %v5950_v21 = vsel %vm398_vm2, %v2469_v47, %v2471_v11 }
 0x235   : > { %2541 = vrot.lane.b32.xlu1 %v5244_v52, %s4787_s5  ;;  %9054 = vst [vmem:[#allocation91_spill] sm:$0xff] %v5950_v21  ;;  %v9056_v11 = vrot.slane %v5462_v61, 3  ;;  %v9062_v61 = vrot.slane %v5815_v28, 4  ;;  %v9114_v21 = vld [vmem:[#allocation29_spill] sm:$0xff] }
 0x236   : > { %2543 = vrot.lane.b32.xlu0 %v5261_v63, %s4787_s5  ;;  %v9046_v34 = vrot.slane %v5804_v57, 4  ;;  %v2468_v7 = vrot.slane %v2462_v16, 6 }
 0x237   : > { %v5970_v40 = vsel %vm403_vm4, %v2264_v25, %v9056_v11 }
 0x238   : > { %v5871_v38 = vsel %vm307_vm0, %v9046_v34, %v2335_v41  ;;  %v2275_v41 = vmul.f32 %v5761_v18, %v5244_v52  ;;  %v9050_v34 = vrot.slane %v5822_v27, 5  ;;  %v2411_v18 = vmul.f32 %v2410_v48, %v5244_v52  ;;  %9057 = vst [vmem:[#allocation93_spill] sm:$0xff] %v5970_v40  ;;  %v9113_v40 = vld [vmem:[#allocation28_spill] sm:$0xff] }
 0x239   : > { %2553 = vrot.lane.b32.xlu1 %v5229_v37, %s4787_s5  ;;  %9047 = vst [vmem:[#allocation86_spill] sm:$0xff] %v5871_v38 }
 0x23a   : > { %2567 = vrot.lane.b32.xlu0 %v5271_v4, %s4787_s5  ;;  %v5892_v38 = vsel %vm400_vm3, %v9050_v34, %v2403_v20  ;;  %v2479_v20 = vmul.f32 %v2478_v53, %v5244_v52  ;;  %v2281_v48 = vrot.slane %v2275_v41, 3  ;;  %v2417_v31 = vrot.slane %v2411_v18, 5 }
 0x23b   : > { %9051 = vst [vmem:[#allocation88_spill] sm:$0xff] %v5892_v38  ;;  %v2377_v41 = vmul.f32 %v5599_v12, %v5258_v62  ;;  %v2298_v12 = vrot.slane %v2292_v44, 3  ;;  %v2366_v34 = vrot.slane %v2360_v43, 4  ;;  %v9058_v18 = vrot.slane %v5793_v39, 3 }
 0x23c   : > { %v2485_v42 = vrot.slane %v2479_v20, 6  ;;  %v2502_v20 = vrot.slane %v2496_v36, 6  ;;  %v2315_v39 = vrot.slane %v2309_v19, 3  ;;  %v6005_v28 = vsel %vm400_vm3, %v2417_v31, %v2418_v56 }
 0x23d   : > { %2565 = vrot.lane.b32.xlu1 %v5258_v62, %s4787_s5  ;;  %v5975_v16 = vsel %vm403_vm4, %v2281_v48, %v9058_v18  ;;  %v2383_v43 = vrot.slane %v2377_v41, 4  ;;  %9066 = vst [vmem:[#allocation98_spill] sm:$0xff] %v6005_v28  ;;  %v6033_v31 = vstv %s5898_s0  ;;  %v6050_v41 = vstv %s5905_s1  ;;  %s6055_s0 = sld [smem:[#allocation2 + $0x196]]  ;;  %s9084_s1 = smov 126  }
 0x23e   : > { %3009 = vrot.lane.b32.xlu0 %v5220_v29, %s8902_s6  ;;  %9059 = vst [vmem:[#allocation94_spill] sm:$0xff] %v5975_v16  ;;  %9073 = vst [vmem:[#allocation103_spill] sm:$0xff] %v6033_v31  ;;  %v6088_v18 = vstv %s5930_s11  ;;  %v6179_v28 = vstv %s6082_s30  ;;  %s7151_s30 = sld [smem:[#allocation2 + $0x182]]  ;;  %s7249_s11 = sld [smem:[#allocation2 + $0x4]] }
 0x23f   : > { %9078 = vst [vmem:[#allocation106_spill] sm:$0xff] %v6050_v41  ;;  %9088 = vst [vmem:[#allocation113_spill] sm:$0xff] %v6088_v18 }
 0x240   : > { %9110 = vst [vmem:[#allocation132_spill] sm:$0xff] %v6179_v28 }
 0x241   : > { %2545 = vrot.lane.b32.xlu1 %v5285_v8, %s4787_s5 }
 0x242   : > { %3013 = vrot.lane.b32.xlu0 %v5238_v46, %s8902_s6  ;;  %v2343_v46 = vmul.f32 %v2342_v49, %v5244_v52  ;;  %v2486_v49 = vrot.slane %v5874_v22, 6  ;;  %v2428_v22 = vmul.f32 %v5587_v35, %v5229_v37 }
 0x244   : > { %v2349_v53 = vrot.slane %v2343_v46, 4  ;;  %v5947_v46 = vsel %vm400_vm3, %v2418_v56, %v2420_v24  ;;  %v5959_v35 = vsel %vm398_vm2, %v2486_v49, %v2488_v33  ;;  %v2445_v24 = vmul.f32 %v5655_v51, %v5258_v62 }
 0x245   : > { %2569 = vrot.lane.b32.xlu1 %v5292_v9, %s4787_s5  ;;  %s5922_s5 = sld [smem:[#allocation2 + $0x12b]]  ;;  %9053 = vst [vmem:[#allocation90_spill] sm:$0xff] %v5947_v46  ;;  %9055 = vst [vmem:[#allocation92_spill] sm:$0xff] %v5959_v35  ;;  %v2434_v33 = vrot.slane %v2428_v22, 5  ;;  %v9060_v51 = vrot.slane %v5804_v57, 4  ;;  %v9064_v57 = vrot.slane %v5822_v27, 5  ;;  %v6019_v27 = vsel %vm398_vm2, %v2485_v42, %v2486_v49 }
 0x246   : > { %3036 = vrot.lane.b32.xlu0 %v5278_v5, %s8902_s6  ;;  %v5989_v25 = vsel %vm307_vm0, %v2349_v53, %v9062_v61  ;;  %v2513_v53 = vmul.f32 %v5758_v32, %v5258_v62  ;;  %9068 = vst [vmem:[#allocation100_spill] sm:$0xff] %v6019_v27  ;;  %v6024_v56 = vsel %vm403_vm4, %v2298_v12, %v9069_v50  ;;  %v2451_v22 = vrot.slane %v2445_v24, 5 }
 0x247   : > { %v5984_v44 = vsel %vm307_vm0, %v2332_v26, %v9060_v51  ;;  %9063 = vst [vmem:[#allocation96_spill] sm:$0xff] %v5989_v25  ;;  %v6000_v48 = vsel %vm400_vm3, %v2400_v30, %v9064_v57  ;;  %v6008_v26 = vsel %vm398_vm2, %v2468_v7, %v2469_v47  ;;  %9070 = vst [vmem:[#allocation101_spill] sm:$0xff] %v6024_v56  ;;  %v9071_v47 = vrot.slane %v5594_v54, 4  ;;  %v9111_v25 = vld [vmem:[#allocation26_spill] sm:$0xff] }
 0x248   : > { %9061 = vst [vmem:[#allocation95_spill] sm:$0xff] %v5984_v44  ;;  %9065 = vst [vmem:[#allocation97_spill] sm:$0xff] %v6000_v48  ;;  %v6042_v49 = vsel %vm400_vm3, %v2434_v33, %v9074_v14  ;;  %v9076_v54 = vrot.slane %v5729_v6, 6  ;;  %v6053_v7 = vstv %s5907_s3  ;;  %v6062_v42 = vsel %vm403_vm4, %v2315_v39, %v9080_v10  ;;  %s6080_s3 = sld [smem:[#allocation2 + $0x1a4]] }
 0x249   : > { %3011 = vrot.lane.b32.xlu1 %v5268_v3, %s8902_s6  ;;  %9067 = vst [vmem:[#allocation99_spill] sm:$0xff] %v6008_v26  ;;  %v6029_v32 = vsel %vm307_vm0, %v2366_v34, %v9071_v47  ;;  %9075 = vst [vmem:[#allocation104_spill] sm:$0xff] %v6042_v49  ;;  %v9082_v6 = vrot.slane %v5632_v60, 4  ;;  %v6072_v34 = vstv %s5914_s19  ;;  %v6075_v24 = vstv %s5916_s23  ;;  %s4789_s19 = smov 125   ;;  %s7207_s23 = sld [smem:[#allocation2 + $0x97]] }
 0x24a   : > { %3038 = vrot.lane.b32.xlu0 %v5251_v55, %s8902_s6  ;;  %9072 = vst [vmem:[#allocation102_spill] sm:$0xff] %v6029_v32  ;;  %v6047_v19 = vsel %vm398_vm2, %v2502_v20, %v9076_v54  ;;  %9079 = vst [vmem:[#allocation107_spill] sm:$0xff] %v6053_v7  ;;  %v2519_v60 = vrot.slane %v2513_v53, 6  ;;  %v6091_v33 = vstv %s5932_s2  ;;  %v9090_v20 = vrot.slane %v5695_v58, 5  ;;  %s7251_s2 = sld [smem:[#allocation2 + $0xac]] }
 0x24b   : > { %9077 = vst [vmem:[#allocation105_spill] sm:$0xff] %v6047_v19  ;;  %9081 = vst [vmem:[#allocation108_spill] sm:$0xff] %v6062_v42  ;;  %v6067_v12 = vsel %vm307_vm0, %v2383_v43, %v9082_v6  ;;  %v6078_v15 = vstv %s5922_s5  ;;  %v6101_v43 = vstv %s5942_s22  ;;  %v6104_v57 = vstv %s5954_s16  ;;  %s7220_s5 = sld [smem:[#allocation2 + $0x9e]]  ;;  %s7294_s22 = sld [smem:[#allocation2 + $0x12]] }
 0x24c   : > { %9083 = vst [vmem:[#allocation109_spill] sm:$0xff] %v6067_v12  ;;  %9085 = vst [vmem:[#allocation110_spill] sm:$0xff] %v6072_v34  ;;  %v6096_v51 = vsel %vm400_vm3, %v2451_v22, %v9090_v20  ;;  %v6108_v47 = vstv %s5956_s28  ;;  %v6111_v14 = vstv %s5965_s12  ;;  %v6114_v58 = vstv %s5979_s27  ;;  %s7303_s16 = sld [smem:[#allocation2 + $0x19]]  ;;  %s7305_s28 = sld [smem:[#allocation2 + $0x20]] }
 0x24d   : > { %3022 = vrot.lane.b32.xlu1 %v5244_v52, %s8902_s6  ;;  %9086 = vst [vmem:[#allocation111_spill] sm:$0xff] %v6075_v24  ;;  %9087 = vst [vmem:[#allocation112_spill] sm:$0xff] %v6078_v15  ;;  %v6119_v22 = vstv %s5977_s10  ;;  %v6125_v54 = vstv %s5995_s25  ;;  %v9100_v10 = vrot.slane %v5787_v2, 6  ;;  %v6141_v39 = vstv %s6014_s7  ;;  %s7019_s25 = sld [smem:[#allocation2 + $0x109]]  ;;  %s7038_s7 = sld [smem:[#allocation2 + $0x117]] }
 0x24e   : > { %3024 = vrot.lane.b32.xlu0 %v5261_v63, %s8902_s6  ;;  %s6035_s6 = sld [smem:[#allocation2 + $0x2c]]  ;;  %9089 = vst [vmem:[#allocation114_spill] sm:$0xff] %v6091_v33  ;;  %9091 = vst [vmem:[#allocation115_spill] sm:$0xff] %v6096_v51  ;;  %v6144_v2 = vstv %s6016_s9  ;;  %v6160_v19 = vstv %s6037_s14  ;;  %v6163_v51 = vstv %s6055_s0  ;;  %s7003_s14 = sld [smem:[#allocation2 + $0x102]] }
 0x24f   : > { %9092 = vst [vmem:[#allocation116_spill] sm:$0xff] %v6101_v43  ;;  %9093 = vst [vmem:[#allocation117_spill] sm:$0xff] %v6104_v57  ;;  %v6130_v6 = vsel %vm398_vm2, %v2519_v60, %v9100_v10  ;;  %v6166_v27 = vstv %s6057_s26  ;;  %v9108_v49 = vstv %s5308_s13  ;;  %v6176_v12 = vstv %s6080_s3  ;;  %s7033_s9 = sld [smem:[#allocation2 + $0x110]]  ;;  %s7311_s12 = sld [smem:[#allocation2 + $0x2e]] }
 0x250   : > { %v649_v36 = vpop.permute.xlu0 %648  ;;  %9094 = vst [vmem:[#allocation118_spill] sm:$0xff] %v6108_v47  ;;  %9095 = vst [vmem:[#allocation119_spill] sm:$0xff] %v6111_v14  ;;  %v9119_v47 = vstv %s5344_s15  ;;  %s7175_s26 = sld [smem:[#allocation2 + $0x90]]  ;;  %s7330_s10 = sld [smem:[#allocation2 + $0x189]] }
 0x251   : > { %3034 = vrot.lane.b32.xlu1 %v5229_v37, %s9084_s1  ;;  %v657_v61 = vsel %vm564_vm11, 0.0, %v649_v36  ;;  %9096 = vst [vmem:[#allocation120_spill] sm:$0xff] %v6114_v58  ;;  %9097 = vst [vmem:[#allocation121_spill] sm:$0xff] %v6119_v22  ;;  %v6122_v36 = vstv %s5993_s4  ;;  %s9137_s4 = smov 3   ;;  %s7357_s27 = sld [smem:[#allocation2 + $0x190]] }
 0x252   : > { %3048 = vrot.lane.b32.xlu0 %v5271_v4, %s9084_s1  ;;  %9098 = vst [vmem:[#allocation122_spill] sm:$0xff] %v6122_v36  ;;  %9099 = vst [vmem:[#allocation123_spill] sm:$0xff] %v6125_v54  ;;  %v6135_v20 = vmul.f32 %v5350_v13, %v657_v61  ;;  %v6138_v50 = vmul.f32 %v5352_v45, %v657_v61  ;;  %v6148_v10 = vmul.f32 %v5354_v59, %v657_v61  ;;  %s7391_s0 = sld [smem:[#allocation2 + $0x197]]  ;;  %s7414_s3 = sld [smem:[#allocation2 + $0x1a5]] }
 0x253   : > { %9101 = vst [vmem:[#allocation124_spill] sm:$0xff] %v6130_v6  ;;  %9102 = vst [vmem:[#allocation125_spill] sm:$0xff] %v6141_v39  ;;  %v6151_v11 = vmul.f32 %v5363_v0, %v657_v61  ;;  %v6157_v30 = vmul.f32 %v5366_v1, %v657_v61  ;;  %v6171_v26 = vmul.f32 %v5377_v17, %v657_v61 }
 0x254   : > { %v677_v53 = vpop.permute.xlu0 %676  ;;  %9103 = vst [vmem:[#allocation126_spill] sm:$0xff] %v6144_v2  ;;  %9105 = vst [vmem:[#allocation128_spill] sm:$0xff] %v6160_v19 }
 0x255   : > { %3046 = vrot.lane.b32.xlu1 %v5258_v62, %s9084_s1  ;;  %v685_v60 = vsel %vm564_vm11, 0.0, %v677_v53  ;;  %9106 = vst [vmem:[#allocation129_spill] sm:$0xff] %v6163_v51  ;;  %9107 = vst [vmem:[#allocation130_spill] sm:$0xff] %v6166_v27  ;;  %v704_v53 = vmul.f32 %v9108_v49, %v657_v61  ;;  %v9112_v61 = vld [vmem:[#allocation27_spill] sm:$0xff] }
 0x256   : > { %3490 = vrot.lane.b32.xlu0 %v5220_v29, %s4789_s19  ;;  %v6154_v29 = vstv %s6035_s6  ;;  %9109 = vst [vmem:[#allocation131_spill] sm:$0xff] %v6176_v12  ;;  %v6187_v56 = vmul.f32 %v9112_v61, %v685_v60  ;;  %v6192_v35 = vmul.f32 %v9113_v40, %v685_v60  ;;  %v6195_v32 = vmul.f32 %v9114_v21, %v685_v60  ;;  %s7164_s6 = sld [smem:[#allocation2 + $0x89]] }
 0x257   : > { %9104 = vst [vmem:[#allocation127_spill] sm:$0xff] %v6154_v29  ;;  %v6205_v28 = vmul.f32 %v9117_v23, %v685_v60  ;;  %v9118_v12 = vstv %s5316_s29 }
 0x258   : > { %v653_v6 = vpop.permute.xlu0 %652  ;;  %v6209_v16 = vmul.f32 %v9118_v12, %v685_v60 }
 0x259   : > { %3026 = vrot.lane.b32.xlu1 %v5285_v8, %s9084_s1  ;;  %v659_v42 = vsel %vm564_vm11, 0.0, %v653_v6  ;;  %v9115_v6 = vld [vmem:[#allocation30_spill] sm:$0xff] }
 0x25a   : > { %3494 = vrot.lane.b32.xlu0 %v9111_v25, %s4789_s19  ;;  %v6199_v46 = vmul.f32 %v9115_v6, %v685_v60  ;;  %v9116_v25 = vld [vmem:[#allocation31_spill] sm:$0xff]  ;;  %v6213_v51 = vmul.f32 %v5350_v13, %v659_v42  ;;  %v6216_v48 = vmul.f32 %v5352_v45, %v659_v42  ;;  %v6221_v19 = vmul.f32 %v5354_v59, %v659_v42 }
 0x25b   : > { %v663_v49 = vpop.permute.xlu1 %662  ;;  %v6202_v38 = vmul.f32 %v9116_v25, %v685_v60  ;;  %v6231_v27 = vmul.f32 %v5363_v0, %v659_v42  ;;  %v6234_v29 = vmul.f32 %v5366_v1, %v659_v42  ;;  %v6239_v54 = vmul.f32 %v5377_v17, %v659_v42 }
 0x25c   : > { %v681_v44 = vpop.permute.xlu0 %680  ;;  %v6224_v58 = vsel %vm564_vm11, 0.0, %v663_v49  ;;  %v737_v22 = vrot.slane %v6213_v51, 1 }
 0x25d   : > { %3050 = vrot.lane.b32.xlu1 %v5292_v9, %s9084_s1  ;;  %v687_v60 = vsel %vm564_vm11, 0.0, %v681_v44  ;;  %v710_v2 = vmul.f32 %v9119_v47, %v6224_v58  ;;  %s7393_s1 = sld [smem:[#allocation2 + $0x19e]] }
 0x25e   : > { %3517 = vrot.lane.b32.xlu0 %v5278_v5, %s4789_s19  ;;  %v6250_v39 = vmul.f32 %v9112_v61, %v687_v60  ;;  %v6256_v44 = vmul.f32 %v9113_v40, %v687_v60  ;;  %v6259_v5 = vmul.f32 %v9114_v21, %v687_v60  ;;  %v6262_v51 = vmul.f32 %v9115_v6, %v687_v60 }
 0x25f   : > { %v691_v49 = vpop.permute.xlu1 %690  ;;  %v6272_v42 = vmul.f32 %v9117_v23, %v687_v60  ;;  %v712_v47 = vadd.f32 %v710_v2, %v704_v53 }
 0x260   : > { %v665_v36 = vpop.permute.xlu0 %664  ;;  %v6276_v43 = vsel %vm564_vm11, 0.0, %v691_v49 }
 0x261   : > { %3492 = vrot.lane.b32.xlu1 %v5268_v3, %s4789_s19  ;;  %v6269_v3 = vmul.f32 %v9116_v25, %v687_v60  ;;  %9120 = vst [vmem:[#allocation26_spill] sm:$0xff] %v6272_v42  ;;  %9121 = vst [vmem:[#allocation27_spill] sm:$0xff] %v6276_v43  ;;  %v6285_v18 = vsel %vm564_vm11, 0.0, %v665_v36 }
 0x262   : > { %3519 = vrot.lane.b32.xlu0 %v5251_v55, %s4789_s19  ;;  %v9122_v55 = vld [vmem:[#allocation35_spill] sm:$0xff] }
 0x263   : > { %v651_v14 = vpop.permute.xlu1 %650  ;;  %v6281_v12 = vmul.f32 %v9122_v55, %v6224_v58  ;;  %v746_v42 = vmul.f32 %v9122_v55, %v6285_v18 }
 0x264   : > { %v658_v33 = vsel %vm564_vm11, 0.0, %v651_v14  ;;  %v693_v34 = vpop.permute.xlu0 %692  ;;  %v9125_v14 = vstv %s5344_s15  ;;  %s9141_s15 = sld [smem:[#allocation42_spill]] }
 0x265   : > { %v729_v57 = vmul.f32 %v5350_v13, %v658_v33  ;;  %3503 = vrot.lane.b32.xlu1 %v5244_v52, %s4789_s19  ;;  %v797_v24 = vmul.f32 %v5352_v45, %v658_v33  ;;  %v9123_v13 = vstv %s5356_s18  ;;  %v9124_v52 = vstv %s5308_s13  ;;  %v9126_v45 = vld [vmem:[#allocation36_spill] sm:$0xff]  ;;  %s7051_s13 = sld [smem:[#allocation2 + $0x12c]] }
 0x266   : > { %3505 = vrot.lane.b32.xlu0 %v5261_v63, %s4789_s19  ;;  %v722_v53 = vmul.f32 %v9123_v13, %v6276_v43  ;;  %v705_v60 = vmul.f32 %v9124_v52, %v658_v33  ;;  %v711_v49 = vmul.f32 %v9125_v14, %v6285_v18  ;;  %v6309_v41 = vmul.f32 %v9126_v45, %v6224_v58  ;;  %v9127_v13 = vld [vmem:[#allocation37_spill] sm:$0xff] }
 0x267   : > { %v735_v7 = vrot.slane %v729_v57, 1  ;;  %v865_v63 = vmul.f32 %v5354_v59, %v658_v33  ;;  %v933_v36 = vmul.f32 %v5363_v0, %v658_v33  ;;  %v1001_v2 = vmul.f32 %v5366_v1, %v658_v33  ;;  %v679_v31 = vpop.permute.xlu1 %678  ;;  %v9128_v59 = vld [vmem:[#allocation45_spill] sm:$0xff]  ;;  %v9130_v0 = vld [vmem:[#allocation52_spill] sm:$0xff] }
 0x268   : > { %v6318_v14 = vmul.f32 %v9127_v13, %v6224_v58  ;;  %v803_v57 = vrot.slane %v797_v24, 2  ;;  %v1069_v52 = vmul.f32 %v5377_v17, %v658_v33  ;;  %v6325_v15 = vmul.f32 %v9128_v59, %v6224_v58  ;;  %v9132_v17 = vld [vmem:[#allocation54_spill] sm:$0xff] }
 0x269   : > { %3515 = vrot.lane.b32.xlu1 %v5229_v37, %s4789_s19  ;;  %v6329_v1 = vmul.f32 %v9130_v0, %v6224_v58  ;;  %v6332_v37 = vadd.f32 %v722_v53, %v6209_v16  ;;  %v713_v43 = vadd.f32 %v711_v49, %v705_v60  ;;  %v6335_v24 = vsel %vm564_vm11, 0.0, %v693_v34  ;;  %v1135_v16 = vpop.permute.xlu0 %1134  ;;  %v4587_v53 = vld [vmem:[%s5051_s20] sm:$0xff] }
 0x26a   : > { %3529 = vrot.lane.b32.xlu0 %v5271_v4, %s4789_s19  ;;  %9129 = vst [vmem:[#allocation28_spill] sm:$0xff] %v6325_v15  ;;  %v6339_v4 = vmul.f32 %v9132_v17, %v6224_v58  ;;  %v9134_v33 = vrot.slane %v6135_v20, 1  ;;  %v738_v0 = vsel %vm407_vm6, %v735_v7, %v737_v22  ;;  %v871_v60 = vrot.slane %v865_v63, 3 }
 0x26b   : > { %9131 = vst [vmem:[#allocation29_spill] sm:$0xff] %v6329_v1  ;;  %v686_v1 = vsel %vm564_vm11, 0.0, %v679_v31  ;;  %v939_v34 = vrot.slane %v933_v36, 4  ;;  %v1007_v49 = vrot.slane %v1001_v2, 5  ;;  %v9135_v58 = vrot.slane %v6138_v50, 2 }
 0x26c   : > { %9133 = vst [vmem:[#allocation30_spill] sm:$0xff] %v6339_v4  ;;  %v736_v15 = vsel %vm407_vm6, %v9134_v33, %v735_v7  ;;  %v1075_v7 = vrot.slane %v1069_v52, 6  ;;  %v9136_v31 = vstv %s5356_s18  ;;  %v763_v33 = vmul.f32 %v9112_v61, %v686_v1  ;;  %s9182_s18 = sld [smem:[#allocation89_spill]] }
 0x26d   : > { %3527 = vrot.lane.b32.xlu1 %v5258_v62, %s4789_s19  ;;  %v804_v20 = vsel %vm405_vm5, %v9135_v58, %v803_v57  ;;  %v723_v22 = vmul.f32 %v9136_v31, %v6335_v24  ;;  %v741_v36 = vadd.f32 %v736_v15, %v712_v47  ;;  %v742_v2 = vadd.f32 %v738_v0, %v713_v43 }
 0x26e   : > { %3997 = vrot.lane.b32.xlu0 %v4587_v53, %s9137_s4  ;;  %v9138_v63 = vrot.slane %v6216_v48, 2  ;;  %v6366_v62 = vsel %vm1143_vm13, 0.0, %v1135_v16  ;;  %v9139_v50 = vstv %s5316_s29  ;;  %v831_v58 = vmul.f32 %v9113_v40, %v686_v1  ;;  %s7118_s29 = sld [smem:[#allocation2 + $0x82]] }
 0x26f   : > { %v717_v52 = vmul.f32 %v9139_v50, %v686_v1  ;;  %v899_v61 = vmul.f32 %v9114_v21, %v686_v1  ;;  %v967_v31 = vmul.f32 %v9115_v6, %v686_v1  ;;  %v9140_v15 = vrot.slane %v6148_v10, 3 }
 0x270   : > { %v6363_v4 = vsel %vm405_vm5, %v803_v57, %v9138_v63  ;;  %v9142_v43 = vrot.slane %v6221_v19, 3  ;;  %v9143_v57 = vrot.slane %v6151_v11, 4  ;;  %v1035_v21 = vmul.f32 %v9116_v25, %v686_v1  ;;  %v667_v25 = vpop.permute.xlu1 %666 }
 0x271   : > { %v6376_v48 = vsel %vm403_vm4, %v9140_v15, %v871_v60  ;;  %3507 = vrot.lane.b32.xlu1 %v5285_v8, %s4789_s19  ;;  %v9144_v40 = vrot.slane %v6231_v27, 4  ;;  %v9145_v19 = vrot.slane %v6157_v30, 5  ;;  %v9146_v11 = vrot.slane %v6234_v29, 5 }
 0x272   : > { %v6381_v47 = vsel %vm403_vm4, %v871_v60, %v9142_v43  ;;  %v6386_v0 = vsel %vm307_vm0, %v9143_v57, %v939_v34  ;;  %v769_v53 = vrot.slane %v763_v33, 1  ;;  %v4588_v60 = vld [vmem:[%s5057_s24] sm:$0xff]  ;;  %v9147_v8 = vrot.slane %v6171_v26, 6 }
 0x273   : > { %v6394_v10 = vsel %vm307_vm0, %v939_v34, %v9144_v40  ;;  %v6399_v6 = vsel %vm400_vm3, %v9145_v19, %v1007_v49  ;;  %v6404_v16 = vsel %vm400_vm3, %v1007_v49, %v9146_v11  ;;  %4009 = vrot.lane.b32.xlu0 %v4588_v60, %s9137_s4  ;;  %v9148_v30 = vrot.slane %v6239_v54, 6 }
 0x274   : > { %v6411_v27 = vsel %vm398_vm2, %v9147_v8, %v1075_v7  ;;  %v1103_v29 = vmul.f32 %v9117_v23, %v686_v1  ;;  %v9149_v49 = vstv %s9141_s15  ;;  %v725_v33 = vadd.f32 %v723_v22, %v717_v52  ;;  %v4589_v8 = vld [vmem:[%s5051_s20 + $0x8] sm:$0xff]  ;;  %s7045_s20 = sld [smem:[#allocation2 + $0x11e]] }
 0x275   : > { %v6416_v34 = vsel %vm398_vm2, %v1075_v7, %v9148_v30  ;;  %v6422_v63 = vmul.f32 %v9149_v49, %v6366_v62  ;;  %v837_v50 = vrot.slane %v831_v58, 2  ;;  %v905_v15 = vrot.slane %v899_v61, 3  ;;  %3531 = vrot.lane.b32.xlu1 %v5292_v9, %s4789_s19 }
 0x276   : > { %v973_v43 = vrot.slane %v967_v31, 4  ;;  %v1041_v57 = vrot.slane %v1035_v21, 5  ;;  %v673_v26 = vsel %vm564_vm11, 0.0, %v667_v25  ;;  %v752_v40 = vrot.slane %v746_v42, 1 }
 0x277   : > { %v814_v54 = vmul.f32 %v9126_v45, %v6285_v18  ;;  %v9150_v23 = vrot.slane %v6187_v56, 1  ;;  %v9151_v7 = vrot.slane %v6250_v39, 1  ;;  %v747_v52 = vmul.f32 %v9122_v55, %v673_v26 }
 0x278   : > { %v815_v58 = vmul.f32 %v9126_v45, %v673_v26  ;;  %v1109_v42 = vrot.slane %v1103_v29, 6  ;;  %v9152_v61 = vrot.slane %v6281_v12, 1  ;;  %v882_v9 = vmul.f32 %v9127_v13, %v6285_v18 }
 0x279   : > { %v770_v1 = vsel %vm407_vm6, %v9150_v23, %v769_v53  ;;  %v772_v22 = vsel %vm407_vm6, %v769_v53, %v9151_v7  ;;  %v820_v21 = vrot.slane %v814_v54, 2  ;;  %v9153_v56 = vrot.slane %v6192_v35, 2  ;;  %3999 = vrot.lane.b32.xlu1 %v4589_v8, %s9137_s4 }
 0x27a   : > { %v753_v31 = vsel %vm407_vm6, %v9152_v61, %v752_v40  ;;  %v887_v19 = vrot.slane %v6318_v14, 3  ;;  %v754_v11 = vrot.slane %v747_v52, 1  ;;  %v6449_v45 = vadd.f32 %v770_v1, %v6332_v37  ;;  %v9163_v52 = vld [vmem:[#allocation26_spill] sm:$0xff] }
 0x27b   : > { %v6445_v39 = vsel %vm405_vm5, %v9153_v56, %v837_v50  ;;  %v758_v55 = vadd.f32 %v753_v31, %v741_v36  ;;  %v6451_v53 = vadd.f32 %v772_v22, %v725_v33  ;;  %v9154_v12 = vrot.slane %v6256_v44, 2  ;;  %v9165_v31 = vld [vmem:[#allocation52_spill] sm:$0xff] }
 0x27c   : > { %v9155_v60 = vrot.slane %v6195_v32, 3  ;;  %v755_v14 = vsel %vm407_vm6, %v752_v40, %v754_v11  ;;  %v822_v36 = vrot.slane %v815_v58, 2  ;;  %v883_v30 = vmul.f32 %v9127_v13, %v673_v26 }
 0x27d   : > { %v6456_v25 = vsel %vm405_vm5, %v837_v50, %v9154_v12  ;;  %v809_v37 = vadd.f32 %v804_v20, %v758_v55  ;;  %v9156_v44 = vrot.slane %v6259_v5, 3  ;;  %v759_v49 = vadd.f32 %v755_v14, %v742_v2  ;;  %v9166_v55 = vld [vmem:[#allocation28_spill] sm:$0xff] }
 0x27e   : > { %v6461_v35 = vsel %vm403_vm4, %v9155_v60, %v905_v15  ;;  %v9157_v32 = vrot.slane %v6309_v41, 2  ;;  %v888_v50 = vrot.slane %v882_v9, 3  ;;  %v9158_v54 = vrot.slane %v6199_v46, 4  ;;  %v9167_v60 = vld [vmem:[#allocation29_spill] sm:$0xff] }
 0x27f   : > { %v6470_v29 = vsel %vm403_vm4, %v905_v15, %v9156_v44  ;;  %v9159_v20 = vrot.slane %v6262_v51, 4  ;;  %v9160_v5 = vrot.slane %v6202_v38, 5  ;;  %v9161_v41 = vrot.slane %v6269_v3, 5  ;;  %v4590_v38 = vld [vmem:[%s5057_s24 + $0x8] sm:$0xff]  ;;  %s7047_s24 = sld [smem:[#allocation2 + $0x125]] }
 0x280   : > { %v821_v33 = vsel %vm405_vm5, %v9157_v32, %v820_v21  ;;  %v6478_v40 = vsel %vm307_vm0, %v9158_v54, %v973_v43  ;;  %v9162_v46 = vrot.slane %v6205_v28, 6  ;;  %v810_v51 = vadd.f32 %v6363_v4, %v759_v49  ;;  %4011 = vrot.lane.b32.xlu1 %v4590_v38, %s9137_s4  ;;  %v9169_v44 = vld [vmem:[#allocation70_spill] sm:$0xff]  ;;  %s7442_s4 = sld [smem:[#allocation2 + $0x1ac]] }
 0x281   : > { %v6483_v13 = vsel %vm307_vm0, %v973_v43, %v9159_v20  ;;  %v6488_v15 = vsel %vm400_vm3, %v9160_v5, %v1041_v57  ;;  %v826_v2 = vadd.f32 %v821_v33, %v809_v37  ;;  %v6493_v23 = vsel %vm400_vm3, %v1041_v57, %v9161_v41  ;;  %v9170_v33 = vld [vmem:[#allocation30_spill] sm:$0xff] }
 0x282   : > { %v6498_v1 = vsel %vm398_vm2, %v9162_v46, %v1109_v42  ;;  %v950_v43 = vmul.f32 %v9128_v59, %v6285_v18  ;;  %v823_v7 = vsel %vm405_vm5, %v820_v21, %v822_v36  ;;  %v890_v22 = vrot.slane %v883_v30, 3  ;;  %v9168_v36 = vld [vmem:[#allocation67_spill] sm:$0xff]  ;;  %v9172_v46 = vld [vmem:[#allocation72_spill] sm:$0xff] }
 0x283   : > { %v877_v3 = vadd.f32 %v6376_v48, %v826_v2  ;;  %v951_v57 = vmul.f32 %v9128_v59, %v673_v26  ;;  %v9164_v28 = vrot.slane %v9163_v52, 6  ;;  %v827_v61 = vadd.f32 %v823_v7, %v810_v51  ;;  %v1139_v59 = vpop.permute.xlu0 %1138  ;;  %v9171_v2 = vld [vmem:[#allocation71_spill] sm:$0xff] }
 0x284   : > { %v889_v4 = vsel %vm403_vm4, %v887_v19, %v888_v50  ;;  %v1018_v9 = vmul.f32 %v9165_v31, %v6285_v18  ;;  %v1019_v11 = vmul.f32 %v9165_v31, %v673_v26  ;;  %v1086_v48 = vmul.f32 %v9132_v17, %v6285_v18  ;;  %v695_v31 = vpop.permute.xlu1 %694 }
 0x285   : > { %v6511_v58 = vsel %vm398_vm2, %v1109_v42, %v9164_v28  ;;  %v894_v56 = vadd.f32 %v889_v4, %v877_v3  ;;  %v1087_v21 = vmul.f32 %v9132_v17, %v673_v26  ;;  %v955_v12 = vrot.slane %v9166_v55, 4  ;;  %v9174_v3 = vld [vmem:[#allocation76_spill] sm:$0xff]  ;;  %v9176_v55 = vld [vmem:[#allocation59_spill] sm:$0xff] }
 0x286   : > { %v1023_v42 = vrot.slane %v9167_v60, 5  ;;  %v878_v8 = vadd.f32 %v6381_v47, %v827_v61  ;;  %v956_v14 = vrot.slane %v950_v43, 4  ;;  %v891_v19 = vsel %vm403_vm4, %v888_v50, %v890_v22 }
 0x287   : > { %v958_v37 = vrot.slane %v951_v57, 4  ;;  %v6526_v30 = vmul.f32 %v9168_v36, %v6366_v62  ;;  %v6530_v18 = vmul.f32 %v9169_v44, %v6366_v62  ;;  %v945_v26 = vadd.f32 %v6386_v0, %v894_v56  ;;  %v9173_v0 = vld [vmem:[#allocation75_spill] sm:$0xff] }
 0x288   : > { %v895_v17 = vadd.f32 %v891_v19, %v878_v8  ;;  %v1024_v49 = vrot.slane %v1018_v9, 5  ;;  %v1146_v32 = vsel %vm1143_vm13, 0.0, %v1139_v59  ;;  %v1091_v47 = vrot.slane %v9170_v33, 6  ;;  %v9175_v59 = vld [vmem:[#allocation27_spill] sm:$0xff]  ;;  %v9178_v8 = vld [vmem:[#allocation78_spill] sm:$0xff] }
 0x289   : > { %v1026_v54 = vrot.slane %v1019_v11, 5  ;;  %v1092_v20 = vrot.slane %v1086_v48, 6  ;;  %v1094_v50 = vrot.slane %v1087_v21, 6  ;;  %v957_v5 = vsel %vm307_vm0, %v955_v12, %v956_v14 }
 0x28a   : > { %v6538_v41 = vmul.f32 %v9171_v2, %v6366_v62  ;;  %v6542_v51 = vmul.f32 %v9172_v46, %v6366_v62  ;;  %v6546_v43 = vmul.f32 %v9173_v0, %v6366_v62  ;;  %v946_v38 = vadd.f32 %v6394_v10, %v895_v17 }
 0x28b   : > { %v959_v7 = vsel %vm307_vm0, %v956_v14, %v958_v37  ;;  %v6552_v22 = vmul.f32 %v9174_v3, %v6366_v62  ;;  %v6555_v57 = vmul.f32 %v9168_v36, %v1146_v32  ;;  %v962_v52 = vadd.f32 %v957_v5, %v945_v26 }
 0x28c   : > { %v1025_v28 = vsel %vm400_vm3, %v1023_v42, %v1024_v49  ;;  %v1283_v4 = vrot.slane %v6530_v18, 2  ;;  %v1027_v9 = vsel %vm400_vm3, %v1024_v49, %v1026_v54  ;;  %v6562_v10 = vsel %vm398_vm2, %v1091_v47, %v1092_v20  ;;  %v9177_v54 = vld [vmem:[#allocation77_spill] sm:$0xff] }
 0x28d   : > { %v6565_v56 = vsel %vm398_vm2, %v1092_v20, %v1094_v50  ;;  %v6568_v62 = vmul.f32 %v9169_v44, %v1146_v32  ;;  %v779_v12 = vmul.f32 %v9176_v55, %v9175_v59  ;;  %v963_v60 = vadd.f32 %v959_v7, %v946_v38 }
 0x28e   : > { %v701_v14 = vsel %vm564_vm11, 0.0, %v695_v31  ;;  %v1013_v19 = vadd.f32 %v6399_v6, %v962_v52  ;;  %v6580_v37 = vmul.f32 %v9171_v2, %v1146_v32  ;;  %v6583_v17 = vmul.f32 %v9172_v46, %v1146_v32 }
 0x28f   : > { %v780_v26 = vmul.f32 %v9176_v55, %v6335_v24  ;;  %v6589_v33 = vmul.f32 %v9173_v0, %v1146_v32  ;;  %v781_v47 = vmul.f32 %v9176_v55, %v701_v14  ;;  %v848_v20 = vmul.f32 %v9177_v54, %v6335_v24 }
 0x290   : > { %v785_v6 = vrot.slane %v779_v12, 1  ;;  %v847_v50 = vmul.f32 %v9177_v54, %v9175_v59  ;;  %v849_v38 = vmul.f32 %v9177_v54, %v701_v14  ;;  %v1014_v7 = vadd.f32 %v6404_v16, %v963_v60 }
 0x291   : > { %v786_v5 = vrot.slane %v780_v26, 1  ;;  %v6599_v52 = vmul.f32 %v9174_v3, %v1146_v32  ;;  %v788_v31 = vrot.slane %v781_v47, 1  ;;  %v916_v61 = vmul.f32 %v9178_v8, %v6335_v24 }
 0x292   : > { %v854_v12 = vrot.slane %v848_v20, 2  ;;  %v917_v21 = vmul.f32 %v9178_v8, %v701_v14  ;;  %v915_v26 = vmul.f32 %v9178_v8, %v9175_v59  ;;  %v856_v32 = vrot.slane %v849_v38, 2 }
 0x293   : > { %v787_v42 = vsel %vm407_vm6, %v785_v6, %v786_v5  ;;  %v789_v54 = vsel %vm407_vm6, %v786_v5, %v788_v31  ;;  %v6610_v60 = vadd.f32 %v1025_v28, %v1013_v19  ;;  %v1422_v47 = vrot.slane %v6583_v17, 4  ;;  %v9193_v17 = vld [vmem:[#allocation110_spill] sm:$0xff] }
 0x294   : > { %v792_v16 = vadd.f32 %v787_v42, %v6449_v45  ;;  %v853_v48 = vrot.slane %v847_v50, 2  ;;  %v793_v55 = vadd.f32 %v789_v54, %v6451_v53  ;;  %v1031_v11 = vadd.f32 %v1027_v9, %v1014_v7  ;;  %v9179_v45 = vld [vmem:[#allocation80_spill] sm:$0xff]  ;;  %v1137_v9 = vpop.permute.xlu1 %1136  ;;  %v9181_v7 = vld [vmem:[#allocation82_spill] sm:$0xff] }
 0x295   : > { %v1490_v20 = vrot.slane %v6589_v33, 5  ;;  %v922_v49 = vrot.slane %v916_v61, 3  ;;  %v924_v31 = vrot.slane %v917_v21, 3  ;;  %v984_v28 = vmul.f32 %v9179_v45, %v6335_v24 }
 0x296   : > { %v843_v6 = vadd.f32 %v6445_v39, %v792_v16  ;;  %v844_v8 = vadd.f32 %v6456_v25, %v793_v55  ;;  %v855_v5 = vsel %vm405_vm5, %v853_v48, %v854_v12  ;;  %v921_v42 = vrot.slane %v915_v26, 3  ;;  %v9180_v25 = vld [vmem:[#allocation81_spill] sm:$0xff] }
 0x297   : > { %v857_v19 = vsel %vm405_vm5, %v854_v12, %v856_v32  ;;  %v985_v53 = vmul.f32 %v9179_v45, %v701_v14  ;;  %v1558_v38 = vrot.slane %v6599_v52, 6  ;;  %v983_v39 = vmul.f32 %v9179_v45, %v9175_v59 }
 0x298   : > { %v860_v50 = vadd.f32 %v855_v5, %v843_v6  ;;  %v1051_v61 = vmul.f32 %v9180_v25, %v9175_v59  ;;  %v861_v48 = vadd.f32 %v857_v19, %v844_v8  ;;  %v1082_v21 = vadd.f32 %v6416_v34, %v1031_v11 }
 0x299   : > { %v6630_v55 = vmul.f32 %v9181_v7, %v9175_v59  ;;  %v923_v26 = vsel %vm403_vm4, %v921_v42, %v922_v49  ;;  %v925_v16 = vsel %vm403_vm4, %v922_v49, %v924_v31  ;;  %v990_v32 = vrot.slane %v984_v28, 4  ;;  %v1162_v31 = vpop.permute.xlu0 %1161 }
 0x29a   : > { %v911_v12 = vadd.f32 %v6461_v35, %v860_v50  ;;  %v912_v54 = vadd.f32 %v6470_v29, %v861_v48  ;;  %v1145_v6 = vsel %vm1143_vm13, 0.0, %v1137_v9  ;;  %v992_v45 = vrot.slane %v985_v53, 4 }
 0x29b   : > { %v1052_v34 = vmul.f32 %v9180_v25, %v6335_v24  ;;  %v1053_v11 = vmul.f32 %v9180_v25, %v701_v14  ;;  %v989_v59 = vrot.slane %v983_v39, 4  ;;  %v1057_v8 = vrot.slane %v1051_v61, 5 }
 0x29c   : > { %v928_v5 = vadd.f32 %v923_v26, %v911_v12  ;;  %v929_v19 = vadd.f32 %v925_v16, %v912_v54  ;;  %v1121_v35 = vmul.f32 %v9181_v7, %v701_v14  ;;  %v1099_v42 = vadd.f32 %v6565_v56, %v1082_v21 }
 0x29d   : > { %v1125_v29 = vrot.slane %v6630_v55, 6  ;;  %v6645_v49 = vmul.f32 %v9181_v7, %v6335_v24  ;;  %v1278_v28 = vmul.f32 %v9169_v44, %v1145_v6  ;;  %v991_v9 = vsel %vm307_vm0, %v989_v59, %v990_v32 }
 0x29e   : > { %v979_v50 = vadd.f32 %v6478_v40, %v928_v5  ;;  %v980_v53 = vadd.f32 %v6483_v13, %v929_v19  ;;  %v1346_v14 = vmul.f32 %v9171_v2, %v1145_v6  ;;  %v993_v56 = vsel %vm307_vm0, %v990_v32, %v992_v45 }
 0x29f   : > { %v1058_v39 = vrot.slane %v1052_v34, 5  ;;  %v1060_v25 = vrot.slane %v1053_v11, 5  ;;  %v1414_v24 = vmul.f32 %v9172_v46, %v1145_v6  ;;  %v1128_v48 = vrot.slane %v1121_v35, 6  ;;  %v1164_v11 = vpop.permute.xlu0 %1163 }
 0x2a0   : > { %v997_v61 = vadd.f32 %v993_v56, %v980_v53  ;;  %v1169_v21 = vsel %vm1143_vm13, 0.0, %v1162_v31  ;;  %v1482_v44 = vmul.f32 %v9173_v0, %v1145_v6  ;;  %v1126_v40 = vrot.slane %v6645_v49, 6  ;;  %v9186_v31 = vld [vmem:[#allocation103_spill] sm:$0xff] }
 0x2a1   : > { %v9183_v13 = vstv %s9141_s15  ;;  %v6660_v12 = vmul.f32 %v9168_v36, %v1145_v6  ;;  %v1284_v2 = vrot.slane %v1278_v28, 2  ;;  %v996_v26 = vadd.f32 %v991_v9, %v979_v50  ;;  %v1148_v50 = vpop.permute.xlu1 %1147  ;;  %s7474_s15 = sld [smem:[#allocation2 + $0x104]] }
 0x2a2   : > { %v1186_v7 = vmul.f32 %v9183_v13, %v1145_v6  ;;  %v1048_v54 = vadd.f32 %v6493_v23, %v997_v61  ;;  %v1352_v16 = vrot.slane %v1346_v14, 3  ;;  %v1550_v46 = vmul.f32 %v9174_v3, %v1145_v6 }
 0x2a3   : > { %v1059_v32 = vsel %vm400_vm3, %v1057_v8, %v1058_v39  ;;  %v1061_v5 = vsel %vm400_vm3, %v1058_v39, %v1060_v25  ;;  %v9184_v45 = vstv %s9182_s18  ;;  %v1420_v34 = vrot.slane %v1414_v24, 4  ;;  %v9191_v24 = vld [vmem:[#allocation106_spill] sm:$0xff] }
 0x2a4   : > { %v1198_v0 = vmul.f32 %v9184_v45, %v1169_v21  ;;  %v1065_v59 = vadd.f32 %v1061_v5, %v1048_v54  ;;  %v1129_v36 = vsel %vm398_vm2, %v1126_v40, %v1128_v48  ;;  %v6671_v19 = vadd.f32 %v1186_v7, %v1099_v42  ;;  %v9192_v48 = vld [vmem:[#allocation107_spill] sm:$0xff] }
 0x2a5   : > { %v1488_v35 = vrot.slane %v1482_v44, 5  ;;  %v1216_v23 = vrot.slane %v6660_v12, 1  ;;  %v6677_v3 = vsel %vm405_vm5, %v1283_v4, %v1284_v2  ;;  %v9185_v6 = vrot.slane %v6568_v62, 2  ;;  %v1160_v5 = vpop.permute.xlu1 %1159 }
 0x2a6   : > { %v6685_v28 = vmul.f32 %v9186_v31, %v1169_v21  ;;  %v1047_v42 = vadd.f32 %v6488_v15, %v996_v26  ;;  %v9187_v53 = vrot.slane %v6538_v41, 3  ;;  %v1556_v18 = vrot.slane %v1550_v46, 6 }
 0x2a7   : > { %v6682_v8 = vsel %vm405_vm5, %v1284_v2, %v9185_v6  ;;  %v1170_v4 = vsel %vm1143_vm13, 0.0, %v1164_v11  ;;  %v1116_v14 = vadd.f32 %v6511_v58, %v1065_v59  ;;  %v9188_v62 = vrot.slane %v6580_v37, 3  ;;  %v1150_v59 = vpop.permute.xlu0 %1149 }
 0x2a8   : > { %v6691_v9 = vsel %vm403_vm4, %v9187_v53, %v1352_v16  ;;  %v9189_v39 = vrot.slane %v6542_v51, 4  ;;  %v1081_v15 = vadd.f32 %v6411_v27, %v6610_v60  ;;  %v6710_v41 = vsel %vm307_vm0, %v1420_v34, %v1422_v47  ;;  %v9194_v47 = vld [vmem:[#allocation111_spill] sm:$0xff] }
 0x2a9   : > { %v6698_v56 = vsel %vm403_vm4, %v1352_v16, %v9188_v62  ;;  %v9190_v58 = vrot.slane %v6546_v43, 5  ;;  %v6720_v51 = vsel %vm400_vm3, %v1488_v35, %v1490_v20  ;;  %v6723_v61 = vmul.f32 %v9191_v24, %v1169_v21  ;;  %v9196_v16 = vld [vmem:[#allocation112_spill] sm:$0xff] }
 0x2aa   : > { %v6703_v25 = vsel %vm307_vm0, %v9189_v39, %v1420_v34  ;;  %v6726_v27 = vmul.f32 %v9192_v48, %v1169_v21  ;;  %v6729_v60 = vmul.f32 %v9193_v17, %v1169_v21  ;;  %v6732_v44 = vmul.f32 %v9194_v47, %v1169_v21 }
 0x2ab   : > { %v6715_v37 = vsel %vm400_vm3, %v9190_v58, %v1488_v35  ;;  %v1245_v43 = vmul.f32 %v9186_v31, %v1170_v4  ;;  %v1064_v13 = vadd.f32 %v1059_v32, %v1047_v42  ;;  %v9195_v33 = vrot.slane %v6552_v22, 6 }
 0x2ac   : > { %v1250_v7 = vrot.slane %v6685_v28, 1  ;;  %v1313_v2 = vmul.f32 %v9191_v24, %v1170_v4  ;;  %v1133_v26 = vadd.f32 %v1129_v36, %v1116_v14  ;;  %v6745_v54 = vsel %vm398_vm2, %v1556_v18, %v1558_v38 }
 0x2ad   : > { %v6738_v20 = vsel %vm398_vm2, %v9195_v33, %v1556_v18  ;;  %v6748_v46 = vmul.f32 %v9196_v16, %v1169_v21  ;;  %v1098_v32 = vadd.f32 %v6562_v10, %v1081_v15  ;;  %v1318_v22 = vrot.slane %v6723_v61, 2 }
 0x2ae   : > { %v1381_v45 = vmul.f32 %v9192_v48, %v1170_v4  ;;  %v1449_v34 = vmul.f32 %v9193_v17, %v1170_v4  ;;  %v1517_v11 = vmul.f32 %v9194_v47, %v1170_v4  ;;  %v1386_v52 = vrot.slane %v6726_v27, 3 }
 0x2af   : > { %v1454_v38 = vrot.slane %v6729_v60, 4  ;;  %v1522_v21 = vrot.slane %v6732_v44, 5  ;;  %v1252_v36 = vrot.slane %v1245_v43, 1  ;;  %v1320_v35 = vrot.slane %v1313_v2, 2  ;;  %v1172_v44 = vpop.permute.xlu1 %1171 }
 0x2b0   : > { %v1585_v10 = vmul.f32 %v9196_v16, %v1170_v4  ;;  %v6760_v6 = vsel %vm1143_vm13, 0.0, %v1148_v50  ;;  %v1168_v42 = vsel %vm1143_vm13, 0.0, %v1160_v5  ;;  %v6763_v53 = vadd.f32 %v1198_v0, %v1133_v26 }
 0x2b1   : > { %v1590_v18 = vrot.slane %v6748_v46, 6  ;;  %v1187_v14 = vadd.f32 %v6422_v63, %v1098_v32  ;;  %v6768_v62 = vsel %vm1143_vm13, 0.0, %v1150_v59  ;;  %v1388_v39 = vrot.slane %v1381_v45, 3 }
 0x2b2   : > { %v1456_v15 = vrot.slane %v1449_v34, 4  ;;  %v1524_v58 = vrot.slane %v1517_v11, 5  ;;  %v1115_v4 = vadd.f32 %v6498_v1, %v1064_v13  ;;  %v9197_v50 = vstv %s5924_s21  ;;  %v1174_v34 = vpop.permute.xlu0 %1173  ;;  %s7233_s21 = sld [smem:[#allocation2 + $0xa5]] }
 0x2b3   : > { %v1191_v61 = vmul.f32 %v9197_v50, %v6760_v6  ;;  %v1311_v27 = vmul.f32 %v9191_v24, %v1168_v42  ;;  %v1379_v0 = vmul.f32 %v9192_v48, %v1168_v42  ;;  %v1447_v60 = vmul.f32 %v9193_v17, %v1168_v42 }
 0x2b4   : > { %v6780_v63 = vsel %vm407_vm6, %v1250_v7, %v1252_v36  ;;  %v6783_v43 = vsel %vm405_vm5, %v1318_v22, %v1320_v35  ;;  %v1592_v33 = vrot.slane %v1585_v10, 6  ;;  %v9198_v1 = vmov %v9197_v50  ;;  %v9201_v36 = vld [vmem:[#allocation113_spill] sm:$0xff] }
 0x2b5   : > { %v1192_v13 = vmul.f32 %v9198_v1, %v6768_v62  ;;  %v1193_v24 = vadd.f32 %v1191_v61, %v1187_v14  ;;  %v1127_v48 = vsel %vm398_vm2, %v1125_v29, %v1126_v40  ;;  %v1243_v17 = vmul.f32 %v9186_v31, %v1168_v42 }
 0x2b6   : > { %v1515_v2 = vmul.f32 %v9194_v47, %v1168_v42  ;;  %v6796_v26 = vsel %vm403_vm4, %v1386_v52, %v1388_v39  ;;  %v6799_v32 = vsel %vm307_vm0, %v1454_v38, %v1456_v15  ;;  %v1132_v45 = vadd.f32 %v1127_v48, %v1115_v4  ;;  %v1152_v4 = vpop.permute.xlu1 %1151 }
 0x2b7   : > { %v1194_v5 = vadd.f32 %v1192_v13, %v6671_v19  ;;  %v6803_v49 = vsel %vm400_vm3, %v1522_v21, %v1524_v58  ;;  %v1317_v55 = vrot.slane %v1311_v27, 2  ;;  %v1385_v11 = vrot.slane %v1379_v0, 3 }
 0x2b8   : > { %v1453_v29 = vrot.slane %v1447_v60, 4  ;;  %v6808_v40 = vsel %vm398_vm2, %v1590_v18, %v1592_v33  ;;  %v9199_v31 = vrot.slane %v6526_v30, 1  ;;  %v9200_v19 = vstv %s9182_s18  ;;  %v1616_v60 = vpop.permute.xlu0 %1615  ;;  %s7487_s18 = sld [smem:[#allocation2 + $0x10b]] }
 0x2b9   : > { %v1197_v59 = vmul.f32 %v9200_v19, %v1168_v42  ;;  %v1226_v35 = vmul.f32 %v9201_v36, %v6760_v6  ;;  %v9202_v14 = vrot.slane %v6555_v57, 1  ;;  %v1249_v15 = vrot.slane %v1243_v17, 1 }
 0x2ba   : > { %v1217_v47 = vsel %vm407_vm6, %v9199_v31, %v1216_v23  ;;  %v1521_v58 = vrot.slane %v1515_v2, 5  ;;  %v1583_v61 = vmul.f32 %v9196_v16, %v1168_v42  ;;  %v6826_v27 = vsel %vm1143_vm13, 0.0, %v1174_v34  ;;  %v9203_v16 = vld [vmem:[#allocation114_spill] sm:$0xff] }
 0x2bb   : > { %v1222_v10 = vadd.f32 %v1217_v47, %v1193_v24  ;;  %v1219_v39 = vsel %vm407_vm6, %v1216_v23, %v9202_v14  ;;  %v1199_v30 = vadd.f32 %v1197_v59, %v1132_v45  ;;  %v6829_v0 = vsel %vm405_vm5, %v1317_v55, %v1318_v22  ;;  %v9206_v55 = vld [vmem:[#allocation116_spill] sm:$0xff] }
 0x2bc   : > { %v1223_v50 = vadd.f32 %v1219_v39, %v1194_v5  ;;  %v6832_v57 = vsel %vm403_vm4, %v1385_v11, %v1386_v52  ;;  %v6835_v12 = vsel %vm307_vm0, %v1453_v29, %v1454_v38  ;;  %v6838_v23 = vsel %vm1143_vm13, 0.0, %v1172_v44 }
 0x2bd   : > { %v1232_v33 = vrot.slane %v1226_v35, 1  ;;  %v1294_v42 = vmul.f32 %v9203_v16, %v6760_v6  ;;  %v1158_v1 = vsel %vm1143_vm13, 0.0, %v1152_v4  ;;  %v1227_v22 = vmul.f32 %v9201_v36, %v6768_v62 }
 0x2be   : > { %v6846_v52 = vsel %vm400_vm3, %v1521_v58, %v1522_v21  ;;  %v9204_v13 = vstv %s5940_s17  ;;  %v1228_v24 = vmul.f32 %v9201_v36, %v1158_v1  ;;  %v1295_v44 = vmul.f32 %v9203_v16, %v6768_v62  ;;  %s7292_s17 = sld [smem:[#allocation2 + $0xb]] }
 0x2bf   : > { %v1204_v38 = vmul.f32 %v9204_v13, %v6826_v27  ;;  %v1589_v48 = vrot.slane %v1583_v61, 6  ;;  %v1251_v17 = vsel %vm407_vm6, %v1249_v15, %v1250_v7  ;;  %v1233_v2 = vrot.slane %v1227_v22, 1 }
 0x2c0   : > { %v1296_v5 = vmul.f32 %v9203_v16, %v1158_v1  ;;  %v9205_v21 = vmov %v9204_v13  ;;  %v1625_v34 = vsel %vm1624_vm14, 0.0, %v1616_v60  ;;  %v1362_v11 = vmul.f32 %v9206_v55, %v6760_v6 }
 0x2c1   : > { %v1203_v45 = vmul.f32 %v9205_v21, %v6838_v23  ;;  %v1235_v29 = vrot.slane %v1228_v24, 1  ;;  %v1300_v31 = vrot.slane %v1294_v42, 2  ;;  %v1234_v47 = vsel %vm407_vm6, %v1232_v33, %v1233_v2  ;;  %v9208_v33 = vld [vmem:[#allocation117_spill] sm:$0xff]  ;;  %v9209_v42 = vld [vmem:[#allocation118_spill] sm:$0xff] }
 0x2c2   : > { %v1301_v19 = vrot.slane %v1295_v44, 2  ;;  %v1363_v28 = vmul.f32 %v9206_v55, %v6768_v62  ;;  %v1239_v59 = vadd.f32 %v1234_v47, %v1222_v10  ;;  %v1303_v36 = vrot.slane %v1296_v5, 2 }
 0x2c3   : > { %v1236_v7 = vsel %vm407_vm6, %v1233_v2, %v1235_v29  ;;  %v1364_v35 = vmul.f32 %v9206_v55, %v1158_v1  ;;  %v6872_v14 = vsel %vm398_vm2, %v1589_v48, %v1590_v18  ;;  %v1206_v39 = vadd.f32 %v1204_v38, %v6763_v53 }
 0x2c4   : > { %v9207_v15 = vstv %s5963_s8  ;;  %v1240_v4 = vadd.f32 %v1236_v7, %v1223_v50  ;;  %v1205_v61 = vadd.f32 %v1203_v45, %v1199_v30  ;;  %v1368_v60 = vrot.slane %v1362_v11, 3 }
 0x2c5   : > { %v6877_v58 = vmul.f32 %v9207_v15, %v1625_v34  ;;  %v1430_v16 = vmul.f32 %v9208_v33, %v6760_v6  ;;  %v1290_v10 = vadd.f32 %v6677_v3, %v1239_v59  ;;  %v1498_v22 = vmul.f32 %v9209_v42, %v6760_v6  ;;  %v9210_v3 = vld [vmem:[#allocation119_spill] sm:$0xff] }
 0x2c6   : > { %v1291_v46 = vadd.f32 %v6682_v8, %v1240_v4  ;;  %v1302_v18 = vsel %vm405_vm5, %v1300_v31, %v1301_v19  ;;  %v1431_v53 = vmul.f32 %v9208_v33, %v6768_v62  ;;  %v1304_v13 = vsel %vm405_vm5, %v1301_v19, %v1303_v36 }
 0x2c7   : > { %v1307_v50 = vadd.f32 %v1302_v18, %v1290_v10  ;;  %v1369_v30 = vrot.slane %v1363_v28, 3  ;;  %v1371_v38 = vrot.slane %v1364_v35, 3  ;;  %v6890_v24 = vadd.f32 %v6780_v63, %v1206_v39  ;;  %v9211_v39 = vld [vmem:[#allocation121_spill] sm:$0xff]  ;;  %v9216_v18 = vld [vmem:[#allocation127_spill] sm:$0xff] }
 0x2c8   : > { %v1566_v44 = vmul.f32 %v9210_v3, %v6760_v6  ;;  %v1308_v48 = vadd.f32 %v1304_v13, %v1291_v46  ;;  %v1432_v2 = vmul.f32 %v9208_v33, %v1158_v1  ;;  %v1436_v8 = vrot.slane %v1430_v16, 4  ;;  %v1620_v6 = vpop.permute.xlu0 %1619  ;;  %v9214_v10 = vld [vmem:[#allocation125_spill] sm:$0xff] }
 0x2c9   : > { %v1358_v5 = vadd.f32 %v6691_v9, %v1307_v50  ;;  %v1499_v21 = vmul.f32 %v9209_v42, %v6768_v62  ;;  %v1500_v45 = vmul.f32 %v9209_v42, %v1158_v1  ;;  %v1437_v11 = vrot.slane %v1431_v53, 4 }
 0x2ca   : > { %v1359_v55 = vadd.f32 %v6698_v56, %v1308_v48  ;;  %v1567_v63 = vmul.f32 %v9210_v3, %v6768_v62  ;;  %v1568_v29 = vmul.f32 %v9210_v3, %v1158_v1  ;;  %v6903_v31 = vadd.f32 %v1251_v17, %v1205_v61  ;;  %v9212_v61 = vld [vmem:[#allocation122_spill] sm:$0xff] }
 0x2cb   : > { %v1504_v47 = vrot.slane %v1498_v22, 5  ;;  %v1370_v19 = vsel %vm403_vm4, %v1368_v60, %v1369_v30  ;;  %v1372_v9 = vsel %vm403_vm4, %v1369_v30, %v1371_v38  ;;  %v1572_v28 = vrot.slane %v1566_v44, 6  ;;  %v9213_v60 = vld [vmem:[#allocation123_spill] sm:$0xff]  ;;  %v9215_v22 = vld [vmem:[#allocation126_spill] sm:$0xff] }
 0x2cc   : > { %v1375_v7 = vadd.f32 %v1370_v19, %v1358_v5  ;;  %v1376_v59 = vadd.f32 %v1372_v9, %v1359_v55  ;;  %v1439_v36 = vrot.slane %v1432_v2, 4  ;;  %v1505_v35 = vrot.slane %v1499_v21, 5  ;;  %v9217_v2 = vld [vmem:[#allocation120_spill] sm:$0xff]  ;;  %v1176_v21 = vpop.permute.xlu1 %1175 }
 0x2cd   : > { %v1507_v56 = vrot.slane %v1500_v45, 5  ;;  %v6908_v15 = vmul.f32 %v9211_v39, %v1625_v34  ;;  %v1627_v62 = vsel %vm1624_vm14, 0.0, %v1620_v6  ;;  %v1438_v1 = vsel %vm307_vm0, %v1436_v8, %v1437_v11 }
 0x2ce   : > { %v1573_v17 = vrot.slane %v1567_v63, 6  ;;  %v1575_v4 = vrot.slane %v1568_v29, 6  ;;  %v6913_v33 = vmul.f32 %v9212_v61, %v1625_v34  ;;  %v6916_v16 = vmul.f32 %v9213_v60, %v1625_v34 }
 0x2cf   : > { %v6919_v42 = vmul.f32 %v9214_v10, %v1625_v34  ;;  %v6922_v46 = vmul.f32 %v9215_v22, %v1625_v34  ;;  %v6925_v53 = vmul.f32 %v9216_v18, %v1625_v34  ;;  %v1426_v13 = vadd.f32 %v6703_v25, %v1375_v7 }
 0x2d0   : > { %v1427_v50 = vadd.f32 %v6710_v41, %v1376_v59  ;;  %v1440_v30 = vsel %vm307_vm0, %v1437_v11, %v1439_v36  ;;  %v6931_v38 = vmul.f32 %v9211_v39, %v1627_v62  ;;  %v1506_v3 = vsel %vm400_vm3, %v1504_v47, %v1505_v35  ;;  %v9219_v47 = vld [vmem:[#allocation129_spill] sm:$0xff] }
 0x2d1   : > { %v1508_v44 = vsel %vm400_vm3, %v1505_v35, %v1507_v56  ;;  %v1260_v8 = vmul.f32 %v9217_v2, %v6838_v23  ;;  %v6939_v34 = vsel %vm398_vm2, %v1572_v28, %v1573_v17  ;;  %v6942_v25 = vsel %vm398_vm2, %v1573_v17, %v1575_v4  ;;  %v9218_v28 = vld [vmem:[#allocation128_spill] sm:$0xff] }
 0x2d2   : > { %v1764_v41 = vrot.slane %v6913_v33, 2  ;;  %v6946_v5 = vmul.f32 %v9212_v61, %v1627_v62  ;;  %v1443_v29 = vadd.f32 %v1438_v1, %v1426_v13  ;;  %v1444_v6 = vadd.f32 %v1440_v30, %v1427_v50 }
 0x2d3   : > { %v6954_v19 = vmul.f32 %v9213_v60, %v1627_v62  ;;  %v1266_v9 = vrot.slane %v1260_v8, 1  ;;  %v1328_v7 = vmul.f32 %v9218_v28, %v6838_v23  ;;  %v1182_v59 = vsel %vm1143_vm13, 0.0, %v1176_v21 }
 0x2d4   : > { %v1261_v36 = vmul.f32 %v9217_v2, %v6826_v27  ;;  %v6963_v56 = vmul.f32 %v9214_v10, %v1627_v62  ;;  %v6966_v1 = vmul.f32 %v9215_v22, %v1627_v62  ;;  %v1262_v17 = vmul.f32 %v9217_v2, %v1182_v59 }
 0x2d5   : > { %v6970_v4 = vmul.f32 %v9216_v18, %v1627_v62  ;;  %v1329_v50 = vmul.f32 %v9218_v28, %v6826_v27  ;;  %v1330_v30 = vmul.f32 %v9218_v28, %v1182_v59  ;;  %v1494_v8 = vadd.f32 %v6715_v37, %v1443_v29 }
 0x2d6   : > { %v1267_v13 = vrot.slane %v1261_v36, 1  ;;  %v1495_v21 = vadd.f32 %v6720_v51, %v1444_v6  ;;  %v1396_v48 = vmul.f32 %v9219_v47, %v6838_v23  ;;  %v1269_v63 = vrot.slane %v1262_v17, 1 }
 0x2d7   : > { %v1334_v2 = vrot.slane %v1328_v7, 2  ;;  %v1398_v36 = vmul.f32 %v9219_v47, %v1182_v59  ;;  %v1337_v28 = vrot.slane %v1330_v30, 2  ;;  %v1397_v37 = vmul.f32 %v9219_v47, %v6826_v27  ;;  %v9220_v30 = vld [vmem:[#allocation130_spill] sm:$0xff] }
 0x2d8   : > { %v1268_v62 = vsel %vm407_vm6, %v1266_v9, %v1267_v13  ;;  %v1270_v55 = vsel %vm407_vm6, %v1267_v13, %v1269_v63  ;;  %v1335_v17 = vrot.slane %v1329_v50, 2  ;;  %v1512_v7 = vadd.f32 %v1508_v44, %v1495_v21  ;;  %v9222_v50 = vld [vmem:[#allocation132_spill] sm:$0xff] }
 0x2d9   : > { %v1273_v45 = vadd.f32 %v1268_v62, %v6903_v31  ;;  %v1274_v6 = vadd.f32 %v1270_v55, %v6890_v24  ;;  %v2039_v9 = vrot.slane %v6970_v4, 6  ;;  %v1402_v11 = vrot.slane %v1396_v48, 3  ;;  %v9221_v48 = vld [vmem:[#allocation131_spill] sm:$0xff] }
 0x2da   : > { %v1336_v31 = vsel %vm405_vm5, %v1334_v2, %v1335_v17  ;;  %v1405_v13 = vrot.slane %v1398_v36, 3  ;;  %v1466_v47 = vmul.f32 %v9220_v30, %v1182_v59  ;;  %v6994_v62 = vadd.f32 %v1506_v3, %v1494_v8 }
 0x2db   : > { %v1324_v35 = vadd.f32 %v6829_v0, %v1273_v45  ;;  %v1325_v63 = vadd.f32 %v6783_v43, %v1274_v6  ;;  %v1338_v29 = vsel %vm405_vm5, %v1335_v17, %v1337_v28  ;;  %v1403_v24 = vrot.slane %v1397_v37, 3  ;;  %v1618_v45 = vpop.permute.xlu1 %1617 }
 0x2dc   : > { %v1464_v44 = vmul.f32 %v9220_v30, %v6838_v23  ;;  %v1532_v55 = vmul.f32 %v9221_v48, %v6838_v23  ;;  %v1465_v43 = vmul.f32 %v9220_v30, %v6826_v27  ;;  %v1563_v3 = vadd.f32 %v6745_v54, %v1512_v7 }
 0x2dd   : > { %v1341_v51 = vadd.f32 %v1336_v31, %v1324_v35  ;;  %v1342_v0 = vadd.f32 %v1338_v29, %v1325_v63  ;;  %v7008_v8 = vmul.f32 %v9222_v50, %v6838_v23  ;;  %v1404_v21 = vsel %vm403_vm4, %v1402_v11, %v1403_v24  ;;  %v1643_v31 = vpop.permute.xlu0 %1642 }
 0x2de   : > { %v1406_v36 = vsel %vm403_vm4, %v1403_v24, %v1405_v13  ;;  %v1473_v28 = vrot.slane %v1466_v47, 4  ;;  %v1533_v37 = vmul.f32 %v9221_v48, %v6826_v27  ;;  %v1534_v6 = vmul.f32 %v9221_v48, %v1182_v59 }
 0x2df   : > { %v1392_v35 = vadd.f32 %v6832_v57, %v1341_v51  ;;  %v1393_v2 = vadd.f32 %v6796_v26, %v1342_v0  ;;  %v1602_v54 = vmul.f32 %v9222_v50, %v1182_v59  ;;  %v1626_v23 = vsel %vm1624_vm14, 0.0, %v1618_v45 }
 0x2e0   : > { %v1470_v17 = vrot.slane %v1464_v44, 4  ;;  %v1538_v7 = vrot.slane %v1532_v55, 5  ;;  %v1471_v51 = vrot.slane %v1465_v43, 4  ;;  %v1580_v26 = vadd.f32 %v6942_v25, %v1563_v3 }
 0x2e1   : > { %v1409_v29 = vadd.f32 %v1404_v21, %v1392_v35  ;;  %v1410_v57 = vadd.f32 %v1406_v36, %v1393_v2  ;;  %v1606_v11 = vrot.slane %v7008_v8, 6  ;;  %v7025_v63 = vmul.f32 %v9222_v50, %v6826_v27 }
 0x2e2   : > { %v1759_v59 = vmul.f32 %v9212_v61, %v1626_v23  ;;  %v1474_v47 = vsel %vm307_vm0, %v1471_v51, %v1473_v28  ;;  %v1827_v24 = vmul.f32 %v9213_v60, %v1626_v23  ;;  %v1539_v44 = vrot.slane %v1533_v37, 5 }
 0x2e3   : > { %v1460_v13 = vadd.f32 %v6835_v12, %v1409_v29  ;;  %v1461_v30 = vadd.f32 %v6799_v32, %v1410_v57  ;;  %v1541_v48 = vrot.slane %v1534_v6, 5  ;;  %v1609_v25 = vrot.slane %v1602_v54, 6  ;;  %v1645_v6 = vpop.permute.xlu0 %1644 }
 0x2e4   : > { %v1895_v55 = vmul.f32 %v9214_v10, %v1626_v23  ;;  %v1677_v0 = vstv %s7003_s14  ;;  %v1650_v61 = vsel %vm1624_vm14, 0.0, %v1643_v31  ;;  %v1963_v12 = vmul.f32 %v9215_v22, %v1626_v23  ;;  %s7497_s14 = sld [smem:[#allocation2 + $0x112]] }
 0x2e5   : > { %v1478_v27 = vadd.f32 %v1474_v47, %v1461_v30  ;;  %v1472_v32 = vsel %vm307_vm0, %v1470_v17, %v1471_v51  ;;  %v1607_v60 = vrot.slane %v7025_v63, 6  ;;  %v7043_v43 = vmul.f32 %v9211_v39, %v1626_v23 }
 0x2e6   : > { %v1765_v10 = vrot.slane %v1759_v59, 2  ;;  %v1477_v45 = vadd.f32 %v1472_v32, %v1460_v13  ;;  %v1540_v22 = vsel %vm400_vm3, %v1538_v7, %v1539_v44  ;;  %v1833_v50 = vrot.slane %v1827_v24, 3 }
 0x2e7   : > { %v1529_v3 = vadd.f32 %v6803_v49, %v1478_v27  ;;  %v1542_v35 = vsel %vm400_vm3, %v1539_v44, %v1541_v48  ;;  %v1679_v21 = vmul.f32 %v1677_v0, %v1650_v61  ;;  %v9223_v39 = vstv %s5963_s8  ;;  %v1629_v48 = vpop.permute.xlu1 %1628  ;;  %s7309_s8 = sld [smem:[#allocation2 + $0x27]] }
 0x2e8   : > { %v1667_v2 = vmul.f32 %v9223_v39, %v1626_v23  ;;  %v1901_v36 = vrot.slane %v1895_v55, 4  ;;  %v1610_v37 = vsel %vm398_vm2, %v1607_v60, %v1609_v25  ;;  %v1969_v29 = vrot.slane %v1963_v12, 5 }
 0x2e9   : > { %v1546_v28 = vadd.f32 %v1542_v35, %v1529_v3  ;;  %v7062_v49 = vstv %s7019_s25  ;;  %v1697_v17 = vrot.slane %v7043_v43, 1  ;;  %v7070_v7 = vsel %vm405_vm5, %v1764_v41, %v1765_v10  ;;  %s7511_s25 = sld [smem:[#allocation2 + $0x119]] }
 0x2ea   : > { %v7064_v54 = vadd.f32 %v1667_v2, %v1580_v26  ;;  %v2031_v57 = vmul.f32 %v9216_v18, %v1626_v23  ;;  %v1528_v51 = vadd.f32 %v6846_v52, %v1477_v45  ;;  %v9224_v31 = vrot.slane %v6946_v5, 2 }
 0x2eb   : > { %v9225_v26 = vrot.slane %v6916_v16, 3  ;;  %v9226_v33 = vrot.slane %v6954_v19, 3  ;;  %v9227_v18 = vrot.slane %v6919_v42, 4  ;;  %v9228_v5 = vrot.slane %v6963_v56, 4 }
 0x2ec   : > { %v7077_v59 = vsel %vm405_vm5, %v1765_v10, %v9224_v31  ;;  %v1791_v16 = vstv %s7033_s9  ;;  %v1651_v30 = vsel %vm1624_vm14, 0.0, %v1645_v6  ;;  %v1597_v47 = vadd.f32 %v6808_v40, %v1546_v28  ;;  %v1641_v31 = vpop.permute.xlu1 %1640  ;;  %s7526_s9 = sld [smem:[#allocation2 + $0x120]] }
 0x2ed   : > { %v7082_v13 = vsel %vm403_vm4, %v9225_v26, %v1833_v50  ;;  %v7087_v41 = vsel %vm403_vm4, %v1833_v50, %v9226_v33  ;;  %v7092_v52 = vsel %vm307_vm0, %v9227_v18, %v1901_v36  ;;  %v7097_v23 = vsel %vm307_vm0, %v1901_v36, %v9228_v5 }
 0x2ee   : > { %v9229_v19 = vrot.slane %v6922_v46, 5  ;;  %v9230_v42 = vrot.slane %v6966_v1, 5  ;;  %v1859_v56 = vstv %s7038_s7  ;;  %v2037_v25 = vrot.slane %v2031_v57, 6  ;;  %s7532_s7 = sld [smem:[#allocation2 + $0x127]] }
 0x2ef   : > { %v7114_v55 = vmul.f32 %v7062_v49, %v1650_v61  ;;  %v1927_v27 = vstv %s7045_s20  ;;  %v1995_v12 = vstv %s7047_s24  ;;  %v1545_v40 = vadd.f32 %v1540_v22, %v1528_v51  ;;  %s7534_s20 = sld [smem:[#allocation2 + $0x12e]]  ;;  %s7597_s24 = sld [smem:[#allocation2 + $0x84]] }
 0x2f0   : > { %v7105_v24 = vsel %vm400_vm3, %v9229_v19, %v1969_v29  ;;  %v7110_v44 = vsel %vm400_vm3, %v1969_v29, %v9230_v42  ;;  %v7120_v46 = vmul.f32 %v1791_v16, %v1650_v61  ;;  %v7123_v32 = vstv %s7051_s13  ;;  %s7660_s13 = sld [smem:[#allocation2 + $0x184]] }
 0x2f1   : > { %v1726_v1 = vmul.f32 %v7062_v49, %v1651_v30  ;;  %v7126_v10 = vmul.f32 %v1859_v56, %v1650_v61  ;;  %v1794_v45 = vmul.f32 %v1791_v16, %v1651_v30  ;;  %v1862_v3 = vmul.f32 %v1859_v56, %v1651_v30 }
 0x2f2   : > { %v1930_v50 = vmul.f32 %v1927_v27, %v1651_v30  ;;  %v1614_v35 = vadd.f32 %v1610_v37, %v1597_v47  ;;  %v7128_v39 = vmul.f32 %v1927_v27, %v1650_v61  ;;  %v7130_v2 = vmul.f32 %v1995_v12, %v1650_v61 }
 0x2f3   : > { %v1562_v36 = vadd.f32 %v6738_v20, %v6994_v62  ;;  %v9231_v22 = vrot.slane %v6925_v53, 6  ;;  %v7142_v29 = vsel %vm398_vm2, %v2037_v25, %v2039_v9  ;;  %v1731_v6 = vrot.slane %v7114_v55, 1  ;;  %v1631_v62 = vpop.permute.xlu0 %1630 }
 0x2f4   : > { %v7146_v37 = vmul.f32 %v7123_v32, %v1650_v61  ;;  %v1799_v57 = vrot.slane %v7120_v46, 2  ;;  %v1733_v51 = vrot.slane %v1726_v1, 1  ;;  %v1998_v20 = vmul.f32 %v1995_v12, %v1651_v30 }
 0x2f5   : > { %v7137_v28 = vsel %vm398_vm2, %v9231_v22, %v2037_v25  ;;  %v1579_v53 = vadd.f32 %v6939_v34, %v1562_v36  ;;  %v1867_v26 = vrot.slane %v7126_v10, 3  ;;  %v1801_v4 = vrot.slane %v1794_v45, 2 }
 0x2f6   : > { %v1869_v33 = vrot.slane %v1862_v3, 3  ;;  %v1937_v9 = vrot.slane %v1930_v50, 4  ;;  %v7153_v18 = vadd.f32 %v1679_v21, %v1614_v35  ;;  %v1935_v61 = vrot.slane %v7128_v39, 4 }
 0x2f7   : > { %v2003_v5 = vrot.slane %v7130_v2, 5  ;;  %v2066_v47 = vmul.f32 %v7123_v32, %v1651_v30  ;;  %v2071_v19 = vrot.slane %v7146_v37, 6  ;;  %v1671_v34 = vstv %s7118_s29  ;;  %v1655_v22 = vpop.permute.xlu0 %1654  ;;  %s7678_s29 = sld [smem:[#allocation2 + $0x8b]] }
 0x2f8   : > { %v7161_v42 = vsel %vm1624_vm14, 0.0, %v1629_v48  ;;  %v1649_v25 = vsel %vm1624_vm14, 0.0, %v1641_v31  ;;  %v7169_v21 = vsel %vm407_vm6, %v1731_v6, %v1733_v51  ;;  %v2005_v1 = vrot.slane %v1998_v20, 5  ;;  %v1653_v31 = vpop.permute.xlu1 %1652 }
 0x2f9   : > { %v1668_v45 = vadd.f32 %v6877_v58, %v1579_v53  ;;  %v7173_v30 = vsel %vm1624_vm14, 0.0, %v1631_v62  ;;  %v7180_v48 = vsel %vm405_vm5, %v1799_v57, %v1801_v4  ;;  %v7185_v3 = vsel %vm403_vm4, %v1867_v26, %v1869_v33 }
 0x2fa   : > { %v7188_v50 = vsel %vm307_vm0, %v1935_v61, %v1937_v9  ;;  %v1596_v58 = vadd.f32 %v6872_v14, %v1545_v40  ;;  %v2073_v35 = vrot.slane %v2066_v47, 6  ;;  %v1672_v39 = vmul.f32 %v1671_v34, %v7161_v42 }
 0x2fb   : > { %v1792_v2 = vmul.f32 %v1791_v16, %v1649_v25  ;;  %v1860_v36 = vmul.f32 %v1859_v56, %v1649_v25  ;;  %v1673_v51 = vmul.f32 %v1671_v34, %v7173_v30  ;;  %v1724_v20 = vmul.f32 %v7062_v49, %v1649_v25 }
 0x2fc   : > { %v1928_v53 = vmul.f32 %v1927_v27, %v1649_v25  ;;  %v1996_v62 = vmul.f32 %v1995_v12, %v1649_v25  ;;  %v7195_v4 = vsel %vm400_vm3, %v2003_v5, %v2005_v1  ;;  %v1674_v14 = vadd.f32 %v1672_v39, %v1668_v45 }
 0x2fd   : > { %v9232_v40 = vrot.slane %v6908_v15, 1  ;;  %v1608_v49 = vsel %vm398_vm2, %v1606_v11, %v1607_v60  ;;  %v1675_v56 = vadd.f32 %v1673_v51, %v7064_v54  ;;  %v1683_v12 = vstv %s7151_s30  ;;  %v1633_v51 = vpop.permute.xlu1 %1632  ;;  %s7703_s30 = sld [smem:[#allocation2 + $0x92]] }
 0x2fe   : > { %v1613_v27 = vadd.f32 %v1608_v49, %v1596_v58  ;;  %v7212_v33 = vsel %vm1624_vm14, 0.0, %v1655_v22  ;;  %v1678_v15 = vmul.f32 %v1677_v0, %v1649_v25  ;;  %v1798_v9 = vrot.slane %v1792_v2, 2 }
 0x2ff   : > { %v1698_v16 = vsel %vm407_vm6, %v9232_v40, %v1697_v17  ;;  %v1866_v47 = vrot.slane %v1860_v36, 3  ;;  %v7217_v63 = vsel %vm1624_vm14, 0.0, %v1653_v31  ;;  %v1730_v8 = vrot.slane %v1724_v20, 1 }
 0x300   : > { %v1934_v34 = vrot.slane %v1928_v53, 4  ;;  %v2002_v11 = vrot.slane %v1996_v62, 5  ;;  %v1706_v60 = vstv %s7164_s6  ;;  %v7225_v54 = vsel %vm398_vm2, %v2071_v19, %v2073_v35  ;;  %s7721_s6 = sld [smem:[#allocation2 + $0x5]] }
 0x301   : > { %v1703_v1 = vadd.f32 %v1698_v16, %v1674_v14  ;;  %v9233_v45 = vrot.slane %v6931_v38, 1  ;;  %v1774_v58 = vstv %s7175_s26  ;;  %v1680_v2 = vadd.f32 %v1678_v15, %v1613_v27  ;;  %s7723_s26 = sld [smem:[#allocation2 + $0x99]] }
 0x302   : > { %v2064_v36 = vmul.f32 %v7123_v32, %v1649_v25  ;;  %v1707_v22 = vmul.f32 %v1706_v60, %v7161_v42  ;;  %v7240_v35 = vsel %vm405_vm5, %v1798_v9, %v1799_v57  ;;  %v7245_v38 = vsel %vm403_vm4, %v1866_v47, %v1867_v26 }
 0x303   : > { %v1700_v0 = vsel %vm407_vm6, %v1697_v17, %v9233_v45  ;;  %v1685_v43 = vmul.f32 %v1683_v12, %v7212_v33  ;;  %v1684_v17 = vmul.f32 %v1683_v12, %v7217_v63  ;;  %v7254_v32 = vsel %vm307_vm0, %v1934_v34, %v1935_v61 }
 0x304   : > { %v1704_v39 = vadd.f32 %v1700_v0, %v1675_v56  ;;  %v7257_v46 = vsel %vm400_vm3, %v2002_v11, %v2003_v5  ;;  %v7262_v10 = vsel %vm407_vm6, %v1730_v8, %v1731_v6  ;;  %v1775_v57 = vmul.f32 %v1774_v58, %v7161_v42 }
 0x305   : > { %v1713_v26 = vrot.slane %v1707_v22, 1  ;;  %v1842_v25 = vstv %s7207_s23  ;;  %v7267_v20 = vsel %vm1624_vm14, 0.0, %v1633_v51  ;;  %v1708_v61 = vmul.f32 %v1706_v60, %v7173_v30  ;;  %s7730_s23 = sld [smem:[#allocation2 + $0xa0]] }
 0x306   : > { %v2070_v53 = vrot.slane %v2064_v36, 6  ;;  %v1687_v5 = vadd.f32 %v1685_v43, %v7153_v18  ;;  %v1709_v62 = vmul.f32 %v1706_v60, %v7267_v20  ;;  %v1776_v55 = vmul.f32 %v1774_v58, %v7173_v30 }
 0x307   : > { %v1686_v31 = vadd.f32 %v1684_v17, %v1680_v2  ;;  %v1714_v6 = vrot.slane %v1708_v61, 1  ;;  %v1777_v14 = vmul.f32 %v1774_v58, %v7267_v20  ;;  %v1843_v40 = vmul.f32 %v1842_v25, %v7161_v42  ;;  %v2529_v58 = vpop.permute.xlu0 %2528 }
 0x308   : > { %v1910_v16 = vstv %s7220_s5  ;;  %v1716_v49 = vrot.slane %v1709_v62, 1  ;;  %v1844_v56 = vmul.f32 %v1842_v25, %v7173_v30  ;;  %v1781_v27 = vrot.slane %v1775_v57, 2  ;;  %s7751_s5 = sld [smem:[#allocation2 + $0xa7]] }
 0x309   : > { %v1978_v12 = vstv %s7233_s21  ;;  %v1715_v18 = vsel %vm407_vm6, %v1713_v26, %v1714_v6  ;;  %v1782_v15 = vrot.slane %v1776_v55, 2  ;;  %v1784_v8 = vrot.slane %v1777_v14, 2  ;;  %s7780_s21 = sld [smem:[#allocation2 + $0xae]] }
 0x30a   : > { %v1717_v9 = vsel %vm407_vm6, %v1714_v6, %v1716_v49  ;;  %v1720_v47 = vadd.f32 %v1715_v18, %v1703_v1  ;;  %v1845_v34 = vmul.f32 %v1842_v25, %v7267_v20  ;;  %v2578_v11 = vstv %s7249_s11  ;;  %s7802_s11 = sld [smem:[#allocation2 + $0xc]] }
 0x30b   : > { %v1911_v60 = vmul.f32 %v1910_v16, %v7161_v42  ;;  %v2046_v45 = vstv %s7251_s2  ;;  %v1721_v0 = vadd.f32 %v1717_v9, %v1704_v39  ;;  %v1849_v2 = vrot.slane %v1843_v40, 3  ;;  %s7808_s2 = sld [smem:[#allocation2 + $0x13]] }
 0x30c   : > { %v1771_v36 = vadd.f32 %v7070_v7, %v1720_v47  ;;  %v1850_v22 = vrot.slane %v1844_v56, 3  ;;  %v1912_v51 = vmul.f32 %v1910_v16, %v7173_v30  ;;  %v1979_v43 = vmul.f32 %v1978_v12, %v7161_v42 }
 0x30d   : > { %v1772_v17 = vadd.f32 %v7077_v59, %v1721_v0  ;;  %v1783_v1 = vsel %vm405_vm5, %v1781_v27, %v1782_v15  ;;  %v1913_v57 = vmul.f32 %v1910_v16, %v7267_v20  ;;  %v1785_v26 = vsel %vm405_vm5, %v1782_v15, %v1784_v8 }
 0x30e   : > { %v1788_v25 = vadd.f32 %v1783_v1, %v1771_v36  ;;  %v1852_v61 = vrot.slane %v1845_v34, 3  ;;  %v1980_v39 = vmul.f32 %v1978_v12, %v7173_v30  ;;  %v7299_v7 = vsel %vm398_vm2, %v2070_v53, %v2071_v19 }
 0x30f   : > { %v2538_v59 = vsel %vm2537_vm15, %v2529_v58, 0.0  ;;  %v2047_v62 = vmul.f32 %v2046_v45, %v7161_v42  ;;  %v1789_v55 = vadd.f32 %v1785_v26, %v1772_v17  ;;  %v1917_v6 = vrot.slane %v1911_v60, 4 }
 0x310   : > { %v1839_v14 = vadd.f32 %v7082_v13, %v1788_v25  ;;  %v1851_v40 = vsel %vm403_vm4, %v1849_v2, %v1850_v22  ;;  %v1918_v16 = vrot.slane %v1912_v51, 4  ;;  %v1920_v19 = vrot.slane %v1913_v57, 4 }
 0x311   : > { %v1840_v37 = vadd.f32 %v7087_v41, %v1789_v55  ;;  %v1981_v42 = vmul.f32 %v1978_v12, %v7267_v20  ;;  %v2048_v53 = vmul.f32 %v2046_v45, %v7173_v30  ;;  %v1985_v49 = vrot.slane %v1979_v43, 5 }
 0x312   : > { %v1853_v56 = vsel %vm403_vm4, %v1850_v22, %v1852_v61  ;;  %v1856_v27 = vadd.f32 %v1851_v40, %v1839_v14  ;;  %v1986_v13 = vrot.slane %v1980_v39, 5  ;;  %v7318_v18 = vadd.f32 %v7169_v21, %v1687_v5 }
 0x313   : > { %v7321_v15 = vadd.f32 %v7262_v10, %v1686_v31  ;;  %v1857_v9 = vadd.f32 %v1853_v56, %v1840_v37  ;;  %v2049_v41 = vmul.f32 %v2046_v45, %v7267_v20  ;;  %v7326_v12 = vmul.f32 %v2578_v11, %v2538_v59  ;;  %v2533_v31 = vpop.permute.xlu0 %2532 }
 0x314   : > { %v2053_v30 = vrot.slane %v2047_v62, 6  ;;  %v1907_v47 = vadd.f32 %v7092_v52, %v1856_v27  ;;  %v1919_v8 = vsel %vm307_vm0, %v1917_v6, %v1918_v16  ;;  %v1921_v10 = vsel %vm307_vm0, %v1918_v16, %v1920_v19 }
 0x315   : > { %v1908_v21 = vadd.f32 %v7097_v23, %v1857_v9  ;;  %v1988_v5 = vrot.slane %v1981_v42, 5  ;;  %v2054_v20 = vrot.slane %v2048_v53, 6  ;;  %v1987_v60 = vsel %vm400_vm3, %v1985_v49, %v1986_v13  ;;  %v1657_v53 = vpop.permute.xlu1 %1656  ;;  %v9238_v9 = vld [vmem:[#allocation48_spill] sm:$0xff] }
 0x316   : > { %v1924_v34 = vadd.f32 %v1919_v8, %v1907_v47  ;;  %v7336_v45 = vstv %s7292_s17  ;;  %v7339_v0 = vstv %s7294_s22  ;;  %v2056_v58 = vrot.slane %v2049_v41, 6  ;;  %s7810_s17 = sld [smem:[#allocation2 + $0x1a]]  ;;  %s7814_s22 = sld [smem:[#allocation2 + $0x21]] }
 0x317   : > { %v1925_v52 = vadd.f32 %v1921_v10, %v1908_v21  ;;  %v7342_v2 = vstv %s7303_s16  ;;  %v7345_v36 = vstv %s7305_s28  ;;  %v7349_v22 = vstv %s7309_s8  ;;  %s7816_s16 = sld [smem:[#allocation2 + $0x28]]  ;;  %s7826_s28 = sld [smem:[#allocation2 + $0x2f]] }
 0x318   : > { %v1975_v23 = vadd.f32 %v7105_v24, %v1924_v34  ;;  %v7352_v51 = vstv %s7311_s12  ;;  %v7355_v43 = vsel %vm2537_vm15, %v2533_v31, 0.0  ;;  %v1989_v1 = vsel %vm400_vm3, %v1986_v13, %v1988_v5  ;;  %v9234_v5 = vld [vmem:[#allocation34_spill] sm:$0xff]  ;;  %s7840_s8 = sld [smem:[#allocation2 + $0x18b]]  ;;  %s7864_s12 = sld [smem:[#allocation2 + $0x192]] }
 0x319   : > { %v1976_v17 = vadd.f32 %v7110_v44, %v1925_v52  ;;  %v7362_v57 = vmul.f32 %v7336_v45, %v2538_v59  ;;  %v7365_v26 = vmul.f32 %v7339_v0, %v2538_v59  ;;  %v2055_v25 = vsel %vm398_vm2, %v2053_v30, %v2054_v20 }
 0x31a   : > { %v1992_v24 = vadd.f32 %v1987_v60, %v1975_v23  ;;  %v7369_v61 = vmul.f32 %v7342_v2, %v2538_v59  ;;  %v7372_v39 = vmul.f32 %v7345_v36, %v2538_v59  ;;  %v7375_v44 = vmul.f32 %v7349_v22, %v2538_v59 }
 0x31b   : > { %v1993_v62 = vadd.f32 %v1989_v1, %v1976_v17  ;;  %v7378_v55 = vmul.f32 %v7352_v51, %v2538_v59  ;;  %v7382_v6 = vmul.f32 %v7336_v45, %v7355_v43  ;;  %v2057_v40 = vsel %vm398_vm2, %v2054_v20, %v2056_v58  ;;  %v9235_v1 = vld [vmem:[#allocation44_spill] sm:$0xff] }
 0x31c   : > { %v2043_v14 = vadd.f32 %v7137_v28, %v1992_v24  ;;  %v7388_v16 = vmul.f32 %v7339_v0, %v7355_v43  ;;  %v1740_v37 = vstv %s7330_s10  ;;  %v2677_v42 = vrot.slane %v7365_v26, 2  ;;  %s7896_s10 = sld [smem:[#allocation2 + $0x199]] }
 0x31d   : > { %v2044_v59 = vadd.f32 %v7142_v29, %v1993_v62  ;;  %v1741_v28 = vmul.f32 %v1740_v37, %v7217_v63  ;;  %v2745_v49 = vrot.slane %v7369_v61, 3  ;;  %v7403_v27 = vmul.f32 %v7342_v2, %v7355_v43 }
 0x31e   : > { %v7407_v13 = vmul.f32 %v7345_v36, %v7355_v43  ;;  %v2060_v47 = vadd.f32 %v2055_v25, %v2043_v14  ;;  %v2680_v8 = vrot.slane %v7388_v16, 2  ;;  %v1808_v21 = vstv %s7357_s27  ;;  %s7924_s27 = sld [smem:[#allocation2 + $0x1a0]] }
 0x31f   : > { %v2061_v29 = vadd.f32 %v2057_v40, %v2044_v59  ;;  %v7417_v10 = vsel %vm1624_vm14, 0.0, %v1657_v53  ;;  %v1747_v31 = vrot.slane %v1741_v28, 1  ;;  %v1809_v34 = vmul.f32 %v1808_v21, %v7217_v63  ;;  %v9236_v40 = vld [vmem:[#allocation33_spill] sm:$0xff] }
 0x320   : > { %v1742_v60 = vmul.f32 %v1740_v37, %v7212_v33  ;;  %v2748_v52 = vrot.slane %v7403_v27, 3  ;;  %v7426_v23 = vmul.f32 %v7349_v22, %v7355_v43  ;;  %v1743_v17 = vmul.f32 %v1740_v37, %v7417_v10 }
 0x321   : > { %v2101_v20 = vadd.f32 %v9234_v5, %v2061_v29  ;;  %v1810_v62 = vmul.f32 %v1808_v21, %v7212_v33  ;;  %v1811_v14 = vmul.f32 %v1808_v21, %v7417_v10  ;;  %v2100_v59 = vadd.f32 %v9236_v40, %v2060_v47  ;;  %v9237_v5 = vld [vmem:[#allocation39_spill] sm:$0xff] }
 0x322   : > { %v1748_v25 = vrot.slane %v1742_v60, 1  ;;  %v1876_v28 = vstv %s7391_s0  ;;  %v1944_v53 = vstv %s7393_s1  ;;  %v1750_v29 = vrot.slane %v1743_v17, 1  ;;  %s7934_s0 = sld [smem:[#allocation2 + $0x1a7]]  ;;  %s7941_s1 = sld [smem:[#allocation2 + $0x1ae]] }
 0x323   : > { %v2107_v24 = vadd.f32 %v9235_v1, %v2101_v20  ;;  %v1815_v19 = vrot.slane %v1809_v34, 2  ;;  %v1877_v41 = vmul.f32 %v1876_v28, %v7217_v63  ;;  %v1818_v1 = vrot.slane %v1811_v14, 2 }
 0x324   : > { %v1749_v37 = vsel %vm407_vm6, %v1747_v31, %v1748_v25  ;;  %v1751_v20 = vsel %vm407_vm6, %v1748_v25, %v1750_v29  ;;  %v1879_v21 = vmul.f32 %v1876_v28, %v7417_v10  ;;  %v1816_v40 = vrot.slane %v1810_v62, 2 }
 0x325   : > { %v2136_v30 = vadd.f32 %v9237_v5, %v2107_v24  ;;  %v1754_v60 = vadd.f32 %v1749_v37, %v7321_v15  ;;  %v1755_v17 = vadd.f32 %v1751_v20, %v7318_v18  ;;  %v1878_v34 = vmul.f32 %v1876_v28, %v7212_v33  ;;  %v9239_v24 = vld [vmem:[#allocation43_spill] sm:$0xff]  ;;  %v9240_v15 = vld [vmem:[#allocation41_spill] sm:$0xff] }
 0x326   : > { %v2106_v5 = vadd.f32 %v9239_v24, %v2100_v59  ;;  %v1945_v31 = vmul.f32 %v1944_v53, %v7217_v63  ;;  %v2012_v58 = vstv %s7414_s3  ;;  %v1883_v29 = vrot.slane %v1877_v41, 3  ;;  %v9241_v20 = vld [vmem:[#allocation50_spill] sm:$0xff]  ;;  %s7964_s3 = sld [smem:[#allocation2 + $0x105]] }
 0x327   : > { %v2153_v47 = vadd.f32 %v9238_v9, %v2136_v30  ;;  %v1805_v25 = vadd.f32 %v7240_v35, %v1754_v60  ;;  %v1806_v37 = vadd.f32 %v7180_v48, %v1755_v17  ;;  %v1817_v9 = vsel %vm405_vm5, %v1815_v19, %v1816_v40  ;;  %v9242_v60 = vld [vmem:[#allocation38_spill] sm:$0xff]  ;;  %v9243_v17 = vld [vmem:[#allocation53_spill] sm:$0xff] }
 0x328   : > { %v1819_v30 = vsel %vm405_vm5, %v1816_v40, %v1818_v1  ;;  %v1886_v62 = vrot.slane %v1879_v21, 3  ;;  %v1947_v28 = vmul.f32 %v1944_v53, %v7417_v10  ;;  %v1884_v56 = vrot.slane %v1878_v34, 3 }
 0x329   : > { %v2204_v14 = vadd.f32 %v9240_v15, %v2153_v47  ;;  %v1822_v18 = vadd.f32 %v1817_v9, %v1805_v25  ;;  %v1823_v24 = vadd.f32 %v1819_v30, %v1806_v37  ;;  %v1946_v35 = vmul.f32 %v1944_v53, %v7212_v33  ;;  %v9244_v9 = vld [vmem:[#allocation47_spill] sm:$0xff] }
 0x32a   : > { %v2135_v47 = vadd.f32 %v9242_v60, %v2106_v5  ;;  %v1951_v41 = vrot.slane %v1945_v31, 4  ;;  %v2013_v48 = vmul.f32 %v2012_v58, %v7217_v63  ;;  %v1885_v40 = vsel %vm403_vm4, %v1883_v29, %v1884_v56 }
 0x32b   : > { %v2221_v59 = vadd.f32 %v9241_v20, %v2204_v14  ;;  %v1873_v19 = vadd.f32 %v7245_v38, %v1822_v18  ;;  %v1874_v21 = vadd.f32 %v7185_v3, %v1823_v24  ;;  %v2014_v25 = vmul.f32 %v2012_v58, %v7212_v33 }
 0x32c   : > { %v1887_v15 = vsel %vm403_vm4, %v1884_v56, %v1886_v62  ;;  %v1954_v14 = vrot.slane %v1947_v28, 4  ;;  %v2015_v53 = vmul.f32 %v2012_v58, %v7417_v10  ;;  %v7468_v5 = vmul.f32 %v7352_v51, %v7355_v43  ;;  %v2531_v56 = vpop.permute.xlu1 %2530  ;;  %v9245_v43 = vld [vmem:[#allocation85_spill] sm:$0xff] }
 0x32d   : > { %v2272_v1 = vadd.f32 %v9243_v17, %v2221_v59  ;;  %v1890_v34 = vadd.f32 %v1885_v40, %v1873_v19  ;;  %v2080_v31 = vstv %s7442_s4  ;;  %v1891_v38 = vadd.f32 %v1887_v15, %v1874_v21  ;;  %v9247_v21 = vld [vmem:[#allocation40_spill] sm:$0xff]  ;;  %v9248_v15 = vld [vmem:[#allocation87_spill] sm:$0xff]  ;;  %s7989_s4 = sld [smem:[#allocation2 + $0x10c]] }
 0x32e   : > { %v1952_v37 = vrot.slane %v1946_v35, 4  ;;  %v2152_v30 = vadd.f32 %v9244_v9, %v2135_v47  ;;  %v2019_v3 = vrot.slane %v2013_v48, 5  ;;  %v2081_v29 = vmul.f32 %v2080_v31, %v7217_v63  ;;  %v9249_v9 = vld [vmem:[#allocation88_spill] sm:$0xff] }
 0x32f   : > { %v1941_v18 = vadd.f32 %v7254_v32, %v1890_v34  ;;  %v1942_v62 = vadd.f32 %v7188_v50, %v1891_v38  ;;  %v2020_v28 = vrot.slane %v2014_v25, 5  ;;  %v2289_v20 = vadd.f32 %v9245_v43, %v2272_v1  ;;  %v9246_v32 = vld [vmem:[#allocation86_spill] sm:$0xff]  ;;  %v2556_v25 = vpop.permute.xlu0 %2555  ;;  %v9250_v43 = vld [vmem:[#allocation90_spill] sm:$0xff] }
 0x330   : > { %v1953_v58 = vsel %vm307_vm0, %v1951_v41, %v1952_v37  ;;  %v1955_v59 = vsel %vm307_vm0, %v1952_v37, %v1954_v14  ;;  %v2022_v35 = vrot.slane %v2015_v53, 5  ;;  %v2083_v60 = vmul.f32 %v2080_v31, %v7417_v10 }
 0x331   : > { %v1958_v24 = vadd.f32 %v1953_v58, %v1941_v18  ;;  %v1959_v47 = vadd.f32 %v1955_v59, %v1942_v62  ;;  %v2082_v63 = vmul.f32 %v2080_v31, %v7212_v33  ;;  %v2340_v48 = vadd.f32 %v9246_v32, %v2289_v20 }
 0x332   : > { %v2539_v19 = vsel %vm2537_vm15, %v2531_v56, 0.0  ;;  %v2884_v50 = vrot.slane %v7426_v23, 5  ;;  %v2952_v41 = vrot.slane %v7468_v5, 6  ;;  %v2087_v17 = vrot.slane %v2081_v29, 6 }
 0x333   : > { %v2009_v1 = vadd.f32 %v7257_v46, %v1958_v24  ;;  %v2203_v40 = vadd.f32 %v9247_v21, %v2152_v30  ;;  %v2010_v10 = vadd.f32 %v7195_v4, %v1959_v47  ;;  %v2021_v33 = vsel %vm400_vm3, %v2019_v3, %v2020_v28  ;;  %v9252_v47 = vld [vmem:[#allocation46_spill] sm:$0xff] }
 0x334   : > { %v2357_v34 = vadd.f32 %v9248_v15, %v2340_v48  ;;  %v2023_v14 = vsel %vm400_vm3, %v2020_v28, %v2022_v35  ;;  %v2090_v31 = vrot.slane %v2083_v60, 6  ;;  %v2672_v38 = vmul.f32 %v7339_v0, %v2539_v19  ;;  %v9253_v48 = vld [vmem:[#allocation51_spill] sm:$0xff] }
 0x335   : > { %v2026_v53 = vadd.f32 %v2021_v33, %v2009_v1  ;;  %v2027_v37 = vadd.f32 %v2023_v14, %v2010_v10  ;;  %v2088_v46 = vrot.slane %v2082_v63, 6  ;;  %v2740_v18 = vmul.f32 %v7342_v2, %v2539_v19  ;;  %v9255_v33 = vld [vmem:[#allocation91_spill] sm:$0xff] }
 0x336   : > { %v2408_v29 = vadd.f32 %v9249_v9, %v2357_v34  ;;  %v2590_v30 = vstv %s7474_s15  ;;  %v7502_v3 = vsel %vm2537_vm15, %v2556_v25, 0.0  ;;  %v2808_v56 = vmul.f32 %v7345_v36, %v2539_v19  ;;  %v9251_v36 = vld [vmem:[#allocation49_spill] sm:$0xff]  ;;  %s7991_s15 = sld [smem:[#allocation2 + $0x113]] }
 0x337   : > { %v2077_v4 = vadd.f32 %v7299_v7, %v2026_v53  ;;  %v2078_v62 = vadd.f32 %v7225_v54, %v2027_v37  ;;  %v2089_v0 = vsel %vm398_vm2, %v2087_v17, %v2088_v46  ;;  %v7508_v58 = vmul.f32 %v7336_v45, %v2539_v19  ;;  %v9259_v37 = vld [vmem:[#allocation56_spill] sm:$0xff] }
 0x338   : > { %v2876_v2 = vmul.f32 %v7349_v22, %v2539_v19  ;;  %v2091_v7 = vsel %vm398_vm2, %v2088_v46, %v2090_v31  ;;  %v2425_v20 = vadd.f32 %v9250_v43, %v2408_v29  ;;  %v2678_v59 = vrot.slane %v2672_v38, 2  ;;  %v9257_v38 = vld [vmem:[#allocation55_spill] sm:$0xff]  ;;  %v9266_v43 = vld [vmem:[#allocation57_spill] sm:$0xff] }
 0x339   : > { %v2094_v28 = vadd.f32 %v2089_v0, %v2077_v4  ;;  %v2220_v24 = vadd.f32 %v9251_v36, %v2203_v40  ;;  %v2095_v54 = vadd.f32 %v2091_v7, %v2078_v62  ;;  %v2746_v35 = vrot.slane %v2740_v18, 3  ;;  %v9262_v18 = vld [vmem:[#allocation64_spill] sm:$0xff]  ;;  %v9264_v0 = vld [vmem:[#allocation65_spill] sm:$0xff] }
 0x33a   : > { %v2944_v60 = vmul.f32 %v7352_v51, %v2539_v19  ;;  %v7521_v22 = vmul.f32 %v2590_v30, %v7502_v3  ;;  %v2814_v63 = vrot.slane %v2808_v56, 4  ;;  %v7524_v32 = vstv %s7487_s18  ;;  %v9254_v51 = vld [vmem:[#allocation61_spill] sm:$0xff]  ;;  %v9263_v56 = vld [vmem:[#allocation92_spill] sm:$0xff]  ;;  %s7994_s18 = sld [smem:[#allocation2 + $0x11a]] }
 0x33b   : > { %v2112_v45 = vadd.f32 %v9252_v47, %v2094_v28  ;;  %v2113_v17 = vadd.f32 %v9253_v48, %v2095_v54  ;;  %v2580_v1 = vmul.f32 %v2578_v11, %v2539_v19  ;;  %v2610_v21 = vrot.slane %v7508_v58, 1  ;;  %v9256_v19 = vld [vmem:[#allocation62_spill] sm:$0xff]  ;;  %v9267_v54 = vld [vmem:[#allocation93_spill] sm:$0xff] }
 0x33c   : > { %v2882_v40 = vrot.slane %v2876_v2, 5  ;;  %v2476_v25 = vadd.f32 %v9255_v33, %v2425_v20  ;;  %v7541_v15 = vsel %vm405_vm5, %v2677_v42, %v2678_v59  ;;  %v7546_v11 = vsel %vm405_vm5, %v2678_v59, %v2680_v8 }
 0x33d   : > { %v2118_v10 = vadd.f32 %v9254_v51, %v2112_v45  ;;  %v2119_v34 = vadd.f32 %v9256_v19, %v2113_v17  ;;  %v7552_v14 = vsel %vm403_vm4, %v2745_v49, %v2746_v35  ;;  %v2950_v53 = vrot.slane %v2944_v60, 6  ;;  %v2558_v49 = vpop.permute.xlu0 %2557 }
 0x33e   : > { %v7555_v31 = vstv %s7497_s14  ;;  %v7561_v42 = vsel %vm403_vm4, %v2746_v35, %v2748_v52  ;;  %v9258_v16 = vrot.slane %v7372_v39, 4  ;;  %v7570_v61 = vmul.f32 %v7524_v32, %v7502_v3  ;;  %v9268_v35 = vld [vmem:[#allocation58_spill] sm:$0xff]  ;;  %s8001_s14 = sld [smem:[#allocation2 + $0x121]] }
 0x33f   : > { %v2169_v26 = vadd.f32 %v9257_v38, %v2118_v10  ;;  %v2170_v46 = vadd.f32 %v9259_v37, %v2119_v34  ;;  %v9260_v9 = vrot.slane %v7407_v13, 4  ;;  %v9261_v27 = vrot.slane %v7375_v44, 5  ;;  %v9270_v10 = vld [vmem:[#allocation68_spill] sm:$0xff] }
 0x340   : > { %v7566_v8 = vsel %vm307_vm0, %v9258_v16, %v2814_v63  ;;  %v7584_v39 = vstv %s7511_s25  ;;  %v2493_v62 = vadd.f32 %v9263_v56, %v2476_v25  ;;  %v7591_v13 = vsel %vm400_vm3, %v2882_v40, %v2884_v50  ;;  %v9272_v16 = vld [vmem:[#allocation60_spill] sm:$0xff]  ;;  %s8003_s25 = sld [smem:[#allocation2 + $0x128]] }
 0x341   : > { %v7576_v29 = vsel %vm307_vm0, %v2814_v63, %v9260_v9  ;;  %v7581_v52 = vsel %vm400_vm3, %v9261_v27, %v2882_v40  ;;  %v2186_v4 = vadd.f32 %v9262_v18, %v2169_v26  ;;  %v7595_v44 = vmul.f32 %v7555_v31, %v7502_v3  ;;  %v2542_v63 = vpop.permute.xlu1 %2541 }
 0x342   : > { %v2187_v2 = vadd.f32 %v9264_v0, %v2170_v46  ;;  %v9265_v7 = vrot.slane %v7378_v55, 6  ;;  %v7608_v23 = vsel %vm398_vm2, %v2950_v53, %v2952_v41  ;;  %v2564_v50 = vsel %vm2537_vm15, %v2558_v49, 0.0  ;;  %v9269_v41 = vld [vmem:[#allocation66_spill] sm:$0xff] }
 0x343   : > { %v2237_v20 = vadd.f32 %v9266_v43, %v2186_v4  ;;  %v2644_v59 = vrot.slane %v7570_v61, 1  ;;  %v7615_v36 = vmul.f32 %v7584_v39, %v7502_v3  ;;  %v2271_v55 = vadd.f32 %v9267_v54, %v2220_v24  ;;  %v9273_v4 = vld [vmem:[#allocation95_spill] sm:$0xff] }
 0x344   : > { %v7603_v28 = vsel %vm398_vm2, %v9265_v7, %v2950_v53  ;;  %v2238_v60 = vadd.f32 %v9268_v35, %v2187_v2  ;;  %v2840_v47 = vstv %s7526_s9  ;;  %v2908_v45 = vstv %s7532_s7  ;;  %v9275_v2 = vld [vmem:[#allocation69_spill] sm:$0xff]  ;;  %s8006_s9 = sld [smem:[#allocation2 + $0x12f]]  ;;  %s8057_s7 = sld [smem:[#allocation2 + $0x85]] }
 0x345   : > { %v2976_v5 = vstv %s7534_s20  ;;  %v2254_v48 = vadd.f32 %v9269_v41, %v2237_v20  ;;  %v7623_v17 = vadd.f32 %v2580_v1, %v2493_v62  ;;  %v2712_v40 = vrot.slane %v7595_v44, 2  ;;  %v9271_v1 = vld [vmem:[#allocation94_spill] sm:$0xff]  ;;  %v9274_v62 = vld [vmem:[#allocation101_spill] sm:$0xff]  ;;  %v9276_v41 = vld [vmem:[#allocation96_spill] sm:$0xff]  ;;  %s8108_s20 = sld [smem:[#allocation2 + $0x8c]] }
 0x346   : > { %v2639_v51 = vmul.f32 %v7524_v32, %v2564_v50  ;;  %v2255_v33 = vadd.f32 %v9270_v10, %v2238_v60  ;;  %v2707_v25 = vmul.f32 %v7555_v31, %v2564_v50  ;;  %v2775_v24 = vmul.f32 %v7584_v39, %v2564_v50 }
 0x347   : > { %v2843_v19 = vmul.f32 %v2840_v47, %v2564_v50  ;;  %v2780_v34 = vrot.slane %v7615_v36, 3  ;;  %v7632_v53 = vmul.f32 %v2840_v47, %v7502_v3  ;;  %v2911_v38 = vmul.f32 %v2908_v45, %v2564_v50 }
 0x348   : > { %v2288_v26 = vadd.f32 %v9271_v1, %v2271_v55  ;;  %v2306_v49 = vadd.f32 %v9272_v16, %v2255_v33  ;;  %v7637_v37 = vmul.f32 %v2908_v45, %v7502_v3  ;;  %v7640_v46 = vmul.f32 %v2976_v5, %v7502_v3  ;;  %v2554_v55 = vpop.permute.xlu1 %2553  ;;  %v9277_v3 = vld [vmem:[#allocation108_spill] sm:$0xff]  ;;  %v2544_v16 = vpop.permute.xlu0 %2543 }
 0x349   : > { %v2979_v9 = vmul.f32 %v2976_v5, %v2564_v50  ;;  %v2646_v27 = vrot.slane %v2639_v51, 1  ;;  %v2584_v18 = vstv %s7597_s24  ;;  %v2305_v0 = vadd.f32 %v9274_v62, %v2254_v48  ;;  %v9278_v50 = vld [vmem:[#allocation63_spill] sm:$0xff]  ;;  %s8113_s24 = sld [smem:[#allocation2 + $0x185]] }
 0x34a   : > { %v2339_v56 = vadd.f32 %v9273_v4, %v2288_v26  ;;  %v2323_v7 = vadd.f32 %v9275_v2, %v2306_v49  ;;  %v2714_v43 = vrot.slane %v2707_v25, 2  ;;  %v2782_v20 = vrot.slane %v2775_v24, 3  ;;  %v9279_v24 = vld [vmem:[#allocation97_spill] sm:$0xff] }
 0x34b   : > { %v2850_v54 = vrot.slane %v2843_v19, 4  ;;  %v2848_v35 = vrot.slane %v7632_v53, 4  ;;  %v2918_v60 = vrot.slane %v2911_v38, 5  ;;  %v2322_v33 = vadd.f32 %v9277_v3, %v2305_v0  ;;  %v9280_v38 = vld [vmem:[#allocation102_spill] sm:$0xff] }
 0x34c   : > { %v2356_v10 = vadd.f32 %v9276_v41, %v2339_v56  ;;  %v2374_v51 = vadd.f32 %v9278_v50, %v2323_v7  ;;  %v2916_v1 = vrot.slane %v7637_v37, 5  ;;  %v2984_v26 = vrot.slane %v7640_v46, 6  ;;  %v9281_v56 = vld [vmem:[#allocation73_spill] sm:$0xff]  ;;  %v9283_v41 = vld [vmem:[#allocation109_spill] sm:$0xff] }
 0x34d   : > { %v2986_v48 = vrot.slane %v2979_v9, 6  ;;  %v7655_v25 = vsel %vm407_vm6, %v2644_v59, %v2646_v27  ;;  %v2373_v49 = vadd.f32 %v9280_v38, %v2322_v33  ;;  %v2562_v4 = vsel %vm2537_vm15, %v2554_v55, 0.0  ;;  %v9282_v7 = vld [vmem:[#allocation98_spill] sm:$0xff] }
 0x34e   : > { %v2407_v19 = vadd.f32 %v9279_v24, %v2356_v10  ;;  %v2391_v62 = vadd.f32 %v9281_v56, %v2374_v51  ;;  %v7666_v9 = vsel %vm405_vm5, %v2712_v40, %v2714_v43  ;;  %v7671_v27 = vsel %vm403_vm4, %v2780_v34, %v2782_v20  ;;  %v9284_v10 = vld [vmem:[#allocation74_spill] sm:$0xff] }
 0x34f   : > { %v7676_v0 = vsel %vm307_vm0, %v2848_v35, %v2850_v54  ;;  %v7683_v2 = vsel %vm400_vm3, %v2916_v1, %v2918_v60  ;;  %v7687_v55 = vsel %vm2537_vm15, %v2544_v16, 0.0  ;;  %v2390_v20 = vadd.f32 %v9283_v41, %v2373_v49  ;;  %v9285_v60 = vld [vmem:[#allocation99_spill] sm:$0xff]  ;;  %v9286_v16 = vld [vmem:[#allocation104_spill] sm:$0xff] }
 0x350   : > { %v2424_v43 = vadd.f32 %v9282_v7, %v2407_v19  ;;  %v2442_v3 = vadd.f32 %v9284_v10, %v2391_v62  ;;  %v7694_v54 = vsel %vm398_vm2, %v2984_v26, %v2986_v48  ;;  %v2705_v33 = vmul.f32 %v7555_v31, %v2562_v4  ;;  %v9287_v49 = vld [vmem:[#allocation79_spill] sm:$0xff]  ;;  %v2566_v10 = vpop.permute.xlu1 %2565 }
 0x351   : > { %v2773_v50 = vmul.f32 %v7584_v39, %v2562_v4  ;;  %v7700_v24 = vsel %vm2537_vm15, %v2542_v63, 0.0  ;;  %v2441_v19 = vadd.f32 %v9286_v16, %v2390_v20  ;;  %v2841_v38 = vmul.f32 %v2840_v47, %v2562_v4  ;;  %v9288_v41 = vld [vmem:[#allocation100_spill] sm:$0xff] }
 0x352   : > { %v2475_v51 = vadd.f32 %v9285_v60, %v2424_v43  ;;  %v2459_v56 = vadd.f32 %v9287_v49, %v2442_v3  ;;  %v2586_v62 = vmul.f32 %v2584_v18, %v7687_v55  ;;  %v2909_v48 = vmul.f32 %v2908_v45, %v2562_v4  ;;  %v9290_v43 = vld [vmem:[#allocation115_spill] sm:$0xff]  ;;  %v9292_v16 = vld [vmem:[#allocation83_spill] sm:$0xff] }
 0x353   : > { %v2977_v7 = vmul.f32 %v2976_v5, %v2562_v4  ;;  %v9289_v39 = vrot.slane %v7362_v57, 1  ;;  %v2458_v20 = vadd.f32 %v9290_v43, %v2441_v19  ;;  %v2637_v47 = vmul.f32 %v7524_v32, %v2562_v4  ;;  %v2568_v57 = vpop.permute.xlu0 %2567 }
 0x354   : > { %v2492_v31 = vadd.f32 %v9288_v41, %v2475_v51  ;;  %v9291_v3 = vrot.slane %v7382_v6, 1  ;;  %v2588_v5 = vadd.f32 %v2586_v62, %v7623_v17  ;;  %v2711_v60 = vrot.slane %v2705_v33, 2  ;;  %v9293_v33 = vld [vmem:[#allocation105_spill] sm:$0xff] }
 0x355   : > { %v2611_v63 = vsel %vm407_vm6, %v9289_v39, %v2610_v21  ;;  %v2779_v51 = vrot.slane %v2773_v50, 3  ;;  %v2510_v32 = vadd.f32 %v9292_v16, %v2459_v56  ;;  %v2585_v19 = vmul.f32 %v2584_v18, %v7700_v24 }
 0x356   : > { %v2613_v45 = vsel %vm407_vm6, %v2610_v21, %v9291_v3  ;;  %v2847_v49 = vrot.slane %v2841_v38, 4  ;;  %v2596_v6 = vstv %s7660_s13  ;;  %v2581_v58 = vadd.f32 %v7326_v12, %v2492_v31  ;;  %s8135_s13 = sld [smem:[#allocation2 + $0x93]] }
 0x357   : > { %v2915_v41 = vrot.slane %v2909_v48, 5  ;;  %v2983_v21 = vrot.slane %v2977_v7, 6  ;;  %v2619_v17 = vstv %s7678_s29  ;;  %v2509_v50 = vadd.f32 %v9293_v33, %v2458_v20  ;;  %v2546_v48 = vpop.permute.xlu1 %2545  ;;  %s8155_s29 = sld [smem:[#allocation2 + $0x9a]] }
 0x358   : > { %v2591_v62 = vmul.f32 %v2590_v30, %v2562_v4  ;;  %v2643_v39 = vrot.slane %v2637_v47, 1  ;;  %v7736_v43 = vsel %vm2537_vm15, %v2568_v57, 0.0  ;;  %v2617_v56 = vadd.f32 %v2613_v45, %v2588_v5  ;;  %v9294_v30 = vld [vmem:[#allocation84_spill] sm:$0xff] }
 0x359   : > { %v7741_v18 = vsel %vm405_vm5, %v2711_v60, %v2712_v40  ;;  %v7746_v12 = vsel %vm403_vm4, %v2779_v51, %v2780_v34  ;;  %v7749_v38 = vsel %vm2537_vm15, %v2566_v10, 0.0  ;;  %v2527_v4 = vadd.f32 %v9294_v30, %v2510_v32  ;;  %v3010_v32 = vpop.permute.xlu0 %3009 }
 0x35a   : > { %v7757_v44 = vsel %vm307_vm0, %v2847_v49, %v2848_v35  ;;  %v2620_v40 = vmul.f32 %v2619_v17, %v7700_v24  ;;  %v2687_v36 = vstv %s7703_s30  ;;  %v2587_v34 = vadd.f32 %v2585_v19, %v2581_v58  ;;  %v9295_v35 = vld [vmem:[#allocation124_spill] sm:$0xff]  ;;  %s8165_s30 = sld [smem:[#allocation2 + $0x6]] }
 0x35b   : > { %v7764_v7 = vsel %vm400_vm3, %v2915_v41, %v2916_v1  ;;  %v7769_v31 = vsel %vm398_vm2, %v2983_v21, %v2984_v26  ;;  %v2598_v53 = vmul.f32 %v2596_v6, %v7736_v43  ;;  %v2526_v20 = vadd.f32 %v9295_v35, %v2509_v50 }
 0x35c   : > { %v2597_v47 = vmul.f32 %v2596_v6, %v7749_v38  ;;  %v2645_v10 = vsel %vm407_vm6, %v2643_v39, %v2644_v59  ;;  %v3059_v37 = vstv %s7721_s6  ;;  %v2688_v1 = vmul.f32 %v2687_v36, %v7700_v24  ;;  %s8172_s6 = sld [smem:[#allocation2 + $0xa1]] }
 0x35d   : > { %v2755_v3 = vstv %s7723_s26  ;;  %v7783_v46 = vsel %vm2537_vm15, %v2546_v48, 0.0  ;;  %v2594_v26 = vadd.f32 %v7521_v22, %v2527_v4  ;;  %v2626_v45 = vrot.slane %v2620_v40, 1  ;;  %s8174_s26 = sld [smem:[#allocation2 + $0xa8]] }
 0x35e   : > { %v2621_v5 = vmul.f32 %v2619_v17, %v7687_v55  ;;  %v2622_v61 = vmul.f32 %v2619_v17, %v7783_v46  ;;  %v2616_v60 = vadd.f32 %v2611_v63, %v2587_v34  ;;  %v2823_v59 = vstv %s7730_s23  ;;  %s8211_s23 = sld [smem:[#allocation2 + $0xaf]] }
 0x35f   : > { %v2689_v51 = vmul.f32 %v2687_v36, %v7687_v55  ;;  %v2690_v57 = vmul.f32 %v2687_v36, %v7783_v46  ;;  %v2593_v16 = vadd.f32 %v2591_v62, %v2526_v20  ;;  %v2756_v19 = vmul.f32 %v2755_v3, %v7700_v24 }
 0x360   : > { %v2627_v49 = vrot.slane %v2621_v5, 1  ;;  %v2629_v6 = vrot.slane %v2622_v61, 1  ;;  %v2694_v58 = vrot.slane %v2688_v1, 2  ;;  %v2891_v41 = vstv %s7751_s5  ;;  %s8238_s5 = sld [smem:[#allocation2 + $0xd]] }
 0x361   : > { %v2757_v22 = vmul.f32 %v2755_v3, %v7687_v55  ;;  %v2758_v21 = vmul.f32 %v2755_v3, %v7783_v46  ;;  %v2695_v33 = vrot.slane %v2689_v51, 2  ;;  %v2697_v50 = vrot.slane %v2690_v57, 2 }
 0x362   : > { %v2628_v63 = vsel %vm407_vm6, %v2626_v45, %v2627_v49  ;;  %v2630_v17 = vsel %vm407_vm6, %v2627_v49, %v2629_v6  ;;  %v2600_v39 = vadd.f32 %v2598_v53, %v2594_v26  ;;  %v7798_v62 = vsel %vm3018_vm1, %v3010_v32, 0.0 }
 0x363   : > { %v2633_v30 = vadd.f32 %v2628_v63, %v2616_v60  ;;  %v2634_v4 = vadd.f32 %v2630_v17, %v2617_v56  ;;  %v2599_v40 = vadd.f32 %v2597_v47, %v2593_v16  ;;  %v2762_v36 = vrot.slane %v2756_v19, 3  ;;  %v3014_v17 = vpop.permute.xlu0 %3013 }
 0x364   : > { %v2824_v48 = vmul.f32 %v2823_v59, %v7700_v24  ;;  %v2825_v34 = vmul.f32 %v2823_v59, %v7687_v55  ;;  %v2892_v35 = vmul.f32 %v2891_v41, %v7700_v24  ;;  %v2959_v20 = vstv %s7780_s21  ;;  %s8244_s21 = sld [smem:[#allocation2 + $0x14]] }
 0x365   : > { %v2684_v1 = vadd.f32 %v7541_v15, %v2633_v30  ;;  %v2685_v53 = vadd.f32 %v7546_v11, %v2634_v4  ;;  %v2696_v56 = vsel %vm405_vm5, %v2694_v58, %v2695_v33  ;;  %v2698_v47 = vsel %vm405_vm5, %v2695_v33, %v2697_v50 }
 0x366   : > { %v2763_v3 = vrot.slane %v2757_v22, 3  ;;  %v2765_v26 = vrot.slane %v2758_v21, 3  ;;  %v7819_v45 = vadd.f32 %v7655_v25, %v2600_v39  ;;  %v7824_v15 = vmul.f32 %v3059_v37, %v7798_v62 }
 0x367   : > { %v2701_v11 = vadd.f32 %v2696_v56, %v2684_v1  ;;  %v2702_v5 = vadd.f32 %v2698_v47, %v2685_v53  ;;  %v2830_v61 = vrot.slane %v2824_v48, 4  ;;  %v2960_v60 = vmul.f32 %v2959_v20, %v7700_v24 }
 0x368   : > { %v2826_v51 = vmul.f32 %v2823_v59, %v7783_v46  ;;  %v2831_v57 = vrot.slane %v2825_v34, 4  ;;  %v2893_v32 = vmul.f32 %v2891_v41, %v7687_v55  ;;  %v2894_v19 = vmul.f32 %v2891_v41, %v7783_v46 }
 0x369   : > { %v2752_v16 = vadd.f32 %v7552_v14, %v2701_v11  ;;  %v2753_v25 = vadd.f32 %v7561_v42, %v2702_v5  ;;  %v7834_v49 = vadd.f32 %v2645_v10, %v2599_v40  ;;  %v2898_v6 = vrot.slane %v2892_v35, 5 }
 0x36a   : > { %v2764_v58 = vsel %vm403_vm4, %v2762_v36, %v2763_v3  ;;  %v2766_v24 = vsel %vm403_vm4, %v2763_v3, %v2765_v26  ;;  %v2961_v14 = vmul.f32 %v2959_v20, %v7687_v55  ;;  %v2962_v42 = vmul.f32 %v2959_v20, %v7783_v46 }
 0x36b   : > { %v2769_v59 = vadd.f32 %v2764_v58, %v2752_v16  ;;  %v2770_v22 = vadd.f32 %v2766_v24, %v2753_v25  ;;  %v2966_v10 = vrot.slane %v2960_v60, 6  ;;  %v2832_v41 = vsel %vm307_vm0, %v2830_v61, %v2831_v57 }
 0x36c   : > { %v2833_v21 = vrot.slane %v2826_v51, 4  ;;  %v7844_v63 = vstv %s7802_s11  ;;  %v2899_v33 = vrot.slane %v2893_v32, 5  ;;  %v2901_v50 = vrot.slane %v2894_v19, 5  ;;  %s8248_s11 = sld [smem:[#allocation2 + $0x1b]] }
 0x36d   : > { %v7847_v39 = vstv %s7808_s2  ;;  %v7850_v30 = vstv %s7810_s17  ;;  %v2820_v55 = vadd.f32 %v7566_v8, %v2769_v59  ;;  %v2821_v46 = vadd.f32 %v7576_v29, %v2770_v22  ;;  %v2570_v22 = vpop.permute.xlu1 %2569  ;;  %s8250_s2 = sld [smem:[#allocation2 + $0x22]]  ;;  %s8254_s17 = sld [smem:[#allocation2 + $0x29]] }
 0x36e   : > { %v7855_v4 = vstv %s7814_s22  ;;  %v7858_v40 = vstv %s7816_s16  ;;  %v2967_v36 = vrot.slane %v2961_v14, 6  ;;  %v2969_v48 = vrot.slane %v2962_v42, 6  ;;  %s8259_s22 = sld [smem:[#allocation2 + $0x30]]  ;;  %s8270_s16 = sld [smem:[#allocation2 + $0x18c]] }
 0x36f   : > { %v7861_v34 = vstv %s7826_s28  ;;  %v3021_v35 = vsel %vm3018_vm1, %v3014_v17, 0.0  ;;  %v2834_v20 = vsel %vm307_vm0, %v2831_v57, %v2833_v21  ;;  %v7869_v8 = vmul.f32 %v7844_v63, %v7798_v62  ;;  %s8291_s28 = sld [smem:[#allocation2 + $0x193]] }
 0x370   : > { %v7873_v29 = vmul.f32 %v7847_v39, %v7798_v62  ;;  %v7877_v1 = vmul.f32 %v7850_v30, %v7798_v62  ;;  %v2900_v53 = vsel %vm400_vm3, %v2898_v6, %v2899_v33  ;;  %v2902_v56 = vsel %vm400_vm3, %v2899_v33, %v2901_v50 }
 0x371   : > { %v7883_v47 = vmul.f32 %v7855_v4, %v7798_v62  ;;  %v7887_v3 = vmul.f32 %v7858_v40, %v7798_v62  ;;  %v2837_v26 = vadd.f32 %v2832_v41, %v2820_v55  ;;  %v2838_v11 = vadd.f32 %v2834_v20, %v2821_v46 }
 0x372   : > { %v7891_v5 = vmul.f32 %v7861_v34, %v7798_v62  ;;  %v7894_v61 = vmul.f32 %v7844_v63, %v3021_v35  ;;  %v7899_v60 = vsel %vm398_vm2, %v2966_v10, %v2967_v36  ;;  %v7902_v51 = vsel %vm398_vm2, %v2967_v36, %v2969_v48 }
 0x373   : > { %v7905_v57 = vmul.f32 %v7847_v39, %v3021_v35  ;;  %v2653_v16 = vstv %s7840_s8  ;;  %v3158_v62 = vrot.slane %v7873_v29, 2  ;;  %v7915_v24 = vmul.f32 %v7850_v30, %v3021_v35  ;;  %s8330_s8 = sld [smem:[#allocation2 + $0x19a]] }
 0x374   : > { %v2654_v19 = vmul.f32 %v2653_v16, %v7749_v38  ;;  %v7918_v59 = vmul.f32 %v7855_v4, %v3021_v35  ;;  %v2888_v14 = vadd.f32 %v7581_v52, %v2837_v26  ;;  %v2889_v42 = vadd.f32 %v7591_v13, %v2838_v11 }
 0x375   : > { %v3161_v21 = vrot.slane %v7905_v57, 2  ;;  %v7928_v17 = vmul.f32 %v7858_v40, %v3021_v35  ;;  %v7931_v33 = vmul.f32 %v7861_v34, %v3021_v35  ;;  %v2721_v50 = vstv %s7864_s12  ;;  %s8338_s12 = sld [smem:[#allocation2 + $0x1a1]] }
 0x376   : > { %v2660_v52 = vrot.slane %v2654_v19, 1  ;;  %v2722_v13 = vmul.f32 %v2721_v50, %v7749_v38  ;;  %v2576_v55 = vsel %vm2537_vm15, %v2570_v22, 0.0  ;;  %v2655_v46 = vmul.f32 %v2653_v16, %v7736_v43 }
 0x377   : > { %v2656_v20 = vmul.f32 %v2653_v16, %v2576_v55  ;;  %v2724_v26 = vmul.f32 %v2721_v50, %v2576_v55  ;;  %v2906_v35 = vadd.f32 %v2902_v56, %v2889_v42  ;;  %v2789_v11 = vstv %s7896_s10  ;;  %s8354_s10 = sld [smem:[#allocation2 + $0x1a8]] }
 0x378   : > { %v2661_v41 = vrot.slane %v2655_v46, 1  ;;  %v2723_v19 = vmul.f32 %v2721_v50, %v7736_v43  ;;  %v7945_v25 = vadd.f32 %v2900_v53, %v2888_v14  ;;  %v2790_v10 = vmul.f32 %v2789_v11, %v7749_v38 }
 0x379   : > { %v2663_v58 = vrot.slane %v2656_v20, 1  ;;  %v2728_v6 = vrot.slane %v2722_v13, 2  ;;  %v2792_v36 = vmul.f32 %v2789_v11, %v2576_v55  ;;  %v2731_v50 = vrot.slane %v2724_v26, 2 }
 0x37a   : > { %v2662_v16 = vsel %vm407_vm6, %v2660_v52, %v2661_v41  ;;  %v2791_v53 = vmul.f32 %v2789_v11, %v7736_v43  ;;  %v2957_v14 = vadd.f32 %v7608_v23, %v2906_v35  ;;  %v2857_v46 = vstv %s7924_s27  ;;  %s4443_s27 = sld [smem:[#allocation2 + $0x1af]] }
 0x37b   : > { %v2664_v56 = vsel %vm407_vm6, %v2661_v41, %v2663_v58  ;;  %v2667_v42 = vadd.f32 %v2662_v16, %v7834_v49  ;;  %v2729_v20 = vrot.slane %v2723_v19, 2  ;;  %v2796_v32 = vrot.slane %v2790_v10, 3 }
 0x37c   : > { %v2668_v22 = vadd.f32 %v2664_v56, %v7819_v45  ;;  %v2858_v13 = vmul.f32 %v2857_v46, %v7749_v38  ;;  %v2925_v48 = vstv %s7934_s0  ;;  %v2799_v49 = vrot.slane %v2792_v36, 3  ;;  %v3012_v45 = vpop.permute.xlu1 %3011  ;;  %s8389_s0 = sld [smem:[#allocation2 + $0x106]] }
 0x37d   : > { %v2718_v52 = vadd.f32 %v7741_v18, %v2667_v42  ;;  %v2730_v41 = vsel %vm405_vm5, %v2728_v6, %v2729_v20  ;;  %v2860_v26 = vmul.f32 %v2857_v46, %v2576_v55  ;;  %v2993_v16 = vstv %s7941_s1  ;;  %s8411_s1 = sld [smem:[#allocation2 + $0x10d]] }
 0x37e   : > { %v2719_v58 = vadd.f32 %v7666_v9, %v2668_v22  ;;  %v2732_v11 = vsel %vm405_vm5, %v2729_v20, %v2731_v50  ;;  %v2797_v35 = vrot.slane %v2791_v53, 3  ;;  %v2926_v10 = vmul.f32 %v2925_v48, %v7749_v38 }
 0x37f   : > { %v2735_v23 = vadd.f32 %v2730_v41, %v2718_v52  ;;  %v7968_v19 = vmul.f32 %v2993_v16, %v7749_v38  ;;  %v2859_v9 = vmul.f32 %v2857_v46, %v7736_v43  ;;  %v2974_v6 = vadd.f32 %v7902_v51, %v2957_v14 }
 0x380   : > { %v2736_v18 = vadd.f32 %v2732_v11, %v2719_v58  ;;  %v2864_v36 = vrot.slane %v2858_v13, 4  ;;  %v2798_v56 = vsel %vm403_vm4, %v2796_v32, %v2797_v35  ;;  %v2800_v50 = vsel %vm403_vm4, %v2797_v35, %v2799_v49  ;;  %v3037_v13 = vpop.permute.xlu0 %3036 }
 0x381   : > { %v2786_v22 = vadd.f32 %v7746_v12, %v2735_v23  ;;  %v2867_v53 = vrot.slane %v2860_v26, 4  ;;  %v3020_v20 = vsel %vm3018_vm1, %v3012_v45, 0.0  ;;  %v2927_v38 = vmul.f32 %v2925_v48, %v7736_v43 }
 0x382   : > { %v2787_v42 = vadd.f32 %v7671_v27, %v2736_v18  ;;  %v2928_v58 = vmul.f32 %v2925_v48, %v2576_v55  ;;  %v2996_v41 = vmul.f32 %v2993_v16, %v2576_v55  ;;  %v2932_v46 = vrot.slane %v2926_v10, 5 }
 0x383   : > { %v2803_v52 = vadd.f32 %v2798_v56, %v2786_v22  ;;  %v3000_v51 = vrot.slane %v7968_v19, 6  ;;  %v2865_v12 = vrot.slane %v2859_v9, 4  ;;  %v7981_v27 = vmul.f32 %v2993_v16, %v7736_v43 }
 0x384   : > { %v2804_v14 = vadd.f32 %v2800_v50, %v2787_v42  ;;  %v3153_v49 = vmul.f32 %v7847_v39, %v3020_v20  ;;  %v3221_v26 = vmul.f32 %v7850_v30, %v3020_v20  ;;  %v3289_v23 = vmul.f32 %v7855_v4, %v3020_v20 }
 0x385   : > { %v2854_v32 = vadd.f32 %v7757_v44, %v2803_v52  ;;  %v2866_v55 = vsel %vm307_vm0, %v2864_v36, %v2865_v12  ;;  %v2868_v48 = vsel %vm307_vm0, %v2865_v12, %v2867_v53  ;;  %v2933_v44 = vrot.slane %v2927_v38, 5 }
 0x386   : > { %v2855_v11 = vadd.f32 %v7676_v0, %v2804_v14  ;;  %v2935_v43 = vrot.slane %v2928_v58, 5  ;;  %v3003_v16 = vrot.slane %v2996_v41, 6  ;;  %v3071_v35 = vstv %s7964_s3  ;;  %v3039_v58 = vpop.permute.xlu0 %3038  ;;  %s8413_s3 = sld [smem:[#allocation2 + $0x114]] }
 0x387   : > { %v3044_v0 = vsel %vm3018_vm1, %v3037_v13, 0.0  ;;  %v7998_v30 = vmul.f32 %v7844_v63, %v3020_v20  ;;  %v3357_v4 = vmul.f32 %v7858_v40, %v3020_v20  ;;  %v2871_v45 = vadd.f32 %v2866_v55, %v2854_v32 }
 0x388   : > { %v2872_v39 = vadd.f32 %v2868_v48, %v2855_v11  ;;  %v3001_v10 = vrot.slane %v7981_v27, 6  ;;  %v3159_v18 = vrot.slane %v3153_v49, 2  ;;  %v3227_v9 = vrot.slane %v3221_v26, 3  ;;  %v3023_v49 = vpop.permute.xlu1 %3022 }
 0x389   : > { %v2934_v22 = vsel %vm400_vm3, %v2932_v46, %v2933_v44  ;;  %v3061_v63 = vmul.f32 %v3059_v37, %v3020_v20  ;;  %v3295_v56 = vrot.slane %v3289_v23, 4  ;;  %v2936_v40 = vsel %vm400_vm3, %v2933_v44, %v2935_v43 }
 0x38a   : > { %v2923_v36 = vadd.f32 %v7683_v2, %v2872_v39  ;;  %v3004_v42 = vsel %vm398_vm2, %v3001_v10, %v3003_v16  ;;  %v3073_v50 = vmul.f32 %v3071_v35, %v3044_v0  ;;  %v3425_v53 = vmul.f32 %v7861_v34, %v3020_v20 }
 0x38b   : > { %v8019_v2 = vadd.f32 %v3061_v63, %v2974_v6  ;;  %v3091_v38 = vrot.slane %v7998_v30, 1  ;;  %v3363_v37 = vrot.slane %v3357_v4, 5  ;;  %v2922_v41 = vadd.f32 %v7764_v7, %v2871_v45 }
 0x38c   : > { %v2940_v52 = vadd.f32 %v2936_v40, %v2923_v36  ;;  %v8026_v46 = vsel %vm405_vm5, %v3158_v62, %v3159_v18  ;;  %v8031_v34 = vsel %vm405_vm5, %v3159_v18, %v3161_v21  ;;  %v9296_v6 = vrot.slane %v7877_v1, 3 }
 0x38d   : > { %v9297_v14 = vrot.slane %v7915_v24, 3  ;;  %v9298_v29 = vrot.slane %v7883_v47, 4  ;;  %v9299_v57 = vrot.slane %v7918_v59, 4  ;;  %v3117_v1 = vstv %s7989_s4  ;;  %s8417_s4 = sld [smem:[#allocation2 + $0x11b]] }
 0x38e   : > { %v8036_v20 = vsel %vm403_vm4, %v9296_v6, %v3227_v9  ;;  %v3431_v12 = vrot.slane %v3425_v53, 6  ;;  %v3185_v32 = vstv %s7991_s15  ;;  %v3253_v13 = vstv %s7994_s18  ;;  %s8419_s15 = sld [smem:[#allocation2 + $0x122]]  ;;  %s8428_s18 = sld [smem:[#allocation2 + $0x129]] }
 0x38f   : > { %v8041_v7 = vsel %vm403_vm4, %v3227_v9, %v9297_v14  ;;  %v8046_v62 = vsel %vm307_vm0, %v9298_v29, %v3295_v56  ;;  %v8051_v21 = vsel %vm307_vm0, %v3295_v56, %v9299_v57  ;;  %v3045_v24 = vsel %vm3018_vm1, %v3039_v58, 0.0 }
 0x390   : > { %v2991_v47 = vadd.f32 %v7694_v54, %v2940_v52  ;;  %v9300_v26 = vrot.slane %v7887_v3, 5  ;;  %v9301_v59 = vrot.slane %v7928_v17, 5  ;;  %v3321_v48 = vstv %s8001_s14  ;;  %s8443_s14 = sld [smem:[#allocation2 + $0x130]] }
 0x391   : > { %v2939_v23 = vadd.f32 %v2934_v22, %v2922_v41  ;;  %v8071_v44 = vmul.f32 %v3117_v1, %v3044_v0  ;;  %v3389_v43 = vstv %s8003_s25  ;;  %v3457_v16 = vstv %s8006_s9  ;;  %s8508_s25 = sld [smem:[#allocation2 + $0x86]]  ;;  %s8547_s9 = sld [smem:[#allocation2 + $0x8d]] }
 0x392   : > { %v8063_v11 = vsel %vm400_vm3, %v9300_v26, %v3363_v37  ;;  %v8068_v55 = vsel %vm400_vm3, %v3363_v37, %v9301_v59  ;;  %v8075_v39 = vmul.f32 %v3185_v32, %v3044_v0  ;;  %v8077_v4 = vmul.f32 %v3253_v13, %v3044_v0  ;;  %v3035_v37 = vpop.permute.xlu1 %3034 }
 0x393   : > { %v3120_v54 = vmul.f32 %v3117_v1, %v3045_v24  ;;  %v2956_v3 = vadd.f32 %v7603_v28, %v7945_v25  ;;  %v9302_v45 = vrot.slane %v7891_v5, 6  ;;  %v8086_v18 = vmul.f32 %v3321_v48, %v3044_v0 }
 0x394   : > { %v3188_v9 = vmul.f32 %v3185_v32, %v3045_v24  ;;  %v3256_v36 = vmul.f32 %v3253_v13, %v3045_v24  ;;  %v3008_v22 = vadd.f32 %v3004_v42, %v2991_v47  ;;  %v9303_v63 = vrot.slane %v7931_v33, 6 }
 0x395   : > { %v8084_v17 = vsel %vm398_vm2, %v9302_v45, %v3431_v12  ;;  %v8093_v40 = vmul.f32 %v3389_v43, %v3044_v0  ;;  %v8095_v53 = vmul.f32 %v3457_v16, %v3044_v0  ;;  %v3125_v28 = vrot.slane %v8071_v44, 1  ;;  %v3025_v0 = vpop.permute.xlu0 %3024 }
 0x396   : > { %v8091_v56 = vsel %vm398_vm2, %v3431_v12, %v9303_v63  ;;  %v3324_v5 = vmul.f32 %v3321_v48, %v3045_v24  ;;  %v3392_v25 = vmul.f32 %v3389_v43, %v3045_v24  ;;  %v3460_v52 = vmul.f32 %v3457_v16, %v3045_v24 }
 0x397   : > { %v3193_v58 = vrot.slane %v8075_v39, 2  ;;  %v3261_v42 = vrot.slane %v8077_v4, 3  ;;  %v3127_v41 = vrot.slane %v3120_v54, 1  ;;  %v2973_v33 = vadd.f32 %v7899_v60, %v2956_v3 }
 0x398   : > { %v3329_v6 = vrot.slane %v8086_v18, 4  ;;  %v3195_v14 = vrot.slane %v3188_v9, 2  ;;  %v3263_v29 = vrot.slane %v3256_v36, 3  ;;  %v3065_v57 = vstv %s8057_s7  ;;  %s8552_s7 = sld [smem:[#allocation2 + $0x186]] }
 0x399   : > { %v8103_v12 = vadd.f32 %v3073_v50, %v3008_v22  ;;  %v3397_v47 = vrot.slane %v8093_v40, 5  ;;  %v3465_v24 = vrot.slane %v8095_v53, 6  ;;  %v3043_v26 = vsel %vm3018_vm1, %v3035_v37, 0.0 }
 0x39a   : > { %v3331_v59 = vrot.slane %v3324_v5, 4  ;;  %v3399_v54 = vrot.slane %v3392_v25, 5  ;;  %v3467_v45 = vrot.slane %v3460_v52, 6  ;;  %v8111_v60 = vsel %vm3018_vm1, %v3023_v49, 0.0 }
 0x39b   : > { %v8118_v50 = vsel %vm407_vm6, %v3125_v28, %v3127_v41  ;;  %v3062_v3 = vadd.f32 %v7824_v15, %v2973_v33  ;;  %v8122_v9 = vsel %vm3018_vm1, %v3025_v0, 0.0  ;;  %v2990_v36 = vadd.f32 %v7769_v31, %v2939_v23  ;;  %v3047_v31 = vpop.permute.xlu1 %3046  ;;  %v3049_v41 = vpop.permute.xlu0 %3048 }
 0x39c   : > { %v8128_v22 = vsel %vm405_vm5, %v3193_v58, %v3195_v14  ;;  %v8133_v49 = vsel %vm403_vm4, %v3261_v42, %v3263_v29  ;;  %v3186_v63 = vmul.f32 %v3185_v32, %v3043_v26  ;;  %v3254_v40 = vmul.f32 %v3253_v13, %v3043_v26 }
 0x39d   : > { %v3066_v15 = vmul.f32 %v3065_v57, %v8111_v60  ;;  %v3118_v53 = vmul.f32 %v3117_v1, %v3043_v26  ;;  %v3322_v5 = vmul.f32 %v3321_v48, %v3043_v26  ;;  %v3390_v25 = vmul.f32 %v3389_v43, %v3043_v26 }
 0x39e   : > { %v8141_v23 = vsel %vm307_vm0, %v3329_v6, %v3331_v59  ;;  %v3067_v52 = vmul.f32 %v3065_v57, %v8122_v9  ;;  %v3002_v32 = vsel %vm398_vm2, %v3000_v51, %v3001_v10  ;;  %v3458_v13 = vmul.f32 %v3457_v16, %v3043_v26 }
 0x39f   : > { %v8150_v1 = vsel %vm400_vm3, %v3397_v47, %v3399_v54  ;;  %v8153_v48 = vsel %vm398_vm2, %v3465_v24, %v3467_v45  ;;  %v3068_v43 = vadd.f32 %v3066_v15, %v3062_v3  ;;  %v3007_v37 = vadd.f32 %v3002_v32, %v2990_v36  ;;  %v3027_v36 = vpop.permute.xlu1 %3026  ;;  %v3491_v18 = vpop.permute.xlu0 %3490 }
 0x3a0   : > { %v9304_v19 = vrot.slane %v7869_v8, 1  ;;  %v3069_v27 = vadd.f32 %v3067_v52, %v8019_v2  ;;  %v3192_v10 = vrot.slane %v3186_v63, 2  ;;  %v3260_v16 = vrot.slane %v3254_v40, 3 }
 0x3a1   : > { %v3072_v33 = vmul.f32 %v3071_v35, %v3043_v26  ;;  %v3124_v14 = vrot.slane %v3118_v53, 1  ;;  %v3328_v29 = vrot.slane %v3322_v5, 4  ;;  %v3396_v57 = vrot.slane %v3390_v25, 5 }
 0x3a2   : > { %v3092_v51 = vsel %vm407_vm6, %v9304_v19, %v3091_v38  ;;  %v3464_v0 = vrot.slane %v3458_v13, 6  ;;  %v3077_v59 = vstv %s8113_s24  ;;  %v8169_v54 = vsel %vm3018_vm1, %v3049_v41, 0.0  ;;  %s8591_s24 = sld [smem:[#allocation2 + $0x9b]] }
 0x3a3   : > { %v3100_v8 = vstv %s8108_s20  ;;  %v3097_v2 = vadd.f32 %v3092_v51, %v3068_v43  ;;  %v9305_v45 = vrot.slane %v7894_v61, 1  ;;  %v3074_v26 = vadd.f32 %v3072_v33, %v3007_v37  ;;  %s8562_s20 = sld [smem:[#allocation2 + $0x94]] }
 0x3a4   : > { %v3101_v3 = vmul.f32 %v3100_v8, %v8111_v60  ;;  %v8185_v40 = vsel %vm405_vm5, %v3192_v10, %v3193_v58  ;;  %v8190_v15 = vsel %vm403_vm4, %v3260_v16, %v3261_v42  ;;  %v3168_v61 = vstv %s8135_s13  ;;  %s8608_s13 = sld [smem:[#allocation2 + $0xa2]] }
 0x3a5   : > { %v3094_v35 = vsel %vm407_vm6, %v3091_v38, %v9305_v45  ;;  %v8196_v30 = vsel %vm307_vm0, %v3328_v29, %v3329_v6  ;;  %v8199_v38 = vsel %vm400_vm3, %v3396_v57, %v3397_v47  ;;  %v3079_v39 = vmul.f32 %v3077_v59, %v8169_v54 }
 0x3a6   : > { %v3098_v63 = vadd.f32 %v3094_v35, %v3069_v27  ;;  %v8203_v53 = vsel %vm3018_vm1, %v3047_v31, 0.0  ;;  %v8206_v4 = vsel %vm398_vm2, %v3464_v0, %v3465_v24  ;;  %v3126_v58 = vsel %vm407_vm6, %v3124_v14, %v3125_v28 }
 0x3a7   : > { %v3033_v42 = vsel %vm3018_vm1, %v3027_v36, 0.0  ;;  %v3107_v6 = vrot.slane %v3101_v3, 1  ;;  %v3169_v47 = vmul.f32 %v3168_v61, %v8111_v60  ;;  %v3236_v5 = vstv %s8155_s29  ;;  %s8621_s29 = sld [smem:[#allocation2 + $0xa9]] }
 0x3a8   : > { %v3102_v25 = vmul.f32 %v3100_v8, %v8122_v9  ;;  %v3081_v24 = vadd.f32 %v3079_v39, %v8103_v12  ;;  %v3103_v31 = vmul.f32 %v3100_v8, %v3033_v42  ;;  %v3170_v44 = vmul.f32 %v3168_v61, %v8122_v9 }
 0x3a9   : > { %v3171_v28 = vmul.f32 %v3168_v61, %v3033_v42  ;;  %v3078_v52 = vmul.f32 %v3077_v59, %v8203_v53  ;;  %v3540_v32 = vstv %s8165_s30  ;;  %v8222_v13 = vsel %vm3499_vm7, %v3491_v18, 0.0  ;;  %s8628_s30 = sld [smem:[#allocation2 + $0xb0]] }
 0x3aa   : > { %v3108_v43 = vrot.slane %v3102_v25, 1  ;;  %v3237_v37 = vmul.f32 %v3236_v5, %v8111_v60  ;;  %v3304_v41 = vstv %s8172_s6  ;;  %v3372_v19 = vstv %s8174_s26  ;;  %s8672_s6 = sld [smem:[#allocation2 + $0x18d]]  ;;  %s8683_s26 = sld [smem:[#allocation2 + $0x194]] }
 0x3ab   : > { %v3110_v51 = vrot.slane %v3103_v31, 1  ;;  %v3175_v27 = vrot.slane %v3169_v47, 2  ;;  %v3176_v10 = vrot.slane %v3170_v44, 2  ;;  %v3238_v16 = vmul.f32 %v3236_v5, %v8122_v9 }
 0x3ac   : > { %v3109_v12 = vsel %vm407_vm6, %v3107_v6, %v3108_v43  ;;  %v3178_v29 = vrot.slane %v3171_v28, 2  ;;  %v3239_v57 = vmul.f32 %v3236_v5, %v3033_v42  ;;  %v8231_v0 = vadd.f32 %v8118_v50, %v3081_v24 }
 0x3ad   : > { %v3111_v33 = vsel %vm407_vm6, %v3108_v43, %v3110_v51  ;;  %v3114_v14 = vadd.f32 %v3109_v12, %v3097_v2  ;;  %v3080_v59 = vadd.f32 %v3078_v52, %v3074_v26  ;;  %v8236_v8 = vmul.f32 %v3540_v32, %v8222_v13 }
 0x3ae   : > { %v3115_v45 = vadd.f32 %v3111_v33, %v3098_v63  ;;  %v3305_v35 = vmul.f32 %v3304_v41, %v8111_v60  ;;  %v3373_v3 = vmul.f32 %v3372_v19, %v8111_v60  ;;  %v3440_v36 = vstv %s8211_s23  ;;  %s8690_s23 = sld [smem:[#allocation2 + $0x19b]] }
 0x3af   : > { %v3165_v2 = vadd.f32 %v8026_v46, %v3114_v14  ;;  %v3243_v61 = vrot.slane %v3237_v37, 3  ;;  %v3177_v26 = vsel %vm405_vm5, %v3175_v27, %v3176_v10  ;;  %v3244_v39 = vrot.slane %v3238_v16, 3  ;;  %v3495_v14 = vpop.permute.xlu0 %3494 }
 0x3b0   : > { %v3166_v50 = vadd.f32 %v8031_v34, %v3115_v45  ;;  %v3179_v63 = vsel %vm405_vm5, %v3176_v10, %v3178_v29  ;;  %v3246_v6 = vrot.slane %v3239_v57, 3  ;;  %v3306_v47 = vmul.f32 %v3304_v41, %v8122_v9 }
 0x3b1   : > { %v3182_v18 = vadd.f32 %v3177_v26, %v3165_v2  ;;  %v8256_v46 = vadd.f32 %v3126_v58, %v3080_v59  ;;  %v3441_v5 = vmul.f32 %v3440_v36, %v8111_v60  ;;  %v3307_v25 = vmul.f32 %v3304_v41, %v3033_v42 }
 0x3b2   : > { %v3183_v34 = vadd.f32 %v3179_v63, %v3166_v50  ;;  %v3311_v24 = vrot.slane %v3305_v35, 4  ;;  %v3374_v44 = vmul.f32 %v3372_v19, %v8122_v9  ;;  %v3375_v28 = vmul.f32 %v3372_v19, %v3033_v42 }
 0x3b3   : > { %v3233_v31 = vadd.f32 %v8036_v20, %v3182_v18  ;;  %v3379_v52 = vrot.slane %v3373_v3, 5  ;;  %v3245_v58 = vsel %vm403_vm4, %v3243_v61, %v3244_v39  ;;  %v3442_v37 = vmul.f32 %v3440_v36, %v8122_v9 }
 0x3b4   : > { %v3234_v43 = vadd.f32 %v8041_v7, %v3183_v34  ;;  %v3247_v60 = vsel %vm403_vm4, %v3244_v39, %v3246_v6  ;;  %v3312_v51 = vrot.slane %v3306_v47, 4  ;;  %v3443_v27 = vmul.f32 %v3440_v36, %v3033_v42 }
 0x3b5   : > { %v3250_v41 = vadd.f32 %v3245_v58, %v3233_v31  ;;  %v3447_v12 = vrot.slane %v3441_v5, 6  ;;  %v3314_v10 = vrot.slane %v3307_v25, 4  ;;  %v8268_v19 = vstv %s8238_s5  ;;  %v3051_v58 = vpop.permute.xlu1 %3050  ;;  %s8704_s5 = sld [smem:[#allocation2 + $0x1a2]] }
 0x3b6   : > { %v3251_v20 = vadd.f32 %v3247_v60, %v3234_v43  ;;  %v3380_v16 = vrot.slane %v3374_v44, 5  ;;  %v3382_v9 = vrot.slane %v3375_v28, 5  ;;  %v8274_v33 = vstv %s8244_s21  ;;  %s8714_s21 = sld [smem:[#allocation2 + $0x1a9]] }
 0x3b7   : > { %v3301_v7 = vadd.f32 %v8046_v62, %v3250_v41  ;;  %v3448_v57 = vrot.slane %v3442_v37, 6  ;;  %v8278_v42 = vstv %s8248_s11  ;;  %v8281_v59 = vstv %s8250_s2  ;;  %s8727_s11 = sld [smem:[#allocation2 + $0x1b0]]  ;;  %s4790_s2 = smov 13  }
 0x3b8   : > { %v3302_v29 = vadd.f32 %v8051_v21, %v3251_v20  ;;  %v3313_v45 = vsel %vm307_vm0, %v3311_v24, %v3312_v51  ;;  %v3450_v35 = vrot.slane %v3443_v27, 6  ;;  %v8286_v3 = vmul.f32 %v8268_v19, %v8222_v13 }
 0x3b9   : > { %v8289_v62 = vstv %s8254_s17  ;;  %v3318_v36 = vadd.f32 %v3313_v45, %v3301_v7  ;;  %v8295_v21 = vmul.f32 %v8274_v33, %v8222_v13  ;;  %v8298_v2 = vstv %s8259_s22  ;;  %s4791_s17 = smov 29   ;;  %s4792_s22 = smov 45  }
 0x3ba   : > { %v3502_v61 = vsel %vm3499_vm7, %v3495_v14, 0.0  ;;  %v3315_v50 = vsel %vm307_vm0, %v3312_v51, %v3314_v10  ;;  %v3381_v26 = vsel %vm400_vm3, %v3379_v52, %v3380_v16  ;;  %v8305_v39 = vmul.f32 %v8278_v42, %v8222_v13 }
 0x3bb   : > { %v8309_v63 = vmul.f32 %v8281_v59, %v8222_v13  ;;  %v3319_v18 = vadd.f32 %v3315_v50, %v3302_v29  ;;  %v3383_v6 = vsel %vm400_vm3, %v3380_v16, %v3382_v9  ;;  %v8313_v47 = vsel %vm398_vm2, %v3447_v12, %v3448_v57 }
 0x3bc   : > { %v8317_v5 = vmul.f32 %v8289_v62, %v8222_v13  ;;  %v8320_v34 = vsel %vm398_vm2, %v3448_v57, %v3450_v35  ;;  %v8325_v24 = vmul.f32 %v8298_v2, %v8222_v13  ;;  %v8328_v31 = vmul.f32 %v8268_v19, %v3502_v61 }
 0x3bd   : > { %v3369_v44 = vadd.f32 %v8063_v11, %v3318_v36  ;;  %v8335_v52 = vmul.f32 %v8274_v33, %v3502_v61  ;;  %v3134_v43 = vstv %s8270_s16  ;;  %v8343_v60 = vmul.f32 %v8278_v42, %v3502_v61  ;;  %s4793_s16 = smov 61  }
 0x3be   : > { %v3135_v41 = vmul.f32 %v3134_v43, %v8203_v53  ;;  %v3370_v11 = vadd.f32 %v8068_v55, %v3319_v18  ;;  %v8349_v27 = vmul.f32 %v8281_v59, %v3502_v61  ;;  %v8352_v12 = vmul.f32 %v8289_v62, %v3502_v61 }
 0x3bf   : > { %v3202_v7 = vstv %s8291_s28  ;;  %v3057_v16 = vsel %vm3018_vm1, %v3051_v58, 0.0  ;;  %v8360_v9 = vadd.f32 %v3381_v26, %v3369_v44  ;;  %v8364_v14 = vmul.f32 %v8298_v2, %v3502_v61  ;;  %s4794_s28 = smov 77  }
 0x3c0   : > { %v3203_v29 = vmul.f32 %v3202_v7, %v8203_v53  ;;  %v3141_v45 = vrot.slane %v3135_v41, 1  ;;  %v3136_v35 = vmul.f32 %v3134_v43, %v8169_v54  ;;  %v3137_v36 = vmul.f32 %v3134_v43, %v3057_v16 }
 0x3c1   : > { %v3387_v50 = vadd.f32 %v3383_v6, %v3370_v11  ;;  %v3205_v44 = vmul.f32 %v3202_v7, %v3057_v16  ;;  %v3270_v58 = vstv %s8330_s8  ;;  %v3204_v25 = vmul.f32 %v3202_v7, %v8169_v54  ;;  %s4796_s8 = smov 109  }
 0x3c2   : > { %v3142_v61 = vrot.slane %v3136_v35, 1  ;;  %v3144_v10 = vrot.slane %v3137_v36, 1  ;;  %v3209_v51 = vrot.slane %v3203_v29, 2  ;;  %v3271_v41 = vmul.f32 %v3270_v58, %v8203_v53 }
 0x3c3   : > { %v3338_v37 = vstv %s8338_s12  ;;  %v3212_v11 = vrot.slane %v3205_v44, 2  ;;  %v3273_v18 = vmul.f32 %v3270_v58, %v3057_v16  ;;  %v3438_v26 = vadd.f32 %v8091_v56, %v3387_v50  ;;  %s9318_s12 = sld [smem:[#allocation21_spill]] }
 0x3c4   : > { %v3143_v43 = vsel %vm407_vm6, %v3141_v45, %v3142_v61  ;;  %v3145_v6 = vsel %vm407_vm6, %v3142_v61, %v3144_v10  ;;  %v3406_v57 = vstv %s8354_s10  ;;  %v3339_v7 = vmul.f32 %v3338_v37, %v8203_v53  ;;  %s9319_s10 = sld [smem:[#allocation24_spill]] }
 0x3c5   : > { %v3148_v35 = vadd.f32 %v3143_v43, %v8256_v46  ;;  %v3149_v36 = vadd.f32 %v3145_v6, %v8231_v0  ;;  %v3210_v20 = vrot.slane %v3204_v25, 2  ;;  %v3272_v29 = vmul.f32 %v3270_v58, %v8169_v54  ;;  %v3493_v0 = vpop.permute.xlu1 %3492 }
 0x3c6   : > { %v3341_v13 = vmul.f32 %v3338_v37, %v3057_v16  ;;  %v3407_v55 = vmul.f32 %v3406_v57, %v8203_v53  ;;  %v3474_v45 = vstv %s4443_s27  ;;  %v3277_v61 = vrot.slane %v3271_v41, 3  ;;  %s9320_s27 = sld [smem:[#allocation25_spill]] }
 0x3c7   : > { %v3199_v10 = vadd.f32 %v8185_v40, %v3148_v35  ;;  %v3200_v44 = vadd.f32 %v8128_v22, %v3149_v36  ;;  %v3211_v56 = vsel %vm405_vm5, %v3209_v51, %v3210_v20  ;;  %v3213_v46 = vsel %vm405_vm5, %v3210_v20, %v3212_v11 }
 0x3c8   : > { %v3280_v50 = vrot.slane %v3273_v18, 3  ;;  %v3455_v25 = vadd.f32 %v8320_v34, %v3438_v26  ;;  %v3340_v6 = vmul.f32 %v3338_v37, %v8169_v54  ;;  %v3345_v28 = vrot.slane %v3339_v7, 4 }
 0x3c9   : > { %v3216_v58 = vadd.f32 %v3211_v56, %v3199_v10  ;;  %v3217_v43 = vadd.f32 %v3213_v46, %v3200_v44  ;;  %v8394_v40 = vmul.f32 %v3474_v45, %v8203_v53  ;;  %v3278_v22 = vrot.slane %v3272_v29, 3 }
 0x3ca   : > { %v3348_v41 = vrot.slane %v3341_v13, 4  ;;  %v3408_v18 = vmul.f32 %v3406_v57, %v8169_v54  ;;  %v3501_v11 = vsel %vm3499_vm7, %v3493_v0, 0.0  ;;  %v3409_v35 = vmul.f32 %v3406_v57, %v3057_v16 }
 0x3cb   : > { %v3267_v51 = vadd.f32 %v8190_v15, %v3216_v58  ;;  %v3268_v20 = vadd.f32 %v8133_v49, %v3217_v43  ;;  %v3279_v34 = vsel %vm403_vm4, %v3277_v61, %v3278_v22  ;;  %v3281_v26 = vsel %vm403_vm4, %v3278_v22, %v3280_v50  ;;  %v3518_v49 = vpop.permute.xlu0 %3517 }
 0x3cc   : > { %v3477_v37 = vmul.f32 %v3474_v45, %v3057_v16  ;;  %v3413_v36 = vrot.slane %v3407_v55, 5  ;;  %v3346_v29 = vrot.slane %v3340_v6, 4  ;;  %v3481_v13 = vrot.slane %v8394_v40, 6 }
 0x3cd   : > { %v3284_v7 = vadd.f32 %v3279_v34, %v3267_v51  ;;  %v3285_v53 = vadd.f32 %v3281_v26, %v3268_v20  ;;  %v8404_v15 = vmul.f32 %v3474_v45, %v8169_v54  ;;  %v3634_v10 = vmul.f32 %v8274_v33, %v3501_v11 }
 0x3ce   : > { %v3702_v44 = vmul.f32 %v8278_v42, %v3501_v11  ;;  %v3349_v16 = vsel %vm307_vm0, %v3346_v29, %v3348_v41  ;;  %v3414_v55 = vrot.slane %v3408_v18, 5  ;;  %v3416_v56 = vrot.slane %v3409_v35, 5 }
 0x3cf   : > { %v3335_v61 = vadd.f32 %v8196_v30, %v3284_v7  ;;  %v3336_v57 = vadd.f32 %v8141_v23, %v3285_v53  ;;  %v3484_v46 = vrot.slane %v3477_v37, 6  ;;  %v3552_v54 = vstv %s8389_s0  ;;  %v3520_v34 = vpop.permute.xlu0 %3519  ;;  %s9321_s0 = sld [smem:[#allocation22_spill]] }
 0x3d0   : > { %v3770_v45 = vmul.f32 %v8281_v59, %v3501_v11  ;;  %v8422_v23 = vsel %vm3499_vm7, %v3518_v49, 0.0  ;;  %v8425_v33 = vmul.f32 %v8268_v19, %v3501_v11  ;;  %v3838_v42 = vmul.f32 %v8289_v62, %v3501_v11 }
 0x3d1   : > { %v3353_v30 = vadd.f32 %v3349_v16, %v3336_v57  ;;  %v3347_v50 = vsel %vm307_vm0, %v3345_v28, %v3346_v29  ;;  %v3482_v59 = vrot.slane %v8404_v15, 6  ;;  %v3640_v0 = vrot.slane %v3634_v10, 2 }
 0x3d2   : > { %v3708_v58 = vrot.slane %v3702_v44, 3  ;;  %v3352_v43 = vadd.f32 %v3347_v50, %v3335_v61  ;;  %v3415_v22 = vsel %vm400_vm3, %v3413_v36, %v3414_v55  ;;  %v3542_v41 = vmul.f32 %v3540_v32, %v3501_v11 }
 0x3d3   : > { %v3404_v6 = vadd.f32 %v8150_v1, %v3353_v30  ;;  %v3417_v19 = vsel %vm400_vm3, %v3414_v55, %v3416_v56  ;;  %v3485_v62 = vsel %vm398_vm2, %v3482_v59, %v3484_v46  ;;  %v3554_v28 = vmul.f32 %v3552_v54, %v8422_v23 }
 0x3d4   : > { %v3776_v51 = vrot.slane %v3770_v45, 4  ;;  %v8445_v20 = vadd.f32 %v3542_v41, %v3455_v25  ;;  %v3572_v32 = vrot.slane %v8425_v33, 1  ;;  %v3844_v18 = vrot.slane %v3838_v42, 5 }
 0x3d5   : > { %v3421_v1 = vadd.f32 %v3417_v19, %v3404_v6  ;;  %v9306_v26 = vrot.slane %v8295_v21, 2  ;;  %v9307_v37 = vrot.slane %v8335_v52, 2  ;;  %v9308_v7 = vrot.slane %v8305_v39, 3  ;;  %p9324_p7 = scmp.ne.s32.totalorder %s9321_s0, 0 }
 0x3d6   : > { %v3906_v53 = vmul.f32 %v8298_v2, %v3501_v11  ;;  %v3403_v29 = vadd.f32 %v8199_v38, %v3352_v43  ;;  %v9309_v21 = vrot.slane %v8343_v60, 3  ;;  %v8471_v10 = vstv %s8411_s1  ;;  %v3504_v2 = vpop.permute.xlu1 %3503  ;;  %s4480_s1 = sshll.u32 %s9318_s12, 7 }
 0x3d7   : > { %v8451_v35 = vsel %vm405_vm5, %v9306_v26, %v3640_v0  ;;  %v8456_v36 = vsel %vm405_vm5, %v3640_v0, %v9307_v37  ;;  %v8461_v25 = vsel %vm403_vm4, %v9308_v7, %v3708_v58  ;;  %v3666_v52 = vstv %s8413_s3  ;;  %s9322_s3 = sshll.u32 %s9319_s10, 3 }
 0x3d8   : > { %v8468_v49 = vsel %vm403_vm4, %v3708_v58, %v9309_v21  ;;  %v9310_v44 = vrot.slane %v8309_v63, 4  ;;  %v3734_v39 = vstv %s8417_s4  ;;  %v3802_v57 = vstv %s8419_s15  ;;  %s302_s4 = scalar_lea.vmem [#allocation10], %s9322_s3 }
 0x3d9   : > { %v3526_v16 = vsel %vm3499_vm7, %v3520_v34, 0.0  ;;  %v3472_v38 = vadd.f32 %v8153_v48, %v3421_v1  ;;  %v9311_v60 = vrot.slane %v8349_v27, 4  ;;  %v9312_v55 = vrot.slane %v8317_v5, 5  ;;  %s4133_s15 = sshll.u32 %s302_s4, 4  ;;  %s8801_s15 = int_to_ptr.vmem [resolvable:$true] %s4133_s15 }
 0x3da   : > { %v8477_v61 = vsel %vm307_vm0, %v9310_v44, %v3776_v51  ;;  %v8494_v56 = vstv %s8428_s18  ;;  %v9313_v46 = vrot.slane %v8352_v12, 5  ;;  %v3912_v30 = vrot.slane %v3906_v53, 6  ;;  %v3516_v7 = vpop.permute.xlu1 %3515 }
 0x3db   : > { %v8486_v11 = vsel %vm307_vm0, %v3776_v51, %v9311_v60  ;;  %v8491_v63 = vsel %vm400_vm3, %v9312_v55, %v3844_v18  ;;  %v8503_v48 = vmul.f32 %v8471_v10, %v8422_v23  ;;  %v8506_v27 = vmul.f32 %v3666_v52, %v8422_v23 }
 0x3dc   : > { %v8499_v45 = vsel %vm400_vm3, %v3844_v18, %v9313_v46  ;;  %v3420_v5 = vadd.f32 %v3415_v22, %v3403_v29  ;;  %v8511_v42 = vmul.f32 %v3734_v39, %v8422_v23  ;;  %v8514_v50 = vmul.f32 %v3802_v57, %v8422_v23  ;;  %v3506_v29 = vpop.permute.xlu0 %3505 }
 0x3dd   : > { %v3601_v12 = vmul.f32 %v8471_v10, %v3526_v16  ;;  %v8519_v0 = vmul.f32 %v8494_v56, %v8422_v23  ;;  %v8522_v58 = vstv %s8443_s14  ;;  %v3669_v43 = vmul.f32 %v3666_v52, %v3526_v16 }
 0x3de   : > { %v3737_v6 = vmul.f32 %v3734_v39, %v3526_v16  ;;  %v3489_v41 = vadd.f32 %v3485_v62, %v3472_v38  ;;  %v3805_v19 = vmul.f32 %v3802_v57, %v3526_v16  ;;  %v3873_v22 = vmul.f32 %v8494_v56, %v3526_v16 }
 0x3df   : > { %v3437_v51 = vadd.f32 %v8084_v17, %v8360_v9  ;;  %v9314_v1 = vrot.slane %v8325_v24, 6  ;;  %v9315_v34 = vrot.slane %v8364_v14, 6  ;;  %v3606_v37 = vrot.slane %v8503_v48, 1 }
 0x3e0   : > { %v3674_v62 = vrot.slane %v8506_v27, 2  ;;  %v3742_v53 = vrot.slane %v8511_v42, 3  ;;  %v3810_v17 = vrot.slane %v8514_v50, 4  ;;  %v3608_v9 = vrot.slane %v3601_v12, 1 }
 0x3e1   : > { %v8530_v18 = vsel %vm398_vm2, %v9314_v1, %v3912_v30  ;;  %v8535_v26 = vsel %vm398_vm2, %v3912_v30, %v9315_v34  ;;  %v3454_v24 = vadd.f32 %v8313_v47, %v3437_v51  ;;  %v3878_v21 = vrot.slane %v8519_v0, 5  ;;  %v3528_v1 = vpop.permute.xlu1 %3527 }
 0x3e2   : > { %v8545_v14 = vmul.f32 %v8522_v58, %v8422_v23  ;;  %v3676_v44 = vrot.slane %v3669_v43, 2  ;;  %v3744_v38 = vrot.slane %v3737_v6, 3  ;;  %v8549_v60 = vadd.f32 %v3554_v28, %v3489_v41 }
 0x3e3   : > { %v3812_v55 = vrot.slane %v3805_v19, 4  ;;  %v3880_v46 = vrot.slane %v3873_v22, 5  ;;  %v3524_v30 = vsel %vm3499_vm7, %v3516_v7, 0.0  ;;  %v3546_v47 = vstv %s8508_s25  ;;  %s9323_s25 = sld [smem:[#allocation137_spill]] }
 0x3e4   : > { %v8556_v12 = vsel %vm3499_vm7, %v3504_v2, 0.0  ;;  %v8559_v51 = vsel %vm3499_vm7, %v3506_v29, 0.0  ;;  %v3471_v23 = vadd.f32 %v8206_v4, %v3420_v5  ;;  %v8567_v28 = vsel %vm407_vm6, %v3606_v37, %v3608_v9 }
 0x3e5   : > { %v8570_v43 = vmul.f32 %v8522_v58, %v3526_v16  ;;  %v3543_v6 = vadd.f32 %v8236_v8, %v3454_v24  ;;  %v3667_v41 = vmul.f32 %v3666_v52, %v3524_v30  ;;  %v8576_v2 = vsel %vm405_vm5, %v3674_v62, %v3676_v44 }
 0x3e6   : > { %v8581_v4 = vsel %vm403_vm4, %v3742_v53, %v3744_v38  ;;  %v3735_v5 = vmul.f32 %v3734_v39, %v3524_v30  ;;  %v3803_v19 = vmul.f32 %v3802_v57, %v3524_v30  ;;  %v3547_v22 = vmul.f32 %v3546_v47, %v8556_v12 }
 0x3e7   : > { %v3548_v16 = vmul.f32 %v3546_v47, %v8559_v51  ;;  %v3483_v8 = vsel %vm398_vm2, %v3481_v13, %v3482_v59  ;;  %v3599_v52 = vmul.f32 %v8471_v10, %v3524_v30  ;;  %v8596_v39 = vsel %vm307_vm0, %v3810_v17, %v3812_v55  ;;  %v3530_v10 = vpop.permute.xlu0 %3529 }
 0x3e8   : > { %v8601_v15 = vsel %vm400_vm3, %v3878_v21, %v3880_v46  ;;  %v9316_v40 = vrot.slane %v8286_v3, 1  ;;  %v3488_v59 = vadd.f32 %v3483_v8, %v3471_v23  ;;  %v3549_v57 = vadd.f32 %v3547_v22, %v3543_v6 }
 0x3e9   : > { %v3550_v34 = vadd.f32 %v3548_v16, %v8445_v20  ;;  %v3673_v7 = vrot.slane %v3667_v41, 2  ;;  %v8612_v9 = vmul.f32 %v8494_v56, %v3524_v30  ;;  %v9317_v24 = vrot.slane %v8328_v31, 1 }
 0x3ea   : > { %v3573_v13 = vsel %vm407_vm6, %v9316_v40, %v3572_v32  ;;  %v3553_v29 = vmul.f32 %v3552_v54, %v3524_v30  ;;  %v3741_v44 = vrot.slane %v3735_v5, 3  ;;  %v3809_v38 = vrot.slane %v3803_v19, 4  ;;  %v3508_v5 = vpop.permute.xlu1 %3507 }
 0x3eb   : > { %v3575_v3 = vsel %vm407_vm6, %v3572_v32, %v9317_v24  ;;  %v3605_v55 = vrot.slane %v3599_v52, 1  ;;  %v3558_v46 = vstv %s8552_s7  ;;  %v8625_v20 = vsel %vm3499_vm7, %v3530_v10, 0.0  ;;  %s4119_s7 = scalar_lea.sflag [#allocation4], %s9319_s10 }
 0x3ec   : > { %v3581_v47 = vstv %s8547_s9  ;;  %v3555_v56 = vadd.f32 %v3553_v29, %v3488_v59  ;;  %v8631_v31 = vsel %vm3499_vm7, %v3528_v1, 0.0  ;;  %v3649_v54 = vstv %s8562_s20  ;;  %s8799_s9 = scalar_lea.hbm %s9323_s25, %s4480_s1  ;;  %s4695_s20 = scalar_lea.vmem %s8801_s15, 128 }
 0x3ed   : > { %v3582_v33 = vmul.f32 %v3581_v47, %v8556_v12  ;;  %v3578_v32 = vadd.f32 %v3573_v13, %v3549_v57  ;;  %v3579_v23 = vadd.f32 %v3575_v3, %v3550_v34  ;;  %v8638_v6 = vsel %vm405_vm5, %v3673_v7, %v3674_v62  ;;  %p4696_p5 = scmp.ne.s32.totalorder %s8801_s15, %s4695_s20 }
 0x3ee   : > { %v3877_v41 = vrot.slane %v8612_v9, 5  ;;  %v8644_v19 = vsel %vm403_vm4, %v3741_v44, %v3742_v53  ;;  %v8649_v22 = vsel %vm307_vm0, %v3809_v38, %v3810_v17  ;;  %v8652_v16 = vmul.f32 %v8522_v58, %v3524_v30 }
 0x3ef   : > { %v3560_v27 = vmul.f32 %v3558_v46, %v8625_v20  ;;  %v3559_v62 = vmul.f32 %v3558_v46, %v8631_v31  ;;  %v3607_v42 = vsel %vm407_vm6, %v3605_v55, %v3606_v37  ;;  %v3650_v53 = vmul.f32 %v3649_v54, %v8556_v12  ;;  %p4697_p2 = pnand %p4696_p5, %p9324_p7 }
 0x3f0   : > { %v3717_v8 = vstv %s8591_s24  ;;  %v3588_v50 = vrot.slane %v3582_v33, 1  ;;  %v3785_v52 = vstv %s8608_s13  ;;  %v3514_v17 = vsel %vm3499_vm7, %v3508_v5, 0.0  ;;  %s4797_s24 = smov [#allocation10]  }
 0x3f1   : > { %v3583_v58 = vmul.f32 %v3581_v47, %v8559_v51  ;;  %v3562_v30 = vadd.f32 %v3560_v27, %v8549_v60  ;;  %v3584_v1 = vmul.f32 %v3581_v47, %v3514_v17  ;;  %v3651_v40 = vmul.f32 %v3649_v54, %v8559_v51  ;;  %p4698_p1 = pneg %p4697_p2  ;;  %s4699_s13 = sshll.u32 %s4797_s24, 4  ;;  %s4700_s13 = int_to_ptr.vmem [resolvable:$false] %s4699_s13 }
 0x3f2   : > { %v3652_v13 = vmul.f32 %v3649_v54, %v3514_v17  ;;  %v3561_v59 = vadd.f32 %v3559_v62, %v3555_v56  ;;  %v3718_v48 = vmul.f32 %v3717_v8, %v8556_v12  ;;  %v3853_v37 = vstv %s8621_s29  ;;  %s4701_s29 = scalar_lea.vmem %s4700_s13, 256  ;;  %p4702_p6 = scmp.lt.s32.totalorder %s8801_s15, %s4700_s13 }
 0x3f3   : > { %v3589_v10 = vrot.slane %v3583_v58, 1  ;;  %v3656_v57 = vrot.slane %v3650_v53, 2  ;;  %v3786_v34 = vmul.f32 %v3785_v52, %v8556_v12  ;;  %v3921_v7 = vstv %s8628_s30  ;;  %p4703_p11 = scmp.lt.s32.totalorder %s4701_s29, %s4695_s20 }
 0x3f4   : > { %v3591_v24 = vrot.slane %v3584_v1, 1  ;;  %v3657_v29 = vrot.slane %v3651_v40, 2  ;;  %v3719_v44 = vmul.f32 %v3717_v8, %v8559_v51  ;;  %v3720_v60 = vmul.f32 %v3717_v8, %v3514_v17 }
 0x3f5   : > { %v3590_v3 = vsel %vm407_vm6, %v3588_v50, %v3589_v10  ;;  %v3659_v46 = vrot.slane %v3652_v13, 2  ;;  %v3787_v47 = vmul.f32 %v3785_v52, %v8559_v51  ;;  %v8677_v56 = vadd.f32 %v8567_v28, %v3562_v30  ;;  %p4704_p0 = por %p4703_p11, %p4702_p6 }
 0x3f6   : > { %v3592_v38 = vsel %vm407_vm6, %v3589_v10, %v3591_v24  ;;  %v3595_v55 = vadd.f32 %v3590_v3, %v3578_v32  ;;  %v8679_v33 = vadd.f32 %v3607_v42, %v3561_v59  ;;  %v3788_v5 = vmul.f32 %v3785_v52, %v3514_v17 }
 0x3f7   : > { %v3596_v54 = vadd.f32 %v3592_v38, %v3579_v23  ;;  %v3724_v27 = vrot.slane %v3718_v48, 3  ;;  %v3792_v62 = vrot.slane %v3786_v34, 4  ;;  %v3854_v53 = vmul.f32 %v3853_v37, %v8556_v12  ;;  %p4705_p12 = pnand %p4704_p0, %p4698_p1 }
 0x3f8   : > { %v3646_v8 = vadd.f32 %v8451_v35, %v3595_v55  ;;  %v8686_v32 = vmul.f32 %v3921_v7, %v8556_v12  ;;  %v3658_v28 = vsel %vm405_vm5, %v3656_v57, %v3657_v29  ;;  %v3725_v58 = vrot.slane %v3719_v44, 3 }
 0x3f9   : > { %v3647_v50 = vadd.f32 %v8456_v36, %v3596_v54  ;;  %v3660_v23 = vsel %vm405_vm5, %v3657_v29, %v3659_v46  ;;  %v3727_v52 = vrot.slane %v3720_v60, 3  ;;  %v3793_v30 = vrot.slane %v3787_v47, 4 }
 0x3fa   : > { %v3663_v42 = vadd.f32 %v3658_v28, %v3646_v8  ;;  %v3795_v35 = vrot.slane %v3788_v5, 4  ;;  %v3855_v40 = vmul.f32 %v3853_v37, %v8559_v51  ;;  %v3856_v13 = vmul.f32 %v3853_v37, %v3514_v17 }
 0x3fb   : > { %v3664_v1 = vadd.f32 %v3660_v23, %v3647_v50  ;;  %v3860_v12 = vrot.slane %v3854_v53, 5  ;;  %v8696_v36 = vmul.f32 %v3921_v7, %v8559_v51  ;;  %v8698_v48 = vmul.f32 %v3921_v7, %v3514_v17  ;;  %v3532_v17 = vpop.permute.xlu1 %3531 }
 0x3fc   : > { %v3714_v59 = vadd.f32 %v8461_v25, %v3663_v42  ;;  %v3928_v10 = vrot.slane %v8686_v32, 6  ;;  %v3726_v34 = vsel %vm403_vm4, %v3724_v27, %v3725_v58  ;;  %v3615_v24 = vstv %s8672_s6 }
 0x3fd   : > { %v3715_v57 = vadd.f32 %v8468_v49, %v3664_v1  ;;  %v3728_v37 = vsel %vm403_vm4, %v3725_v58, %v3727_v52  ;;  %v3794_v25 = vsel %vm307_vm0, %v3792_v62, %v3793_v30  ;;  %v3616_v51 = vmul.f32 %v3615_v24, %v8631_v31 }
 0x3fe   : > { %v3731_v3 = vadd.f32 %v3726_v34, %v3714_v59  ;;  %v3796_v29 = vsel %vm307_vm0, %v3793_v30, %v3795_v35  ;;  %v3861_v44 = vrot.slane %v3855_v40, 5  ;;  %v3863_v49 = vrot.slane %v3856_v13, 5 }
 0x3ff   : > { %v3732_v7 = vadd.f32 %v3728_v37, %v3715_v57  ;;  %v3929_v38 = vrot.slane %v8696_v36, 6  ;;  %v3931_v55 = vrot.slane %v8698_v48, 6  ;;  %v3683_v46 = vstv %s8683_s26 }
 0x400   : > { %v3782_v60 = vadd.f32 %v8477_v61, %v3731_v3  ;;  %v3684_v54 = vmul.f32 %v3683_v46, %v8631_v31  ;;  %v3751_v5 = vstv %s8690_s23  ;;  %v8720_v27 = vsel %vm3499_vm7, %v3532_v17, 0.0 }
 0x401   : > { %v3783_v47 = vadd.f32 %v8486_v11, %v3732_v7  ;;  %v3622_v53 = vrot.slane %v3616_v51, 1  ;;  %v3617_v61 = vmul.f32 %v3615_v24, %v8625_v20  ;;  %v3618_v8 = vmul.f32 %v3615_v24, %v8720_v27 }
 0x402   : > { %v3799_v62 = vadd.f32 %v3794_v25, %v3782_v60  ;;  %v3862_v28 = vsel %vm400_vm3, %v3860_v12, %v3861_v44  ;;  %v3864_v58 = vsel %vm400_vm3, %v3861_v44, %v3863_v49  ;;  %v3752_v11 = vmul.f32 %v3751_v5, %v8631_v31 }
 0x403   : > { %v3800_v50 = vadd.f32 %v3796_v29, %v3783_v47  ;;  %v3623_v23 = vrot.slane %v3617_v61, 1  ;;  %v3625_v42 = vrot.slane %v3618_v8, 1  ;;  %v3685_v52 = vmul.f32 %v3683_v46, %v8625_v20 }
 0x404   : > { %v3686_v30 = vmul.f32 %v3683_v46, %v8720_v27  ;;  %v3850_v1 = vadd.f32 %v8491_v63, %v3799_v62  ;;  %v3690_v40 = vrot.slane %v3684_v54, 2  ;;  %v3819_v13 = vstv %s8704_s5 }
 0x405   : > { %v3851_v35 = vadd.f32 %v8499_v45, %v3800_v50  ;;  %v3624_v12 = vsel %vm407_vm6, %v3622_v53, %v3623_v23  ;;  %v3626_v59 = vsel %vm407_vm6, %v3623_v23, %v3625_v42  ;;  %v3754_v57 = vmul.f32 %v3751_v5, %v8720_v27 }
 0x406   : > { %v3693_v48 = vrot.slane %v3686_v30, 2  ;;  %v3629_v24 = vadd.f32 %v3624_v12, %v8679_v33  ;;  %v3630_v37 = vadd.f32 %v3626_v59, %v8677_v56  ;;  %v3753_v3 = vmul.f32 %v3751_v5, %v8625_v20 }
 0x407   : > { %v3868_v34 = vadd.f32 %v3864_v58, %v3851_v35  ;;  %v3758_v25 = vrot.slane %v3752_v11, 3  ;;  %v3820_v63 = vmul.f32 %v3819_v13, %v8631_v31  ;;  %v3887_v45 = vstv %s8714_s21 }
 0x408   : > { %v3691_v51 = vrot.slane %v3685_v52, 2  ;;  %v3867_v17 = vadd.f32 %v3862_v28, %v3850_v1  ;;  %v3680_v7 = vadd.f32 %v8638_v6, %v3629_v24  ;;  %v3681_v29 = vadd.f32 %v8576_v2, %v3630_v37 }
 0x409   : > { %v3822_v44 = vmul.f32 %v3819_v13, %v8720_v27  ;;  %v3919_v49 = vadd.f32 %v8535_v26, %v3868_v34  ;;  %v3761_v60 = vrot.slane %v3754_v57, 3  ;;  %v3759_v54 = vrot.slane %v3753_v3, 3 }
 0x40a   : > { %v3692_v33 = vsel %vm405_vm5, %v3690_v40, %v3691_v51  ;;  %v3694_v56 = vsel %vm405_vm5, %v3691_v51, %v3693_v48  ;;  %v3821_v5 = vmul.f32 %v3819_v13, %v8625_v20  ;;  %v3932_v6 = vsel %vm398_vm2, %v3929_v38, %v3931_v55 }
 0x40b   : > { %v3697_v46 = vadd.f32 %v3692_v33, %v3680_v7  ;;  %v3698_v47 = vadd.f32 %v3694_v56, %v3681_v29  ;;  %v3826_v62 = vrot.slane %v3820_v63, 4  ;;  %v3888_v2 = vmul.f32 %v3887_v45, %v8631_v31 }
 0x40c   : > { %v3955_v53 = vstv %s8727_s11  ;;  %v3760_v8 = vsel %vm403_vm4, %v3758_v25, %v3759_v54  ;;  %v3829_v50 = vrot.slane %v3822_v44, 4  ;;  %v3936_v28 = vadd.f32 %v3932_v6, %v3919_v49 }
 0x40d   : > { %v3748_v26 = vadd.f32 %v8644_v19, %v3697_v46  ;;  %v3749_v61 = vadd.f32 %v8581_v4, %v3698_v47  ;;  %v3762_v58 = vsel %vm403_vm4, %v3759_v54, %v3761_v60  ;;  %v3890_v11 = vmul.f32 %v3887_v45, %v8720_v27 }
 0x40e   : > { %v3918_v23 = vadd.f32 %v8530_v18, %v3867_v17  ;;  %v3827_v52 = vrot.slane %v3821_v5, 4  ;;  %v3930_v19 = vsel %vm398_vm2, %v3928_v10, %v3929_v38  ;;  %v3894_v4 = vrot.slane %v3888_v2, 5 }
 0x40f   : > { %v3765_v42 = vadd.f32 %v3760_v8, %v3748_v26  ;;  %v3766_v55 = vadd.f32 %v3762_v58, %v3749_v61  ;;  %v3956_v30 = vmul.f32 %v3955_v53, %v8631_v31  ;;  %v3889_v1 = vmul.f32 %v3887_v45, %v8625_v20  ;;  %v4000_v61 = vpop.permute.xlu1 %3999 }
 0x410   : > { %v3935_v35 = vadd.f32 %v3930_v19, %v3918_v23  ;;  %v3828_v18 = vsel %vm307_vm0, %v3826_v62, %v3827_v52  ;;  %v3830_v12 = vsel %vm307_vm0, %v3827_v52, %v3829_v50  ;;  %v3897_v59 = vrot.slane %v3890_v11, 5 }
 0x411   : > { %v3816_v40 = vadd.f32 %v8649_v22, %v3765_v42  ;;  %v3817_v13 = vadd.f32 %v8596_v39, %v3766_v55  ;;  %v3958_v36 = vmul.f32 %v3955_v53, %v8720_v27  ;;  %v3972_v48 = vsub.f32 0.0, %v3936_v28 }
 0x412   : > { %v3971_v32 = vsub.f32 0.0, %v3935_v35  ;;  %v3948_v10 = vrot.slane %v8570_v43, 6  ;;  %v3879_v31 = vsel %vm400_vm3, %v3877_v41, %v3878_v21  ;;  %v3945_v39 = vrot.slane %v8652_v16, 6 }
 0x413   : > { %v3833_v22 = vadd.f32 %v3828_v18, %v3816_v40  ;;  %v3834_v38 = vadd.f32 %v3830_v12, %v3817_v13  ;;  %v3895_v57 = vrot.slane %v3889_v1, 5  ;;  %v3957_v34 = vmul.f32 %v3955_v53, %v8625_v20  ;;  %v3998_v53 = vpop.permute.xlu0 %3997  ;;  %v4012_v55 = vpop.permute.xlu1 %4011 }
 0x414   : > { %v3973_v24 = vmul.f32 1.442695, %v3971_v32  ;;  %v3946_v27 = vrot.slane %v8545_v14, 6  ;;  %v3962_v37 = vrot.slane %v3956_v30, 6  ;;  %v3965_v25 = vrot.slane %v3958_v36, 6 }
 0x415   : > { %v3884_v3 = vadd.f32 %v3879_v31, %v3833_v22  ;;  %v3885_v43 = vadd.f32 %v8601_v15, %v3834_v38  ;;  %v3896_v0 = vsel %vm400_vm3, %v3894_v4, %v3895_v57  ;;  %v3898_v9 = vsel %vm400_vm3, %v3895_v57, %v3897_v59 }
 0x416   : > { %v3975_v21 = vmul.f32 1.442695, %v3972_v48  ;;  %4571 = vpow2.f32 %v3973_v24  ;;  %v3949_v16 = vsel %vm398_vm2, %v3946_v27, %v3948_v10  ;;  %v3947_v20 = vsel %vm398_vm2, %v3945_v39, %v3946_v27 }
 0x417   : > { %v3901_v41 = vadd.f32 %v3896_v0, %v3884_v3  ;;  %v3902_v63 = vadd.f32 %v3898_v9, %v3885_v43  ;;  %v3963_v45 = vrot.slane %v3957_v34, 6  ;;  %v4010_v28 = vpop.permute.xlu0 %4009  ;;  %vm4083_vm0 = vcmask 130048  }
 0x418   : > { %4573 = vpow2.f32 %v3975_v21  ;;  %vm4087_vm3 = vcmask 392192   ;;  %vm4089_vm4 = vcmask 523264   ;;  %vm4091_vm5 = vcmask 654336  }
 0x419   : > { %v3953_v51 = vadd.f32 %v3949_v16, %v3902_v63  ;;  %v3952_v14 = vadd.f32 %v3947_v20, %v3901_v41  ;;  %v3966_v17 = vsel %vm398_vm2, %v3963_v45, %v3965_v25  ;;  %v3964_v15 = vsel %vm398_vm2, %v3962_v37, %v3963_v45 }
 0x41a   : > { %v4104_v41 = vlaneseq  ;;  %vm4085_vm2 = vcmask 261120   ;;  %vm4093_vm6 = vcmask 785408  }
 0x41b   : > { %v3970_v7 = vadd.f32 %v3966_v17, %v3953_v51  ;;  %v3969_v29 = vadd.f32 %v3964_v15, %v3952_v14 }
 0x41c   : > { %v4105_v51 = vshrl.u32 %v4104_v41, 7 }
 0x41d   : > { %v3983_v44 = vsub.f32 0.0, %v3969_v29  ;;  %v3984_v49 = vsub.f32 0.0, %v3970_v7 }
 0x41f   : > { %v3985_v33 = vmul.f32 1.442695, %v3983_v44  ;;  %v3987_v56 = vmul.f32 1.442695, %v3984_v49 }
 0x420   : > { %v4572_v60 = vpop.eup %4571 }
 0x421   : > { %4575 = vpow2.f32 %v3985_v33  ;;  %v3977_v47 = vadd.f32 1.0, %v4572_v60  ;;  %v4106_v60 = vsub.s32 0, %v4105_v51 }
 0x422   : > { %v4574_v46 = vpop.eup %4573  ;;  %4577 = vpow2.f32 %v3987_v56 }
 0x423   : > { %v3978_v54 = vadd.f32 1.0, %v4574_v46  ;;  %4579 = vrcp.f32 %v3977_v47 }
 0x425   : > { %4581 = vrcp.f32 %v3978_v54 }
 0x42b   : > { %v4576_v5 = vpop.eup %4575 }
 0x42c   : > { %v3989_v6 = vadd.f32 1.0, %v4576_v5  ;;  %v4578_v62 = vpop.eup %4577 }
 0x42d   : > { %v3990_v2 = vadd.f32 1.0, %v4578_v62  ;;  %v4580_v26 = vpop.eup %4579 }
 0x42e   : > { %4583 = vrcp.f32 %v3989_v6  ;;  %v4003_v50 = vmul.f32 %v4580_v26, %v3998_v53 }
 0x42f   : > { %4585 = vrcp.f32 %v3990_v2  ;;  %v4582_v8 = vpop.eup %4581 }
 0x430   : > { %v4004_v11 = vmul.f32 %v4582_v8, %v4000_v61  ;;  %v4005_v23 = vadd.f32 1.0, %v4003_v50  ;;  %v4591_v61 = vld [vmem:[%s9320_s27] sm:$0xff] }
 0x432   : > { %v4006_v4 = vadd.f32 1.0, %v4004_v11 }
 0x438   : > { %v4584_v58 = vpop.eup %4583 }
 0x439   : > { %v4015_v42 = vmul.f32 %v4584_v58, %v4010_v28  ;;  %v4586_v52 = vpop.eup %4585 }
 0x43a   : > { %v4016_v30 = vmul.f32 %v4586_v52, %v4012_v55 }
 0x43b   : > { %v4017_v19 = vadd.f32 %v4015_v42, %v4005_v23 }
 0x43c   : > { %v4018_v35 = vadd.f32 %v4016_v30, %v4006_v4 }
 0x43d   : > { %4020 = vrot.lane.b32.xlu0 %v4017_v19, %s4789_s19  ;;  %v4023_v1 = vrot.slane %v4017_v19, 1  ;;  %v4027_v13 = vrot.slane %v4017_v19, 2  ;;  %v4031_v12 = vrot.slane %v4017_v19, 3  ;;  %v4035_v36 = vrot.slane %v4017_v19, 4 }
 0x43e   : > { %v4055_v40 = vrot.slane %v4018_v35, 1  ;;  %v4059_v18 = vrot.slane %v4018_v35, 2  ;;  %v4063_v59 = vrot.slane %v4018_v35, 3  ;;  %v4067_v32 = vrot.slane %v4018_v35, 4 }
 0x43f   : > { %4024 = vrot.lane.b32.xlu1 %v4023_v1, %s4790_s2  ;;  %v4039_v48 = vrot.slane %v4017_v19, 5  ;;  %v4071_v10 = vrot.slane %v4018_v35, 5  ;;  %v4043_v31 = vrot.slane %v4017_v19, 6  ;;  %v4075_v22 = vrot.slane %v4018_v35, 6 }
 0x440   : > { %v4047_v38 = vrot.slane %v4017_v19, 7  ;;  %v4079_v39 = vrot.slane %v4018_v35, 7 }
 0x441   : > { %4052 = vrot.lane.b32.xlu0 %v4018_v35, %s4789_s19  ;;  %s4795_s19 = smov 93  }
 0x443   : > { %4056 = vrot.lane.b32.xlu1 %v4055_v40, %s4790_s2 }
 0x445   : > { %4028 = vrot.lane.b32.xlu0 %v4027_v13, %s4791_s17 }
 0x447   : > { %4060 = vrot.lane.b32.xlu1 %v4059_v18, %s4791_s17 }
 0x449   : > { %4032 = vrot.lane.b32.xlu0 %v4031_v12, %s4792_s22 }
 0x44b   : > { %4064 = vrot.lane.b32.xlu1 %v4063_v59, %s4792_s22 }
 0x44d   : > { %4036 = vrot.lane.b32.xlu0 %v4035_v36, %s4793_s16 }
 0x44f   : > { %4068 = vrot.lane.b32.xlu1 %v4067_v32, %s4793_s16 }
 0x451   : > { %4040 = vrot.lane.b32.xlu0 %v4039_v48, %s4794_s28 }
 0x453   : > { %4072 = vrot.lane.b32.xlu1 %v4071_v10, %s4794_s28 }
 0x455   : > { %4044 = vrot.lane.b32.xlu0 %v4043_v31, %s4795_s19 }
 0x457   : > { %4076 = vrot.lane.b32.xlu1 %v4075_v22, %s4795_s19 }
 0x459   : > { %4048 = vrot.lane.b32.xlu0 %v4047_v38, %s4796_s8 }
 0x45b   : > { %4080 = vrot.lane.b32.xlu1 %v4079_v39, %s4796_s8 }
 0x4af   : > { %v4021_v57 = vpop.permute.xlu0 %4020 }
 0x4b1   : > { %v4025_v34 = vpop.permute.xlu1 %4024 }
 0x4b2   : > { %v4084_v16 = vsel %vm4083_vm0, %v4021_v57, %v4025_v34 }
 0x4b3   : > { %v4053_v24 = vpop.permute.xlu0 %4052 }
 0x4b5   : > { %v4057_v27 = vpop.permute.xlu1 %4056 }
 0x4b6   : > { %v4097_v14 = vsel %vm4083_vm0, %v4053_v24, %v4057_v27 }
 0x4b7   : > { %v4029_v37 = vpop.permute.xlu0 %4028 }
 0x4b8   : > { %v4086_v20 = vsel %vm4085_vm2, %v4084_v16, %v4029_v37 }
 0x4b9   : > { %v4061_v3 = vpop.permute.xlu1 %4060 }
 0x4ba   : > { %v4098_v15 = vsel %vm4085_vm2, %v4097_v14, %v4061_v3 }
 0x4bb   : > { %v4033_v43 = vpop.permute.xlu0 %4032 }
 0x4bc   : > { %v4088_v17 = vsel %vm4087_vm3, %v4086_v20, %v4033_v43 }
 0x4bd   : > { %v4065_v0 = vpop.permute.xlu1 %4064 }
 0x4be   : > { %v4099_v44 = vsel %vm4087_vm3, %v4098_v15, %v4065_v0 }
 0x4bf   : > { %v4037_v9 = vpop.permute.xlu0 %4036 }
 0x4c0   : > { %v4090_v7 = vsel %vm4089_vm4, %v4088_v17, %v4037_v9 }
 0x4c1   : > { %v4069_v25 = vpop.permute.xlu1 %4068 }
 0x4c2   : > { %v4100_v33 = vsel %vm4089_vm4, %v4099_v44, %v4069_v25 }
 0x4c3   : > { %v4041_v21 = vpop.permute.xlu0 %4040 }
 0x4c4   : > { %v4092_v49 = vsel %vm4091_vm5, %v4090_v7, %v4041_v21 }
 0x4c5   : > { %v4073_v63 = vpop.permute.xlu1 %4072 }
 0x4c6   : > { %v4101_v47 = vsel %vm4091_vm5, %v4100_v33, %v4073_v63 }
 0x4c7   : > { %v4045_v45 = vpop.permute.xlu0 %4044 }
 0x4c8   : > { %v4094_v56 = vsel %vm4093_vm6, %v4092_v49, %v4045_v45 }
 0x4c9   : > { %v4077_v29 = vpop.permute.xlu1 %4076 }
 0x4ca   : > { %v4102_v5 = vsel %vm4093_vm6, %v4101_v47, %v4077_v29 }
 0x4cb   : > { %v4049_v46 = vpop.permute.xlu0 %4048 }
 0x4cc   : > { %v4096_v54 = vsel %vm4095_vm8, %v4094_v56, %v4049_v46 }
 0x4cd   : > { %v4081_v6 = vpop.permute.xlu1 %4080  ;;  %v4107_v2 = vrot.slane %v4096_v54, %v4106_v60 }
 0x4ce   : > { %v4103_v62 = vsel %vm4095_vm8, %v4102_v5, %v4081_v6 }
 0x4cf   : > { %v4111_v53 = vrot.slane %v4103_v62, %v4106_v60 }
 0x4d1   : > { %v4114_v26 = vcombine.low %v4107_v2, %v4111_v53 }
 0x4d3   : > { %v4116_v8 = vmul.f32 %v4591_v61, %v4114_v26 }
 0x4d5   : > { %4117 = vst [vmem:[%s302_s4] sm:$0xff] %v4116_v8 }
 0x4d6   : > { %4708 = shalt.err (!%p4705_p12)
}
 0x4d7   : > { %s4709_s30 = scalar_lea.hbm %s8799_s9, 128  ;;  %s4713_s23 = scalar_lea.hbm %s9323_s25, 256 }
 0x4d8   : > { %p4710_p13 = scmp.ne.s32.totalorder %s8799_s9, %s4709_s30  ;;  %p4714_p10 = scmp.lt.u32.totalorder %s8799_s9, %s9323_s25 }
 0x4d9   : > { %p4715_p3 = scmp.lt.u32.totalorder %s4713_s23, %s4709_s30  ;;  %p4717_p5 = scmp.lt.u32.totalorder %s4709_s30, %s8799_s9 }
 0x4da   : > { %p4711_p4 = pnand %p4710_p13, %p9324_p7 }
 0x4db   : > { %p4716_p9 = por %p4715_p3, %p4714_p10 }
 0x4dc   : > { %p4712_p8 = pneg %p4711_p4 }
 0x4dd   : > { %p4718_p2 = por %p4717_p5, %p4716_p9 }
 0x4df   : > { %p4719_p1 = pnand %p4718_p2, %p4712_p8 }
 0x4e1   : > { %4722 = shalt.err (!%p4719_p1)
}
 0x4e2   : > { %4491 = dma.vmem_to_hbm [thread:$0]  (%p9324_p7), %s8801_s15, 128, %s8799_s9, %s4119_s7  }
 0x4e3 PF: > { %s9325_s11 = sld [smem:[#allocation15_spill]]  ;;  %s9326_s2 = sld [smem:[#allocation23_spill]] }
 0x4e4   : > { %s9327_s17 = sld [smem:[#allocation18_spill]] }
 0x4e9   : > { %s4145_s22 = sand.u32 1, %s9325_s11   ;;  %p9328_p6 = scmp.ne.s32.totalorder %s9326_s2, 0 }
 0x4ea   : > { %p9329_p11 = scmp.ge.s32.totalorder %s9327_s17, 2  ;;  %s4146_s16 = scalar_lea.sflag [#allocation4], %s4145_s22 }
 0x4ec   : > { %p4508_p0 = pnand %p9329_p11, %p9328_p6 }
 0x4ee   : > { %4752 = dma.done.wait (!%p4508_p0), %s4146_s16, 128  }
 0x4ef   : > { %4754 = vsyncadd (!%p4508_p0), %s4146_s16, 4294967168  ;;  %s9330_s18 = sld [smem:[#allocation19_spill]]  ;;  %s9331_s15 = sld [smem:[#allocation16_spill]] }
 0x4f0   : > { %s9332_s16 = sld [smem:[#allocation17_spill]]  ;;  %s9333_s17 = sld [smem:[#allocation20_spill]] }
 0x4f5   : > { %p21_p12 = scmp.ge.s32.totalorder %s9330_s18, 4  }
 0x4f7   :  { %23 = sbr.rel (!%p21_p12) target bundleno = 14 (0xe), region = 110 }
 0x4fe   :  { %4151 = vsyncpa [#allocation3], 1 }
 0x4ff   :  { %4153 = vsyncpa [#allocation3 + $0x1], 1 }
 0x500   :  { %4154 = vsyncpa [#allocation8], 1 }
 0x501   :  { %4156 = vsyncpa [#allocation8 + $0x1], 1 }
 0x502   :  { %4157 = vsyncpa [#allocation4], 1 }
 0x503   :  { %4159 = vsyncpa [#allocation4 + $0x1], 1 }
 0x504   :  { %4160 = vsyncpa [#allocation5], 1 }
 0x505   :  { %4162 = vsyncpa [#allocation5 + $0x1], 1 }

</bundles_post_ra>
